<compile_context>
chip_gen: v7x
topology: tpu7x:2x2x1
jax: 0.10.0
libtpu: 0.0.40
codegen_flags: <defaults>
</compile_context>

<pallas_src>
import functools

import jax
import jax.numpy as jnp
from jax.experimental import pallas as pl
from jax.experimental.pallas import tpu as pltpu


STROKE_DIMS = [8, 16, 32, 64, 128]
TRAJ_HIDDEN = 128
LATENT_DIM = 5
FEAT_DIM = 2 * 2 * STROKE_DIMS[-1] + TRAJ_HIDDEN   # 640
STROKE_FEAT = FEAT_DIM - TRAJ_HIDDEN               # 512

_PALLAS_MIN_M = 1024    # below this M, a pallas_call is pure launch overhead


def _round_up(x, m):
    return ((x + m - 1) // m) * m


def _apply_act(y, act):
    if act == "leaky_relu":
        return jnp.where(y >= 0, y, 0.01 * y)
    if act == "tanh":
        return jnp.tanh(y)
    return y


# ----------------------------------------------------------------------------
# Pallas kernel 1: tiled  act(x @ W + b)  for the big-M conv layers
# ----------------------------------------------------------------------------
def _mm_bias_act_kernel(x_ref, w_ref, b_ref, o_ref, *, act):
    y = jnp.dot(x_ref[...], w_ref[...], preferred_element_type=jnp.float32)
    y = _apply_act(y + b_ref[...], act)
    o_ref[...] = y.astype(o_ref.dtype)


def _choose_bm(m):
    # >=2 grid steps for the M=2048 / M=8192 layers (feeds both v7x TensorCores
    # via dimension_semantics=("parallel",)), while the largest per-step working
    # set (bm=4096: ~0.6 MiB bf16 patches + 2 MiB f32 out, x2 buffers + weights)
    # stays far below v5e's 16 MiB scoped-VMEM default.
    if m >= 8192:
        return 4096
    if m >= 2048:
        return 1024
    return _round_up(m, 8)


def matmul_act(x, wp, bp, n_out, act="none", out_dtype=jnp.float32):
    """act(x @ W + b) with pre-packed weights wp:(Kp,Np) bf16, bp:(1,Np) f32.

    Small-M layers go through plain XLA (launch-latency bound at B=2); big-M
    layers use the tiled Pallas kernel with bf16 inputs / f32 accumulation and
    store in `out_dtype`.
    """
    M, K = x.shape
    Kp, Np = wp.shape

    if M < _PALLAS_MIN_M:
        # Tiny layer: let XLA fuse pad + dot + bias + act + slice in one kernel.
        xk = jnp.pad(x, ((0, 0), (0, Kp - K))).astype(jnp.bfloat16)
        y = jnp.dot(xk, wp, preferred_element_type=jnp.float32) + bp
        return _apply_act(y[:, :n_out], act).astype(out_dtype)

    bm = _choose_bm(M)
    Mp = _round_up(M, bm)
    xp = jnp.pad(x.astype(jnp.bfloat16), ((0, Mp - M), (0, Kp - K)))

    out_size = jnp.dtype(out_dtype).itemsize
    flops = 2 * Mp * Kp * Np
    transcendentals = Mp * Np if act == "tanh" else 0
    bytes_accessed = Mp * Kp * 2 + Kp * Np * 2 + Np * 4 + Mp * Np * out_size

    out = pl.pallas_call(
        functools.partial(_mm_bias_act_kernel, act=act),
        out_shape=jax.ShapeDtypeStruct((Mp, Np), out_dtype),
        grid=(Mp // bm,),
        in_specs=[
            pl.BlockSpec((bm, Kp), lambda i: (i, 0)),
            pl.BlockSpec((Kp, Np), lambda i: (0, 0)),
            pl.BlockSpec((1, Np), lambda i: (0, 0)),
        ],
        out_specs=pl.BlockSpec((bm, Np), lambda i: (i, 0)),
        compiler_params=pltpu.CompilerParams(
            dimension_semantics=("parallel",),
            vmem_limit_bytes=32 * 1024 * 1024),
        cost_estimate=pl.CostEstimate(
            flops=flops, transcendentals=transcendentals,
            bytes_accessed=bytes_accessed),
    )(xp, wp, bp)
    return out[:M, :n_out]


# ----------------------------------------------------------------------------
# NHWC conv / deconv wrappers (transpose-free im2col glue; the matmul + bias +
# BN-folded scale + activation runs in the Pallas kernel for big-M layers)
# ----------------------------------------------------------------------------
def conv2d_s2(x, wp, bp, cout, act, out_dtype):
    """3x3 / stride 2 / pad 1 conv on NHWC x."""
    B, H, W, C = x.shape
    Ho, Wo = H // 2, W // 2
    xp = jnp.pad(x, ((0, 0), (1, 1), (1, 1), (0, 0)))
    taps = [xp[:, kh:kh + 2 * Ho:2, kw:kw + 2 * Wo:2, :]
            for kh in range(3) for kw in range(3)]
    p = jnp.stack(taps, axis=3).reshape(B * Ho * Wo, 9 * C)
    out = matmul_act(p, wp, bp, cout, act, out_dtype)
    return out.reshape(B, Ho, Wo, cout)


def conv2d_s1(x, wp, bp, cout, act, out_dtype):
    """3x3 / stride 1 / pad 1 conv on NHWC x."""
    B, H, W, C = x.shape
    xp = jnp.pad(x, ((0, 0), (1, 1), (1, 1), (0, 0)))
    taps = [xp[:, kh:kh + H, kw:kw + W, :] for kh in range(3) for kw in range(3)]
    p = jnp.stack(taps, axis=3).reshape(B * H * W, 9 * C)
    out = matmul_act(p, wp, bp, cout, act, out_dtype)
    return out.reshape(B, H, W, cout)


def deconv2d(x, wp, bp, cout, act, out_dtype):
    """ConvTranspose2d(k=3, s=2, p=1, output_padding=1) on NHWC x via parity
    decomposition: one matmul on 2x2-tap patches -> 4 output parities."""
    B, H, W, C = x.shape
    xe = jnp.pad(x, ((0, 0), (0, 1), (0, 1), (0, 0)))
    taps = [xe[:, :H, :W, :], xe[:, :H, 1:, :], xe[:, 1:, :W, :], xe[:, 1:, 1:, :]]
    p = jnp.stack(taps, axis=3).reshape(B * H * W, 4 * C)
    out = matmul_act(p, wp, bp, 4 * cout, act, out_dtype)     # (B*H*W, 4*cout)
    out = out.reshape(B, H, W, 2, 2, cout)                    # (..., rh, rw, c)
    out = out.transpose(0, 1, 3, 2, 4, 5).reshape(B, 2 * H, 2 * W, cout)
    return out


# ----------------------------------------------------------------------------
# Pallas kernel 2: fused dense middle (all weights VMEM-resident, ONE launch):
#   traj_enc -> [mean|var]_fc on concat(stroke_feat, traj_feat) ->
#   reparameterize -> decoder_fc -> traj_decoder.
# Layout trick: mean occupies lanes [0,5), logvar lanes [8,13) so the 5-wide
# latent is handled as an aligned 8-lane slab (padding lanes carry exact 0s).
# ----------------------------------------------------------------------------
def _middle_kernel(x1_ref, x2_ref, eps_ref,
                   wte_ref, bte_ref, wmv1_ref, wmv2_ref, bmv_ref,
                   wdec_ref, bdec_ref, wtd_ref, btd_ref,
                   mv_ref, dec_ref, traj_ref):
    # traj encoder: Linear(32 -> 128) + LeakyReLU
    x2 = jnp.dot(x2_ref[...], wte_ref[...], preferred_element_type=jnp.float32)
    x2 = x2 + bte_ref[...]
    x2 = jnp.where(x2 >= 0, x2, 0.01 * x2)

    # mean_fc / var_fc on concat([x1, x2]) done as a split matmul
    mv = (jnp.dot(x1_ref[...], wmv1_ref[...], preferred_element_type=jnp.float32)
          + jnp.dot(x2, wmv2_ref[...], preferred_element_type=jnp.float32)
          + bmv_ref[...])
    mv_ref[...] = mv

    # reparameterize: latent = mean + eps * exp(0.5 * logvar)   (8-lane slab)
    latent = mv[:, 0:8] + eps_ref[...] * jnp.exp(0.5 * mv[:, 8:16])

    # decoder fc: Linear(5 -> 640)
    dec = jnp.dot(latent, wdec_ref[...], preferred_element_type=jnp.float32)
    dec = dec + bdec_ref[...]
    dec_ref[...] = dec[:, :STROKE_FEAT]

    # traj decoder: Tanh(Linear(LeakyReLU(dec[:, 512:640])))
    t = dec[:, STROKE_FEAT:]
    t = jnp.where(t >= 0, t, 0.01 * t)
    t = jnp.dot(t, wtd_ref[...], preferred_element_type=jnp.float32) + btd_ref[...]
    traj_ref[...] = jnp.tanh(t)


def middle_block(mid, x1, x2, eps):
    B = x1.shape[0]
    Mp = _round_up(B, 8)
    x1p = jnp.pad(x1.astype(jnp.float32), ((0, Mp - B), (0, 0)))
    x2p = jnp.pad(x2.astype(jnp.float32), ((0, Mp - B), (0, 0)))
    epsp = jnp.pad(eps.astype(jnp.float32), ((0, Mp - B), (0, 8 - LATENT_DIM)))

    def fullspec(a):
        shape = a.shape
        return pl.BlockSpec(shape, lambda i: (0,) * len(shape))

    ins = (x1p, x2p, epsp,
           mid["wte"], mid["bte"], mid["wmv1"], mid["wmv2"], mid["bmv"],
           mid["wdec"], mid["bdec"], mid["wtd"], mid["btd"])
    out_shape = (jax.ShapeDtypeStruct((Mp, 128), jnp.float32),
                 jax.ShapeDtypeStruct((Mp, STROKE_FEAT), jnp.float32),
                 jax.ShapeDtypeStruct((Mp, 128), jnp.float32))
    out_specs = tuple(pl.BlockSpec(s.shape, lambda i: (0, 0)) for s in out_shape)

    mv, dec1, traj = pl.pallas_call(
        _middle_kernel,
        out_shape=out_shape,
        grid=(1,),
        in_specs=[fullspec(a) for a in ins],
        out_specs=out_specs,
        compiler_params=pltpu.CompilerParams(dimension_semantics=("arbitrary",)),
    )(*ins)

    mean = mv[:B, 0:LATENT_DIM]
    logvar = mv[:B, 8:8 + LATENT_DIM]
    return mean, logvar, dec1[:B], traj[:B, :32]


# ----------------------------------------------------------------------------
# One-time weight preparation (BN folding, matrix layout, padding, bf16 cast)
# ----------------------------------------------------------------------------
def _fold_bn_conv(W, b, gamma, beta, mu, var, eps=1e-5):
    s = gamma / jnp.sqrt(var + eps)
    return W * s[:, None, None, None], (b - mu) * s + beta


def _fold_bn_deconv(Wt, b, gamma, beta, mu, var, eps=1e-5):
    s = gamma / jnp.sqrt(var + eps)
    return Wt * s[None, :, None, None], (b - mu) * s + beta


def _pack_matrix(wm, b):
    """wm: (K, N) f32, b: (N,) -> K padded to mult of 16 (bf16 sublane packing),
    N padded to mult of 128 (lane-dense output), bf16 weight + (1, Np) f32 bias."""
    K, N = wm.shape
    Kp, Np = _round_up(K, 16), _round_up(N, 128)
    wp = jnp.pad(wm, ((0, Kp - K), (0, Np - N))).astype(jnp.bfloat16)
    bp = jnp.pad(jnp.asarray(b, jnp.float32), (0, Np - N)).reshape(1, Np)
    return wp, bp


def _conv_matrix(W):
    """(Cout, Cin, 3, 3) -> (9*Cin, Cout), rows ordered (kh, kw, cin)."""
    Cout, Cin, _, _ = W.shape
    return W.transpose(2, 3, 1, 0).reshape(9 * Cin, Cout)


def _deconv_parity_matrix(Wt):
    """(Cin, Cout, 3, 3) -> (4*Cin, 4*Cout) parity-decomposed deconv matrix.
    Row tap order: [x(a,b), x(a,b+1), x(a+1,b), x(a+1,b+1)]
    Col parity order: [(0,0), (0,1), (1,0), (1,1)]."""
    Cin, Cout, _, _ = Wt.shape
    Z = jnp.zeros((Cin, Cout), jnp.float32)
    t = lambda kh, kw: Wt[:, :, kh, kw]
    rows = [
        [t(1, 1), t(1, 2), t(2, 1), t(2, 2)],   # x[a, b]
        [Z,       t(1, 0), Z,       t(2, 0)],   # x[a, b+1]
        [Z,       Z,       t(0, 1), t(0, 2)],   # x[a+1, b]
        [Z,       Z,       Z,       t(0, 0)],   # x[a+1, b+1]
    ]
    return jnp.concatenate([jnp.concatenate(r, axis=1) for r in rows], axis=0)


# ----------------------------------------------------------------------------
# Parameters (deterministic synthetic init, PyTorch layouts)
# ----------------------------------------------------------------------------
def init_params(key):
    keys = iter(jax.random.split(key, 64))

    def nrm(shape, scale=0.05):
        return jax.random.normal(next(keys), shape, jnp.float32) * scale

    def bn(c):
        return (jnp.ones((c,), jnp.float32), jnp.zeros((c,), jnp.float32),
                jnp.zeros((c,), jnp.float32), jnp.ones((c,), jnp.float32))

    params = {}
    enc = []
    prev = 1
    for d in STROKE_DIMS:
        enc.append((nrm((d, prev, 3, 3)), nrm((d,))) + bn(d))
        prev = d
    params["enc"] = enc
    params["traj_enc"] = (nrm((TRAJ_HIDDEN, 32)), nrm((TRAJ_HIDDEN,)))
    params["mean_fc"] = (nrm((LATENT_DIM, FEAT_DIM)), nrm((LATENT_DIM,)))
    params["var_fc"] = (nrm((LATENT_DIM, FEAT_DIM)), nrm((LATENT_DIM,)))
    params["dec_fc"] = (nrm((FEAT_DIM, LATENT_DIM)), nrm((FEAT_DIM,)))

    rev = list(reversed(STROKE_DIMS))          # [128, 64, 32, 16, 8]
    deconvs = []
    for i in range(len(rev) - 1):
        cin, cout = rev[i], rev[i + 1]
        deconvs.append((nrm((cin, cout, 3, 3)), nrm((cout,))) + bn(cout))
    params["deconvs"] = deconvs
    params["final_deconv"] = (nrm((rev[-1], rev[-1], 3, 3)), nrm((rev[-1],))) + bn(rev[-1])
    params["final_conv"] = (nrm((1, rev[-1], 3, 3)), nrm((1,)))
    params["traj_dec"] = (nrm((32, TRAJ_HIDDEN)), nrm((32,)))
    return params


def prepare_params(params):
    """Run ONCE (outside jit): fold BN, build packed weight matrices."""
    prep = {}

    enc = []
    for (W, b, g, be, mu, var) in params["enc"]:
        Wf, bf = _fold_bn_conv(W, b, g, be, mu, var)
        enc.append(_pack_matrix(_conv_matrix(Wf), bf))
    prep["enc"] = enc

    deconvs = []
    for (Wt, b, g, be, mu, var) in params["deconvs"]:
        assert Wt.shape[2:] == (3, 3)   # parity math assumes k=3, s=2, p=1, op=1
        Wf, bf = _fold_bn_deconv(Wt, b, g, be, mu, var)
        deconvs.append(_pack_matrix(_deconv_parity_matrix(Wf), jnp.tile(bf, 4)))
    prep["deconvs"] = deconvs

    Wt, b, g, be, mu, var = params["final_deconv"]
    Wf, bf = _fold_bn_deconv(Wt, b, g, be, mu, var)
    prep["final_deconv"] = _pack_matrix(_deconv_parity_matrix(Wf), jnp.tile(bf, 4))

    W, b = params["final_conv"]
    prep["final_conv"] = _pack_matrix(_conv_matrix(W), b)

    # --- fused dense middle: f32 weights in the layouts the kernel expects ---
    Wte, bte = params["traj_enc"]      # (128, 32), (128,)
    Wm, bmean = params["mean_fc"]      # (5, 640), (5,)
    Wv, bvar = params["var_fc"]        # (5, 640), (5,)
    Wd, bd = params["dec_fc"]          # (640, 5), (640,)
    Wtd, btd_ = params["traj_dec"]     # (32, 128), (32,)

    wmv = jnp.zeros((FEAT_DIM, 128), jnp.float32)
    wmv = wmv.at[:, 0:LATENT_DIM].set(Wm.T).at[:, 8:8 + LATENT_DIM].set(Wv.T)
    bmv = jnp.zeros((128,), jnp.float32)
    bmv = bmv.at[0:LATENT_DIM].set(bmean).at[8:8 + LATENT_DIM].set(bvar)

    wdec = jnp.zeros((8, FEAT_DIM), jnp.float32).at[:LATENT_DIM, :].set(Wd.T)
    wtd = jnp.zeros((TRAJ_HIDDEN, 128), jnp.float32).at[:, :32].set(Wtd.T)
    btd = jnp.zeros((128,), jnp.float32).at[:32].set(btd_)

    prep["middle"] = dict(
        wte=jnp.asarray(Wte.T, jnp.float32),                         # (32, 128)
        bte=jnp.asarray(bte, jnp.float32).reshape(1, TRAJ_HIDDEN),   # (1, 128)
        wmv1=wmv[:STROKE_FEAT],                                      # (512, 128)
        wmv2=wmv[STROKE_FEAT:],                                      # (128, 128)
        bmv=bmv.reshape(1, 128),
        wdec=wdec,                                                   # (8, 640)
        bdec=jnp.asarray(bd, jnp.float32).reshape(1, FEAT_DIM),      # (1, 640)
        wtd=wtd,                                                     # (128, 128)
        btd=btd.reshape(1, 128),
    )
    return prep


# ----------------------------------------------------------------------------
# Forward pass (mirrors StrokeTrajVAE.forward)
# ----------------------------------------------------------------------------
def forward(prep, stroke, trajectory, eps):
    B = stroke.shape[0]

    # ---- stroke encoder (NHWC; conv1 in Pallas, tiny-M layers fused by XLA) ----
    x = jnp.transpose(stroke, (0, 2, 3, 1))                   # (B, 64, 64, 1)
    for (wp, bp), cout in zip(prep["enc"], STROKE_DIMS):
        x = conv2d_s2(x, wp, bp, cout, act="leaky_relu", out_dtype=jnp.bfloat16)
    # match PyTorch's NCHW flatten order (tiny (B,2,2,128) tensor)
    x1 = jnp.transpose(x, (0, 3, 1, 2)).reshape(B, -1).astype(jnp.float32)  # (B,512)
    x2 = trajectory.reshape(B, -1).astype(jnp.float32)                       # (B,32)

    # ---- fused dense middle (single pallas_call):
    #      traj_enc -> mean/var fc -> sample -> dec_fc -> traj_dec ----
    mean, logvar, x1d_flat, traj_raw = middle_block(prep["middle"], x1, x2, eps)

    # ---- stroke decoder ----
    x1d = x1d_flat.reshape(B, 128, 2, 2).transpose(0, 2, 3, 1)   # NHWC (B,2,2,128)
    rev = list(reversed(STROKE_DIMS))                            # [128,64,32,16,8]
    for (wp, bp), cout in zip(prep["deconvs"], rev[1:]):
        x1d = deconv2d(x1d, wp, bp, cout, act="leaky_relu", out_dtype=jnp.bfloat16)
    wp, bp = prep["final_deconv"]
    x1d = deconv2d(x1d, wp, bp, rev[-1], act="leaky_relu", out_dtype=jnp.bfloat16)
    wp, bp = prep["final_conv"]
    # act="none": tanh only on the single real output channel, after the slice.
    x1d = conv2d_s1(x1d, wp, bp, 1, act="none", out_dtype=jnp.float32)
    x1d = jnp.tanh(x1d)                                          # (B, 64, 64, 1)
    stroke_dec = jnp.transpose(x1d, (0, 3, 1, 2))                # back to NCHW

    scale = jnp.array([0.05, 0.03, 0.5, 0.0], jnp.float32)
    shift = jnp.array([0.05, 0.0, 0.5, 0.0], jnp.float32)
    traj_dec = traj_raw.reshape(B, 8, 4) * scale + shift

    return (stroke_dec, traj_dec), (stroke, trajectory), logvar, mean


# ----------------------------------------------------------------------------
if __name__ == "__main__":
    key = jax.random.PRNGKey(0)
    kp, ks, kt, ke = jax.random.split(key, 4)
    params = init_params(kp)
    prep = prepare_params(params)          # one-time weight prep (outside jit)

    stroke = jax.random.normal(ks, (2, 1, 64, 64), jnp.float32)     # NCHW
    trajectory = jax.random.normal(kt, (2, 8, 4), jnp.float32)
    eps = jax.random.normal(ke, (2, LATENT_DIM), jnp.float32)

    fwd = jax.jit(forward)
    out = fwd(prep, stroke, trajectory, eps)
    out = jax.tree_util.tree_map(lambda a: a.block_until_ready(), out)

    (stroke_dec, traj_dec), _, logvar, mean = out
    assert stroke_dec.shape == (2, 1, 64, 64)
    assert traj_dec.shape == (2, 8, 4)
    assert mean.shape == (2, LATENT_DIM) and logvar.shape == (2, LATENT_DIM)
    assert all(bool(jnp.isfinite(a).all()) for a in (stroke_dec, traj_dec, mean, logvar))
    print("KERNEL_OK")
</pallas_src>

<mosaic_0001>
module attributes {stable_mosaic.version = 11 : i64} {
  func.func @_mm_bias_act_kernel(%arg0: i32, %arg1: memref<1024x16xbf16, #tpu.memory_space<vmem>>, %arg2: memref<16x128xbf16, #tpu.memory_space<vmem>>, %arg3: memref<1x128xf32, #tpu.memory_space<vmem>>, %arg4: memref<1024x128xbf16, #tpu.memory_space<vmem>>) attributes {dimension_semantics = [#tpu.dimension_semantics<parallel>], iteration_bounds = array<i64: 2>, scalar_prefetch = 0 : i64, scratch_operands = 0 : i64, tpu.core_type = #tpu.core_type<tc>, window_params = [{transform_indices = @transform_0, window_bounds = array<i64: 1024, 16>}, {pipeline_mode = #tpu.pipeline_mode<synchronous>, transform_indices = @transform_1, window_bounds = array<i64: 16, 128>}, {pipeline_mode = #tpu.pipeline_mode<synchronous>, transform_indices = @transform_2, window_bounds = array<i64: 1, 128>}, {transform_indices = @transform_3, window_bounds = array<i64: 1024, 128>}]} {
    %c0 = arith.constant 0 : index
    %c0_0 = arith.constant 0 : index
    %0 = vector.load %arg1[%c0, %c0_0] : memref<1024x16xbf16, #tpu.memory_space<vmem>>, vector<1024x16xbf16>
    %c0_1 = arith.constant 0 : index
    %c0_2 = arith.constant 0 : index
    %1 = vector.load %arg2[%c0_1, %c0_2] : memref<16x128xbf16, #tpu.memory_space<vmem>>, vector<16x128xbf16>
    %cst = arith.constant dense<0.000000e+00> : vector<1024x128xf32>
    %2 = tpu.matmul %0, %1, %cst {dimension_numbers = #tpu.dot_dimension_numbers<[1], [0], [0], [1], [0, 0, 1, 1], [], []>} : vector<1024x16xbf16>, vector<16x128xbf16>, vector<1024x128xf32> -> vector<1024x128xf32>
    %c0_3 = arith.constant 0 : index
    %c0_4 = arith.constant 0 : index
    %3 = vector.load %arg3[%c0_3, %c0_4] : memref<1x128xf32, #tpu.memory_space<vmem>>, vector<1x128xf32>
    %4 = vector.broadcast %3 : vector<1x128xf32> to vector<1024x128xf32>
    %5 = arith.addf %2, %4 : vector<1024x128xf32>
    %cst_5 = arith.constant 0.000000e+00 : f32
    %6 = vector.broadcast %cst_5 : f32 to vector<1024x128xf32>
    %7 = arith.cmpf oge, %5, %6 : vector<1024x128xf32>
    %cst_6 = arith.constant 0.00999999977 : f32
    %8 = vector.broadcast %cst_6 : f32 to vector<1024x128xf32>
    %9 = arith.mulf %8, %5 : vector<1024x128xf32>
    %10 = arith.select %7, %5, %9 : vector<1024x128xi1>, vector<1024x128xf32>
    %11 = arith.truncf %10 : vector<1024x128xf32> to vector<1024x128xbf16>
    %c0_7 = arith.constant 0 : index
    %c0_8 = arith.constant 0 : index
    %12 = vector.load %arg4[%c0_7, %c0_8] : memref<1024x128xbf16, #tpu.memory_space<vmem>>, vector<1024x128xbf16>
    tpu.vector_store %arg4[%c0_7, %c0_8], %11 {strides = array<i32>} : memref<1024x128xbf16, #tpu.memory_space<vmem>>, vector<1024x128xbf16>,
    return
  }
  func.func @transform_0(%arg0: i32) -> (i32, i32) {
    %c0_i32 = arith.constant 0 : i32
    %c0_i32_0 = arith.constant 0 : i32
    return %arg0, %c0_i32 : i32, i32
  }
  func.func @transform_1(%arg0: i32) -> (i32, i32) {
    %c0_i32 = arith.constant 0 : i32
    %c0_i32_0 = arith.constant 0 : i32
    %c0_i32_1 = arith.constant 0 : i32
    return %c0_i32, %c0_i32_0 : i32, i32
  }
  func.func @transform_2(%arg0: i32) -> (i32, i32) {
    %c0_i32 = arith.constant 0 : i32
    %c0_i32_0 = arith.constant 0 : i32
    %c0_i32_1 = arith.constant 0 : i32
    return %c0_i32, %c0_i32_0 : i32, i32
  }
  func.func @transform_3(%arg0: i32) -> (i32, i32) {
    %c0_i32 = arith.constant 0 : i32
    %c0_i32_0 = arith.constant 0 : i32
    return %arg0, %c0_i32 : i32, i32
  }
}

module attributes {stable_mosaic.version = 11 : i64} {
  func.func @_middle_kernel(%arg0: i32, %arg1: memref<8x512xf32, #tpu.memory_space<vmem>>, %arg2: memref<8x32xf32, #tpu.memory_space<vmem>>, %arg3: memref<8x8xf32, #tpu.memory_space<vmem>>, %arg4: memref<32x128xf32, #tpu.memory_space<vmem>>, %arg5: memref<1x128xf32, #tpu.memory_space<vmem>>, %arg6: memref<512x128xf32, #tpu.memory_space<vmem>>, %arg7: memref<128x128xf32, #tpu.memory_space<vmem>>, %arg8: memref<1x128xf32, #tpu.memory_space<vmem>>, %arg9: memref<8x640xf32, #tpu.memory_space<vmem>>, %arg10: memref<1x640xf32, #tpu.memory_space<vmem>>, %arg11: memref<128x128xf32, #tpu.memory_space<vmem>>, %arg12: memref<1x128xf32, #tpu.memory_space<vmem>>, %arg13: memref<8x128xf32, #tpu.memory_space<vmem>>, %arg14: memref<8x512xf32, #tpu.memory_space<vmem>>, %arg15: memref<8x128xf32, #tpu.memory_space<vmem>>) attributes {dimension_semantics = [#tpu.dimension_semantics<arbitrary>], iteration_bounds = array<i64: 1>, scalar_prefetch = 0 : i64, scratch_operands = 0 : i64, tpu.core_type = #tpu.core_type<tc>, window_params = [{pipeline_mode = #tpu.pipeline_mode<synchronous>, transform_indices = @transform_0, window_bounds = array<i64: 8, 512>}, {pipeline_mode = #tpu.pipeline_mode<synchronous>, transform_indices = @transform_1, window_bounds = array<i64: 8, 32>}, {pipeline_mode = #tpu.pipeline_mode<synchronous>, transform_indices = @transform_2, window_bounds = array<i64: 8, 8>}, {pipeline_mode = #tpu.pipeline_mode<synchronous>, transform_indices = @transform_3, window_bounds = array<i64: 32, 128>}, {pipeline_mode = #tpu.pipeline_mode<synchronous>, transform_indices = @transform_4, window_bounds = array<i64: 1, 128>}, {pipeline_mode = #tpu.pipeline_mode<synchronous>, transform_indices = @transform_5, window_bounds = array<i64: 512, 128>}, {pipeline_mode = #tpu.pipeline_mode<synchronous>, transform_indices = @transform_6, window_bounds = array<i64: 128, 128>}, {pipeline_mode = #tpu.pipeline_mode<synchronous>, transform_indices = @transform_7, window_bounds = array<i64: 1, 128>}, {pipeline_mode = #tpu.pipeline_mode<synchronous>, transform_indices = @transform_8, window_bounds = array<i64: 8, 640>}, {pipeline_mode = #tpu.pipeline_mode<synchronous>, transform_indices = @transform_9, window_bounds = array<i64: 1, 640>}, {pipeline_mode = #tpu.pipeline_mode<synchronous>, transform_indices = @transform_10, window_bounds = array<i64: 128, 128>}, {pipeline_mode = #tpu.pipeline_mode<synchronous>, transform_indices = @transform_11, window_bounds = array<i64: 1, 128>}, {pipeline_mode = #tpu.pipeline_mode<synchronous>, transform_indices = @transform_12, window_bounds = array<i64: 8, 128>}, {pipeline_mode = #tpu.pipeline_mode<synchronous>, transform_indices = @transform_13, window_bounds = array<i64: 8, 512>}, {pipeline_mode = #tpu.pipeline_mode<synchronous>, transform_indices = @transform_14, window_bounds = array<i64: 8, 128>}]} {
    %c0 = arith.constant 0 : index
    %c0_0 = arith.constant 0 : index
    %0 = vector.load %arg2[%c0, %c0_0] : memref<8x32xf32, #tpu.memory_space<vmem>>, vector<8x32xf32>
    %c0_1 = arith.constant 0 : index
    %c0_2 = arith.constant 0 : index
    %1 = vector.load %arg4[%c0_1, %c0_2] : memref<32x128xf32, #tpu.memory_space<vmem>>, vector<32x128xf32>
    %cst = arith.constant dense<0.000000e+00> : vector<8x128xf32>
    %2 = tpu.matmul %0, %1, %cst {dimension_numbers = #tpu.dot_dimension_numbers<[1], [0], [0], [1], [0, 0, 1, 1], [], []>} : vector<8x32xf32>, vector<32x128xf32>, vector<8x128xf32> -> vector<8x128xf32>
    %c0_3 = arith.constant 0 : index
    %c0_4 = arith.constant 0 : index
    %3 = vector.load %arg5[%c0_3, %c0_4] : memref<1x128xf32, #tpu.memory_space<vmem>>, vector<1x128xf32>
    %4 = vector.broadcast %3 : vector<1x128xf32> to vector<8x128xf32>
    %5 = arith.addf %2, %4 : vector<8x128xf32>
    %cst_5 = arith.constant 0.000000e+00 : f32
    %6 = vector.broadcast %cst_5 : f32 to vector<8x128xf32>
    %7 = arith.cmpf oge, %5, %6 : vector<8x128xf32>
    %cst_6 = arith.constant 0.00999999977 : f32
    %8 = vector.broadcast %cst_6 : f32 to vector<8x128xf32>
    %9 = arith.mulf %8, %5 : vector<8x128xf32>
    %10 = arith.select %7, %5, %9 : vector<8x128xi1>, vector<8x128xf32>
    %c0_7 = arith.constant 0 : index
    %c0_8 = arith.constant 0 : index
    %11 = vector.load %arg1[%c0_7, %c0_8] : memref<8x512xf32, #tpu.memory_space<vmem>>, vector<8x512xf32>
    %c0_9 = arith.constant 0 : index
    %c0_10 = arith.constant 0 : index
    %12 = vector.load %arg6[%c0_9, %c0_10] : memref<512x128xf32, #tpu.memory_space<vmem>>, vector<512x128xf32>
    %cst_11 = arith.constant dense<0.000000e+00> : vector<8x128xf32>
    %13 = tpu.matmul %11, %12, %cst_11 {dimension_numbers = #tpu.dot_dimension_numbers<[1], [0], [0], [1], [0, 0, 1, 1], [], []>} : vector<8x512xf32>, vector<512x128xf32>, vector<8x128xf32> -> vector<8x128xf32>
    %c0_12 = arith.constant 0 : index
    %c0_13 = arith.constant 0 : index
    %14 = vector.load %arg7[%c0_12, %c0_13] : memref<128x128xf32, #tpu.memory_space<vmem>>, vector<128x128xf32>
    %cst_14 = arith.constant dense<0.000000e+00> : vector<8x128xf32>
    %15 = tpu.matmul %10, %14, %cst_14 {dimension_numbers = #tpu.dot_dimension_numbers<[1], [0], [0], [1], [0, 0, 1, 1], [], []>} : vector<8x128xf32>, vector<128x128xf32>, vector<8x128xf32> -> vector<8x128xf32>
    %16 = arith.addf %13, %15 : vector<8x128xf32>
    %c0_15 = arith.constant 0 : index
    %c0_16 = arith.constant 0 : index
    %17 = vector.load %arg8[%c0_15, %c0_16] : memref<1x128xf32, #tpu.memory_space<vmem>>, vector<1x128xf32>
    %18 = vector.broadcast %17 : vector<1x128xf32> to vector<8x128xf32>
    %19 = arith.addf %16, %18 : vector<8x128xf32>
    %c0_17 = arith.constant 0 : index
    %c0_18 = arith.constant 0 : index
    %20 = vector.load %arg13[%c0_17, %c0_18] : memref<8x128xf32, #tpu.memory_space<vmem>>, vector<8x128xf32>
    tpu.vector_store %arg13[%c0_17, %c0_18], %19 {strides = array<i32>} : memref<8x128xf32, #tpu.memory_space<vmem>>, vector<8x128xf32>,
    %21 = vector.extract_strided_slice %19 {offsets = [0, 0], sizes = [8, 8], strides = [1, 1]} : vector<8x128xf32> to vector<8x8xf32>
    %c0_19 = arith.constant 0 : index
    %c0_20 = arith.constant 0 : index
    %22 = vector.load %arg3[%c0_19, %c0_20] : memref<8x8xf32, #tpu.memory_space<vmem>>, vector<8x8xf32>
    %23 = vector.extract_strided_slice %19 {offsets = [0, 8], sizes = [8, 8], strides = [1, 1]} : vector<8x128xf32> to vector<8x8xf32>
    %cst_21 = arith.constant 5.000000e-01 : f32
    %24 = vector.broadcast %cst_21 : f32 to vector<8x8xf32>
    %25 = arith.mulf %24, %23 : vector<8x8xf32>
    %26 = math.exp %25 : vector<8x8xf32>
    %27 = arith.mulf %22, %26 : vector<8x8xf32>
    %28 = arith.addf %21, %27 : vector<8x8xf32>
    %c0_22 = arith.constant 0 : index
    %c0_23 = arith.constant 0 : index
    %29 = vector.load %arg9[%c0_22, %c0_23] : memref<8x640xf32, #tpu.memory_space<vmem>>, vector<8x640xf32>
    %cst_24 = arith.constant dense<0.000000e+00> : vector<8x640xf32>
    %30 = tpu.matmul %28, %29, %cst_24 {dimension_numbers = #tpu.dot_dimension_numbers<[1], [0], [0], [1], [0, 0, 1, 1], [], []>} : vector<8x8xf32>, vector<8x640xf32>, vector<8x640xf32> -> vector<8x640xf32>
    %c0_25 = arith.constant 0 : index
    %c0_26 = arith.constant 0 : index
    %31 = vector.load %arg10[%c0_25, %c0_26] : memref<1x640xf32, #tpu.memory_space<vmem>>, vector<1x640xf32>
    %32 = vector.broadcast %31 : vector<1x640xf32> to vector<8x640xf32>
    %33 = arith.addf %30, %32 : vector<8x640xf32>
    %34 = vector.extract_strided_slice %33 {offsets = [0, 0], sizes = [8, 512], strides = [1, 1]} : vector<8x640xf32> to vector<8x512xf32>
    %c0_27 = arith.constant 0 : index
    %c0_28 = arith.constant 0 : index
    %35 = vector.load %arg14[%c0_27, %c0_28] : memref<8x512xf32, #tpu.memory_space<vmem>>, vector<8x512xf32>
    tpu.vector_store %arg14[%c0_27, %c0_28], %34 {strides = array<i32>} : memref<8x512xf32, #tpu.memory_space<vmem>>, vector<8x512xf32>,
    %36 = vector.extract_strided_slice %33 {offsets = [0, 512], sizes = [8, 128], strides = [1, 1]} : vector<8x640xf32> to vector<8x128xf32>
    %cst_29 = arith.constant 0.000000e+00 : f32
    %37 = vector.broadcast %cst_29 : f32 to vector<8x128xf32>
    %38 = arith.cmpf oge, %36, %37 : vector<8x128xf32>
    %cst_30 = arith.constant 0.00999999977 : f32
    %39 = vector.broadcast %cst_30 : f32 to vector<8x128xf32>
    %40 = arith.mulf %39, %36 : vector<8x128xf32>
    %41 = arith.select %38, %36, %40 : vector<8x128xi1>, vector<8x128xf32>
    %c0_31 = arith.constant 0 : index
    %c0_32 = arith.constant 0 : index
    %42 = vector.load %arg11[%c0_31, %c0_32] : memref<128x128xf32, #tpu.memory_space<vmem>>, vector<128x128xf32>
    %cst_33 = arith.constant dense<0.000000e+00> : vector<8x128xf32>
    %43 = tpu.matmul %41, %42, %cst_33 {dimension_numbers = #tpu.dot_dimension_numbers<[1], [0], [0], [1], [0, 0, 1, 1], [], []>} : vector<8x128xf32>, vector<128x128xf32>, vector<8x128xf32> -> vector<8x128xf32>
    %c0_34 = arith.constant 0 : index
    %c0_35 = arith.constant 0 : index
    %44 = vector.load %arg12[%c0_34, %c0_35] : memref<1x128xf32, #tpu.memory_space<vmem>>, vector<1x128xf32>
    %45 = vector.broadcast %44 : vector<1x128xf32> to vector<8x128xf32>
    %46 = arith.addf %43, %45 : vector<8x128xf32>
    %47 = math.tanh %46 : vector<8x128xf32>
    %c0_36 = arith.constant 0 : index
    %c0_37 = arith.constant 0 : index
    %48 = vector.load %arg15[%c0_36, %c0_37] : memref<8x128xf32, #tpu.memory_space<vmem>>, vector<8x128xf32>
    tpu.vector_store %arg15[%c0_36, %c0_37], %47 {strides = array<i32>} : memref<8x128xf32, #tpu.memory_space<vmem>>, vector<8x128xf32>,
    return
  }
  func.func @transform_0(%arg0: i32) -> (i32, i32) {
    %c0_i32 = arith.constant 0 : i32
    %c0_i32_0 = arith.constant 0 : i32
    %c0_i32_1 = arith.constant 0 : i32
    return %c0_i32, %c0_i32_0 : i32, i32
  }
  func.func @transform_1(%arg0: i32) -> (i32, i32) {
    %c0_i32 = arith.constant 0 : i32
    %c0_i32_0 = arith.constant 0 : i32
    %c0_i32_1 = arith.constant 0 : i32
    return %c0_i32, %c0_i32_0 : i32, i32
  }
  func.func @transform_2(%arg0: i32) -> (i32, i32) {
    %c0_i32 = arith.constant 0 : i32
    %c0_i32_0 = arith.constant 0 : i32
    %c0_i32_1 = arith.constant 0 : i32
    return %c0_i32, %c0_i32_0 : i32, i32
  }
  func.func @transform_3(%arg0: i32) -> (i32, i32) {
    %c0_i32 = arith.constant 0 : i32
    %c0_i32_0 = arith.constant 0 : i32
    %c0_i32_1 = arith.constant 0 : i32
    return %c0_i32, %c0_i32_0 : i32, i32
  }
  func.func @transform_4(%arg0: i32) -> (i32, i32) {
    %c0_i32 = arith.constant 0 : i32
    %c0_i32_0 = arith.constant 0 : i32
    %c0_i32_1 = arith.constant 0 : i32
    return %c0_i32, %c0_i32_0 : i32, i32
  }
  func.func @transform_5(%arg0: i32) -> (i32, i32) {
    %c0_i32 = arith.constant 0 : i32
    %c0_i32_0 = arith.constant 0 : i32
    %c0_i32_1 = arith.constant 0 : i32
    return %c0_i32, %c0_i32_0 : i32, i32
  }
  func.func @transform_6(%arg0: i32) -> (i32, i32) {
    %c0_i32 = arith.constant 0 : i32
    %c0_i32_0 = arith.constant 0 : i32
    %c0_i32_1 = arith.constant 0 : i32
    return %c0_i32, %c0_i32_0 : i32, i32
  }
  func.func @transform_7(%arg0: i32) -> (i32, i32) {
    %c0_i32 = arith.constant 0 : i32
    %c0_i32_0 = arith.constant 0 : i32
    %c0_i32_1 = arith.constant 0 : i32
    return %c0_i32, %c0_i32_0 : i32, i32
  }
  func.func @transform_8(%arg0: i32) -> (i32, i32) {
    %c0_i32 = arith.constant 0 : i32
    %c0_i32_0 = arith.constant 0 : i32
    %c0_i32_1 = arith.constant 0 : i32
    return %c0_i32, %c0_i32_0 : i32, i32
  }
  func.func @transform_9(%arg0: i32) -> (i32, i32) {
    %c0_i32 = arith.constant 0 : i32
    %c0_i32_0 = arith.constant 0 : i32
    %c0_i32_1 = arith.constant 0 : i32
    return %c0_i32, %c0_i32_0 : i32, i32
  }
  func.func @transform_10(%arg0: i32) -> (i32, i32) {
    %c0_i32 = arith.constant 0 : i32
    %c0_i32_0 = arith.constant 0 : i32
    %c0_i32_1 = arith.constant 0 : i32
    return %c0_i32, %c0_i32_0 : i32, i32
  }
  func.func @transform_11(%arg0: i32) -> (i32, i32) {
    %c0_i32 = arith.constant 0 : i32
    %c0_i32_0 = arith.constant 0 : i32
    %c0_i32_1 = arith.constant 0 : i32
    return %c0_i32, %c0_i32_0 : i32, i32
  }
  func.func @transform_12(%arg0: i32) -> (i32, i32) {
    %c0_i32 = arith.constant 0 : i32
    %c0_i32_0 = arith.constant 0 : i32
    %c0_i32_1 = arith.constant 0 : i32
    return %c0_i32, %c0_i32_0 : i32, i32
  }
  func.func @transform_13(%arg0: i32) -> (i32, i32) {
    %c0_i32 = arith.constant 0 : i32
    %c0_i32_0 = arith.constant 0 : i32
    %c0_i32_1 = arith.constant 0 : i32
    return %c0_i32, %c0_i32_0 : i32, i32
  }
  func.func @transform_14(%arg0: i32) -> (i32, i32) {
    %c0_i32 = arith.constant 0 : i32
    %c0_i32_0 = arith.constant 0 : i32
    %c0_i32_1 = arith.constant 0 : i32
    return %c0_i32, %c0_i32_0 : i32, i32
  }
}

module attributes {stable_mosaic.version = 11 : i64} {
  func.func @_mm_bias_act_kernel(%arg0: i32, %arg1: memref<1024x32xbf16, #tpu.memory_space<vmem>>, %arg2: memref<32x128xbf16, #tpu.memory_space<vmem>>, %arg3: memref<1x128xf32, #tpu.memory_space<vmem>>, %arg4: memref<1024x128xbf16, #tpu.memory_space<vmem>>) attributes {dimension_semantics = [#tpu.dimension_semantics<parallel>], iteration_bounds = array<i64: 2>, scalar_prefetch = 0 : i64, scratch_operands = 0 : i64, tpu.core_type = #tpu.core_type<tc>, window_params = [{transform_indices = @transform_0, window_bounds = array<i64: 1024, 32>}, {pipeline_mode = #tpu.pipeline_mode<synchronous>, transform_indices = @transform_1, window_bounds = array<i64: 32, 128>}, {pipeline_mode = #tpu.pipeline_mode<synchronous>, transform_indices = @transform_2, window_bounds = array<i64: 1, 128>}, {transform_indices = @transform_3, window_bounds = array<i64: 1024, 128>}]} {
    %c0 = arith.constant 0 : index
    %c0_0 = arith.constant 0 : index
    %0 = vector.load %arg1[%c0, %c0_0] : memref<1024x32xbf16, #tpu.memory_space<vmem>>, vector<1024x32xbf16>
    %c0_1 = arith.constant 0 : index
    %c0_2 = arith.constant 0 : index
    %1 = vector.load %arg2[%c0_1, %c0_2] : memref<32x128xbf16, #tpu.memory_space<vmem>>, vector<32x128xbf16>
    %cst = arith.constant dense<0.000000e+00> : vector<1024x128xf32>
    %2 = tpu.matmul %0, %1, %cst {dimension_numbers = #tpu.dot_dimension_numbers<[1], [0], [0], [1], [0, 0, 1, 1], [], []>} : vector<1024x32xbf16>, vector<32x128xbf16>, vector<1024x128xf32> -> vector<1024x128xf32>
    %c0_3 = arith.constant 0 : index
    %c0_4 = arith.constant 0 : index
    %3 = vector.load %arg3[%c0_3, %c0_4] : memref<1x128xf32, #tpu.memory_space<vmem>>, vector<1x128xf32>
    %4 = vector.broadcast %3 : vector<1x128xf32> to vector<1024x128xf32>
    %5 = arith.addf %2, %4 : vector<1024x128xf32>
    %cst_5 = arith.constant 0.000000e+00 : f32
    %6 = vector.broadcast %cst_5 : f32 to vector<1024x128xf32>
    %7 = arith.cmpf oge, %5, %6 : vector<1024x128xf32>
    %cst_6 = arith.constant 0.00999999977 : f32
    %8 = vector.broadcast %cst_6 : f32 to vector<1024x128xf32>
    %9 = arith.mulf %8, %5 : vector<1024x128xf32>
    %10 = arith.select %7, %5, %9 : vector<1024x128xi1>, vector<1024x128xf32>
    %11 = arith.truncf %10 : vector<1024x128xf32> to vector<1024x128xbf16>
    %c0_7 = arith.constant 0 : index
    %c0_8 = arith.constant 0 : index
    %12 = vector.load %arg4[%c0_7, %c0_8] : memref<1024x128xbf16, #tpu.memory_space<vmem>>, vector<1024x128xbf16>
    tpu.vector_store %arg4[%c0_7, %c0_8], %11 {strides = array<i32>} : memref<1024x128xbf16, #tpu.memory_space<vmem>>, vector<1024x128xbf16>,
    return
  }
  func.func @transform_0(%arg0: i32) -> (i32, i32) {
    %c0_i32 = arith.constant 0 : i32
    %c0_i32_0 = arith.constant 0 : i32
    return %arg0, %c0_i32 : i32, i32
  }
  func.func @transform_1(%arg0: i32) -> (i32, i32) {
    %c0_i32 = arith.constant 0 : i32
    %c0_i32_0 = arith.constant 0 : i32
    %c0_i32_1 = arith.constant 0 : i32
    return %c0_i32, %c0_i32_0 : i32, i32
  }
  func.func @transform_2(%arg0: i32) -> (i32, i32) {
    %c0_i32 = arith.constant 0 : i32
    %c0_i32_0 = arith.constant 0 : i32
    %c0_i32_1 = arith.constant 0 : i32
    return %c0_i32, %c0_i32_0 : i32, i32
  }
  func.func @transform_3(%arg0: i32) -> (i32, i32) {
    %c0_i32 = arith.constant 0 : i32
    %c0_i32_0 = arith.constant 0 : i32
    return %arg0, %c0_i32 : i32, i32
  }
}

module attributes {stable_mosaic.version = 11 : i64} {
  func.func @_mm_bias_act_kernel(%arg0: i32, %arg1: memref<4096x80xbf16, #tpu.memory_space<vmem>>, %arg2: memref<80x128xbf16, #tpu.memory_space<vmem>>, %arg3: memref<1x128xf32, #tpu.memory_space<vmem>>, %arg4: memref<4096x128xf32, #tpu.memory_space<vmem>>) attributes {dimension_semantics = [#tpu.dimension_semantics<parallel>], iteration_bounds = array<i64: 2>, scalar_prefetch = 0 : i64, scratch_operands = 0 : i64, tpu.core_type = #tpu.core_type<tc>, window_params = [{transform_indices = @transform_0, window_bounds = array<i64: 4096, 80>}, {pipeline_mode = #tpu.pipeline_mode<synchronous>, transform_indices = @transform_1, window_bounds = array<i64: 80, 128>}, {pipeline_mode = #tpu.pipeline_mode<synchronous>, transform_indices = @transform_2, window_bounds = array<i64: 1, 128>}, {transform_indices = @transform_3, window_bounds = array<i64: 4096, 128>}]} {
    %c0 = arith.constant 0 : index
    %c0_0 = arith.constant 0 : index
    %0 = vector.load %arg1[%c0, %c0_0] : memref<4096x80xbf16, #tpu.memory_space<vmem>>, vector<4096x80xbf16>
    %c0_1 = arith.constant 0 : index
    %c0_2 = arith.constant 0 : index
    %1 = vector.load %arg2[%c0_1, %c0_2] : memref<80x128xbf16, #tpu.memory_space<vmem>>, vector<80x128xbf16>
    %cst = arith.constant dense<0.000000e+00> : vector<4096x128xf32>
    %2 = tpu.matmul %0, %1, %cst {dimension_numbers = #tpu.dot_dimension_numbers<[1], [0], [0], [1], [0, 0, 1, 1], [], []>} : vector<4096x80xbf16>, vector<80x128xbf16>, vector<4096x128xf32> -> vector<4096x128xf32>
    %c0_3 = arith.constant 0 : index
    %c0_4 = arith.constant 0 : index
    %3 = vector.load %arg3[%c0_3, %c0_4] : memref<1x128xf32, #tpu.memory_space<vmem>>, vector<1x128xf32>
    %4 = vector.broadcast %3 : vector<1x128xf32> to vector<4096x128xf32>
    %5 = arith.addf %2, %4 : vector<4096x128xf32>
    %c0_5 = arith.constant 0 : index
    %c0_6 = arith.constant 0 : index
    %6 = vector.load %arg4[%c0_5, %c0_6] : memref<4096x128xf32, #tpu.memory_space<vmem>>, vector<4096x128xf32>
    tpu.vector_store %arg4[%c0_5, %c0_6], %5 {strides = array<i32>} : memref<4096x128xf32, #tpu.memory_space<vmem>>, vector<4096x128xf32>,
    return
  }
  func.func @transform_0(%arg0: i32) -> (i32, i32) {
    %c0_i32 = arith.constant 0 : i32
    %c0_i32_0 = arith.constant 0 : i32
    return %arg0, %c0_i32 : i32, i32
  }
  func.func @transform_1(%arg0: i32) -> (i32, i32) {
    %c0_i32 = arith.constant 0 : i32
    %c0_i32_0 = arith.constant 0 : i32
    %c0_i32_1 = arith.constant 0 : i32
    return %c0_i32, %c0_i32_0 : i32, i32
  }
  func.func @transform_2(%arg0: i32) -> (i32, i32) {
    %c0_i32 = arith.constant 0 : i32
    %c0_i32_0 = arith.constant 0 : i32
    %c0_i32_1 = arith.constant 0 : i32
    return %c0_i32, %c0_i32_0 : i32, i32
  }
  func.func @transform_3(%arg0: i32) -> (i32, i32) {
    %c0_i32 = arith.constant 0 : i32
    %c0_i32_0 = arith.constant 0 : i32
    return %arg0, %c0_i32 : i32, i32
  }
}

</mosaic_0001>

<bundles_post_ra>
// kernel: forward.4
= control target key start
LH: loop header
LB: loop body
LE: loop exit
PB: predicated region body
PF: predicated region fallthrough
CT: control target
= control target key end

     0   :  { %s3535_s12 = smov 0   ;;  %s4050_s0 = inlined_call_operand.vmem [shape: bf16[2048,16], index: 0, kind: input, shape index: {}]   ;;  %s4051_s1 = inlined_call_operand.vmem [shape: bf16[16,128], index: 1, kind: input, shape index: {}]   ;;  %s4052_s2 = inlined_call_operand.vmem [shape: f32[1,128], index: 2, kind: input, shape index: {}]   ;;  %s4053_s3 = inlined_call_operand.vmem [shape: bf16[2048,128], index: 3, kind: output, shape index: {}]  }
   0x1 LB: > { %s2456_s13 = sadd.s32 4294967295, %s3513_s12   ;;  %p2460_p0 = scmp.ge.s32.totalorder %s3513_s12, 1  ;;  %s3513_s12 = sphi %s3535_s12, %s13_s12  }
   0x2   : > { %p138_p1 = scmp.lt.s32.totalorder %s3513_s12, 3 }
   0x4   : > { %p139_p2 = pnand %p2460_p0, %p138_p1 }
   0x5   : > { %v3441_v0 = vld [vmem:[%s4051_s1] sm:$0xff] (!%p139_p2)   ;;  %s2461_s16 = sshll.u32 (!%p139_p2), %s2456_s13, 7  ;;  %vm638_vm0 = vcmask (!%p139_p2), 130048  }
   0x6   : > { %142 = sbr.rel (%p139_p2) target bundleno = 379 (0x17b), region = 32  ;;  %p163_p3 = scmp.lt.s32.totalorder (!%p139_p2), %s2461_s16, 255  ;;  %3301 = vmatprep.subr.bf16.mxu0 (!%p139_p2), %v3441_v0  ;;  %3431 = vmatprep.subr.bf16.mxu1 (!%p139_p2), %v3441_v0 }
   0x7   : > { %3302 = vmatpush3.bf16.msra.mxu0 (!%p139_p2), %v3441_v0  ;;  %3432 = vmatpush3.bf16.msra.mxu1 (!%p139_p2), %v3441_v0 }
   0xd   : > { %s4055_s16 = smov (!%p163_p3, %s2461_s16), 255 }
   0xe   : > { %s2462_s17 = sshll.u32 %s4055_s16, 2 }
   0xf   : > { %s3554_s20 = scalar_lea.vmem %s4050_s0, %s2462_s17  ;;  %s3702_s25 = scalar_lea.vmem %s4053_s3, %s2462_s17 }
  0x10   : > { %v3442_v1 = vld [vmem:[%s3554_s20] sm:$0xff]   ;;  %v3444_v3 = vld [vmem:[%s3554_s20 + $0x8] sm:$0xff]   ;;  %v3446_v5 = vld [vmem:[%s3554_s20 + $0x10] sm:$0xff]  }
  0x11   : > { %v3443_v2 = vld [vmem:[%s3554_s20 + $0x100] sm:$0xff]   ;;  %3303 = vmatprep.mubr.msk.bf16.mxu0 %vm638_vm0, %v3442_v1  ;;  %v3445_v4 = vld [vmem:[%s3554_s20 + $0x108] sm:$0xff]   ;;  %v3447_v6 = vld [vmem:[%s3554_s20 + $0x110] sm:$0xff]  }
  0x12   : > { %3367 = vmatprep.mubr.msk.bf16.mxu1 %vm638_vm0, %v3443_v2  ;;  %3304 = vmatmul.mubr.msk.bf16.vlgmr.msra.gmra.mrb[0].mxu0 %vm638_vm0, %v3444_v3  ;;  %v3448_v7 = vld [vmem:[%s3554_s20 + $0x18] sm:$0xff]   ;;  %v3450_v9 = vld [vmem:[%s3554_s20 + $0x20] sm:$0xff]   ;;  %v3452_v11 = vld [vmem:[%s3554_s20 + $0x28] sm:$0xff]  }
  0x13   : > { %3368 = vmatmul.mubr.msk.bf16.vlgmr.msra.gmra.mrb[0].mxu1 %vm638_vm0, %v3445_v4  ;;  %3307 = vmatprep.mubr.msk.bf16.mxu0 %vm638_vm0, %v3446_v5  ;;  %v3449_v8 = vld [vmem:[%s3554_s20 + $0x118] sm:$0xff]   ;;  %v3451_v10 = vld [vmem:[%s3554_s20 + $0x120] sm:$0xff]   ;;  %v3453_v12 = vld [vmem:[%s3554_s20 + $0x128] sm:$0xff]  }
  0x14   : > { %3371 = vmatprep.mubr.msk.bf16.mxu1 %vm638_vm0, %v3447_v6  ;;  %v3454_v13 = vld [vmem:[%s3554_s20 + $0x30] sm:$0xff]   ;;  %v3456_v15 = vld [vmem:[%s3554_s20 + $0x38] sm:$0xff]   ;;  %v3458_v17 = vld [vmem:[%s3554_s20 + $0x40] sm:$0xff]  }
  0x15   : > { %v3455_v14 = vld [vmem:[%s3554_s20 + $0x130] sm:$0xff]   ;;  %v3457_v16 = vld [vmem:[%s3554_s20 + $0x138] sm:$0xff]   ;;  %v3459_v18 = vld [vmem:[%s3554_s20 + $0x140] sm:$0xff]  }
  0x16   : > { %v3460_v19 = vld [vmem:[%s3554_s20 + $0x48] sm:$0xff]   ;;  %v3462_v21 = vld [vmem:[%s3554_s20 + $0x50] sm:$0xff]   ;;  %v3464_v23 = vld [vmem:[%s3554_s20 + $0x58] sm:$0xff]  }
  0x17   : > { %v3461_v20 = vld [vmem:[%s3554_s20 + $0x148] sm:$0xff]   ;;  %v3463_v22 = vld [vmem:[%s3554_s20 + $0x150] sm:$0xff]   ;;  %v3465_v24 = vld [vmem:[%s3554_s20 + $0x158] sm:$0xff]  }
  0x18   : > { %v3466_v25 = vld [vmem:[%s3554_s20 + $0x60] sm:$0xff]   ;;  %v3468_v27 = vld [vmem:[%s3554_s20 + $0x68] sm:$0xff]   ;;  %v3470_v29 = vld [vmem:[%s3554_s20 + $0x70] sm:$0xff]  }
  0x19   : > { %v3467_v26 = vld [vmem:[%s3554_s20 + $0x160] sm:$0xff]   ;;  %v3469_v28 = vld [vmem:[%s3554_s20 + $0x168] sm:$0xff]   ;;  %v3471_v30 = vld [vmem:[%s3554_s20 + $0x170] sm:$0xff]  }
  0x1a   : > { %3308 = vmatmul.mubr.msk.bf16.gmra.mrb[4].mxu0 %vm638_vm0, %v3448_v7  ;;  %v3472_v31 = vld [vmem:[%s3554_s20 + $0x78] sm:$0xff]   ;;  %v3474_v33 = vld [vmem:[%s3554_s20 + $0x80] sm:$0xff]   ;;  %v3476_v35 = vld [vmem:[%s3554_s20 + $0x88] sm:$0xff]  }
  0x1b   : > { %3372 = vmatmul.mubr.msk.bf16.gmra.mrb[4].mxu1 %vm638_vm0, %v3449_v8  ;;  %3311 = vmatprep.mubr.msk.bf16.mxu0 %vm638_vm0, %v3450_v9  ;;  %v3473_v32 = vld [vmem:[%s3554_s20 + $0x178] sm:$0xff]   ;;  %v3475_v34 = vld [vmem:[%s3554_s20 + $0x180] sm:$0xff]   ;;  %v3477_v36 = vld [vmem:[%s3554_s20 + $0x188] sm:$0xff]  }
  0x1c   : > { %3375 = vmatprep.mubr.msk.bf16.mxu1 %vm638_vm0, %v3451_v10  ;;  %v3478_v37 = vld [vmem:[%s3554_s20 + $0x90] sm:$0xff]   ;;  %v3480_v39 = vld [vmem:[%s3554_s20 + $0x98] sm:$0xff]   ;;  %v3482_v41 = vld [vmem:[%s3554_s20 + $0xa0] sm:$0xff]  }
  0x1d   : > { %v3479_v38 = vld [vmem:[%s3554_s20 + $0x190] sm:$0xff]   ;;  %v3481_v40 = vld [vmem:[%s3554_s20 + $0x198] sm:$0xff]   ;;  %v3483_v42 = vld [vmem:[%s3554_s20 + $0x1a0] sm:$0xff]  }
  0x1e   : > { %v3484_v43 = vld [vmem:[%s3554_s20 + $0xa8] sm:$0xff]   ;;  %v3486_v45 = vld [vmem:[%s3554_s20 + $0xb0] sm:$0xff]   ;;  %v3488_v47 = vld [vmem:[%s3554_s20 + $0xb8] sm:$0xff]  }
  0x1f   : > { %v3485_v44 = vld [vmem:[%s3554_s20 + $0x1a8] sm:$0xff]   ;;  %v3487_v46 = vld [vmem:[%s3554_s20 + $0x1b0] sm:$0xff]   ;;  %v3489_v48 = vld [vmem:[%s3554_s20 + $0x1b8] sm:$0xff]  }
  0x20   : > { %v3490_v49 = vld [vmem:[%s3554_s20 + $0xc0] sm:$0xff]   ;;  %v3492_v51 = vld [vmem:[%s3554_s20 + $0xc8] sm:$0xff]   ;;  %v3494_v53 = vld [vmem:[%s3554_s20 + $0xd0] sm:$0xff]  }
  0x21   : > { %v3491_v50 = vld [vmem:[%s3554_s20 + $0x1c0] sm:$0xff]   ;;  %v3493_v52 = vld [vmem:[%s3554_s20 + $0x1c8] sm:$0xff]   ;;  %v3495_v54 = vld [vmem:[%s3554_s20 + $0x1d0] sm:$0xff]  }
  0x22   : > { %3312 = vmatmul.mubr.msk.bf16.gmra.mrb[8].mxu0 %vm638_vm0, %v3452_v11  ;;  %v3496_v55 = vld [vmem:[%s3554_s20 + $0xd8] sm:$0xff]   ;;  %v3498_v57 = vld [vmem:[%s3554_s20 + $0xe0] sm:$0xff]   ;;  %v3500_v59 = vld [vmem:[%s3554_s20 + $0xe8] sm:$0xff]  }
  0x23   : > { %3376 = vmatmul.mubr.msk.bf16.gmra.mrb[8].mxu1 %vm638_vm0, %v3453_v12  ;;  %3315 = vmatprep.mubr.msk.bf16.mxu0 %vm638_vm0, %v3454_v13  ;;  %v3497_v56 = vld [vmem:[%s3554_s20 + $0x1d8] sm:$0xff]   ;;  %v3499_v58 = vld [vmem:[%s3554_s20 + $0x1e0] sm:$0xff]   ;;  %v3501_v60 = vld [vmem:[%s3554_s20 + $0x1e8] sm:$0xff]  }
  0x24   : > { %3379 = vmatprep.mubr.msk.bf16.mxu1 %vm638_vm0, %v3455_v14  ;;  %v3502_v61 = vld [vmem:[%s3554_s20 + $0xf0] sm:$0xff]   ;;  %v3504_v63 = vld [vmem:[%s3554_s20 + $0xf8] sm:$0xff]   ;;  %v3687_v1 = vld [vmem:[%s4052_s2] ss:$0 sm:$0xff] }
  0x25   : > { %v3503_v62 = vld [vmem:[%s3554_s20 + $0x1f0] sm:$0xff]   ;;  %v3505_v0 = vld [vmem:[%s3554_s20 + $0x1f8] sm:$0xff]  }
  0x2a   : > { %3316 = vmatmul.mubr.msk.bf16.gmra.mrb[12].mxu0 %vm638_vm0, %v3456_v15 }
  0x2b   : > { %3380 = vmatmul.mubr.msk.bf16.gmra.mrb[12].mxu1 %vm638_vm0, %v3457_v16  ;;  %3319 = vmatprep.mubr.msk.bf16.mxu0 %vm638_vm0, %v3458_v17 }
  0x2c   : > { %3383 = vmatprep.mubr.msk.bf16.mxu1 %vm638_vm0, %v3459_v18 }
  0x32   : > { %3320 = vmatmul.mubr.msk.bf16.gmra.mrb[16].mxu0 %vm638_vm0, %v3460_v19 }
  0x33   : > { %3384 = vmatmul.mubr.msk.bf16.gmra.mrb[16].mxu1 %vm638_vm0, %v3461_v20  ;;  %3323 = vmatprep.mubr.msk.bf16.mxu0 %vm638_vm0, %v3462_v21 }
  0x34   : > { %3387 = vmatprep.mubr.msk.bf16.mxu1 %vm638_vm0, %v3463_v22 }
  0x3a   : > { %3324 = vmatmul.mubr.msk.bf16.gmra.mrb[20].mxu0 %vm638_vm0, %v3464_v23 }
  0x3b   : > { %3388 = vmatmul.mubr.msk.bf16.gmra.mrb[20].mxu1 %vm638_vm0, %v3465_v24  ;;  %3327 = vmatprep.mubr.msk.bf16.mxu0 %vm638_vm0, %v3466_v25 }
  0x3c   : > { %3391 = vmatprep.mubr.msk.bf16.mxu1 %vm638_vm0, %v3467_v26 }
  0x42   : > { %3328 = vmatmul.mubr.msk.bf16.gmra.mrb[24].mxu0 %vm638_vm0, %v3468_v27 }
  0x43   : > { %3392 = vmatmul.mubr.msk.bf16.gmra.mrb[24].mxu1 %vm638_vm0, %v3469_v28  ;;  %3331 = vmatprep.mubr.msk.bf16.mxu0 %vm638_vm0, %v3470_v29 }
  0x44   : > { %3395 = vmatprep.mubr.msk.bf16.mxu1 %vm638_vm0, %v3471_v30 }
  0x4a   : > { %3332 = vmatmul.mubr.msk.bf16.gmra.mrb[28].mxu0 %vm638_vm0, %v3472_v31 }
  0x4b   : > { %3396 = vmatmul.mubr.msk.bf16.gmra.mrb[28].mxu1 %vm638_vm0, %v3473_v32  ;;  %3335 = vmatprep.mubr.msk.bf16.mxu0 %vm638_vm0, %v3474_v33 }
  0x4c   : > { %3399 = vmatprep.mubr.msk.bf16.mxu1 %vm638_vm0, %v3475_v34 }
  0x52   : > { %3336 = vmatmul.mubr.msk.bf16.gmra.mrb[32].mxu0 %vm638_vm0, %v3476_v35 }
  0x53   : > { %3400 = vmatmul.mubr.msk.bf16.gmra.mrb[32].mxu1 %vm638_vm0, %v3477_v36  ;;  %3339 = vmatprep.mubr.msk.bf16.mxu0 %vm638_vm0, %v3478_v37 }
  0x54   : > { %3403 = vmatprep.mubr.msk.bf16.mxu1 %vm638_vm0, %v3479_v38 }
  0x5a   : > { %3340 = vmatmul.mubr.msk.bf16.gmra.mrb[36].mxu0 %vm638_vm0, %v3480_v39 }
  0x5b   : > { %3404 = vmatmul.mubr.msk.bf16.gmra.mrb[36].mxu1 %vm638_vm0, %v3481_v40  ;;  %3343 = vmatprep.mubr.msk.bf16.mxu0 %vm638_vm0, %v3482_v41 }
  0x5c   : > { %3407 = vmatprep.mubr.msk.bf16.mxu1 %vm638_vm0, %v3483_v42 }
  0x62   : > { %3344 = vmatmul.mubr.msk.bf16.gmra.mrb[40].mxu0 %vm638_vm0, %v3484_v43 }
  0x63   : > { %3408 = vmatmul.mubr.msk.bf16.gmra.mrb[40].mxu1 %vm638_vm0, %v3485_v44  ;;  %3347 = vmatprep.mubr.msk.bf16.mxu0 %vm638_vm0, %v3486_v45 }
  0x64   : > { %3411 = vmatprep.mubr.msk.bf16.mxu1 %vm638_vm0, %v3487_v46 }
  0x6a   : > { %3348 = vmatmul.mubr.msk.bf16.gmra.mrb[44].mxu0 %vm638_vm0, %v3488_v47 }
  0x6b   : > { %3412 = vmatmul.mubr.msk.bf16.gmra.mrb[44].mxu1 %vm638_vm0, %v3489_v48  ;;  %3351 = vmatprep.mubr.msk.bf16.mxu0 %vm638_vm0, %v3490_v49 }
  0x6c   : > { %3415 = vmatprep.mubr.msk.bf16.mxu1 %vm638_vm0, %v3491_v50 }
  0x72   : > { %3352 = vmatmul.mubr.msk.bf16.gmra.mrb[48].mxu0 %vm638_vm0, %v3492_v51 }
  0x73   : > { %3416 = vmatmul.mubr.msk.bf16.gmra.mrb[48].mxu1 %vm638_vm0, %v3493_v52  ;;  %3355 = vmatprep.mubr.msk.bf16.mxu0 %vm638_vm0, %v3494_v53 }
  0x74   : > { %3419 = vmatprep.mubr.msk.bf16.mxu1 %vm638_vm0, %v3495_v54 }
  0x7a   : > { %3356 = vmatmul.mubr.msk.bf16.gmra.mrb[52].mxu0 %vm638_vm0, %v3496_v55 }
  0x7b   : > { %3420 = vmatmul.mubr.msk.bf16.gmra.mrb[52].mxu1 %vm638_vm0, %v3497_v56  ;;  %3359 = vmatprep.mubr.msk.bf16.mxu0 %vm638_vm0, %v3498_v57 }
  0x7c   : > { %3423 = vmatprep.mubr.msk.bf16.mxu1 %vm638_vm0, %v3499_v58 }
  0x82   : > { %3360 = vmatmul.mubr.msk.bf16.gmra.mrb[56].mxu0 %vm638_vm0, %v3500_v59 }
  0x83   : > { %3424 = vmatmul.mubr.msk.bf16.gmra.mrb[56].mxu1 %vm638_vm0, %v3501_v60  ;;  %3363 = vmatprep.mubr.msk.bf16.mxu0 %vm638_vm0, %v3502_v61 }
  0x84   : > { %3427 = vmatprep.mubr.msk.bf16.mxu1 %vm638_vm0, %v3503_v62 }
  0x8a   : > { %3364 = vmatmul.mubr.msk.bf16.gmra.mrb[60].mxu0 %vm638_vm0, %v3504_v63 }
  0x8b   : > { %3428 = vmatmul.mubr.msk.bf16.gmra.mrb[60].mxu1 %vm638_vm0, %v3505_v0 }
  0xe5   : > { %v3305_v2 = vpop.f32.mrb[0].mxu0 }
  0xe6   : > { %v874_v3 = vadd.f32 %v3305_v2, %v3687_v1  ;;  %v3369_v4 = vpop.f32.mrb[0].mxu1  ;;  %v865_v5 = vpop.f32.mrb[1].mxu0 }
  0xe7   : > { %v1130_v6 = vadd.f32 %v3369_v4, %v3687_v1  ;;  %v866_v7 = vadd.f32 %v3687_v1, %v865_v5  ;;  %v1121_v8 = vpop.f32.mrb[1].mxu1  ;;  %v3306_v9 = vpop.f32.mrb[2].mxu0 }
  0xe8   : > { %vm1378_vm1 = vcmp.ge.f32.partialorder %v874_v3, 0.0  ;;  %v1506_v10 = vmul.f32 0.01, %v874_v3  ;;  %v1122_v11 = vadd.f32 %v3687_v1, %v1121_v8  ;;  %v877_v12 = vadd.f32 %v3306_v9, %v3687_v1  ;;  %v3370_v13 = vpop.f32.mrb[2].mxu1  ;;  %v868_v14 = vpop.f32.mrb[3].mxu0 }
  0xe9   : > { %vm1442_vm2 = vcmp.ge.f32.partialorder %v1130_v6, 0.0  ;;  %v1570_v15 = vmul.f32 0.01, %v1130_v6  ;;  %vm1376_vm3 = vcmp.ge.f32.partialorder %v866_v7, 0.0  ;;  %v1504_v16 = vmul.f32 0.01, %v866_v7 }
  0xea   : > { %vm1440_vm4 = vcmp.ge.f32.partialorder %v1122_v11, 0.0  ;;  %v1568_v17 = vmul.f32 0.01, %v1122_v11  ;;  %vm1379_vm5 = vcmp.ge.f32.partialorder %v877_v12, 0.0  ;;  %v1124_v18 = vpop.f32.mrb[3].mxu1  ;;  %v1634_v19 = vsel %vm1378_vm1, %v874_v3, %v1506_v10 }
  0xeb   : > { %v1507_v20 = vmul.f32 0.01, %v877_v12  ;;  %v1133_v21 = vadd.f32 %v3370_v13, %v3687_v1  ;;  %v1698_v22 = vsel %vm1442_vm2, %v1130_v6, %v1570_v15  ;;  %v1632_v23 = vsel %vm1376_vm3, %v866_v7, %v1504_v16 }
  0xec   : > { %v869_v24 = vadd.f32 %v3687_v1, %v868_v14  ;;  %v1125_v25 = vadd.f32 %v3687_v1, %v1124_v18  ;;  %v1696_v26 = vsel %vm1440_vm4, %v1122_v11, %v1568_v17 }
  0xed   : > { %v1635_v27 = vsel %vm1379_vm5, %v877_v12, %v1507_v20  ;;  %vm1443_vm6 = vcmp.ge.f32.partialorder %v1133_v21, 0.0  ;;  %v1571_v28 = vmul.f32 0.01, %v1133_v21  ;;  %v3309_v29 = vpop.f32.mrb[4].mxu0 }
  0xee   : > { %v2861_v30 = vpack.c.bf16 %v1635_v27, %v1634_v19  ;;  %vm1377_vm7 = vcmp.ge.f32.partialorder %v869_v24, 0.0  ;;  %v1505_v31 = vmul.f32 0.01, %v869_v24  ;;  %vm1441_vm8 = vcmp.ge.f32.partialorder %v1125_v25, 0.0  ;;  %v3373_v32 = vpop.f32.mrb[4].mxu1  ;;  %v881_v33 = vpop.f32.mrb[5].mxu0 }
  0xef   : > { %v1699_v34 = vsel %vm1443_vm6, %v1133_v21, %v1571_v28  ;;  %v1569_v35 = vmul.f32 0.01, %v1125_v25  ;;  %v890_v36 = vadd.f32 %v3309_v29, %v3687_v1  ;;  %v1146_v37 = vadd.f32 %v3373_v32, %v3687_v1  ;;  %v1137_v38 = vpop.f32.mrb[5].mxu1  ;;  %v3310_v39 = vpop.f32.mrb[6].mxu0 }
  0xf0   : > { %3173 = vst [vmem:[%s3702_s25 + $0x8] sm:$0xff] %v2861_v30   ;;  %v3021_v40 = vpack.c.bf16 %v1699_v34, %v1698_v22  ;;  %v1633_v41 = vsel %vm1377_vm7, %v869_v24, %v1505_v31  ;;  %v882_v42 = vadd.f32 %v3687_v1, %v881_v33  ;;  %v1138_v43 = vadd.f32 %v3687_v1, %v1137_v38  ;;  %v3374_v44 = vpop.f32.mrb[6].mxu1  ;;  %v884_v45 = vpop.f32.mrb[7].mxu0 }
  0xf1   : > { %v2856_v46 = vpack.c.bf16 %v1633_v41, %v1632_v23  ;;  %v1697_v47 = vsel %vm1441_vm8, %v1125_v25, %v1569_v35  ;;  %vm1382_vm9 = vcmp.ge.f32.partialorder %v890_v36, 0.0  ;;  %v1510_v48 = vmul.f32 0.01, %v890_v36  ;;  %v1140_v49 = vpop.f32.mrb[7].mxu1 }
  0xf2   : > { %3205 = vst [vmem:[%s3702_s25 + $0x108] sm:$0xff] %v3021_v40   ;;  %v3016_v50 = vpack.c.bf16 %v1697_v47, %v1696_v26  ;;  %vm1446_vm10 = vcmp.ge.f32.partialorder %v1146_v37, 0.0  ;;  %v1574_v51 = vmul.f32 0.01, %v1146_v37  ;;  %vm1380_vm11 = vcmp.ge.f32.partialorder %v882_v42, 0.0 }
  0xf3   : > { %2857 = vst [vmem:[%s3702_s25] sm:$0xff] %v2856_v46   ;;  %v1638_v52 = vsel %vm1382_vm9, %v890_v36, %v1510_v48  ;;  %v1508_v53 = vmul.f32 0.01, %v882_v42  ;;  %v1572_v54 = vmul.f32 0.01, %v1138_v43  ;;  %v893_v55 = vadd.f32 %v3310_v39, %v3687_v1 }
  0xf4   : > { %3204 = vst [vmem:[%s3702_s25 + $0x100] sm:$0xff] %v3016_v50   ;;  %v1149_v56 = vadd.f32 %v3374_v44, %v3687_v1  ;;  %v885_v57 = vadd.f32 %v3687_v1, %v884_v45  ;;  %v1702_v58 = vsel %vm1446_vm10, %v1146_v37, %v1574_v51  ;;  %vm1444_vm12 = vcmp.ge.f32.partialorder %v1138_v43, 0.0 }
  0xf5   : > { %v1636_v59 = vsel %vm1380_vm11, %v882_v42, %v1508_v53  ;;  %v1141_v60 = vadd.f32 %v3687_v1, %v1140_v49  ;;  %v3313_v61 = vpop.f32.mrb[8].mxu0  ;;  %vm1383_vm13 = vcmp.ge.f32.partialorder %v893_v55, 0.0  ;;  %v1511_v62 = vmul.f32 0.01, %v893_v55 }
  0xf6   : > { %vm1447_vm14 = vcmp.ge.f32.partialorder %v1149_v56, 0.0  ;;  %v1575_v63 = vmul.f32 0.01, %v1149_v56  ;;  %vm1381_vm15 = vcmp.ge.f32.partialorder %v885_v57, 0.0  ;;  %v1509_v0 = vmul.f32 0.01, %v885_v57 }
  0xf7   : > { %vm1445_vm0 = vcmp.ge.f32.partialorder %v1141_v60, 0.0  ;;  %v1573_v2 = vmul.f32 0.01, %v1141_v60  ;;  %v1700_v3 = vsel %vm1444_vm12, %v1138_v43, %v1572_v54  ;;  %v1639_v4 = vsel %vm1383_vm13, %v893_v55, %v1511_v62  ;;  %v3377_v7 = vpop.f32.mrb[8].mxu1  ;;  %v897_v8 = vpop.f32.mrb[9].mxu0 }
  0xf8   : > { %v1703_v5 = vsel %vm1447_vm14, %v1149_v56, %v1575_v63  ;;  %v906_v6 = vadd.f32 %v3313_v61, %v3687_v1  ;;  %v2871_v9 = vpack.c.bf16 %v1639_v4, %v1638_v52  ;;  %v1637_v11 = vsel %vm1381_vm15, %v885_v57, %v1509_v0  ;;  %v1153_v13 = vpop.f32.mrb[9].mxu1  ;;  %v3314_v14 = vpop.f32.mrb[10].mxu0 }
  0xf9   : > { %v3031_v10 = vpack.c.bf16 %v1703_v5, %v1702_v58  ;;  %v1701_v12 = vsel %vm1445_vm0, %v1141_v60, %v1573_v2  ;;  %v2866_v15 = vpack.c.bf16 %v1637_v11, %v1636_v59  ;;  %v3378_v18 = vpop.f32.mrb[10].mxu1  ;;  %v900_v19 = vpop.f32.mrb[11].mxu0  ;;  %v1162_v20 = vadd.f32 %v3377_v7, %v3687_v1 }
  0xfa   : > { %v3026_v16 = vpack.c.bf16 %v1701_v12, %v1700_v3  ;;  %vm1386_vm1 = vcmp.ge.f32.partialorder %v906_v6, 0.0  ;;  %v1514_v17 = vmul.f32 0.01, %v906_v6  ;;  %3175 = vst [vmem:[%s3702_s25 + $0x18] sm:$0xff] %v2871_v9   ;;  %v898_v21 = vadd.f32 %v3687_v1, %v897_v8  ;;  %v1156_v24 = vpop.f32.mrb[11].mxu1 }
  0xfb   : > { %3207 = vst [vmem:[%s3702_s25 + $0x118] sm:$0xff] %v3031_v10   ;;  %v1154_v22 = vadd.f32 %v3687_v1, %v1153_v13  ;;  %v909_v23 = vadd.f32 %v3314_v14, %v3687_v1  ;;  %3174 = vst [vmem:[%s3702_s25 + $0x10] sm:$0xff] %v2866_v15   ;;  %v1165_v26 = vadd.f32 %v3378_v18, %v3687_v1  ;;  %vm1450_vm2 = vcmp.ge.f32.partialorder %v1162_v20, 0.0 }
  0xfc   : > { %3206 = vst [vmem:[%s3702_s25 + $0x110] sm:$0xff] %v3026_v16   ;;  %v1642_v25 = vsel %vm1386_vm1, %v906_v6, %v1514_v17  ;;  %v901_v27 = vadd.f32 %v3687_v1, %v900_v19  ;;  %v1157_v28 = vadd.f32 %v3687_v1, %v1156_v24  ;;  %v1578_v29 = vmul.f32 0.01, %v1162_v20 }
  0xfd   : > { %vm1384_vm3 = vcmp.ge.f32.partialorder %v898_v21, 0.0  ;;  %v1512_v30 = vmul.f32 0.01, %v898_v21  ;;  %vm1448_vm4 = vcmp.ge.f32.partialorder %v1154_v22, 0.0  ;;  %v1576_v31 = vmul.f32 0.01, %v1154_v22 }
  0xfe   : > { %vm1387_vm5 = vcmp.ge.f32.partialorder %v909_v23, 0.0  ;;  %v1515_v32 = vmul.f32 0.01, %v909_v23  ;;  %v1706_v33 = vsel %vm1450_vm2, %v1162_v20, %v1578_v29  ;;  %vm1451_vm6 = vcmp.ge.f32.partialorder %v1165_v26, 0.0  ;;  %v3317_v36 = vpop.f32.mrb[12].mxu0  ;;  %v3381_v37 = vpop.f32.mrb[12].mxu1 }
  0xff   : > { %v1640_v34 = vsel %vm1384_vm3, %v898_v21, %v1512_v30  ;;  %v1579_v35 = vmul.f32 0.01, %v1165_v26  ;;  %v1704_v38 = vsel %vm1448_vm4, %v1154_v22, %v1576_v31  ;;  %vm1385_vm7 = vcmp.ge.f32.partialorder %v901_v27, 0.0  ;;  %v913_v41 = vpop.f32.mrb[13].mxu0  ;;  %v1169_v42 = vpop.f32.mrb[13].mxu1 }
 0x100   : > { %v1643_v39 = vsel %vm1387_vm5, %v909_v23, %v1515_v32  ;;  %v1513_v40 = vmul.f32 0.01, %v901_v27  ;;  %vm1449_vm8 = vcmp.ge.f32.partialorder %v1157_v28, 0.0  ;;  %v1577_v45 = vmul.f32 0.01, %v1157_v28  ;;  %v3318_v46 = vpop.f32.mrb[14].mxu0 }
 0x101   : > { %v2881_v43 = vpack.c.bf16 %v1643_v39, %v1642_v25  ;;  %v1707_v44 = vsel %vm1451_vm6, %v1165_v26, %v1579_v35  ;;  %v3382_v47 = vpop.f32.mrb[14].mxu1  ;;  %v922_v50 = vadd.f32 %v3317_v36, %v3687_v1  ;;  %v1178_v51 = vadd.f32 %v3381_v37, %v3687_v1  ;;  %v916_v52 = vpop.f32.mrb[15].mxu0 }
 0x102   : > { %v3041_v48 = vpack.c.bf16 %v1707_v44, %v1706_v33  ;;  %v1641_v49 = vsel %vm1385_vm7, %v901_v27, %v1513_v40  ;;  %v1172_v53 = vpop.f32.mrb[15].mxu1  ;;  %v1705_v55 = vsel %vm1449_vm8, %v1157_v28, %v1577_v45  ;;  %v914_v56 = vadd.f32 %v3687_v1, %v913_v41 }
 0x103   : > { %3177 = vst [vmem:[%s3702_s25 + $0x28] sm:$0xff] %v2881_v43   ;;  %v2876_v54 = vpack.c.bf16 %v1641_v49, %v1640_v34  ;;  %v1170_v57 = vadd.f32 %v3687_v1, %v1169_v42  ;;  %v3036_v58 = vpack.c.bf16 %v1705_v55, %v1704_v38  ;;  %vm1390_vm9 = vcmp.ge.f32.partialorder %v922_v50, 0.0 }
 0x104   : > { %3209 = vst [vmem:[%s3702_s25 + $0x128] sm:$0xff] %v3041_v48   ;;  %v1518_v59 = vmul.f32 0.01, %v922_v50  ;;  %vm1454_vm10 = vcmp.ge.f32.partialorder %v1178_v51, 0.0  ;;  %v1582_v60 = vmul.f32 0.01, %v1178_v51  ;;  %v925_v0 = vadd.f32 %v3318_v46, %v3687_v1 }
 0x105   : > { %3176 = vst [vmem:[%s3702_s25 + $0x20] sm:$0xff] %v2876_v54   ;;  %vm1388_vm11 = vcmp.ge.f32.partialorder %v914_v56, 0.0  ;;  %v1516_v61 = vmul.f32 0.01, %v914_v56  ;;  %vm1452_vm12 = vcmp.ge.f32.partialorder %v1170_v57, 0.0  ;;  %3208 = vst [vmem:[%s3702_s25 + $0x120] sm:$0xff] %v3036_v58   ;;  %v1181_v2 = vadd.f32 %v3382_v47, %v3687_v1 }
 0x106   : > { %v1646_v62 = vsel %vm1390_vm9, %v922_v50, %v1518_v59  ;;  %v1580_v63 = vmul.f32 0.01, %v1170_v57  ;;  %v3321_v3 = vpop.f32.mrb[16].mxu0  ;;  %v3385_v4 = vpop.f32.mrb[16].mxu1  ;;  %v1710_v5 = vsel %vm1454_vm10, %v1178_v51, %v1582_v60  ;;  %v917_v7 = vadd.f32 %v3687_v1, %v916_v52 }
 0x107   : > { %v1644_v6 = vsel %vm1388_vm11, %v914_v56, %v1516_v61  ;;  %v1173_v8 = vadd.f32 %v3687_v1, %v1172_v53  ;;  %v929_v9 = vpop.f32.mrb[17].mxu0  ;;  %v1185_v10 = vpop.f32.mrb[17].mxu1  ;;  %vm1391_vm13 = vcmp.ge.f32.partialorder %v925_v0, 0.0  ;;  %v1519_v12 = vmul.f32 0.01, %v925_v0 }
 0x108   : > { %v1708_v11 = vsel %vm1452_vm12, %v1170_v57, %v1580_v63  ;;  %vm1455_vm14 = vcmp.ge.f32.partialorder %v1181_v2, 0.0  ;;  %v3322_v13 = vpop.f32.mrb[18].mxu0  ;;  %v3386_v14 = vpop.f32.mrb[18].mxu1  ;;  %v1583_v15 = vmul.f32 0.01, %v1181_v2  ;;  %vm1389_vm15 = vcmp.ge.f32.partialorder %v917_v7, 0.0 }
 0x109   : > { %v1517_v16 = vmul.f32 0.01, %v917_v7  ;;  %vm1453_vm0 = vcmp.ge.f32.partialorder %v1173_v8, 0.0  ;;  %v1647_v17 = vsel %vm1391_vm13, %v925_v0, %v1519_v12  ;;  %v1581_v18 = vmul.f32 0.01, %v1173_v8  ;;  %v932_v21 = vpop.f32.mrb[19].mxu0 }
 0x10a   : > { %v938_v19 = vadd.f32 %v3321_v3, %v3687_v1  ;;  %v1194_v20 = vadd.f32 %v3385_v4, %v3687_v1  ;;  %v1188_v22 = vpop.f32.mrb[19].mxu1  ;;  %v2891_v23 = vpack.c.bf16 %v1647_v17, %v1646_v62  ;;  %v1711_v24 = vsel %vm1455_vm14, %v1181_v2, %v1583_v15 }
 0x10b   : > { %v1645_v25 = vsel %vm1389_vm15, %v917_v7, %v1517_v16  ;;  %v930_v26 = vadd.f32 %v3687_v1, %v929_v9  ;;  %v3051_v27 = vpack.c.bf16 %v1711_v24, %v1710_v5  ;;  %v1709_v29 = vsel %vm1453_vm0, %v1173_v8, %v1581_v18 }
 0x10c   : > { %v2886_v28 = vpack.c.bf16 %v1645_v25, %v1644_v6  ;;  %vm1394_vm1 = vcmp.ge.f32.partialorder %v938_v19, 0.0  ;;  %3179 = vst [vmem:[%s3702_s25 + $0x38] sm:$0xff] %v2891_v23   ;;  %v3046_v30 = vpack.c.bf16 %v1709_v29, %v1708_v11  ;;  %v1522_v31 = vmul.f32 0.01, %v938_v19 }
 0x10d   : > { %vm1458_vm2 = vcmp.ge.f32.partialorder %v1194_v20, 0.0  ;;  %v1586_v32 = vmul.f32 0.01, %v1194_v20  ;;  %v3325_v33 = vpop.f32.mrb[20].mxu0  ;;  %3211 = vst [vmem:[%s3702_s25 + $0x138] sm:$0xff] %v3051_v27   ;;  %vm1392_vm3 = vcmp.ge.f32.partialorder %v930_v26, 0.0  ;;  %v1186_v35 = vadd.f32 %v3687_v1, %v1185_v10 }
 0x10e   : > { %3178 = vst [vmem:[%s3702_s25 + $0x30] sm:$0xff] %v2886_v28   ;;  %v1520_v34 = vmul.f32 0.01, %v930_v26  ;;  %v941_v36 = vadd.f32 %v3322_v13, %v3687_v1  ;;  %v3389_v37 = vpop.f32.mrb[20].mxu1  ;;  %v945_v38 = vpop.f32.mrb[21].mxu0  ;;  %3210 = vst [vmem:[%s3702_s25 + $0x130] sm:$0xff] %v3046_v30   ;;  %v1650_v39 = vsel %vm1394_vm1, %v938_v19, %v1522_v31  ;;  %v1197_v41 = vadd.f32 %v3386_v14, %v3687_v1 }
 0x10f   : > { %v1714_v40 = vsel %vm1458_vm2, %v1194_v20, %v1586_v32  ;;  %v933_v42 = vadd.f32 %v3687_v1, %v932_v21  ;;  %v1201_v43 = vpop.f32.mrb[21].mxu1  ;;  %v3326_v44 = vpop.f32.mrb[22].mxu0  ;;  %vm1456_vm4 = vcmp.ge.f32.partialorder %v1186_v35, 0.0  ;;  %v1584_v46 = vmul.f32 0.01, %v1186_v35 }
 0x110   : > { %v1648_v45 = vsel %vm1392_vm3, %v930_v26, %v1520_v34  ;;  %vm1395_vm5 = vcmp.ge.f32.partialorder %v941_v36, 0.0  ;;  %v3390_v47 = vpop.f32.mrb[22].mxu1  ;;  %v948_v48 = vpop.f32.mrb[23].mxu0  ;;  %v1523_v49 = vmul.f32 0.01, %v941_v36  ;;  %vm1459_vm6 = vcmp.ge.f32.partialorder %v1197_v41, 0.0 }
 0x111   : > { %v1587_v50 = vmul.f32 0.01, %v1197_v41  ;;  %vm1393_vm7 = vcmp.ge.f32.partialorder %v933_v42, 0.0  ;;  %v1712_v51 = vsel %vm1456_vm4, %v1186_v35, %v1584_v46  ;;  %v1521_v52 = vmul.f32 0.01, %v933_v42  ;;  %v1204_v55 = vpop.f32.mrb[23].mxu1 }
 0x112   : > { %v1189_v53 = vadd.f32 %v3687_v1, %v1188_v22  ;;  %v954_v54 = vadd.f32 %v3325_v33, %v3687_v1  ;;  %v1651_v56 = vsel %vm1395_vm5, %v941_v36, %v1523_v49  ;;  %v1210_v58 = vadd.f32 %v3389_v37, %v3687_v1 }
 0x113   : > { %v1715_v57 = vsel %vm1459_vm6, %v1197_v41, %v1587_v50  ;;  %v946_v59 = vadd.f32 %v3687_v1, %v945_v38  ;;  %v2901_v60 = vpack.c.bf16 %v1651_v56, %v1650_v39  ;;  %v1649_v62 = vsel %vm1393_vm7, %v933_v42, %v1521_v52 }
 0x114   : > { %v3061_v61 = vpack.c.bf16 %v1715_v57, %v1714_v40  ;;  %vm1457_vm8 = vcmp.ge.f32.partialorder %v1189_v53, 0.0  ;;  %v2896_v63 = vpack.c.bf16 %v1649_v62, %v1648_v45  ;;  %v1585_v0 = vmul.f32 0.01, %v1189_v53 }
 0x115   : > { %vm1398_vm9 = vcmp.ge.f32.partialorder %v954_v54, 0.0  ;;  %v1526_v2 = vmul.f32 0.01, %v954_v54  ;;  %v3329_v3 = vpop.f32.mrb[24].mxu0  ;;  %3181 = vst [vmem:[%s3702_s25 + $0x48] sm:$0xff] %v2901_v60   ;;  %vm1462_vm10 = vcmp.ge.f32.partialorder %v1210_v58, 0.0  ;;  %v1202_v8 = vadd.f32 %v3687_v1, %v1201_v43 }
 0x116   : > { %3213 = vst [vmem:[%s3702_s25 + $0x148] sm:$0xff] %v3061_v61   ;;  %v1590_v4 = vmul.f32 0.01, %v1210_v58  ;;  %vm1396_vm11 = vcmp.ge.f32.partialorder %v946_v59, 0.0  ;;  %v1524_v5 = vmul.f32 0.01, %v946_v59  ;;  %v1713_v6 = vsel %vm1457_vm8, %v1189_v53, %v1585_v0 }
 0x117   : > { %3180 = vst [vmem:[%s3702_s25 + $0x40] sm:$0xff] %v2896_v63   ;;  %v1654_v7 = vsel %vm1398_vm9, %v954_v54, %v1526_v2  ;;  %v957_v9 = vadd.f32 %v3326_v44, %v3687_v1  ;;  %v3393_v10 = vpop.f32.mrb[24].mxu1  ;;  %v961_v11 = vpop.f32.mrb[25].mxu0  ;;  %v3056_v12 = vpack.c.bf16 %v1713_v6, %v1712_v51  ;;  %v1213_v15 = vadd.f32 %v3390_v47, %v3687_v1 }
 0x118   : > { %v1718_v13 = vsel %vm1462_vm10, %v1210_v58, %v1590_v4  ;;  %v1652_v14 = vsel %vm1396_vm11, %v946_v59, %v1524_v5  ;;  %v1217_v16 = vpop.f32.mrb[25].mxu1  ;;  %v3330_v17 = vpop.f32.mrb[26].mxu0  ;;  %vm1460_vm12 = vcmp.ge.f32.partialorder %v1202_v8, 0.0  ;;  %v1588_v18 = vmul.f32 0.01, %v1202_v8 }
 0x119   : > { %vm1399_vm13 = vcmp.ge.f32.partialorder %v957_v9, 0.0  ;;  %v1527_v19 = vmul.f32 0.01, %v957_v9  ;;  %3212 = vst [vmem:[%s3702_s25 + $0x140] sm:$0xff] %v3056_v12   ;;  %vm1463_vm14 = vcmp.ge.f32.partialorder %v1213_v15, 0.0  ;;  %v949_v21 = vadd.f32 %v3687_v1, %v948_v48  ;;  %v3394_v23 = vpop.f32.mrb[26].mxu1 }
 0x11a   : > { %v1591_v20 = vmul.f32 0.01, %v1213_v15  ;;  %v1205_v22 = vadd.f32 %v3687_v1, %v1204_v55  ;;  %v964_v24 = vpop.f32.mrb[27].mxu0  ;;  %v1716_v25 = vsel %vm1460_vm12, %v1202_v8, %v1588_v18  ;;  %v970_v27 = vadd.f32 %v3329_v3, %v3687_v1  ;;  %v1220_v29 = vpop.f32.mrb[27].mxu1 }
 0x11b   : > { %v1655_v26 = vsel %vm1399_vm13, %v957_v9, %v1527_v19  ;;  %v1226_v28 = vadd.f32 %v3393_v10, %v3687_v1  ;;  %vm1397_vm15 = vcmp.ge.f32.partialorder %v949_v21, 0.0  ;;  %v1525_v32 = vmul.f32 0.01, %v949_v21 }
 0x11c   : > { %v2911_v30 = vpack.c.bf16 %v1655_v26, %v1654_v7  ;;  %v1719_v31 = vsel %vm1463_vm14, %v1213_v15, %v1591_v20  ;;  %vm1461_vm0 = vcmp.ge.f32.partialorder %v1205_v22, 0.0  ;;  %v1589_v34 = vmul.f32 0.01, %v1205_v22 }
 0x11d   : > { %v3071_v33 = vpack.c.bf16 %v1719_v31, %v1718_v13  ;;  %vm1402_vm1 = vcmp.ge.f32.partialorder %v970_v27, 0.0  ;;  %v3333_v35 = vpop.f32.mrb[28].mxu0  ;;  %v1653_v36 = vsel %vm1397_vm15, %v949_v21, %v1525_v32  ;;  %v1530_v37 = vmul.f32 0.01, %v970_v27 }
 0x11e   : > { %3183 = vst [vmem:[%s3702_s25 + $0x58] sm:$0xff] %v2911_v30   ;;  %vm1466_vm2 = vcmp.ge.f32.partialorder %v1226_v28, 0.0  ;;  %v1594_v38 = vmul.f32 0.01, %v1226_v28  ;;  %v3397_v39 = vpop.f32.mrb[28].mxu1  ;;  %v2906_v40 = vpack.c.bf16 %v1653_v36, %v1652_v14  ;;  %v1717_v41 = vsel %vm1461_vm0, %v1205_v22, %v1589_v34  ;;  %v977_v44 = vpop.f32.mrb[29].mxu0 }
 0x11f   : > { %3215 = vst [vmem:[%s3702_s25 + $0x158] sm:$0xff] %v3071_v33   ;;  %v962_v42 = vadd.f32 %v3687_v1, %v961_v11  ;;  %v1218_v43 = vadd.f32 %v3687_v1, %v1217_v16  ;;  %v1233_v45 = vpop.f32.mrb[29].mxu1  ;;  %v3066_v46 = vpack.c.bf16 %v1717_v41, %v1716_v25  ;;  %v1658_v47 = vsel %vm1402_vm1, %v970_v27, %v1530_v37  ;;  %v3334_v50 = vpop.f32.mrb[30].mxu0 }
 0x120   : > { %v1722_v48 = vsel %vm1466_vm2, %v1226_v28, %v1594_v38  ;;  %v973_v49 = vadd.f32 %v3330_v17, %v3687_v1  ;;  %v3398_v51 = vpop.f32.mrb[30].mxu1  ;;  %3182 = vst [vmem:[%s3702_s25 + $0x50] sm:$0xff] %v2906_v40   ;;  %v1229_v55 = vadd.f32 %v3394_v23, %v3687_v1  ;;  %v965_v56 = vadd.f32 %v3687_v1, %v964_v24  ;;  %v980_v57 = vpop.f32.mrb[31].mxu0 }
 0x121   : > { %vm1400_vm3 = vcmp.ge.f32.partialorder %v962_v42, 0.0  ;;  %v1528_v52 = vmul.f32 0.01, %v962_v42  ;;  %vm1464_vm4 = vcmp.ge.f32.partialorder %v1218_v43, 0.0  ;;  %v1592_v53 = vmul.f32 0.01, %v1218_v43 }
 0x122   : > { %3214 = vst [vmem:[%s3702_s25 + $0x150] sm:$0xff] %v3066_v46   ;;  %vm1403_vm5 = vcmp.ge.f32.partialorder %v973_v49, 0.0  ;;  %v1531_v54 = vmul.f32 0.01, %v973_v49  ;;  %v1236_v58 = vpop.f32.mrb[31].mxu1  ;;  %v1221_v61 = vadd.f32 %v3687_v1, %v1220_v29  ;;  %v986_v62 = vadd.f32 %v3333_v35, %v3687_v1 }
 0x123   : > { %v1656_v59 = vsel %vm1400_vm3, %v962_v42, %v1528_v52  ;;  %v1720_v60 = vsel %vm1464_vm4, %v1218_v43, %v1592_v53  ;;  %vm1467_vm6 = vcmp.ge.f32.partialorder %v1229_v55, 0.0  ;;  %v1595_v0 = vmul.f32 0.01, %v1229_v55 }
 0x124   : > { %v1659_v63 = vsel %vm1403_vm5, %v973_v49, %v1531_v54  ;;  %vm1401_vm7 = vcmp.ge.f32.partialorder %v965_v56, 0.0  ;;  %v1529_v3 = vmul.f32 0.01, %v965_v56  ;;  %vm1465_vm8 = vcmp.ge.f32.partialorder %v1221_v61, 0.0 }
 0x125   : > { %v2921_v2 = vpack.c.bf16 %v1659_v63, %v1658_v47  ;;  %v1593_v4 = vmul.f32 0.01, %v1221_v61  ;;  %v3337_v5 = vpop.f32.mrb[32].mxu0  ;;  %v1723_v6 = vsel %vm1467_vm6, %v1229_v55, %v1595_v0  ;;  %vm1406_vm9 = vcmp.ge.f32.partialorder %v986_v62, 0.0 }
 0x126   : > { %v1534_v7 = vmul.f32 0.01, %v986_v62  ;;  %v1242_v8 = vadd.f32 %v3397_v39, %v3687_v1  ;;  %v3401_v9 = vpop.f32.mrb[32].mxu1  ;;  %v993_v10 = vpop.f32.mrb[33].mxu0  ;;  %v3081_v11 = vpack.c.bf16 %v1723_v6, %v1722_v48  ;;  %v1657_v12 = vsel %vm1401_vm7, %v965_v56, %v1529_v3 }
 0x127   : > { %3185 = vst [vmem:[%s3702_s25 + $0x68] sm:$0xff] %v2921_v2   ;;  %v1721_v13 = vsel %vm1465_vm8, %v1221_v61, %v1593_v4  ;;  %v978_v14 = vadd.f32 %v3687_v1, %v977_v44  ;;  %v1249_v15 = vpop.f32.mrb[33].mxu1  ;;  %v3338_v16 = vpop.f32.mrb[34].mxu0  ;;  %v2916_v17 = vpack.c.bf16 %v1657_v12, %v1656_v59  ;;  %v1234_v24 = vadd.f32 %v3687_v1, %v1233_v45 }
 0x128   : > { %v3076_v18 = vpack.c.bf16 %v1721_v13, %v1720_v60  ;;  %v1662_v19 = vsel %vm1406_vm9, %v986_v62, %v1534_v7  ;;  %vm1470_vm10 = vcmp.ge.f32.partialorder %v1242_v8, 0.0  ;;  %v3402_v20 = vpop.f32.mrb[34].mxu1  ;;  %v996_v21 = vpop.f32.mrb[35].mxu0  ;;  %3217 = vst [vmem:[%s3702_s25 + $0x168] sm:$0xff] %v3081_v11   ;;  %v1598_v22 = vmul.f32 0.01, %v1242_v8 }
 0x129   : > { %vm1404_vm11 = vcmp.ge.f32.partialorder %v978_v14, 0.0  ;;  %v1532_v23 = vmul.f32 0.01, %v978_v14  ;;  %v3785_v25 = vpop.f32.mrb[35].mxu1  ;;  %3184 = vst [vmem:[%s3702_s25 + $0x60] sm:$0xff] %v2916_v17   ;;  %v989_v26 = vadd.f32 %v3334_v50, %v3687_v1  ;;  %v1245_v27 = vadd.f32 %v3398_v51, %v3687_v1 }
 0x12a   : > { %3216 = vst [vmem:[%s3702_s25 + $0x160] sm:$0xff] %v3076_v18   ;;  %v981_v28 = vadd.f32 %v3687_v1, %v980_v57  ;;  %v1237_v29 = vadd.f32 %v3687_v1, %v1236_v58  ;;  %v1726_v30 = vsel %vm1470_vm10, %v1242_v8, %v1598_v22  ;;  %vm1468_vm12 = vcmp.ge.f32.partialorder %v1234_v24, 0.0 }
 0x12b   : > { %v1660_v31 = vsel %vm1404_vm11, %v978_v14, %v1532_v23  ;;  %v1596_v32 = vmul.f32 0.01, %v1234_v24  ;;  %vm1407_vm13 = vcmp.ge.f32.partialorder %v989_v26, 0.0  ;;  %v1535_v33 = vmul.f32 0.01, %v989_v26 }
 0x12c   : > { %vm1471_vm14 = vcmp.ge.f32.partialorder %v1245_v27, 0.0  ;;  %v1599_v34 = vmul.f32 0.01, %v1245_v27  ;;  %vm1405_vm15 = vcmp.ge.f32.partialorder %v981_v28, 0.0  ;;  %v1533_v36 = vmul.f32 0.01, %v981_v28 }
 0x12d   : > { %v1724_v35 = vsel %vm1468_vm12, %v1234_v24, %v1596_v32  ;;  %vm1469_vm0 = vcmp.ge.f32.partialorder %v1237_v29, 0.0  ;;  %v3341_v37 = vpop.f32.mrb[36].mxu0  ;;  %v1663_v38 = vsel %vm1407_vm13, %v989_v26, %v1535_v33  ;;  %v1597_v40 = vmul.f32 0.01, %v1237_v29 }
 0x12e   : > { %v1727_v39 = vsel %vm1471_vm14, %v1245_v27, %v1599_v34  ;;  %v1002_v41 = vadd.f32 %v3337_v5, %v3687_v1  ;;  %v3405_v42 = vpop.f32.mrb[36].mxu1  ;;  %v3794_v43 = vpop.f32.mrb[37].mxu0  ;;  %v2931_v44 = vpack.c.bf16 %v1663_v38, %v1662_v19  ;;  %v1661_v46 = vsel %vm1405_vm15, %v981_v28, %v1533_v36 }
 0x12f   : > { %v3091_v45 = vpack.c.bf16 %v1727_v39, %v1726_v30  ;;  %v1258_v47 = vadd.f32 %v3401_v9, %v3687_v1  ;;  %v1265_v48 = vpop.f32.mrb[37].mxu1  ;;  %v3797_v49 = vpop.f32.mrb[38].mxu0  ;;  %v2926_v50 = vpack.c.bf16 %v1661_v46, %v1660_v31  ;;  %v1725_v51 = vsel %vm1469_vm0, %v1237_v29, %v1597_v40 }
 0x130   : > { %vm1410_vm1 = vcmp.ge.f32.partialorder %v1002_v41, 0.0  ;;  %v1538_v52 = vmul.f32 0.01, %v1002_v41  ;;  %v3406_v53 = vpop.f32.mrb[38].mxu1  ;;  %v3799_v54 = vpop.f32.mrb[39].mxu0  ;;  %3187 = vst [vmem:[%s3702_s25 + $0x78] sm:$0xff] %v2931_v44   ;;  %v3086_v55 = vpack.c.bf16 %v1725_v51, %v1724_v35  ;;  %v994_v57 = vadd.f32 %v3687_v1, %v993_v10 }
 0x131   : > { %3219 = vst [vmem:[%s3702_s25 + $0x178] sm:$0xff] %v3091_v45   ;;  %vm1474_vm2 = vcmp.ge.f32.partialorder %v1258_v47, 0.0  ;;  %v1602_v56 = vmul.f32 0.01, %v1258_v47  ;;  %v3804_v58 = vpop.f32.mrb[39].mxu1  ;;  %3186 = vst [vmem:[%s3702_s25 + $0x70] sm:$0xff] %v2926_v50   ;;  %v1250_v60 = vadd.f32 %v3687_v1, %v1249_v15  ;;  %v1005_v61 = vadd.f32 %v3338_v16, %v3687_v1 }
 0x132   : > { %v1666_v59 = vsel %vm1410_vm1, %v1002_v41, %v1538_v52  ;;  %v1261_v62 = vadd.f32 %v3402_v20, %v3687_v1  ;;  %3218 = vst [vmem:[%s3702_s25 + $0x170] sm:$0xff] %v3086_v55   ;;  %vm1408_vm3 = vcmp.ge.f32.partialorder %v994_v57, 0.0  ;;  %v1536_v0 = vmul.f32 0.01, %v994_v57 }
 0x133   : > { %v1730_v63 = vsel %vm1474_vm2, %v1258_v47, %v1602_v56  ;;  %v997_v2 = vadd.f32 %v3687_v1, %v996_v21  ;;  %vm1472_vm4 = vcmp.ge.f32.partialorder %v1250_v60, 0.0  ;;  %v1600_v3 = vmul.f32 0.01, %v1250_v60 }
 0x134   : > { %vm1411_vm5 = vcmp.ge.f32.partialorder %v1005_v61, 0.0  ;;  %v1539_v4 = vmul.f32 0.01, %v1005_v61  ;;  %v1664_v5 = vsel %vm1408_vm3, %v994_v57, %v1536_v0  ;;  %vm1475_vm6 = vcmp.ge.f32.partialorder %v1261_v62, 0.0 }
 0x135   : > { %v1603_v6 = vmul.f32 0.01, %v1261_v62  ;;  %vm1409_vm7 = vcmp.ge.f32.partialorder %v997_v2, 0.0  ;;  %v3345_v7 = vpop.f32.mrb[40].mxu0  ;;  %v1728_v8 = vsel %vm1472_vm4, %v1250_v60, %v1600_v3  ;;  %v1537_v10 = vmul.f32 0.01, %v997_v2 }
 0x136   : > { %v1667_v9 = vsel %vm1411_vm5, %v1005_v61, %v1539_v4  ;;  %v1253_v11 = vadd.f32 %v3687_v1, %v3785_v25  ;;  %v3409_v12 = vpop.f32.mrb[40].mxu1  ;;  %v3814_v13 = vpop.f32.mrb[41].mxu0  ;;  %v1018_v16 = vadd.f32 %v3341_v37, %v3687_v1  ;;  %v1274_v17 = vadd.f32 %v3405_v42, %v3687_v1 }
 0x137   : > { %v2941_v14 = vpack.c.bf16 %v1667_v9, %v1666_v59  ;;  %v1731_v15 = vsel %vm1475_vm6, %v1261_v62, %v1603_v6  ;;  %v3818_v18 = vpop.f32.mrb[41].mxu1  ;;  %v3820_v19 = vpop.f32.mrb[42].mxu0  ;;  %v1665_v21 = vsel %vm1409_vm7, %v997_v2, %v1537_v10  ;;  %v1010_v30 = vadd.f32 %v3687_v1, %v3794_v43 }
 0x138   : > { %v3101_v20 = vpack.c.bf16 %v1731_v15, %v1730_v63  ;;  %vm1473_vm8 = vcmp.ge.f32.partialorder %v1253_v11, 0.0  ;;  %v1601_v22 = vmul.f32 0.01, %v1253_v11  ;;  %v3822_v23 = vpop.f32.mrb[42].mxu1  ;;  %v3824_v24 = vpop.f32.mrb[43].mxu0  ;;  %v2936_v25 = vpack.c.bf16 %v1665_v21, %v1664_v5 }
 0x139   : > { %3189 = vst [vmem:[%s3702_s25 + $0x88] sm:$0xff] %v2941_v14   ;;  %vm1414_vm9 = vcmp.ge.f32.partialorder %v1018_v16, 0.0  ;;  %v1542_v26 = vmul.f32 0.01, %v1018_v16  ;;  %vm1478_vm10 = vcmp.ge.f32.partialorder %v1274_v17, 0.0  ;;  %v3827_v27 = vpop.f32.mrb[43].mxu1  ;;  %v1266_v31 = vadd.f32 %v3687_v1, %v1265_v48 }
 0x13a   : > { %3221 = vst [vmem:[%s3702_s25 + $0x188] sm:$0xff] %v3101_v20   ;;  %v1729_v28 = vsel %vm1473_vm8, %v1253_v11, %v1601_v22  ;;  %v1606_v29 = vmul.f32 0.01, %v1274_v17  ;;  %3188 = vst [vmem:[%s3702_s25 + $0x80] sm:$0xff] %v2936_v25   ;;  %v1021_v34 = vadd.f32 %v3797_v49, %v3687_v1  ;;  %v1277_v35 = vadd.f32 %v3406_v53, %v3687_v1 }
 0x13b   : > { %v3096_v32 = vpack.c.bf16 %v1729_v28, %v1728_v8  ;;  %v1670_v33 = vsel %vm1414_vm9, %v1018_v16, %v1542_v26  ;;  %vm1412_vm11 = vcmp.ge.f32.partialorder %v1010_v30, 0.0  ;;  %v1540_v37 = vmul.f32 0.01, %v1010_v30 }
 0x13c   : > { %v1734_v36 = vsel %vm1478_vm10, %v1274_v17, %v1606_v29  ;;  %vm1476_vm12 = vcmp.ge.f32.partialorder %v1266_v31, 0.0  ;;  %v1604_v38 = vmul.f32 0.01, %v1266_v31  ;;  %vm1415_vm13 = vcmp.ge.f32.partialorder %v1021_v34, 0.0 }
 0x13d   : > { %3220 = vst [vmem:[%s3702_s25 + $0x180] sm:$0xff] %v3096_v32   ;;  %v1543_v39 = vmul.f32 0.01, %v1021_v34  ;;  %vm1479_vm14 = vcmp.ge.f32.partialorder %v1277_v35, 0.0  ;;  %v1668_v40 = vsel %vm1412_vm11, %v1010_v30, %v1540_v37  ;;  %v1607_v41 = vmul.f32 0.01, %v1277_v35 }
 0x13e   : > { %v1013_v42 = vadd.f32 %v3687_v1, %v3799_v54  ;;  %v1269_v43 = vadd.f32 %v3687_v1, %v3804_v58  ;;  %v3349_v44 = vpop.f32.mrb[44].mxu0  ;;  %v3842_v45 = vpop.f32.mrb[44].mxu1  ;;  %v1732_v46 = vsel %vm1476_vm12, %v1266_v31, %v1604_v38  ;;  %v1034_v48 = vadd.f32 %v3345_v7, %v3687_v1 }
 0x13f   : > { %v1671_v47 = vsel %vm1415_vm13, %v1021_v34, %v1543_v39  ;;  %v1290_v49 = vadd.f32 %v3409_v12, %v3687_v1  ;;  %v3846_v50 = vpop.f32.mrb[45].mxu0  ;;  %v3848_v51 = vpop.f32.mrb[45].mxu1  ;;  %v1735_v53 = vsel %vm1479_vm14, %v1277_v35, %v1607_v41  ;;  %v1026_v3 = vadd.f32 %v3687_v1, %v3814_v13  ;;  %v3871_v12 = vld [vmem:[%s4052_s2] ss:$0 sm:$0xff] }
 0x140   : > { %v2951_v52 = vpack.c.bf16 %v1671_v47, %v1670_v33  ;;  %vm1413_vm15 = vcmp.ge.f32.partialorder %v1013_v42, 0.0  ;;  %v1541_v54 = vmul.f32 0.01, %v1013_v42  ;;  %v3850_v55 = vpop.f32.mrb[46].mxu0  ;;  %v3852_v56 = vpop.f32.mrb[46].mxu1  ;;  %v3111_v57 = vpack.c.bf16 %v1735_v53, %v1734_v36 }
 0x141   : > { %vm1477_vm0 = vcmp.ge.f32.partialorder %v1269_v43, 0.0  ;;  %v1605_v58 = vmul.f32 0.01, %v1269_v43  ;;  %vm1418_vm1 = vcmp.ge.f32.partialorder %v1034_v48, 0.0  ;;  %v3854_v59 = vpop.f32.mrb[47].mxu0  ;;  %v3856_v60 = vpop.f32.mrb[47].mxu1  ;;  %v1282_v4 = vadd.f32 %v3687_v1, %v3818_v18 }
 0x142   : > { %3191 = vst [vmem:[%s3702_s25 + $0x98] sm:$0xff] %v2951_v52   ;;  %v1669_v61 = vsel %vm1413_vm15, %v1013_v42, %v1541_v54  ;;  %v1546_v62 = vmul.f32 0.01, %v1034_v48  ;;  %vm1482_vm2 = vcmp.ge.f32.partialorder %v1290_v49, 0.0  ;;  %v1610_v63 = vmul.f32 0.01, %v1290_v49 }
 0x143   : > { %3223 = vst [vmem:[%s3702_s25 + $0x198] sm:$0xff] %v3111_v57   ;;  %v2946_v0 = vpack.c.bf16 %v1669_v61, %v1668_v40  ;;  %v1733_v2 = vsel %vm1477_vm0, %v1269_v43, %v1605_v58  ;;  %v1037_v8 = vadd.f32 %v3820_v19, %v3687_v1  ;;  %vm1416_vm3 = vcmp.ge.f32.partialorder %v1026_v3, 0.0 }
 0x144   : > { %v3106_v5 = vpack.c.bf16 %v1733_v2, %v1732_v46  ;;  %v1674_v6 = vsel %vm1418_vm1, %v1034_v48, %v1546_v62  ;;  %v1738_v7 = vsel %vm1482_vm2, %v1290_v49, %v1610_v63  ;;  %v1544_v9 = vmul.f32 0.01, %v1026_v3 }
 0x145   : > { %3190 = vst [vmem:[%s3702_s25 + $0x90] sm:$0xff] %v2946_v0   ;;  %vm1480_vm4 = vcmp.ge.f32.partialorder %v1282_v4, 0.0  ;;  %v1608_v10 = vmul.f32 0.01, %v1282_v4  ;;  %vm1419_vm5 = vcmp.ge.f32.partialorder %v1037_v8, 0.0  ;;  %v1293_v13 = vadd.f32 %v3871_v12, %v3822_v23  ;;  %v3877_v1 = vpop.f32.mrb[48].mxu0 }
 0x146   : > { %3222 = vst [vmem:[%s3702_s25 + $0x190] sm:$0xff] %v3106_v5   ;;  %v1547_v11 = vmul.f32 0.01, %v1037_v8  ;;  %v1029_v14 = vadd.f32 %v3871_v12, %v3824_v24  ;;  %v3879_v15 = vpop.f32.mrb[48].mxu1  ;;  %v1672_v16 = vsel %vm1416_vm3, %v1026_v3, %v1544_v9  ;;  %v1285_v18 = vadd.f32 %v3871_v12, %v3827_v27  ;;  %v3884_v20 = vpop.f32.mrb[49].mxu0 }
 0x147   : > { %v1736_v17 = vsel %vm1480_vm4, %v1282_v4, %v1608_v10  ;;  %v1050_v19 = vadd.f32 %v3871_v12, %v3349_v44  ;;  %v3886_v21 = vpop.f32.mrb[49].mxu1  ;;  %vm1483_vm6 = vcmp.ge.f32.partialorder %v1293_v13, 0.0  ;;  %v1611_v23 = vmul.f32 0.01, %v1293_v13  ;;  %v3888_v24 = vpop.f32.mrb[50].mxu0 }
 0x148   : > { %v1675_v22 = vsel %vm1419_vm5, %v1037_v8, %v1547_v11  ;;  %vm1417_vm7 = vcmp.ge.f32.partialorder %v1029_v14, 0.0  ;;  %v3890_v25 = vpop.f32.mrb[50].mxu1  ;;  %v1545_v28 = vmul.f32 0.01, %v1029_v14  ;;  %vm1481_vm8 = vcmp.ge.f32.partialorder %v1285_v18, 0.0  ;;  %v3892_v27 = vpop.f32.mrb[51].mxu0 }
 0x149   : > { %v2961_v26 = vpack.c.bf16 %v1675_v22, %v1674_v6  ;;  %v1609_v29 = vmul.f32 0.01, %v1285_v18  ;;  %v1739_v30 = vsel %vm1483_vm6, %v1293_v13, %v1611_v23  ;;  %vm1422_vm9 = vcmp.ge.f32.partialorder %v1050_v19, 0.0  ;;  %v3896_v33 = vpop.f32.mrb[51].mxu1 }
 0x14a   : > { %v1550_v31 = vmul.f32 0.01, %v1050_v19  ;;  %v1306_v32 = vadd.f32 %v3871_v12, %v3842_v45  ;;  %v3121_v34 = vpack.c.bf16 %v1739_v30, %v1738_v7  ;;  %v1673_v35 = vsel %vm1417_vm7, %v1029_v14, %v1545_v28 }
 0x14b   : > { %3193 = vst [vmem:[%s3702_s25 + $0xa8] sm:$0xff] %v2961_v26   ;;  %v1737_v36 = vsel %vm1481_vm8, %v1285_v18, %v1609_v29  ;;  %v1042_v37 = vadd.f32 %v3871_v12, %v3846_v50  ;;  %v2956_v38 = vpack.c.bf16 %v1673_v35, %v1672_v16  ;;  %v1298_v43 = vadd.f32 %v3871_v12, %v3848_v51 }
 0x14c   : > { %v3116_v39 = vpack.c.bf16 %v1737_v36, %v1736_v17  ;;  %v1678_v40 = vsel %vm1422_vm9, %v1050_v19, %v1550_v31  ;;  %vm1486_vm10 = vcmp.ge.f32.partialorder %v1306_v32, 0.0  ;;  %3225 = vst [vmem:[%s3702_s25 + $0x1a8] sm:$0xff] %v3121_v34   ;;  %v1614_v41 = vmul.f32 0.01, %v1306_v32 }
 0x14d   : > { %vm1420_vm11 = vcmp.ge.f32.partialorder %v1042_v37, 0.0  ;;  %v1548_v42 = vmul.f32 0.01, %v1042_v37  ;;  %v3904_v44 = vpop.f32.mrb[52].mxu0  ;;  %3192 = vst [vmem:[%s3702_s25 + $0xa0] sm:$0xff] %v2956_v38   ;;  %v1053_v45 = vadd.f32 %v3871_v12, %v3850_v55  ;;  %v1309_v46 = vadd.f32 %v3871_v12, %v3852_v56 }
 0x14e   : > { %3224 = vst [vmem:[%s3702_s25 + $0x1a0] sm:$0xff] %v3116_v39   ;;  %v1045_v47 = vadd.f32 %v3871_v12, %v3854_v59  ;;  %v1301_v48 = vadd.f32 %v3871_v12, %v3856_v60  ;;  %v3916_v49 = vpop.f32.mrb[52].mxu1  ;;  %v3918_v50 = vpop.f32.mrb[53].mxu0  ;;  %v1742_v51 = vsel %vm1486_vm10, %v1306_v32, %v1614_v41  ;;  %vm1484_vm12 = vcmp.ge.f32.partialorder %v1298_v43, 0.0 }
 0x14f   : > { %v1676_v52 = vsel %vm1420_vm11, %v1042_v37, %v1548_v42  ;;  %v1612_v53 = vmul.f32 0.01, %v1298_v43  ;;  %v3920_v54 = vpop.f32.mrb[53].mxu1  ;;  %v3922_v55 = vpop.f32.mrb[54].mxu0  ;;  %vm1423_vm13 = vcmp.ge.f32.partialorder %v1053_v45, 0.0  ;;  %vm1487_vm14 = vcmp.ge.f32.partialorder %v1309_v46, 0.0 }
 0x150   : > { %v1551_v56 = vmul.f32 0.01, %v1053_v45  ;;  %v1615_v57 = vmul.f32 0.01, %v1309_v46  ;;  %vm1421_vm15 = vcmp.ge.f32.partialorder %v1045_v47, 0.0  ;;  %vm1485_vm0 = vcmp.ge.f32.partialorder %v1301_v48, 0.0 }
 0x151   : > { %v1740_v58 = vsel %vm1484_vm12, %v1298_v43, %v1612_v53  ;;  %v1549_v59 = vmul.f32 0.01, %v1045_v47  ;;  %v3924_v60 = vpop.f32.mrb[54].mxu1  ;;  %v3926_v61 = vpop.f32.mrb[55].mxu0  ;;  %v1613_v0 = vmul.f32 0.01, %v1301_v48  ;;  %v1066_v2 = vadd.f32 %v3871_v12, %v3877_v1 }
 0x152   : > { %v1679_v62 = vsel %vm1423_vm13, %v1053_v45, %v1551_v56  ;;  %v1743_v63 = vsel %vm1487_vm14, %v1309_v46, %v1615_v57  ;;  %v3930_v3 = vpop.f32.mrb[55].mxu1  ;;  %v1322_v7 = vadd.f32 %v3871_v12, %v3879_v15  ;;  %v1058_v14 = vadd.f32 %v3871_v12, %v3884_v20 }
 0x153   : > { %v2971_v4 = vpack.c.bf16 %v1679_v62, %v1678_v40  ;;  %v3131_v5 = vpack.c.bf16 %v1743_v63, %v1742_v51  ;;  %v1677_v6 = vsel %vm1421_vm15, %v1045_v47, %v1549_v59  ;;  %v1741_v9 = vsel %vm1485_vm0, %v1301_v48, %v1613_v0 }
 0x154   : > { %v2966_v8 = vpack.c.bf16 %v1677_v6, %v1676_v52  ;;  %vm1426_vm1 = vcmp.ge.f32.partialorder %v1066_v2, 0.0  ;;  %v1554_v10 = vmul.f32 0.01, %v1066_v2  ;;  %v3126_v11 = vpack.c.bf16 %v1741_v9, %v1740_v58 }
 0x155   : > { %3195 = vst [vmem:[%s3702_s25 + $0xb8] sm:$0xff] %v2971_v4   ;;  %3227 = vst [vmem:[%s3702_s25 + $0x1b8] sm:$0xff] %v3131_v5   ;;  %vm1490_vm2 = vcmp.ge.f32.partialorder %v1322_v7, 0.0  ;;  %v1618_v13 = vmul.f32 0.01, %v1322_v7  ;;  %v3938_v1 = vpop.f32.mrb[56].mxu0  ;;  %v1314_v15 = vadd.f32 %v3871_v12, %v3886_v21  ;;  %v1069_v17 = vadd.f32 %v3871_v12, %v3888_v24 }
 0x156   : > { %3194 = vst [vmem:[%s3702_s25 + $0xb0] sm:$0xff] %v2966_v8   ;;  %v1682_v16 = vsel %vm1426_vm1, %v1066_v2, %v1554_v10  ;;  %v1325_v18 = vadd.f32 %v3871_v12, %v3890_v25  ;;  %v3947_v19 = vpop.f32.mrb[56].mxu1  ;;  %v3949_v22 = vpop.f32.mrb[57].mxu0  ;;  %3226 = vst [vmem:[%s3702_s25 + $0x1b0] sm:$0xff] %v3126_v11   ;;  %vm1424_vm3 = vcmp.ge.f32.partialorder %v1058_v14, 0.0  ;;  %v1061_v26 = vadd.f32 %v3871_v12, %v3892_v27 }
 0x157   : > { %v1746_v23 = vsel %vm1490_vm2, %v1322_v7, %v1618_v13  ;;  %v1552_v20 = vmul.f32 0.01, %v1058_v14  ;;  %v3954_v28 = vpop.f32.mrb[57].mxu1  ;;  %v3956_v21 = vpop.f32.mrb[58].mxu0  ;;  %vm1488_vm4 = vcmp.ge.f32.partialorder %v1314_v15, 0.0  ;;  %vm1427_vm5 = vcmp.ge.f32.partialorder %v1069_v17, 0.0 }
 0x158   : > { %v1616_v24 = vmul.f32 0.01, %v1314_v15  ;;  %v1555_v29 = vmul.f32 0.01, %v1069_v17  ;;  %vm1491_vm6 = vcmp.ge.f32.partialorder %v1325_v18, 0.0  ;;  %vm1425_vm7 = vcmp.ge.f32.partialorder %v1061_v26, 0.0 }
 0x159   : > { %v1680_v25 = vsel %vm1424_vm3, %v1058_v14, %v1552_v20  ;;  %v1619_v30 = vmul.f32 0.01, %v1325_v18  ;;  %v3958_v31 = vpop.f32.mrb[58].mxu1  ;;  %v3960_v32 = vpop.f32.mrb[59].mxu0  ;;  %v1553_v27 = vmul.f32 0.01, %v1061_v26  ;;  %v1317_v36 = vadd.f32 %v3871_v12, %v3896_v33 }
 0x15a   : > { %v1744_v34 = vsel %vm1488_vm4, %v1314_v15, %v1616_v24  ;;  %v1683_v35 = vsel %vm1427_vm5, %v1069_v17, %v1555_v29  ;;  %v3964_v37 = vpop.f32.mrb[59].mxu1  ;;  %v1082_v40 = vadd.f32 %v3871_v12, %v3904_v44  ;;  %v1338_v41 = vadd.f32 %v3871_v12, %v3916_v49 }
 0x15b   : > { %v2981_v38 = vpack.c.bf16 %v1683_v35, %v1682_v16  ;;  %v1747_v39 = vsel %vm1491_vm6, %v1325_v18, %v1619_v30  ;;  %v1681_v43 = vsel %vm1425_vm7, %v1061_v26, %v1553_v27  ;;  %vm1489_vm8 = vcmp.ge.f32.partialorder %v1317_v36, 0.0 }
 0x15c   : > { %v3141_v42 = vpack.c.bf16 %v1747_v39, %v1746_v23  ;;  %v1617_v45 = vmul.f32 0.01, %v1317_v36  ;;  %v2976_v46 = vpack.c.bf16 %v1681_v43, %v1680_v25  ;;  %vm1430_vm9 = vcmp.ge.f32.partialorder %v1082_v40, 0.0 }
 0x15d   : > { %3197 = vst [vmem:[%s3702_s25 + $0xc8] sm:$0xff] %v2981_v38   ;;  %v1558_v33 = vmul.f32 0.01, %v1082_v40  ;;  %vm1494_vm10 = vcmp.ge.f32.partialorder %v1338_v41, 0.0  ;;  %v3971_v47 = vpop.f32.mrb[60].mxu0  ;;  %v1074_v44 = vadd.f32 %v3871_v12, %v3918_v50  ;;  %v1330_v49 = vadd.f32 %v3871_v12, %v3920_v54 }
 0x15e   : > { %3229 = vst [vmem:[%s3702_s25 + $0x1c8] sm:$0xff] %v3141_v42   ;;  %v1745_v48 = vsel %vm1489_vm8, %v1317_v36, %v1617_v45  ;;  %v1622_v51 = vmul.f32 0.01, %v1338_v41  ;;  %v3978_v52 = vpop.f32.mrb[60].mxu1  ;;  %v3980_v53 = vpop.f32.mrb[61].mxu0  ;;  %3196 = vst [vmem:[%s3702_s25 + $0xc0] sm:$0xff] %v2976_v46   ;;  %v1085_v58 = vadd.f32 %v3871_v12, %v3922_v55  ;;  %v1341_v59 = vadd.f32 %v3871_v12, %v3924_v60 }
 0x15f   : > { %v3136_v56 = vpack.c.bf16 %v1745_v48, %v1744_v34  ;;  %v1686_v57 = vsel %vm1430_vm9, %v1082_v40, %v1558_v33  ;;  %v3987_v62 = vpop.f32.mrb[61].mxu1  ;;  %v3989_v50 = vpop.f32.mrb[62].mxu0  ;;  %vm1428_vm11 = vcmp.ge.f32.partialorder %v1074_v44, 0.0  ;;  %v1556_v63 = vmul.f32 0.01, %v1074_v44 }
 0x160   : > { %v1750_v54 = vsel %vm1494_vm10, %v1338_v41, %v1622_v51  ;;  %vm1492_vm12 = vcmp.ge.f32.partialorder %v1330_v49, 0.0  ;;  %v3992_v0 = vpop.f32.mrb[62].mxu1  ;;  %v3994_v2 = vpop.f32.mrb[63].mxu0  ;;  %v1620_v4 = vmul.f32 0.01, %v1330_v49  ;;  %vm1431_vm13 = vcmp.ge.f32.partialorder %v1085_v58, 0.0 }
 0x161   : > { %3228 = vst [vmem:[%s3702_s25 + $0x1c0] sm:$0xff] %v3136_v56   ;;  %v1559_v55 = vmul.f32 0.01, %v1085_v58  ;;  %vm1495_vm14 = vcmp.ge.f32.partialorder %v1341_v59, 0.0  ;;  %v1684_v5 = vsel %vm1428_vm11, %v1074_v44, %v1556_v63  ;;  %v1623_v60 = vmul.f32 0.01, %v1341_v59 }
 0x162   : > { %v1077_v6 = vadd.f32 %v3871_v12, %v3926_v61  ;;  %v1333_v7 = vadd.f32 %v3871_v12, %v3930_v3  ;;  %v4001_v8 = vpop.f32.mrb[63].mxu1  ;;  %v1748_v9 = vsel %vm1492_vm12, %v1330_v49, %v1620_v4  ;;  %v1098_v11 = vadd.f32 %v3871_v12, %v3938_v1 }
 0x163   : > { %v1687_v10 = vsel %vm1431_vm13, %v1085_v58, %v1559_v55  ;;  %v1354_v13 = vadd.f32 %v3871_v12, %v3947_v19  ;;  %v1751_v16 = vsel %vm1495_vm14, %v1341_v59, %v1623_v60  ;;  %v1090_v19 = vadd.f32 %v3871_v12, %v3949_v22 }
 0x164   : > { %v2991_v14 = vpack.c.bf16 %v1687_v10, %v1686_v57  ;;  %vm1429_vm15 = vcmp.ge.f32.partialorder %v1077_v6, 0.0  ;;  %v1557_v15 = vmul.f32 0.01, %v1077_v6  ;;  %v3151_v17 = vpack.c.bf16 %v1751_v16, %v1750_v54 }
 0x165   : > { %vm1493_vm0 = vcmp.ge.f32.partialorder %v1333_v7, 0.0  ;;  %v1621_v61 = vmul.f32 0.01, %v1333_v7  ;;  %vm1434_vm1 = vcmp.ge.f32.partialorder %v1098_v11, 0.0  ;;  %v1562_v18 = vmul.f32 0.01, %v1098_v11 }
 0x166   : > { %3199 = vst [vmem:[%s3702_s25 + $0xd8] sm:$0xff] %v2991_v14   ;;  %v1685_v3 = vsel %vm1429_vm15, %v1077_v6, %v1557_v15  ;;  %vm1498_vm2 = vcmp.ge.f32.partialorder %v1354_v13, 0.0  ;;  %v1626_v23 = vmul.f32 0.01, %v1354_v13  ;;  %3231 = vst [vmem:[%s3702_s25 + $0x1d8] sm:$0xff] %v3151_v17   ;;  %v1346_v26 = vadd.f32 %v3871_v12, %v3954_v28 }
 0x167   : > { %v2986_v1 = vpack.c.bf16 %v1685_v3, %v1684_v5  ;;  %v1749_v20 = vsel %vm1493_vm0, %v1333_v7, %v1621_v61  ;;  %v1690_v29 = vsel %vm1434_vm1, %v1098_v11, %v1562_v18  ;;  %v1101_v30 = vadd.f32 %v3871_v12, %v3956_v21 }
 0x168   : > { %v3146_v24 = vpack.c.bf16 %v1749_v20, %v1748_v9  ;;  %v1754_v25 = vsel %vm1498_vm2, %v1354_v13, %v1626_v23  ;;  %vm1432_vm3 = vcmp.ge.f32.partialorder %v1090_v19, 0.0  ;;  %v1560_v34 = vmul.f32 0.01, %v1090_v19 }
 0x169   : > { %3198 = vst [vmem:[%s3702_s25 + $0xd0] sm:$0xff] %v2986_v1   ;;  %vm1496_vm4 = vcmp.ge.f32.partialorder %v1346_v26, 0.0  ;;  %v1624_v35 = vmul.f32 0.01, %v1346_v26  ;;  %vm1435_vm5 = vcmp.ge.f32.partialorder %v1101_v30, 0.0  ;;  %v1357_v22 = vadd.f32 %v3871_v12, %v3958_v31 }
 0x16a   : > { %3230 = vst [vmem:[%s3702_s25 + $0x1d0] sm:$0xff] %v3146_v24   ;;  %v1563_v27 = vmul.f32 0.01, %v1101_v30  ;;  %v1093_v28 = vadd.f32 %v3871_v12, %v3960_v32  ;;  %v1688_v36 = vsel %vm1432_vm3, %v1090_v19, %v1560_v34  ;;  %v1349_v21 = vadd.f32 %v3871_v12, %v3964_v37 }
 0x16b   : > { %v1752_v38 = vsel %vm1496_vm4, %v1346_v26, %v1624_v35  ;;  %v1114_v39 = vadd.f32 %v3871_v12, %v3971_v47  ;;  %vm1499_vm6 = vcmp.ge.f32.partialorder %v1357_v22, 0.0  ;;  %v1627_v41 = vmul.f32 0.01, %v1357_v22 }
 0x16c   : > { %v1691_v40 = vsel %vm1435_vm5, %v1101_v30, %v1563_v27  ;;  %vm1433_vm7 = vcmp.ge.f32.partialorder %v1093_v28, 0.0  ;;  %v1561_v43 = vmul.f32 0.01, %v1093_v28  ;;  %vm1497_vm8 = vcmp.ge.f32.partialorder %v1349_v21, 0.0 }
 0x16d   : > { %v3001_v42 = vpack.c.bf16 %v1691_v40, %v1690_v29  ;;  %v1625_v31 = vmul.f32 0.01, %v1349_v21  ;;  %v1755_v32 = vsel %vm1499_vm6, %v1357_v22, %v1627_v41  ;;  %vm1438_vm9 = vcmp.ge.f32.partialorder %v1114_v39, 0.0 }
 0x16e   : > { %v1566_v45 = vmul.f32 0.01, %v1114_v39  ;;  %v1370_v37 = vadd.f32 %v3871_v12, %v3978_v52  ;;  %v3161_v46 = vpack.c.bf16 %v1755_v32, %v1754_v25  ;;  %v1689_v33 = vsel %vm1433_vm7, %v1093_v28, %v1561_v43 }
 0x16f   : > { %3201 = vst [vmem:[%s3702_s25 + $0xe8] sm:$0xff] %v3001_v42   ;;  %v1753_v47 = vsel %vm1497_vm8, %v1349_v21, %v1625_v31  ;;  %v1106_v48 = vadd.f32 %v3871_v12, %v3980_v53  ;;  %v2996_v51 = vpack.c.bf16 %v1689_v33, %v1688_v36  ;;  %v1362_v57 = vadd.f32 %v3871_v12, %v3987_v62 }
 0x170   : > { %v3156_v44 = vpack.c.bf16 %v1753_v47, %v1752_v38  ;;  %3233 = vst [vmem:[%s3702_s25 + $0x1e8] sm:$0xff] %v3161_v46   ;;  %v1694_v49 = vsel %vm1438_vm9, %v1114_v39, %v1566_v45  ;;  %v1630_v56 = vmul.f32 0.01, %v1370_v37  ;;  %v1117_v52 = vadd.f32 %v3871_v12, %v3989_v50 }
 0x171   : > { %3200 = vst [vmem:[%s3702_s25 + $0xe0] sm:$0xff] %v2996_v51   ;;  %v1373_v58 = vadd.f32 %v3871_v12, %v3992_v0  ;;  %v1109_v59 = vadd.f32 %v3871_v12, %v3994_v2  ;;  %v1365_v53 = vadd.f32 %v3871_v12, %v4001_v8  ;;  %vm1502_vm10 = vcmp.ge.f32.partialorder %v1370_v37, 0.0 }
 0x172   : > { %3232 = vst [vmem:[%s3702_s25 + $0x1e0] sm:$0xff] %v3156_v44   ;;  %vm1436_vm11 = vcmp.ge.f32.partialorder %v1106_v48, 0.0  ;;  %v1564_v54 = vmul.f32 0.01, %v1106_v48  ;;  %v1628_v63 = vmul.f32 0.01, %v1362_v57  ;;  %v1758_v0 = vsel %vm1502_vm10, %v1370_v37, %v1630_v56 }
 0x173   : > { %vm1439_vm12 = vcmp.ge.f32.partialorder %v1117_v52, 0.0  ;;  %v1567_v62 = vmul.f32 0.01, %v1117_v52  ;;  %vm1503_vm13 = vcmp.ge.f32.partialorder %v1373_v58, 0.0  ;;  %v1631_v4 = vmul.f32 0.01, %v1373_v58 }
 0x174   : > { %vm1500_vm14 = vcmp.ge.f32.partialorder %v1362_v57, 0.0  ;;  %vm1437_vm15 = vcmp.ge.f32.partialorder %v1109_v59, 0.0  ;;  %v1565_v50 = vmul.f32 0.01, %v1109_v59  ;;  %vm1501_vm0 = vcmp.ge.f32.partialorder %v1365_v53, 0.0 }
 0x175   : > { %v1695_v2 = vsel %vm1439_vm12, %v1117_v52, %v1567_v62  ;;  %v1759_v55 = vsel %vm1503_vm13, %v1373_v58, %v1631_v4  ;;  %v1629_v12 = vmul.f32 0.01, %v1365_v53  ;;  %v1692_v5 = vsel %vm1436_vm11, %v1106_v48, %v1564_v54 }
 0x176   : > { %v3011_v60 = vpack.c.bf16 %v1695_v2, %v1694_v49  ;;  %v3171_v6 = vpack.c.bf16 %v1759_v55, %v1758_v0  ;;  %v1693_v7 = vsel %vm1437_vm15, %v1109_v59, %v1565_v50  ;;  %v1756_v8 = vsel %vm1500_vm14, %v1362_v57, %v1628_v63 }
 0x177   : > { %v3006_v9 = vpack.c.bf16 %v1693_v7, %v1692_v5  ;;  %v1757_v10 = vsel %vm1501_vm0, %v1365_v53, %v1629_v12 }
 0x178   : > { %3203 = vst [vmem:[%s3702_s25 + $0xf8] sm:$0xff] %v3011_v60   ;;  %3235 = vst [vmem:[%s3702_s25 + $0x1f8] sm:$0xff] %v3171_v6   ;;  %v3166_v11 = vpack.c.bf16 %v1757_v10, %v1756_v8 }
 0x179   : > { %3202 = vst [vmem:[%s3702_s25 + $0xf0] sm:$0xff] %v3006_v9  }
 0x17a   : > { %3234 = vst [vmem:[%s3702_s25 + $0x1f0] sm:$0xff] %v3166_v11  }
 0x17b PF: > { %s13_s12 = sadd.s32 1, %s3513_s12  }
 0x17c   : > { %p10_p4 = scmp.ge.s32.totalorder %s13_s12, 4  }
 0x17e   :  { %12 = sbr.rel (!%p10_p4) target bundleno = 1 (0x1), region = 62 }

// kernel: forward.5
= control target key start
LH: loop header
LB: loop body
LE: loop exit
PB: predicated region body
PF: predicated region fallthrough
CT: control target
= control target key end

     0   :  { %v1138_v0 = vmov 0.0|0.0   ;;  %vm1139_vm0 = vmmov 0   ;;  %v1140_v4 = vmov 0.0   ;;  %vm56_vm1 = vcmask 261120   ;;  %s1612_s3 = inlined_call_operand.vmem [shape: f32[32,128], index: 3, kind: input, shape index: {}]   ;;  %s1613_s5 = inlined_call_operand.vmem [shape: f32[512,128], index: 5, kind: input, shape index: {}]   ;;  %s1614_s6 = inlined_call_operand.vmem [shape: f32[128,128], index: 6, kind: input, shape index: {}]   ;;  %s1615_s1 = inlined_call_operand.vmem [shape: f32[8,32], index: 1, kind: input, shape index: {}]   ;;  %s1616_s0 = inlined_call_operand.vmem [shape: f32[8,512], index: 0, kind: input, shape index: {}]   ;;  %s1617_s4 = inlined_call_operand.vmem [shape: f32[1,128], index: 4, kind: input, shape index: {}]   ;;  %s1618_s7 = inlined_call_operand.vmem [shape: f32[1,128], index: 7, kind: input, shape index: {}]   ;;  %s1619_s12 = inlined_call_operand.vmem [shape: f32[8,128], index: 12, kind: output, shape index: {0}]   ;;  %s1620_s8 = inlined_call_operand.vmem [shape: f32[8,640], index: 8, kind: input, shape index: {}]   ;;  %s1621_s2 = inlined_call_operand.vmem [shape: f32[8,8], index: 2, kind: input, shape index: {}]   ;;  %s1622_s10 = inlined_call_operand.vmem [shape: f32[128,128], index: 10, kind: input, shape index: {}]   ;;  %s1623_s9 = inlined_call_operand.vmem [shape: f32[1,640], index: 9, kind: input, shape index: {}]   ;;  %s1624_s13 = inlined_call_operand.vmem [shape: f32[8,512], index: 13, kind: output, shape index: {1}]   ;;  %s1625_s11 = inlined_call_operand.vmem [shape: f32[1,128], index: 11, kind: input, shape index: {}]   ;;  %s1626_s14 = inlined_call_operand.vmem [shape: f32[8,128], index: 14, kind: output, shape index: {2}]  }
   0x1   :  { %1012 = vmatprep.subr.bf16.mxu1 %v1138_v0  ;;  %v45_v1 = vld [vmem:[%s1612_s3] sm:$0xff]  ;;  %v46_v2 = vld [vmem:[%s1612_s3 + $0x8] sm:$0xff]  ;;  %v47_v3 = vld [vmem:[%s1612_s3 + $0x10] sm:$0xff]  ;;  %934 = vmatprep.mubr.msk.f32.mxu1 %vm1139_vm0, %v1140_v4  ;;  %vm478_vm3 = vcmask 64512  }
   0x2   :  { %v1013_v5 = vpack.c.bf16 %v46_v2, %v45_v1  ;;  %v48_v6 = vld [vmem:[%s1612_s3 + $0x18] sm:$0xff]  ;;  %v153_v7 = vld [vmem:[%s1613_s5 + $0x80] sm:$0xff]  ;;  %v154_v8 = vld [vmem:[%s1613_s5 + $0x88] sm:$0xff] }
   0x3   :  { %v137_v9 = vld [vmem:[%s1613_s5] sm:$0xff]  ;;  %v138_v10 = vld [vmem:[%s1613_s5 + $0x8] sm:$0xff]  ;;  %v1016_v11 = vpack.c.bf16 %v48_v6, %v47_v3  ;;  %v1042_v12 = vpack.c.bf16 %v154_v8, %v153_v7  ;;  %v155_v16 = vld [vmem:[%s1613_s5 + $0x90] sm:$0xff] }
   0x4   :  { %1014 = vmatpush3.bf16.msra.mxu1 %v1013_v5  ;;  %v1044_v13 = vpack.c.bf16 %v138_v10, %v137_v9  ;;  %v201_v14 = vld [vmem:[%s1614_s6] sm:$0xff]  ;;  %v202_v15 = vld [vmem:[%s1614_s6 + $0x8] sm:$0xff]  ;;  %v156_v17 = vld [vmem:[%s1613_s5 + $0x98] sm:$0xff] }
   0x5   :  { %1015 = vmatprep.subr.bf16.mxu1 %v1138_v0  ;;  %v139_v18 = vld [vmem:[%s1613_s5 + $0x10] sm:$0xff]  ;;  %v140_v19 = vld [vmem:[%s1613_s5 + $0x18] sm:$0xff]  ;;  %1043 = vmatprep.subr.bf16.mxu0 %v1042_v12  ;;  %v1046_v20 = vpack.c.bf16 %v156_v17, %v155_v16  ;;  %v157_v21 = vld [vmem:[%s1613_s5 + $0xa0] sm:$0xff]  ;;  %v1019_v25 = vpack.c.bf16 %v202_v15, %v201_v14 }
   0x6   :  { %v44_v22 = vld [vmem:[%s1615_s1] sm:$0xff]  ;;  %1045 = vmatpush3.bf16.msra.mxu0 %v1044_v13  ;;  %v1048_v23 = vpack.c.bf16 %v140_v19, %v139_v18  ;;  %v158_v24 = vld [vmem:[%s1613_s5 + $0xa8] sm:$0xff]  ;;  %v203_v26 = vld [vmem:[%s1614_s6 + $0x10] sm:$0xff] }
   0x7   :  { %1047 = vmatprep.subr.bf16.mxu0 %v1046_v20  ;;  %v1050_v27 = vpack.c.bf16 %v158_v24, %v157_v21  ;;  %v141_v28 = vld [vmem:[%s1613_s5 + $0x20] sm:$0xff]  ;;  %v142_v29 = vld [vmem:[%s1613_s5 + $0x28] sm:$0xff]  ;;  %v204_v30 = vld [vmem:[%s1614_s6 + $0x18] sm:$0xff] }
   0x8   :  { %1017 = vmatpush3.bf16.msra.mxu1 %v1016_v11  ;;  %v159_v31 = vld [vmem:[%s1613_s5 + $0xb0] sm:$0xff]  ;;  %v160_v32 = vld [vmem:[%s1613_s5 + $0xb8] sm:$0xff]  ;;  %v1052_v33 = vpack.c.bf16 %v142_v29, %v141_v28  ;;  %v1022_v34 = vpack.c.bf16 %v204_v30, %v203_v26  ;;  %v205_v35 = vld [vmem:[%s1614_s6 + $0x20] sm:$0xff] }
   0x9   :  { %1018 = vmatprep.subr.bf16.mxu1 %v1138_v0  ;;  %v1054_v36 = vpack.c.bf16 %v160_v32, %v159_v31  ;;  %v143_v37 = vld [vmem:[%s1613_s5 + $0x30] sm:$0xff]  ;;  %v144_v38 = vld [vmem:[%s1613_s5 + $0x38] sm:$0xff]  ;;  %v206_v39 = vld [vmem:[%s1614_s6 + $0x28] sm:$0xff] }
   0xa   :  { %1049 = vmatpush3.bf16.msra.mxu0 %v1048_v23  ;;  %v161_v40 = vld [vmem:[%s1613_s5 + $0xc0] sm:$0xff]  ;;  %v162_v41 = vld [vmem:[%s1613_s5 + $0xc8] sm:$0xff]  ;;  %v1056_v42 = vpack.c.bf16 %v144_v38, %v143_v37  ;;  %v1025_v43 = vpack.c.bf16 %v206_v39, %v205_v35  ;;  %v207_v44 = vld [vmem:[%s1614_s6 + $0x30] sm:$0xff] }
   0xb   :  { %935 = vmatmul.mubr.msk.f32.vlgmr.msra.gmra.mrb[0].mxu1 %vm56_vm1, %v44_v22  ;;  %1051 = vmatprep.subr.bf16.mxu0 %v1050_v27  ;;  %v1058_v45 = vpack.c.bf16 %v162_v41, %v161_v40  ;;  %v145_v46 = vld [vmem:[%s1613_s5 + $0x40] sm:$0xff]  ;;  %v146_v47 = vld [vmem:[%s1613_s5 + $0x48] sm:$0xff]  ;;  %v208_v48 = vld [vmem:[%s1614_s6 + $0x38] sm:$0xff] }
   0xc   :  { %1020 = vmatpush3.bf16.msra.mxu1 %v1019_v25  ;;  %969 = vmatprep.mubr.msk.f32.mxu1 %vm1139_vm0, %v1140_v4  ;;  %v163_v49 = vld [vmem:[%s1613_s5 + $0xd0] sm:$0xff]  ;;  %v164_v50 = vld [vmem:[%s1613_s5 + $0xd8] sm:$0xff]  ;;  %v1060_v51 = vpack.c.bf16 %v146_v47, %v145_v46  ;;  %v1028_v52 = vpack.c.bf16 %v208_v48, %v207_v44  ;;  %v209_v53 = vld [vmem:[%s1614_s6 + $0x40] sm:$0xff] }
   0xd   :  { %1021 = vmatprep.subr.bf16.mxu1 %v1138_v0  ;;  %v1062_v54 = vpack.c.bf16 %v164_v50, %v163_v49  ;;  %v147_v55 = vld [vmem:[%s1613_s5 + $0x50] sm:$0xff]  ;;  %v148_v56 = vld [vmem:[%s1613_s5 + $0x58] sm:$0xff]  ;;  %v210_v57 = vld [vmem:[%s1614_s6 + $0x48] sm:$0xff] }
   0xe   :  { %1053 = vmatpush3.bf16.msra.mxu0 %v1052_v33  ;;  %v165_v58 = vld [vmem:[%s1613_s5 + $0xe0] sm:$0xff]  ;;  %v166_v59 = vld [vmem:[%s1613_s5 + $0xe8] sm:$0xff]  ;;  %v1064_v60 = vpack.c.bf16 %v148_v56, %v147_v55  ;;  %v1031_v61 = vpack.c.bf16 %v210_v57, %v209_v53  ;;  %v211_v62 = vld [vmem:[%s1614_s6 + $0x50] sm:$0xff] }
   0xf   :  { %1055 = vmatprep.subr.bf16.mxu0 %v1054_v36  ;;  %v1066_v63 = vpack.c.bf16 %v166_v59, %v165_v58  ;;  %v149_v1 = vld [vmem:[%s1613_s5 + $0x60] sm:$0xff]  ;;  %v150_v2 = vld [vmem:[%s1613_s5 + $0x68] sm:$0xff]  ;;  %v212_v3 = vld [vmem:[%s1614_s6 + $0x58] sm:$0xff] }
  0x10   :  { %1023 = vmatpush3.bf16.msra.mxu1 %v1022_v34  ;;  %v167_v5 = vld [vmem:[%s1613_s5 + $0xf0] sm:$0xff]  ;;  %v168_v6 = vld [vmem:[%s1613_s5 + $0xf8] sm:$0xff]  ;;  %v1068_v7 = vpack.c.bf16 %v150_v2, %v149_v1  ;;  %v1034_v8 = vpack.c.bf16 %v212_v3, %v211_v62  ;;  %v213_v10 = vld [vmem:[%s1614_s6 + $0x60] sm:$0xff] }
  0x11   :  { %1024 = vmatprep.subr.bf16.mxu1 %v1138_v0  ;;  %v1070_v9 = vpack.c.bf16 %v168_v6, %v167_v5  ;;  %v214_v11 = vld [vmem:[%s1614_s6 + $0x68] sm:$0xff]  ;;  %v151_v13 = vld [vmem:[%s1613_s5 + $0x70] sm:$0xff]  ;;  %v152_v14 = vld [vmem:[%s1613_s5 + $0x78] sm:$0xff] }
  0x12   :  { %1057 = vmatpush3.bf16.msra.mxu0 %v1056_v42  ;;  %v1037_v12 = vpack.c.bf16 %v214_v11, %v213_v10  ;;  %v1072_v15 = vpack.c.bf16 %v152_v14, %v151_v13  ;;  %v215_v16 = vld [vmem:[%s1614_s6 + $0x70] sm:$0xff]  ;;  %v216_v17 = vld [vmem:[%s1614_s6 + $0x78] sm:$0xff]  ;;  %v134_v19 = vld [vmem:[%s1616_s0 + $0x8] sm:$0xff] }
  0x13   :  { %1059 = vmatprep.subr.bf16.mxu0 %v1058_v45  ;;  %v1040_v18 = vpack.c.bf16 %v216_v17, %v215_v16  ;;  %351 = vmatprep.mubr.f32.mxu0 %v134_v19  ;;  %v133_v20 = vld [vmem:[%s1616_s0] sm:$0xff]  ;;  %v186_v22 = vld [vmem:[%s1613_s5 + $0x188] sm:$0xff]  ;;  %v187_v30 = vld [vmem:[%s1613_s5 + $0x190] sm:$0xff] }
  0x14   :  { %1026 = vmatpush3.bf16.msra.mxu1 %v1025_v43  ;;  %v185_v21 = vld [vmem:[%s1613_s5 + $0x180] sm:$0xff]  ;;  %v170_v27 = vld [vmem:[%s1613_s5 + $0x108] sm:$0xff]  ;;  %v188_v31 = vld [vmem:[%s1613_s5 + $0x198] sm:$0xff] }
  0x15   :  { %1027 = vmatprep.subr.bf16.mxu1 %v1138_v0  ;;  %v1074_v23 = vpack.c.bf16 %v186_v22, %v185_v21  ;;  %v808_v24 = vld [vmem:[%s1617_s4] ss:$0 sm:$0xff]  ;;  %v1078_v34 = vpack.c.bf16 %v188_v31, %v187_v30  ;;  %v171_v35 = vld [vmem:[%s1613_s5 + $0x110] sm:$0xff]  ;;  %v172_v36 = vld [vmem:[%s1613_s5 + $0x118] sm:$0xff] }
  0x16   :  { %1061 = vmatpush3.bf16.msra.mxu0 %v1060_v51  ;;  %v169_v26 = vld [vmem:[%s1613_s5 + $0x100] sm:$0xff]  ;;  %v136_v37 = vld [vmem:[%s1616_s0 + $0x18] sm:$0xff]  ;;  %v190_v40 = vld [vmem:[%s1613_s5 + $0x1a8] sm:$0xff]  ;;  %v1080_v41 = vpack.c.bf16 %v172_v36, %v171_v35 }
  0x17   :  { %1063 = vmatprep.subr.bf16.mxu0 %v1062_v54  ;;  %v1076_v33 = vpack.c.bf16 %v170_v27, %v169_v26  ;;  %v189_v39 = vld [vmem:[%s1613_s5 + $0x1a0] sm:$0xff]  ;;  %v174_v44 = vld [vmem:[%s1613_s5 + $0x128] sm:$0xff]  ;;  %v191_v45 = vld [vmem:[%s1613_s5 + $0x1b0] sm:$0xff] }
  0x18   :  { %1029 = vmatpush3.bf16.msra.mxu1 %v1028_v52  ;;  %v1082_v42 = vpack.c.bf16 %v190_v40, %v189_v39  ;;  %v173_v43 = vld [vmem:[%s1613_s5 + $0x120] sm:$0xff]  ;;  %v192_v46 = vld [vmem:[%s1613_s5 + $0x1b8] sm:$0xff]  ;;  %v175_v49 = vld [vmem:[%s1613_s5 + $0x130] sm:$0xff] }
  0x19   :  { %1030 = vmatprep.subr.bf16.mxu1 %v1138_v0  ;;  %v1084_v47 = vpack.c.bf16 %v174_v44, %v173_v43  ;;  %v1086_v48 = vpack.c.bf16 %v192_v46, %v191_v45  ;;  %v176_v50 = vld [vmem:[%s1613_s5 + $0x138] sm:$0xff]  ;;  %v193_v51 = vld [vmem:[%s1613_s5 + $0x1c0] sm:$0xff]  ;;  %v194_v52 = vld [vmem:[%s1613_s5 + $0x1c8] sm:$0xff] }
  0x1a   :  { %1065 = vmatpush3.bf16.msra.mxu0 %v1064_v60  ;;  %v1088_v53 = vpack.c.bf16 %v176_v50, %v175_v49  ;;  %v1090_v54 = vpack.c.bf16 %v194_v52, %v193_v51  ;;  %v177_v55 = vld [vmem:[%s1613_s5 + $0x140] sm:$0xff]  ;;  %v178_v56 = vld [vmem:[%s1613_s5 + $0x148] sm:$0xff]  ;;  %v195_v57 = vld [vmem:[%s1613_s5 + $0x1d0] sm:$0xff] }
  0x1b   :  { %1067 = vmatprep.subr.bf16.mxu0 %v1066_v63  ;;  %v196_v58 = vld [vmem:[%s1613_s5 + $0x1d8] sm:$0xff]  ;;  %v1092_v59 = vpack.c.bf16 %v178_v56, %v177_v55  ;;  %v197_v63 = vld [vmem:[%s1613_s5 + $0x1e0] sm:$0xff]  ;;  %v198_v1 = vld [vmem:[%s1613_s5 + $0x1e8] sm:$0xff] }
  0x1c   :  { %1032 = vmatpush3.bf16.msra.mxu1 %v1031_v61  ;;  %v1094_v60 = vpack.c.bf16 %v196_v58, %v195_v57  ;;  %v179_v61 = vld [vmem:[%s1613_s5 + $0x150] sm:$0xff]  ;;  %v180_v62 = vld [vmem:[%s1613_s5 + $0x158] sm:$0xff]  ;;  %v1098_v3 = vpack.c.bf16 %v198_v1, %v197_v63  ;;  %v181_v5 = vld [vmem:[%s1613_s5 + $0x160] sm:$0xff] }
  0x1d   :  { %1033 = vmatprep.subr.bf16.mxu1 %v1138_v0  ;;  %v1096_v2 = vpack.c.bf16 %v180_v62, %v179_v61  ;;  %v182_v6 = vld [vmem:[%s1613_s5 + $0x168] sm:$0xff]  ;;  %v183_v11 = vld [vmem:[%s1613_s5 + $0x170] sm:$0xff]  ;;  %v446_v30 = vld [vmem:[%s1620_s8] sm:$0xff]  ;;  %v453_v62 = vlaneseq }
  0x1e   :  { %1069 = vmatpush3.bf16.msra.mxu0 %v1068_v7  ;;  %v199_v7 = vld [vmem:[%s1613_s5 + $0x1f0] sm:$0xff]  ;;  %v449_v31 = vld [vmem:[%s1620_s8 + $0x18] sm:$0xff]  ;;  %v701_v39 = vld [vmem:[%s1622_s10] sm:$0xff] }
  0x1f   :  { %1071 = vmatprep.subr.bf16.mxu0 %v1070_v9  ;;  %v1100_v9 = vpack.c.bf16 %v182_v6, %v181_v5  ;;  %v135_v14 = vld [vmem:[%s1616_s0 + $0x10] sm:$0xff]  ;;  %v702_v40 = vld [vmem:[%s1622_s10 + $0x8] sm:$0xff]  ;;  %v704_v43 = vld [vmem:[%s1622_s10 + $0x18] sm:$0xff]  ;;  %v454_v63 = vshrl.u32 %v453_v62, 7 }
  0x20   :  { %1035 = vmatpush3.bf16.msra.mxu1 %v1034_v8  ;;  %v200_v8 = vld [vmem:[%s1613_s5 + $0x1f8] sm:$0xff]  ;;  %v705_v45 = vld [vmem:[%s1622_s10 + $0x20] sm:$0xff]  ;;  %v706_v46 = vld [vmem:[%s1622_s10 + $0x28] sm:$0xff] }
  0x21   :  { %1036 = vmatprep.subr.bf16.mxu1 %v1138_v0  ;;  %v1102_v10 = vpack.c.bf16 %v200_v8, %v199_v7  ;;  %v709_v50 = vld [vmem:[%s1622_s10 + $0x40] sm:$0xff]  ;;  %v710_v51 = vld [vmem:[%s1622_s10 + $0x48] sm:$0xff]  ;;  %v455_v1 = vsub.s32 0, %v454_v63  ;;  %v467_v7 = vsub.s32 3, %v454_v63 }
  0x22   :  { %1073 = vmatpush3.bf16.msra.mxu0 %v1072_v15  ;;  %v1119_v52 = vpack.c.bf16 %v710_v51, %v709_v50  ;;  %v713_v56 = vld [vmem:[%s1622_s10 + $0x60] sm:$0xff]  ;;  %v714_v57 = vld [vmem:[%s1622_s10 + $0x68] sm:$0xff] }
  0x23   :  { %v1125_v58 = vpack.c.bf16 %v714_v57, %v713_v56 }
  0x24   :  { %1038 = vmatpush3.bf16.msra.mxu1 %v1037_v12  ;;  %v184_v12 = vld [vmem:[%s1613_s5 + $0x178] sm:$0xff] }
  0x25   :  { %1039 = vmatprep.subr.bf16.mxu1 %v1138_v0  ;;  %352 = vmatmul.mubr.f32.vlgmr.msra.gmra.mrb[0].mxu0 %v133_v20  ;;  %v1104_v13 = vpack.c.bf16 %v184_v12, %v183_v11  ;;  %v471_v12 = vsub.s32 4, %v454_v63 }
  0x26   :  { %546 = vmatprep.mubr.f32.mxu0 %v1140_v4 }
  0x28   :  { %1041 = vmatpush3.bf16.msra.mxu1 %v1040_v18 }
  0x29   :  { %1075 = vmatprep.subr.bf16.mxu1 %v1074_v23 }
  0xde   :  { %v126_v25 = vpop.f32.mrb[0].mxu1 }
  0xdf   :  { %v127_v28 = vadd.f32 %v808_v24, %v126_v25  ;;  %v936_v29 = vpop.f32.mrb[1].mxu1  ;;  %v810_v24 = vld [vmem:[%s1618_s7] ss:$0 sm:$0xff] }
  0xe0   :  { %v447_v29 = vld [vmem:[%s1620_s8 + $0x8] sm:$0xff] }
  0xe1   :  { %vm130_vm2 = vcmp.ge.f32.partialorder %v127_v28, 0.0  ;;  %v131_v32 = vmul.f32 0.01, %v127_v28  ;;  %482 = vmatprep.subr.mxu0 %v447_v29 }
  0xe2   :  { %483 = vmatpush1.msra.mxu0 %v446_v30 }
  0xe3   :  { %v132_v38 = vsel %vm130_vm2, %v127_v28, %v131_v32  ;;  %553 = vmatprep.subr.mxu0 %v449_v31 }
  0xe4   :  { %970 = vmatmul.mubr.f32.vlgmr.msra.gmra.mrb[2].mxu1 %v132_v38  ;;  %v450_v38 = vld [vmem:[%s1620_s8 + $0x20] sm:$0xff] }
  0xe5   :  { %1077 = vmatpush3.bf16.msra.mxu1 %v1076_v33  ;;  %421 = vmatprep.mubr.f32.mxu1 %v136_v37  ;;  %v436_v33 = vld [vmem:[%s1621_s2] sm:$0xff]  ;;  %v448_v37 = vld [vmem:[%s1620_s8 + $0x10] sm:$0xff] }
  0xe6   :  { %1079 = vmatprep.subr.bf16.mxu1 %v1078_v34 }
  0xe9   :  { %1081 = vmatpush3.bf16.msra.mxu1 %v1080_v41  ;;  %v1107_v41 = vpack.c.bf16 %v702_v40, %v701_v39 }
  0xea   :  { %1083 = vmatprep.subr.bf16.mxu1 %v1082_v42  ;;  %v703_v42 = vld [vmem:[%s1622_s10 + $0x10] sm:$0xff] }
  0xeb   :  { %v1110_v44 = vpack.c.bf16 %v704_v43, %v703_v42 }
  0xed   :  { %1085 = vmatpush3.bf16.msra.mxu1 %v1084_v47  ;;  %v1113_v47 = vpack.c.bf16 %v706_v46, %v705_v45 }
  0xee   :  { %1087 = vmatprep.subr.bf16.mxu1 %v1086_v48  ;;  %v707_v48 = vld [vmem:[%s1622_s10 + $0x30] sm:$0xff] }
  0xf1   :  { %1089 = vmatpush3.bf16.msra.mxu1 %v1088_v53  ;;  %v711_v53 = vld [vmem:[%s1622_s10 + $0x50] sm:$0xff] }
  0xf2   :  { %1091 = vmatprep.subr.bf16.mxu1 %v1090_v54  ;;  %v712_v54 = vld [vmem:[%s1622_s10 + $0x58] sm:$0xff] }
  0xf3   :  { %v1122_v55 = vpack.c.bf16 %v712_v54, %v711_v53 }
  0xf5   :  { %1093 = vmatpush3.bf16.msra.mxu1 %v1092_v59  ;;  %v715_v59 = vld [vmem:[%s1622_s10 + $0x70] sm:$0xff] }
  0xf6   :  { %1095 = vmatprep.subr.bf16.mxu1 %v1094_v60  ;;  %v716_v60 = vld [vmem:[%s1622_s10 + $0x78] sm:$0xff] }
  0xf7   :  { %v1128_v61 = vpack.c.bf16 %v716_v60, %v715_v59 }
  0xf8   :  { %v869_v15 = vpop.f32.mrb[0].mxu0 }
  0xf9   :  { %1097 = vmatpush3.bf16.msra.mxu1 %v1096_v2  ;;  %v870_v16 = vpop.f32.mrb[1].mxu0  ;;  %v451_v2 = vld [vmem:[%s1623_s9] sm:$0x1f] }
  0xfa   :  { %1099 = vmatprep.subr.bf16.mxu1 %v1098_v3  ;;  %v871_v17 = vadd.f32 %v870_v16, %v869_v15  ;;  %v459_v3 = vsub.s32 1, %v454_v63  ;;  %v456_v5 = vrot.slane %v451_v2, %v455_v1 }
  0xfc   :  { %v460_v6 = vrot.slane %v451_v2, %v459_v3 }
  0xfd   :  { %1101 = vmatpush3.bf16.msra.mxu1 %v1100_v9 }
  0xfe   :  { %1103 = vmatprep.subr.bf16.mxu1 %v1102_v10 }
 0x101   :  { %1105 = vmatpush3.bf16.msra.mxu1 %v1104_v13 }
 0x104   :  { %422 = vmatmul.mubr.f32.vlgmr.msra.gmra.mrb[4].mxu1 %v135_v14  ;;  %v468_v14 = vrot.slane %v451_v2, %v467_v7 }
 0x1b7   :  { %v283_v18 = vpop.f32.mrb[2].mxu1 }
 0x1b8   :  { %v354_v19 = vadd.f32 %v871_v17, %v283_v18  ;;  %v971_v20 = vpop.f32.mrb[3].mxu1  ;;  %v472_v18 = vrot.slane %v451_v2, %v471_v12 }
 0x1d7   :  { %v904_v21 = vpop.f32.mrb[4].mxu1 }
 0x1d8   :  { %v905_v22 = vpop.f32.mrb[5].mxu1 }
 0x1d9   :  { %v906_v23 = vadd.f32 %v905_v22, %v904_v21 }
 0x1db   :  { %v424_v25 = vadd.f32 %v906_v23, %v354_v19 }
 0x1dd   :  { %v434_v26 = vadd.f32 %v810_v24, %v424_v25  ;;  %v814_v25 = vld [vmem:[%s1625_s11] ss:$0 sm:$0xff] }
 0x1df   :  { %435 = vst [vmem:[%s1619_s12] sm:$0xff] %v434_v26  ;;  %v437_v27 = vmul.f32 0.5, %v434_v26  ;;  %s1141_s12 = smov 120  }
 0x1e1   :  { %v438_v28 = vmul.f32 1.442695, %v437_v27 }
 0x1e3   :  { %1134 = vpow2.f32 %v438_v28 }
 0x1ed   :  { %v1135_v32 = vpop.eup %1134 }
 0x1ee   :  { %441 = vrot.lane.b32.xlu0 %v1135_v32, %s1141_s12 }
 0x260   :  { %v442_v34 = vpop.permute.xlu0 %441 }
 0x261   :  { %v444_v35 = vmul.f32 %v442_v34, %v436_v33 }
 0x263   :  { %v445_v36 = vadd.f32 %v444_v35, %v434_v26 }
 0x265   :  { %811 = vmatmul.mubr.msk.f32.vlgmr.msra.gmra.mrb[2].mxu0 %vm478_vm3, %v445_v36 }
 0x266   :  { %554 = vmatpush1.msra.mxu0 %v448_v37  ;;  %617 = vmatprep.mubr.f32.mxu0 %v1140_v4 }
 0x267   :  { %972 = vmatprep.subr.mxu0 %v1140_v4 }
 0x269   :  { %812 = vmatmul.mubr.msk.f32.vlgmr.msra.gmra.mrb[4].mxu0 %vm478_vm3, %v445_v36 }
 0x26a   :  { %973 = vmatpush3.msra.mxu0 %v450_v38  ;;  %974 = vmatprep.mubr.msk.f32.mxu0 %vm1139_vm0, %v1140_v4 }
 0x26b   :  { %1106 = vmatprep.subr.bf16.mxu0 %v1138_v0 }
 0x26d   :  { %975 = vmatmul.mubr.msk.f32.vlgmr.msra.gmra.mrb[6].mxu0 %vm478_vm3, %v445_v36 }
 0x26e   :  { %1108 = vmatpush3.bf16.msra.mxu0 %v1107_v41  ;;  %1009 = vmatprep.mubr.msk.f32.mxu0 %vm1139_vm0, %v1140_v4  ;;  %v708_v4 = vld [vmem:[%s1622_s10 + $0x38] sm:$0xff] }
 0x26f   :  { %1109 = vmatprep.subr.bf16.mxu0 %v1138_v0  ;;  %v1116_v49 = vpack.c.bf16 %v708_v4, %v707_v48 }
 0x272   :  { %1111 = vmatpush3.bf16.msra.mxu0 %v1110_v44 }
 0x273   :  { %1112 = vmatprep.subr.bf16.mxu0 %v1138_v0 }
 0x276   :  { %1114 = vmatpush3.bf16.msra.mxu0 %v1113_v47 }
 0x277   :  { %1115 = vmatprep.subr.bf16.mxu0 %v1138_v0 }
 0x27a   :  { %1117 = vmatpush3.bf16.msra.mxu0 %v1116_v49 }
 0x27b   :  { %1118 = vmatprep.subr.bf16.mxu0 %v1138_v0 }
 0x27e   :  { %1120 = vmatpush3.bf16.msra.mxu0 %v1119_v52 }
 0x27f   :  { %1121 = vmatprep.subr.bf16.mxu0 %v1138_v0 }
 0x282   :  { %1123 = vmatpush3.bf16.msra.mxu0 %v1122_v55 }
 0x283   :  { %1124 = vmatprep.subr.bf16.mxu0 %v1138_v0 }
 0x286   :  { %1126 = vmatpush3.bf16.msra.mxu0 %v1125_v58 }
 0x287   :  { %1127 = vmatprep.subr.bf16.mxu0 %v1138_v0  ;;  %v463_v0 = vsub.s32 2, %v454_v63 }
 0x289   :  { %v464_v11 = vrot.slane %v451_v2, %v463_v0 }
 0x28a   :  { %1129 = vmatpush3.bf16.msra.mxu0 %v1128_v61 }
 0x338   :  { %v548_v8 = vpop.f32.mrb[2].mxu0 }
 0x339   :  { %v549_v9 = vadd.f32 %v548_v8, %v456_v5  ;;  %v550_v10 = vpop.f32.mrb[3].mxu0 }
 0x33a   :  { %v551_v13 = vadd.f32 %v550_v10, %v460_v6 }
 0x33b   :  { %694 = vst [vmem:[%s1624_s13] sm:$0xff] %v549_v9 }
 0x33c   :  { %695 = vst [vmem:[%s1624_s13 + $0x8] sm:$0xff] %v551_v13  ;;  %v619_v15 = vpop.f32.mrb[4].mxu0 }
 0x33d   :  { %v620_v16 = vadd.f32 %v619_v15, %v464_v11  ;;  %v621_v17 = vpop.f32.mrb[5].mxu0 }
 0x33e   :  { %v622_v19 = vadd.f32 %v621_v17, %v468_v14 }
 0x33f   :  { %696 = vst [vmem:[%s1624_s13 + $0x10] sm:$0xff] %v620_v16 }
 0x340   :  { %697 = vst [vmem:[%s1624_s13 + $0x18] sm:$0xff] %v622_v19  ;;  %v690_v20 = vpop.f32.mrb[6].mxu0 }
 0x341   :  { %v691_v21 = vadd.f32 %v690_v20, %v472_v18  ;;  %v976_v22 = vpop.f32.mrb[7].mxu0 }
 0x343   :  { %vm698_vm4 = vcmp.ge.f32.partialorder %v691_v21, 0.0  ;;  %v699_v23 = vmul.f32 0.01, %v691_v21 }
 0x345   :  { %v700_v24 = vsel %vm698_vm4, %v691_v21, %v699_v23 }
 0x346   :  { %1010 = vmatmul.mubr.f32.vlgmr.msra.gmra.mrb[8].mxu0 %v700_v24 }
 0x419   :  { %v790_v26 = vpop.f32.mrb[8].mxu0 }
 0x41a   :  { %v791_v27 = vadd.f32 %v814_v25, %v790_v26  ;;  %v1011_v28 = vpop.f32.mrb[9].mxu0 }
 0x41c   :  { %1136 = vtanh.f32 %v791_v27 }
 0x426   :  { %v1137_v29 = vpop.eup %1136 }
 0x427   :  { %795 = vst [vmem:[%s1626_s14] sm:$0xff] %v1137_v29 }

// kernel: forward.6
= control target key start
LH: loop header
LB: loop body
LE: loop exit
PB: predicated region body
PF: predicated region fallthrough
CT: control target
= control target key end

     0   :  { %s3550_s12 = smov 0   ;;  %s4068_s0 = inlined_call_operand.vmem [shape: bf16[2048,32], index: 0, kind: input, shape index: {}]   ;;  %s4069_s1 = inlined_call_operand.vmem [shape: bf16[32,128], index: 1, kind: input, shape index: {}]   ;;  %s4070_s2 = inlined_call_operand.vmem [shape: f32[1,128], index: 2, kind: input, shape index: {}]   ;;  %s4071_s3 = inlined_call_operand.vmem [shape: bf16[2048,128], index: 3, kind: output, shape index: {}]  }
   0x1 LB: > { %s2464_s13 = sadd.s32 4294967295, %s3528_s12   ;;  %p2468_p0 = scmp.ge.s32.totalorder %s3528_s12, 1  ;;  %s3528_s12 = sphi %s3550_s12, %s13_s12  }
   0x2   : > { %p138_p1 = scmp.lt.s32.totalorder %s3528_s12, 3 }
   0x4   : > { %p139_p2 = pnand %p2468_p0, %p138_p1 }
   0x5   : > { %v3455_v0 = vld [vmem:[%s4069_s1] sm:$0xff] (!%p139_p2)   ;;  %s2469_s16 = sshll.u32 (!%p139_p2), %s2464_s13, 7  ;;  %v3456_v1 = vld [vmem:[%s4069_s1 + $0x8] sm:$0xff] (!%p139_p2)   ;;  %vm646_vm0 = vcmask (!%p139_p2), 261120  }
   0x6   : > { %142 = sbr.rel (%p139_p2) target bundleno = 379 (0x17b), region = 32  ;;  %p163_p3 = scmp.lt.s32.totalorder (!%p139_p2), %s2469_s16, 255  ;;  %3311 = vmatprep.subr.bf16.mxu0 (!%p139_p2), %v3455_v0  ;;  %3443 = vmatprep.subr.bf16.mxu1 (!%p139_p2), %v3455_v0 }
   0x7   : > { %3312 = vmatpush3.bf16.msra.mxu0 (!%p139_p2), %v3455_v0  ;;  %3445 = vmatpush3.bf16.msra.mxu1 (!%p139_p2), %v3455_v0 }
   0x8   : > { %3313 = vmatprep.subr.bf16.mxu0 (!%p139_p2), %v3456_v1  ;;  %3444 = vmatprep.subr.bf16.mxu1 (!%p139_p2), %v3456_v1 }
   0xb   : > { %3314 = vmatpush3.bf16.msra.mxu0 (!%p139_p2), %v3456_v1  ;;  %3446 = vmatpush3.bf16.msra.mxu1 (!%p139_p2), %v3456_v1 }
   0xd   : > { %s4073_s16 = smov (!%p163_p3, %s2469_s16), 255 }
   0xe   : > { %s2470_s19 = sshll.u32 %s4073_s16, 2 }
   0xf   : > { %s3572_s22 = scalar_lea.vmem %s4068_s0, %s2470_s19  ;;  %s3720_s27 = scalar_lea.vmem %s4071_s3, %s2470_s19 }
  0x10   : > { %v3457_v2 = vld [vmem:[%s3572_s22] sm:$0xff]   ;;  %v3459_v4 = vld [vmem:[%s3572_s22 + $0x8] sm:$0xff]   ;;  %v3461_v6 = vld [vmem:[%s3572_s22 + $0x10] sm:$0xff]  }
  0x11   : > { %v3458_v3 = vld [vmem:[%s3572_s22 + $0x100] sm:$0xff]   ;;  %3315 = vmatprep.mubr.msk.bf16.mxu0 %vm646_vm0, %v3457_v2  ;;  %v3460_v5 = vld [vmem:[%s3572_s22 + $0x108] sm:$0xff]   ;;  %v3462_v7 = vld [vmem:[%s3572_s22 + $0x110] sm:$0xff]  }
  0x12   : > { %3379 = vmatprep.mubr.msk.bf16.mxu1 %vm646_vm0, %v3458_v3  ;;  %3316 = vmatmul.mubr.msk.bf16.vlgmr.msra.gmra.mrb[0].mxu0 %vm646_vm0, %v3459_v4  ;;  %v3463_v8 = vld [vmem:[%s3572_s22 + $0x18] sm:$0xff]   ;;  %v3465_v10 = vld [vmem:[%s3572_s22 + $0x20] sm:$0xff]   ;;  %v3467_v12 = vld [vmem:[%s3572_s22 + $0x28] sm:$0xff]  }
  0x13   : > { %3380 = vmatmul.mubr.msk.bf16.vlgmr.msra.gmra.mrb[0].mxu1 %vm646_vm0, %v3460_v5  ;;  %3319 = vmatprep.mubr.msk.bf16.mxu0 %vm646_vm0, %v3461_v6  ;;  %v3464_v9 = vld [vmem:[%s3572_s22 + $0x118] sm:$0xff]   ;;  %v3466_v11 = vld [vmem:[%s3572_s22 + $0x120] sm:$0xff]   ;;  %v3468_v13 = vld [vmem:[%s3572_s22 + $0x128] sm:$0xff]  }
  0x14   : > { %3383 = vmatprep.mubr.msk.bf16.mxu1 %vm646_vm0, %v3462_v7  ;;  %v3469_v14 = vld [vmem:[%s3572_s22 + $0x30] sm:$0xff]   ;;  %v3471_v16 = vld [vmem:[%s3572_s22 + $0x38] sm:$0xff]   ;;  %v3473_v18 = vld [vmem:[%s3572_s22 + $0x40] sm:$0xff]  }
  0x15   : > { %v3470_v15 = vld [vmem:[%s3572_s22 + $0x130] sm:$0xff]   ;;  %v3472_v17 = vld [vmem:[%s3572_s22 + $0x138] sm:$0xff]   ;;  %v3474_v19 = vld [vmem:[%s3572_s22 + $0x140] sm:$0xff]  }
  0x16   : > { %v3475_v20 = vld [vmem:[%s3572_s22 + $0x48] sm:$0xff]   ;;  %v3477_v22 = vld [vmem:[%s3572_s22 + $0x50] sm:$0xff]   ;;  %v3479_v24 = vld [vmem:[%s3572_s22 + $0x58] sm:$0xff]  }
  0x17   : > { %v3476_v21 = vld [vmem:[%s3572_s22 + $0x148] sm:$0xff]   ;;  %v3478_v23 = vld [vmem:[%s3572_s22 + $0x150] sm:$0xff]   ;;  %v3480_v25 = vld [vmem:[%s3572_s22 + $0x158] sm:$0xff]  }
  0x18   : > { %v3481_v26 = vld [vmem:[%s3572_s22 + $0x60] sm:$0xff]   ;;  %v3483_v28 = vld [vmem:[%s3572_s22 + $0x68] sm:$0xff]   ;;  %v3485_v30 = vld [vmem:[%s3572_s22 + $0x70] sm:$0xff]  }
  0x19   : > { %v3482_v27 = vld [vmem:[%s3572_s22 + $0x160] sm:$0xff]   ;;  %v3484_v29 = vld [vmem:[%s3572_s22 + $0x168] sm:$0xff]   ;;  %v3486_v31 = vld [vmem:[%s3572_s22 + $0x170] sm:$0xff]  }
  0x1a   : > { %3320 = vmatmul.mubr.msk.bf16.gmra.mrb[4].mxu0 %vm646_vm0, %v3463_v8  ;;  %v3487_v32 = vld [vmem:[%s3572_s22 + $0x78] sm:$0xff]   ;;  %v3489_v34 = vld [vmem:[%s3572_s22 + $0x80] sm:$0xff]   ;;  %v3491_v36 = vld [vmem:[%s3572_s22 + $0x88] sm:$0xff]  }
  0x1b   : > { %3384 = vmatmul.mubr.msk.bf16.gmra.mrb[4].mxu1 %vm646_vm0, %v3464_v9  ;;  %3323 = vmatprep.mubr.msk.bf16.mxu0 %vm646_vm0, %v3465_v10  ;;  %v3488_v33 = vld [vmem:[%s3572_s22 + $0x178] sm:$0xff]   ;;  %v3490_v35 = vld [vmem:[%s3572_s22 + $0x180] sm:$0xff]   ;;  %v3492_v37 = vld [vmem:[%s3572_s22 + $0x188] sm:$0xff]  }
  0x1c   : > { %3387 = vmatprep.mubr.msk.bf16.mxu1 %vm646_vm0, %v3466_v11  ;;  %v3493_v38 = vld [vmem:[%s3572_s22 + $0x90] sm:$0xff]   ;;  %v3495_v40 = vld [vmem:[%s3572_s22 + $0x98] sm:$0xff]   ;;  %v3497_v42 = vld [vmem:[%s3572_s22 + $0xa0] sm:$0xff]  }
  0x1d   : > { %v3494_v39 = vld [vmem:[%s3572_s22 + $0x190] sm:$0xff]   ;;  %v3496_v41 = vld [vmem:[%s3572_s22 + $0x198] sm:$0xff]   ;;  %v3498_v43 = vld [vmem:[%s3572_s22 + $0x1a0] sm:$0xff]  }
  0x1e   : > { %v3499_v44 = vld [vmem:[%s3572_s22 + $0xa8] sm:$0xff]   ;;  %v3501_v46 = vld [vmem:[%s3572_s22 + $0xb0] sm:$0xff]   ;;  %v3503_v48 = vld [vmem:[%s3572_s22 + $0xb8] sm:$0xff]  }
  0x1f   : > { %v3500_v45 = vld [vmem:[%s3572_s22 + $0x1a8] sm:$0xff]   ;;  %v3502_v47 = vld [vmem:[%s3572_s22 + $0x1b0] sm:$0xff]   ;;  %v3504_v49 = vld [vmem:[%s3572_s22 + $0x1b8] sm:$0xff]  }
  0x20   : > { %v3505_v50 = vld [vmem:[%s3572_s22 + $0xc0] sm:$0xff]   ;;  %v3507_v52 = vld [vmem:[%s3572_s22 + $0xc8] sm:$0xff]   ;;  %v3509_v54 = vld [vmem:[%s3572_s22 + $0xd0] sm:$0xff]  }
  0x21   : > { %v3506_v51 = vld [vmem:[%s3572_s22 + $0x1c0] sm:$0xff]   ;;  %v3508_v53 = vld [vmem:[%s3572_s22 + $0x1c8] sm:$0xff]   ;;  %v3510_v55 = vld [vmem:[%s3572_s22 + $0x1d0] sm:$0xff]  }
  0x22   : > { %3324 = vmatmul.mubr.msk.bf16.gmra.mrb[8].mxu0 %vm646_vm0, %v3467_v12  ;;  %v3511_v56 = vld [vmem:[%s3572_s22 + $0xd8] sm:$0xff]   ;;  %v3513_v58 = vld [vmem:[%s3572_s22 + $0xe0] sm:$0xff]   ;;  %v3515_v60 = vld [vmem:[%s3572_s22 + $0xe8] sm:$0xff]  }
  0x23   : > { %3388 = vmatmul.mubr.msk.bf16.gmra.mrb[8].mxu1 %vm646_vm0, %v3468_v13  ;;  %3327 = vmatprep.mubr.msk.bf16.mxu0 %vm646_vm0, %v3469_v14  ;;  %v3512_v57 = vld [vmem:[%s3572_s22 + $0x1d8] sm:$0xff]   ;;  %v3514_v59 = vld [vmem:[%s3572_s22 + $0x1e0] sm:$0xff]   ;;  %v3516_v61 = vld [vmem:[%s3572_s22 + $0x1e8] sm:$0xff]  }
  0x24   : > { %3391 = vmatprep.mubr.msk.bf16.mxu1 %vm646_vm0, %v3470_v15  ;;  %v3517_v62 = vld [vmem:[%s3572_s22 + $0xf0] sm:$0xff]   ;;  %v3519_v0 = vld [vmem:[%s3572_s22 + $0xf8] sm:$0xff]   ;;  %v3705_v2 = vld [vmem:[%s4070_s2] ss:$0 sm:$0xff] }
  0x25   : > { %v3518_v63 = vld [vmem:[%s3572_s22 + $0x1f0] sm:$0xff]   ;;  %v3520_v1 = vld [vmem:[%s3572_s22 + $0x1f8] sm:$0xff]  }
  0x2a   : > { %3328 = vmatmul.mubr.msk.bf16.gmra.mrb[12].mxu0 %vm646_vm0, %v3471_v16 }
  0x2b   : > { %3392 = vmatmul.mubr.msk.bf16.gmra.mrb[12].mxu1 %vm646_vm0, %v3472_v17  ;;  %3331 = vmatprep.mubr.msk.bf16.mxu0 %vm646_vm0, %v3473_v18 }
  0x2c   : > { %3395 = vmatprep.mubr.msk.bf16.mxu1 %vm646_vm0, %v3474_v19 }
  0x32   : > { %3332 = vmatmul.mubr.msk.bf16.gmra.mrb[16].mxu0 %vm646_vm0, %v3475_v20 }
  0x33   : > { %3396 = vmatmul.mubr.msk.bf16.gmra.mrb[16].mxu1 %vm646_vm0, %v3476_v21  ;;  %3335 = vmatprep.mubr.msk.bf16.mxu0 %vm646_vm0, %v3477_v22 }
  0x34   : > { %3399 = vmatprep.mubr.msk.bf16.mxu1 %vm646_vm0, %v3478_v23 }
  0x3a   : > { %3336 = vmatmul.mubr.msk.bf16.gmra.mrb[20].mxu0 %vm646_vm0, %v3479_v24 }
  0x3b   : > { %3400 = vmatmul.mubr.msk.bf16.gmra.mrb[20].mxu1 %vm646_vm0, %v3480_v25  ;;  %3339 = vmatprep.mubr.msk.bf16.mxu0 %vm646_vm0, %v3481_v26 }
  0x3c   : > { %3403 = vmatprep.mubr.msk.bf16.mxu1 %vm646_vm0, %v3482_v27 }
  0x42   : > { %3340 = vmatmul.mubr.msk.bf16.gmra.mrb[24].mxu0 %vm646_vm0, %v3483_v28 }
  0x43   : > { %3404 = vmatmul.mubr.msk.bf16.gmra.mrb[24].mxu1 %vm646_vm0, %v3484_v29  ;;  %3343 = vmatprep.mubr.msk.bf16.mxu0 %vm646_vm0, %v3485_v30 }
  0x44   : > { %3407 = vmatprep.mubr.msk.bf16.mxu1 %vm646_vm0, %v3486_v31 }
  0x4a   : > { %3344 = vmatmul.mubr.msk.bf16.gmra.mrb[28].mxu0 %vm646_vm0, %v3487_v32 }
  0x4b   : > { %3408 = vmatmul.mubr.msk.bf16.gmra.mrb[28].mxu1 %vm646_vm0, %v3488_v33  ;;  %3347 = vmatprep.mubr.msk.bf16.mxu0 %vm646_vm0, %v3489_v34 }
  0x4c   : > { %3411 = vmatprep.mubr.msk.bf16.mxu1 %vm646_vm0, %v3490_v35 }
  0x52   : > { %3348 = vmatmul.mubr.msk.bf16.gmra.mrb[32].mxu0 %vm646_vm0, %v3491_v36 }
  0x53   : > { %3412 = vmatmul.mubr.msk.bf16.gmra.mrb[32].mxu1 %vm646_vm0, %v3492_v37  ;;  %3351 = vmatprep.mubr.msk.bf16.mxu0 %vm646_vm0, %v3493_v38 }
  0x54   : > { %3415 = vmatprep.mubr.msk.bf16.mxu1 %vm646_vm0, %v3494_v39 }
  0x5a   : > { %3352 = vmatmul.mubr.msk.bf16.gmra.mrb[36].mxu0 %vm646_vm0, %v3495_v40 }
  0x5b   : > { %3416 = vmatmul.mubr.msk.bf16.gmra.mrb[36].mxu1 %vm646_vm0, %v3496_v41  ;;  %3355 = vmatprep.mubr.msk.bf16.mxu0 %vm646_vm0, %v3497_v42 }
  0x5c   : > { %3419 = vmatprep.mubr.msk.bf16.mxu1 %vm646_vm0, %v3498_v43 }
  0x62   : > { %3356 = vmatmul.mubr.msk.bf16.gmra.mrb[40].mxu0 %vm646_vm0, %v3499_v44 }
  0x63   : > { %3420 = vmatmul.mubr.msk.bf16.gmra.mrb[40].mxu1 %vm646_vm0, %v3500_v45  ;;  %3359 = vmatprep.mubr.msk.bf16.mxu0 %vm646_vm0, %v3501_v46 }
  0x64   : > { %3423 = vmatprep.mubr.msk.bf16.mxu1 %vm646_vm0, %v3502_v47 }
  0x6a   : > { %3360 = vmatmul.mubr.msk.bf16.gmra.mrb[44].mxu0 %vm646_vm0, %v3503_v48 }
  0x6b   : > { %3424 = vmatmul.mubr.msk.bf16.gmra.mrb[44].mxu1 %vm646_vm0, %v3504_v49  ;;  %3363 = vmatprep.mubr.msk.bf16.mxu0 %vm646_vm0, %v3505_v50 }
  0x6c   : > { %3427 = vmatprep.mubr.msk.bf16.mxu1 %vm646_vm0, %v3506_v51 }
  0x72   : > { %3364 = vmatmul.mubr.msk.bf16.gmra.mrb[48].mxu0 %vm646_vm0, %v3507_v52 }
  0x73   : > { %3428 = vmatmul.mubr.msk.bf16.gmra.mrb[48].mxu1 %vm646_vm0, %v3508_v53  ;;  %3367 = vmatprep.mubr.msk.bf16.mxu0 %vm646_vm0, %v3509_v54 }
  0x74   : > { %3431 = vmatprep.mubr.msk.bf16.mxu1 %vm646_vm0, %v3510_v55 }
  0x7a   : > { %3368 = vmatmul.mubr.msk.bf16.gmra.mrb[52].mxu0 %vm646_vm0, %v3511_v56 }
  0x7b   : > { %3432 = vmatmul.mubr.msk.bf16.gmra.mrb[52].mxu1 %vm646_vm0, %v3512_v57  ;;  %3371 = vmatprep.mubr.msk.bf16.mxu0 %vm646_vm0, %v3513_v58 }
  0x7c   : > { %3435 = vmatprep.mubr.msk.bf16.mxu1 %vm646_vm0, %v3514_v59 }
  0x82   : > { %3372 = vmatmul.mubr.msk.bf16.gmra.mrb[56].mxu0 %vm646_vm0, %v3515_v60 }
  0x83   : > { %3436 = vmatmul.mubr.msk.bf16.gmra.mrb[56].mxu1 %vm646_vm0, %v3516_v61  ;;  %3375 = vmatprep.mubr.msk.bf16.mxu0 %vm646_vm0, %v3517_v62 }
  0x84   : > { %3439 = vmatprep.mubr.msk.bf16.mxu1 %vm646_vm0, %v3518_v63 }
  0x8a   : > { %3376 = vmatmul.mubr.msk.bf16.gmra.mrb[60].mxu0 %vm646_vm0, %v3519_v0 }
  0x8b   : > { %3440 = vmatmul.mubr.msk.bf16.gmra.mrb[60].mxu1 %vm646_vm0, %v3520_v1 }
  0xe5   : > { %v3317_v3 = vpop.f32.mrb[0].mxu0 }
  0xe6   : > { %v882_v4 = vadd.f32 %v3317_v3, %v3705_v2  ;;  %v3381_v5 = vpop.f32.mrb[0].mxu1  ;;  %v873_v6 = vpop.f32.mrb[1].mxu0 }
  0xe7   : > { %v1138_v7 = vadd.f32 %v3381_v5, %v3705_v2  ;;  %v874_v8 = vadd.f32 %v3705_v2, %v873_v6  ;;  %v1129_v9 = vpop.f32.mrb[1].mxu1  ;;  %v3318_v10 = vpop.f32.mrb[2].mxu0 }
  0xe8   : > { %vm1386_vm1 = vcmp.ge.f32.partialorder %v882_v4, 0.0  ;;  %v1514_v11 = vmul.f32 0.01, %v882_v4  ;;  %v1130_v12 = vadd.f32 %v3705_v2, %v1129_v9  ;;  %v885_v13 = vadd.f32 %v3318_v10, %v3705_v2  ;;  %v3382_v14 = vpop.f32.mrb[2].mxu1  ;;  %v876_v15 = vpop.f32.mrb[3].mxu0 }
  0xe9   : > { %vm1450_vm2 = vcmp.ge.f32.partialorder %v1138_v7, 0.0  ;;  %v1578_v16 = vmul.f32 0.01, %v1138_v7  ;;  %vm1384_vm3 = vcmp.ge.f32.partialorder %v874_v8, 0.0  ;;  %v1512_v17 = vmul.f32 0.01, %v874_v8 }
  0xea   : > { %vm1448_vm4 = vcmp.ge.f32.partialorder %v1130_v12, 0.0  ;;  %v1576_v18 = vmul.f32 0.01, %v1130_v12  ;;  %vm1387_vm5 = vcmp.ge.f32.partialorder %v885_v13, 0.0  ;;  %v1132_v19 = vpop.f32.mrb[3].mxu1  ;;  %v1642_v20 = vsel %vm1386_vm1, %v882_v4, %v1514_v11 }
  0xeb   : > { %v1515_v21 = vmul.f32 0.01, %v885_v13  ;;  %v1141_v22 = vadd.f32 %v3382_v14, %v3705_v2  ;;  %v1706_v23 = vsel %vm1450_vm2, %v1138_v7, %v1578_v16  ;;  %v1640_v24 = vsel %vm1384_vm3, %v874_v8, %v1512_v17 }
  0xec   : > { %v877_v25 = vadd.f32 %v3705_v2, %v876_v15  ;;  %v1133_v26 = vadd.f32 %v3705_v2, %v1132_v19  ;;  %v1704_v27 = vsel %vm1448_vm4, %v1130_v12, %v1576_v18 }
  0xed   : > { %v1643_v28 = vsel %vm1387_vm5, %v885_v13, %v1515_v21  ;;  %vm1451_vm6 = vcmp.ge.f32.partialorder %v1141_v22, 0.0  ;;  %v1579_v29 = vmul.f32 0.01, %v1141_v22  ;;  %v3321_v30 = vpop.f32.mrb[4].mxu0 }
  0xee   : > { %v2870_v31 = vpack.c.bf16 %v1643_v28, %v1642_v20  ;;  %vm1385_vm7 = vcmp.ge.f32.partialorder %v877_v25, 0.0  ;;  %v1513_v32 = vmul.f32 0.01, %v877_v25  ;;  %vm1449_vm8 = vcmp.ge.f32.partialorder %v1133_v26, 0.0  ;;  %v3385_v33 = vpop.f32.mrb[4].mxu1  ;;  %v889_v34 = vpop.f32.mrb[5].mxu0 }
  0xef   : > { %v1707_v35 = vsel %vm1451_vm6, %v1141_v22, %v1579_v29  ;;  %v1577_v36 = vmul.f32 0.01, %v1133_v26  ;;  %v898_v37 = vadd.f32 %v3321_v30, %v3705_v2  ;;  %v1154_v38 = vadd.f32 %v3385_v33, %v3705_v2  ;;  %v1145_v39 = vpop.f32.mrb[5].mxu1  ;;  %v3322_v40 = vpop.f32.mrb[6].mxu0 }
  0xf0   : > { %3182 = vst [vmem:[%s3720_s27 + $0x8] sm:$0xff] %v2870_v31   ;;  %v3030_v41 = vpack.c.bf16 %v1707_v35, %v1706_v23  ;;  %v1641_v42 = vsel %vm1385_vm7, %v877_v25, %v1513_v32  ;;  %v890_v43 = vadd.f32 %v3705_v2, %v889_v34  ;;  %v1146_v44 = vadd.f32 %v3705_v2, %v1145_v39  ;;  %v3386_v45 = vpop.f32.mrb[6].mxu1  ;;  %v892_v46 = vpop.f32.mrb[7].mxu0 }
  0xf1   : > { %v2865_v47 = vpack.c.bf16 %v1641_v42, %v1640_v24  ;;  %v1705_v48 = vsel %vm1449_vm8, %v1133_v26, %v1577_v36  ;;  %vm1390_vm9 = vcmp.ge.f32.partialorder %v898_v37, 0.0  ;;  %v1518_v49 = vmul.f32 0.01, %v898_v37  ;;  %v1148_v50 = vpop.f32.mrb[7].mxu1 }
  0xf2   : > { %3214 = vst [vmem:[%s3720_s27 + $0x108] sm:$0xff] %v3030_v41   ;;  %v3025_v51 = vpack.c.bf16 %v1705_v48, %v1704_v27  ;;  %vm1454_vm10 = vcmp.ge.f32.partialorder %v1154_v38, 0.0  ;;  %v1582_v52 = vmul.f32 0.01, %v1154_v38  ;;  %vm1388_vm11 = vcmp.ge.f32.partialorder %v890_v43, 0.0 }
  0xf3   : > { %2866 = vst [vmem:[%s3720_s27] sm:$0xff] %v2865_v47   ;;  %v1646_v53 = vsel %vm1390_vm9, %v898_v37, %v1518_v49  ;;  %v1516_v54 = vmul.f32 0.01, %v890_v43  ;;  %v1580_v55 = vmul.f32 0.01, %v1146_v44  ;;  %v901_v56 = vadd.f32 %v3322_v40, %v3705_v2 }
  0xf4   : > { %3213 = vst [vmem:[%s3720_s27 + $0x100] sm:$0xff] %v3025_v51   ;;  %v1157_v57 = vadd.f32 %v3386_v45, %v3705_v2  ;;  %v893_v58 = vadd.f32 %v3705_v2, %v892_v46  ;;  %v1710_v59 = vsel %vm1454_vm10, %v1154_v38, %v1582_v52  ;;  %vm1452_vm12 = vcmp.ge.f32.partialorder %v1146_v44, 0.0 }
  0xf5   : > { %v1644_v60 = vsel %vm1388_vm11, %v890_v43, %v1516_v54  ;;  %v1149_v61 = vadd.f32 %v3705_v2, %v1148_v50  ;;  %v3325_v62 = vpop.f32.mrb[8].mxu0  ;;  %vm1391_vm13 = vcmp.ge.f32.partialorder %v901_v56, 0.0  ;;  %v1519_v63 = vmul.f32 0.01, %v901_v56 }
  0xf6   : > { %vm1455_vm14 = vcmp.ge.f32.partialorder %v1157_v57, 0.0  ;;  %v1583_v0 = vmul.f32 0.01, %v1157_v57  ;;  %vm1389_vm15 = vcmp.ge.f32.partialorder %v893_v58, 0.0  ;;  %v1517_v1 = vmul.f32 0.01, %v893_v58 }
  0xf7   : > { %vm1453_vm0 = vcmp.ge.f32.partialorder %v1149_v61, 0.0  ;;  %v1581_v3 = vmul.f32 0.01, %v1149_v61  ;;  %v1708_v4 = vsel %vm1452_vm12, %v1146_v44, %v1580_v55  ;;  %v1647_v5 = vsel %vm1391_vm13, %v901_v56, %v1519_v63  ;;  %v3389_v8 = vpop.f32.mrb[8].mxu1  ;;  %v905_v9 = vpop.f32.mrb[9].mxu0 }
  0xf8   : > { %v1711_v6 = vsel %vm1455_vm14, %v1157_v57, %v1583_v0  ;;  %v914_v7 = vadd.f32 %v3325_v62, %v3705_v2  ;;  %v2880_v10 = vpack.c.bf16 %v1647_v5, %v1646_v53  ;;  %v1645_v12 = vsel %vm1389_vm15, %v893_v58, %v1517_v1  ;;  %v1161_v14 = vpop.f32.mrb[9].mxu1  ;;  %v3326_v15 = vpop.f32.mrb[10].mxu0 }
  0xf9   : > { %v3040_v11 = vpack.c.bf16 %v1711_v6, %v1710_v59  ;;  %v1709_v13 = vsel %vm1453_vm0, %v1149_v61, %v1581_v3  ;;  %v2875_v16 = vpack.c.bf16 %v1645_v12, %v1644_v60  ;;  %v3390_v19 = vpop.f32.mrb[10].mxu1  ;;  %v908_v20 = vpop.f32.mrb[11].mxu0  ;;  %v1170_v21 = vadd.f32 %v3389_v8, %v3705_v2 }
  0xfa   : > { %v3035_v17 = vpack.c.bf16 %v1709_v13, %v1708_v4  ;;  %vm1394_vm1 = vcmp.ge.f32.partialorder %v914_v7, 0.0  ;;  %v1522_v18 = vmul.f32 0.01, %v914_v7  ;;  %3184 = vst [vmem:[%s3720_s27 + $0x18] sm:$0xff] %v2880_v10   ;;  %v906_v22 = vadd.f32 %v3705_v2, %v905_v9  ;;  %v1164_v25 = vpop.f32.mrb[11].mxu1 }
  0xfb   : > { %3216 = vst [vmem:[%s3720_s27 + $0x118] sm:$0xff] %v3040_v11   ;;  %v1162_v23 = vadd.f32 %v3705_v2, %v1161_v14  ;;  %v917_v24 = vadd.f32 %v3326_v15, %v3705_v2  ;;  %3183 = vst [vmem:[%s3720_s27 + $0x10] sm:$0xff] %v2875_v16   ;;  %v1173_v27 = vadd.f32 %v3390_v19, %v3705_v2  ;;  %vm1458_vm2 = vcmp.ge.f32.partialorder %v1170_v21, 0.0 }
  0xfc   : > { %3215 = vst [vmem:[%s3720_s27 + $0x110] sm:$0xff] %v3035_v17   ;;  %v1650_v26 = vsel %vm1394_vm1, %v914_v7, %v1522_v18  ;;  %v909_v28 = vadd.f32 %v3705_v2, %v908_v20  ;;  %v1165_v29 = vadd.f32 %v3705_v2, %v1164_v25  ;;  %v1586_v30 = vmul.f32 0.01, %v1170_v21 }
  0xfd   : > { %vm1392_vm3 = vcmp.ge.f32.partialorder %v906_v22, 0.0  ;;  %v1520_v31 = vmul.f32 0.01, %v906_v22  ;;  %vm1456_vm4 = vcmp.ge.f32.partialorder %v1162_v23, 0.0  ;;  %v1584_v32 = vmul.f32 0.01, %v1162_v23 }
  0xfe   : > { %vm1395_vm5 = vcmp.ge.f32.partialorder %v917_v24, 0.0  ;;  %v1523_v33 = vmul.f32 0.01, %v917_v24  ;;  %v1714_v34 = vsel %vm1458_vm2, %v1170_v21, %v1586_v30  ;;  %vm1459_vm6 = vcmp.ge.f32.partialorder %v1173_v27, 0.0  ;;  %v3329_v37 = vpop.f32.mrb[12].mxu0  ;;  %v3393_v38 = vpop.f32.mrb[12].mxu1 }
  0xff   : > { %v1648_v35 = vsel %vm1392_vm3, %v906_v22, %v1520_v31  ;;  %v1587_v36 = vmul.f32 0.01, %v1173_v27  ;;  %v1712_v39 = vsel %vm1456_vm4, %v1162_v23, %v1584_v32  ;;  %vm1393_vm7 = vcmp.ge.f32.partialorder %v909_v28, 0.0  ;;  %v921_v42 = vpop.f32.mrb[13].mxu0  ;;  %v1177_v43 = vpop.f32.mrb[13].mxu1 }
 0x100   : > { %v1651_v40 = vsel %vm1395_vm5, %v917_v24, %v1523_v33  ;;  %v1521_v41 = vmul.f32 0.01, %v909_v28  ;;  %vm1457_vm8 = vcmp.ge.f32.partialorder %v1165_v29, 0.0  ;;  %v1585_v46 = vmul.f32 0.01, %v1165_v29  ;;  %v3330_v47 = vpop.f32.mrb[14].mxu0 }
 0x101   : > { %v2890_v44 = vpack.c.bf16 %v1651_v40, %v1650_v26  ;;  %v1715_v45 = vsel %vm1459_vm6, %v1173_v27, %v1587_v36  ;;  %v3394_v48 = vpop.f32.mrb[14].mxu1  ;;  %v930_v51 = vadd.f32 %v3329_v37, %v3705_v2  ;;  %v1186_v52 = vadd.f32 %v3393_v38, %v3705_v2  ;;  %v924_v53 = vpop.f32.mrb[15].mxu0 }
 0x102   : > { %v3050_v49 = vpack.c.bf16 %v1715_v45, %v1714_v34  ;;  %v1649_v50 = vsel %vm1393_vm7, %v909_v28, %v1521_v41  ;;  %v1180_v54 = vpop.f32.mrb[15].mxu1  ;;  %v1713_v56 = vsel %vm1457_vm8, %v1165_v29, %v1585_v46  ;;  %v922_v57 = vadd.f32 %v3705_v2, %v921_v42 }
 0x103   : > { %3186 = vst [vmem:[%s3720_s27 + $0x28] sm:$0xff] %v2890_v44   ;;  %v2885_v55 = vpack.c.bf16 %v1649_v50, %v1648_v35  ;;  %v1178_v58 = vadd.f32 %v3705_v2, %v1177_v43  ;;  %v3045_v59 = vpack.c.bf16 %v1713_v56, %v1712_v39  ;;  %vm1398_vm9 = vcmp.ge.f32.partialorder %v930_v51, 0.0 }
 0x104   : > { %3218 = vst [vmem:[%s3720_s27 + $0x128] sm:$0xff] %v3050_v49   ;;  %v1526_v60 = vmul.f32 0.01, %v930_v51  ;;  %vm1462_vm10 = vcmp.ge.f32.partialorder %v1186_v52, 0.0  ;;  %v1590_v61 = vmul.f32 0.01, %v1186_v52  ;;  %v933_v1 = vadd.f32 %v3330_v47, %v3705_v2 }
 0x105   : > { %3185 = vst [vmem:[%s3720_s27 + $0x20] sm:$0xff] %v2885_v55   ;;  %vm1396_vm11 = vcmp.ge.f32.partialorder %v922_v57, 0.0  ;;  %v1524_v62 = vmul.f32 0.01, %v922_v57  ;;  %vm1460_vm12 = vcmp.ge.f32.partialorder %v1178_v58, 0.0  ;;  %3217 = vst [vmem:[%s3720_s27 + $0x120] sm:$0xff] %v3045_v59   ;;  %v1189_v3 = vadd.f32 %v3394_v48, %v3705_v2 }
 0x106   : > { %v1654_v63 = vsel %vm1398_vm9, %v930_v51, %v1526_v60  ;;  %v1588_v0 = vmul.f32 0.01, %v1178_v58  ;;  %v3333_v4 = vpop.f32.mrb[16].mxu0  ;;  %v3397_v5 = vpop.f32.mrb[16].mxu1  ;;  %v1718_v6 = vsel %vm1462_vm10, %v1186_v52, %v1590_v61  ;;  %v925_v8 = vadd.f32 %v3705_v2, %v924_v53 }
 0x107   : > { %v1652_v7 = vsel %vm1396_vm11, %v922_v57, %v1524_v62  ;;  %v1181_v9 = vadd.f32 %v3705_v2, %v1180_v54  ;;  %v937_v10 = vpop.f32.mrb[17].mxu0  ;;  %v1193_v11 = vpop.f32.mrb[17].mxu1  ;;  %vm1399_vm13 = vcmp.ge.f32.partialorder %v933_v1, 0.0  ;;  %v1527_v13 = vmul.f32 0.01, %v933_v1 }
 0x108   : > { %v1716_v12 = vsel %vm1460_vm12, %v1178_v58, %v1588_v0  ;;  %vm1463_vm14 = vcmp.ge.f32.partialorder %v1189_v3, 0.0  ;;  %v3334_v14 = vpop.f32.mrb[18].mxu0  ;;  %v3398_v15 = vpop.f32.mrb[18].mxu1  ;;  %v1591_v16 = vmul.f32 0.01, %v1189_v3  ;;  %vm1397_vm15 = vcmp.ge.f32.partialorder %v925_v8, 0.0 }
 0x109   : > { %v1525_v17 = vmul.f32 0.01, %v925_v8  ;;  %vm1461_vm0 = vcmp.ge.f32.partialorder %v1181_v9, 0.0  ;;  %v1655_v18 = vsel %vm1399_vm13, %v933_v1, %v1527_v13  ;;  %v1589_v19 = vmul.f32 0.01, %v1181_v9  ;;  %v940_v22 = vpop.f32.mrb[19].mxu0 }
 0x10a   : > { %v946_v20 = vadd.f32 %v3333_v4, %v3705_v2  ;;  %v1202_v21 = vadd.f32 %v3397_v5, %v3705_v2  ;;  %v1196_v23 = vpop.f32.mrb[19].mxu1  ;;  %v2900_v24 = vpack.c.bf16 %v1655_v18, %v1654_v63  ;;  %v1719_v25 = vsel %vm1463_vm14, %v1189_v3, %v1591_v16 }
 0x10b   : > { %v1653_v26 = vsel %vm1397_vm15, %v925_v8, %v1525_v17  ;;  %v938_v27 = vadd.f32 %v3705_v2, %v937_v10  ;;  %v3060_v28 = vpack.c.bf16 %v1719_v25, %v1718_v6  ;;  %v1717_v30 = vsel %vm1461_vm0, %v1181_v9, %v1589_v19 }
 0x10c   : > { %v2895_v29 = vpack.c.bf16 %v1653_v26, %v1652_v7  ;;  %vm1402_vm1 = vcmp.ge.f32.partialorder %v946_v20, 0.0  ;;  %3188 = vst [vmem:[%s3720_s27 + $0x38] sm:$0xff] %v2900_v24   ;;  %v3055_v31 = vpack.c.bf16 %v1717_v30, %v1716_v12  ;;  %v1530_v32 = vmul.f32 0.01, %v946_v20 }
 0x10d   : > { %vm1466_vm2 = vcmp.ge.f32.partialorder %v1202_v21, 0.0  ;;  %v1594_v33 = vmul.f32 0.01, %v1202_v21  ;;  %v3337_v34 = vpop.f32.mrb[20].mxu0  ;;  %3220 = vst [vmem:[%s3720_s27 + $0x138] sm:$0xff] %v3060_v28   ;;  %vm1400_vm3 = vcmp.ge.f32.partialorder %v938_v27, 0.0  ;;  %v1194_v36 = vadd.f32 %v3705_v2, %v1193_v11 }
 0x10e   : > { %3187 = vst [vmem:[%s3720_s27 + $0x30] sm:$0xff] %v2895_v29   ;;  %v1528_v35 = vmul.f32 0.01, %v938_v27  ;;  %v949_v37 = vadd.f32 %v3334_v14, %v3705_v2  ;;  %v3401_v38 = vpop.f32.mrb[20].mxu1  ;;  %v953_v39 = vpop.f32.mrb[21].mxu0  ;;  %3219 = vst [vmem:[%s3720_s27 + $0x130] sm:$0xff] %v3055_v31   ;;  %v1658_v40 = vsel %vm1402_vm1, %v946_v20, %v1530_v32  ;;  %v1205_v42 = vadd.f32 %v3398_v15, %v3705_v2 }
 0x10f   : > { %v1722_v41 = vsel %vm1466_vm2, %v1202_v21, %v1594_v33  ;;  %v941_v43 = vadd.f32 %v3705_v2, %v940_v22  ;;  %v1209_v44 = vpop.f32.mrb[21].mxu1  ;;  %v3338_v45 = vpop.f32.mrb[22].mxu0  ;;  %vm1464_vm4 = vcmp.ge.f32.partialorder %v1194_v36, 0.0  ;;  %v1592_v47 = vmul.f32 0.01, %v1194_v36 }
 0x110   : > { %v1656_v46 = vsel %vm1400_vm3, %v938_v27, %v1528_v35  ;;  %vm1403_vm5 = vcmp.ge.f32.partialorder %v949_v37, 0.0  ;;  %v3402_v48 = vpop.f32.mrb[22].mxu1  ;;  %v956_v49 = vpop.f32.mrb[23].mxu0  ;;  %v1531_v50 = vmul.f32 0.01, %v949_v37  ;;  %vm1467_vm6 = vcmp.ge.f32.partialorder %v1205_v42, 0.0 }
 0x111   : > { %v1595_v51 = vmul.f32 0.01, %v1205_v42  ;;  %vm1401_vm7 = vcmp.ge.f32.partialorder %v941_v43, 0.0  ;;  %v1720_v52 = vsel %vm1464_vm4, %v1194_v36, %v1592_v47  ;;  %v1529_v53 = vmul.f32 0.01, %v941_v43  ;;  %v1212_v56 = vpop.f32.mrb[23].mxu1 }
 0x112   : > { %v1197_v54 = vadd.f32 %v3705_v2, %v1196_v23  ;;  %v962_v55 = vadd.f32 %v3337_v34, %v3705_v2  ;;  %v1659_v57 = vsel %vm1403_vm5, %v949_v37, %v1531_v50  ;;  %v1218_v59 = vadd.f32 %v3401_v38, %v3705_v2 }
 0x113   : > { %v1723_v58 = vsel %vm1467_vm6, %v1205_v42, %v1595_v51  ;;  %v954_v60 = vadd.f32 %v3705_v2, %v953_v39  ;;  %v2910_v61 = vpack.c.bf16 %v1659_v57, %v1658_v40  ;;  %v1657_v63 = vsel %vm1401_vm7, %v941_v43, %v1529_v53 }
 0x114   : > { %v3070_v62 = vpack.c.bf16 %v1723_v58, %v1722_v41  ;;  %vm1465_vm8 = vcmp.ge.f32.partialorder %v1197_v54, 0.0  ;;  %v2905_v0 = vpack.c.bf16 %v1657_v63, %v1656_v46  ;;  %v1593_v1 = vmul.f32 0.01, %v1197_v54 }
 0x115   : > { %vm1406_vm9 = vcmp.ge.f32.partialorder %v962_v55, 0.0  ;;  %v1534_v3 = vmul.f32 0.01, %v962_v55  ;;  %v3341_v4 = vpop.f32.mrb[24].mxu0  ;;  %3190 = vst [vmem:[%s3720_s27 + $0x48] sm:$0xff] %v2910_v61   ;;  %vm1470_vm10 = vcmp.ge.f32.partialorder %v1218_v59, 0.0  ;;  %v1210_v9 = vadd.f32 %v3705_v2, %v1209_v44 }
 0x116   : > { %3222 = vst [vmem:[%s3720_s27 + $0x148] sm:$0xff] %v3070_v62   ;;  %v1598_v5 = vmul.f32 0.01, %v1218_v59  ;;  %vm1404_vm11 = vcmp.ge.f32.partialorder %v954_v60, 0.0  ;;  %v1532_v6 = vmul.f32 0.01, %v954_v60  ;;  %v1721_v7 = vsel %vm1465_vm8, %v1197_v54, %v1593_v1 }
 0x117   : > { %3189 = vst [vmem:[%s3720_s27 + $0x40] sm:$0xff] %v2905_v0   ;;  %v1662_v8 = vsel %vm1406_vm9, %v962_v55, %v1534_v3  ;;  %v965_v10 = vadd.f32 %v3338_v45, %v3705_v2  ;;  %v3405_v11 = vpop.f32.mrb[24].mxu1  ;;  %v969_v12 = vpop.f32.mrb[25].mxu0  ;;  %v3065_v13 = vpack.c.bf16 %v1721_v7, %v1720_v52  ;;  %v1221_v16 = vadd.f32 %v3402_v48, %v3705_v2 }
 0x118   : > { %v1726_v14 = vsel %vm1470_vm10, %v1218_v59, %v1598_v5  ;;  %v1660_v15 = vsel %vm1404_vm11, %v954_v60, %v1532_v6  ;;  %v1225_v17 = vpop.f32.mrb[25].mxu1  ;;  %v3342_v18 = vpop.f32.mrb[26].mxu0  ;;  %vm1468_vm12 = vcmp.ge.f32.partialorder %v1210_v9, 0.0  ;;  %v1596_v19 = vmul.f32 0.01, %v1210_v9 }
 0x119   : > { %vm1407_vm13 = vcmp.ge.f32.partialorder %v965_v10, 0.0  ;;  %v1535_v20 = vmul.f32 0.01, %v965_v10  ;;  %3221 = vst [vmem:[%s3720_s27 + $0x140] sm:$0xff] %v3065_v13   ;;  %vm1471_vm14 = vcmp.ge.f32.partialorder %v1221_v16, 0.0  ;;  %v957_v22 = vadd.f32 %v3705_v2, %v956_v49  ;;  %v3406_v24 = vpop.f32.mrb[26].mxu1 }
 0x11a   : > { %v1599_v21 = vmul.f32 0.01, %v1221_v16  ;;  %v1213_v23 = vadd.f32 %v3705_v2, %v1212_v56  ;;  %v972_v25 = vpop.f32.mrb[27].mxu0  ;;  %v1724_v26 = vsel %vm1468_vm12, %v1210_v9, %v1596_v19  ;;  %v978_v28 = vadd.f32 %v3341_v4, %v3705_v2  ;;  %v1228_v30 = vpop.f32.mrb[27].mxu1 }
 0x11b   : > { %v1663_v27 = vsel %vm1407_vm13, %v965_v10, %v1535_v20  ;;  %v1234_v29 = vadd.f32 %v3405_v11, %v3705_v2  ;;  %vm1405_vm15 = vcmp.ge.f32.partialorder %v957_v22, 0.0  ;;  %v1533_v33 = vmul.f32 0.01, %v957_v22 }
 0x11c   : > { %v2920_v31 = vpack.c.bf16 %v1663_v27, %v1662_v8  ;;  %v1727_v32 = vsel %vm1471_vm14, %v1221_v16, %v1599_v21  ;;  %vm1469_vm0 = vcmp.ge.f32.partialorder %v1213_v23, 0.0  ;;  %v1597_v35 = vmul.f32 0.01, %v1213_v23 }
 0x11d   : > { %v3080_v34 = vpack.c.bf16 %v1727_v32, %v1726_v14  ;;  %vm1410_vm1 = vcmp.ge.f32.partialorder %v978_v28, 0.0  ;;  %v3345_v36 = vpop.f32.mrb[28].mxu0  ;;  %v1661_v37 = vsel %vm1405_vm15, %v957_v22, %v1533_v33  ;;  %v1538_v38 = vmul.f32 0.01, %v978_v28 }
 0x11e   : > { %3192 = vst [vmem:[%s3720_s27 + $0x58] sm:$0xff] %v2920_v31   ;;  %vm1474_vm2 = vcmp.ge.f32.partialorder %v1234_v29, 0.0  ;;  %v1602_v39 = vmul.f32 0.01, %v1234_v29  ;;  %v3409_v40 = vpop.f32.mrb[28].mxu1  ;;  %v2915_v41 = vpack.c.bf16 %v1661_v37, %v1660_v15  ;;  %v1725_v42 = vsel %vm1469_vm0, %v1213_v23, %v1597_v35  ;;  %v985_v45 = vpop.f32.mrb[29].mxu0 }
 0x11f   : > { %3224 = vst [vmem:[%s3720_s27 + $0x158] sm:$0xff] %v3080_v34   ;;  %v970_v43 = vadd.f32 %v3705_v2, %v969_v12  ;;  %v1226_v44 = vadd.f32 %v3705_v2, %v1225_v17  ;;  %v1241_v46 = vpop.f32.mrb[29].mxu1  ;;  %v3075_v47 = vpack.c.bf16 %v1725_v42, %v1724_v26  ;;  %v1666_v48 = vsel %vm1410_vm1, %v978_v28, %v1538_v38  ;;  %v3346_v51 = vpop.f32.mrb[30].mxu0 }
 0x120   : > { %v1730_v49 = vsel %vm1474_vm2, %v1234_v29, %v1602_v39  ;;  %v981_v50 = vadd.f32 %v3342_v18, %v3705_v2  ;;  %v3410_v52 = vpop.f32.mrb[30].mxu1  ;;  %3191 = vst [vmem:[%s3720_s27 + $0x50] sm:$0xff] %v2915_v41   ;;  %v1237_v56 = vadd.f32 %v3406_v24, %v3705_v2  ;;  %v973_v57 = vadd.f32 %v3705_v2, %v972_v25  ;;  %v988_v58 = vpop.f32.mrb[31].mxu0 }
 0x121   : > { %vm1408_vm3 = vcmp.ge.f32.partialorder %v970_v43, 0.0  ;;  %v1536_v53 = vmul.f32 0.01, %v970_v43  ;;  %vm1472_vm4 = vcmp.ge.f32.partialorder %v1226_v44, 0.0  ;;  %v1600_v54 = vmul.f32 0.01, %v1226_v44 }
 0x122   : > { %3223 = vst [vmem:[%s3720_s27 + $0x150] sm:$0xff] %v3075_v47   ;;  %vm1411_vm5 = vcmp.ge.f32.partialorder %v981_v50, 0.0  ;;  %v1539_v55 = vmul.f32 0.01, %v981_v50  ;;  %v1244_v59 = vpop.f32.mrb[31].mxu1  ;;  %v1229_v62 = vadd.f32 %v3705_v2, %v1228_v30  ;;  %v994_v63 = vadd.f32 %v3345_v36, %v3705_v2 }
 0x123   : > { %v1664_v60 = vsel %vm1408_vm3, %v970_v43, %v1536_v53  ;;  %v1728_v61 = vsel %vm1472_vm4, %v1226_v44, %v1600_v54  ;;  %vm1475_vm6 = vcmp.ge.f32.partialorder %v1237_v56, 0.0  ;;  %v1603_v1 = vmul.f32 0.01, %v1237_v56 }
 0x124   : > { %v1667_v0 = vsel %vm1411_vm5, %v981_v50, %v1539_v55  ;;  %vm1409_vm7 = vcmp.ge.f32.partialorder %v973_v57, 0.0  ;;  %v1537_v4 = vmul.f32 0.01, %v973_v57  ;;  %vm1473_vm8 = vcmp.ge.f32.partialorder %v1229_v62, 0.0 }
 0x125   : > { %v2930_v3 = vpack.c.bf16 %v1667_v0, %v1666_v48  ;;  %v1601_v5 = vmul.f32 0.01, %v1229_v62  ;;  %v3349_v6 = vpop.f32.mrb[32].mxu0  ;;  %v1731_v7 = vsel %vm1475_vm6, %v1237_v56, %v1603_v1  ;;  %vm1414_vm9 = vcmp.ge.f32.partialorder %v994_v63, 0.0 }
 0x126   : > { %v1542_v8 = vmul.f32 0.01, %v994_v63  ;;  %v1250_v9 = vadd.f32 %v3409_v40, %v3705_v2  ;;  %v3413_v10 = vpop.f32.mrb[32].mxu1  ;;  %v1001_v11 = vpop.f32.mrb[33].mxu0  ;;  %v3090_v12 = vpack.c.bf16 %v1731_v7, %v1730_v49  ;;  %v1665_v13 = vsel %vm1409_vm7, %v973_v57, %v1537_v4 }
 0x127   : > { %3194 = vst [vmem:[%s3720_s27 + $0x68] sm:$0xff] %v2930_v3   ;;  %v1729_v14 = vsel %vm1473_vm8, %v1229_v62, %v1601_v5  ;;  %v986_v15 = vadd.f32 %v3705_v2, %v985_v45  ;;  %v1257_v16 = vpop.f32.mrb[33].mxu1  ;;  %v3350_v17 = vpop.f32.mrb[34].mxu0  ;;  %v2925_v18 = vpack.c.bf16 %v1665_v13, %v1664_v60  ;;  %v1242_v25 = vadd.f32 %v3705_v2, %v1241_v46 }
 0x128   : > { %v3085_v19 = vpack.c.bf16 %v1729_v14, %v1728_v61  ;;  %v1670_v20 = vsel %vm1414_vm9, %v994_v63, %v1542_v8  ;;  %vm1478_vm10 = vcmp.ge.f32.partialorder %v1250_v9, 0.0  ;;  %v3414_v21 = vpop.f32.mrb[34].mxu1  ;;  %v1004_v22 = vpop.f32.mrb[35].mxu0  ;;  %3226 = vst [vmem:[%s3720_s27 + $0x168] sm:$0xff] %v3090_v12   ;;  %v1606_v23 = vmul.f32 0.01, %v1250_v9 }
 0x129   : > { %vm1412_vm11 = vcmp.ge.f32.partialorder %v986_v15, 0.0  ;;  %v1540_v24 = vmul.f32 0.01, %v986_v15  ;;  %v3803_v26 = vpop.f32.mrb[35].mxu1  ;;  %3193 = vst [vmem:[%s3720_s27 + $0x60] sm:$0xff] %v2925_v18   ;;  %v997_v27 = vadd.f32 %v3346_v51, %v3705_v2  ;;  %v1253_v28 = vadd.f32 %v3410_v52, %v3705_v2 }
 0x12a   : > { %3225 = vst [vmem:[%s3720_s27 + $0x160] sm:$0xff] %v3085_v19   ;;  %v989_v29 = vadd.f32 %v3705_v2, %v988_v58  ;;  %v1245_v30 = vadd.f32 %v3705_v2, %v1244_v59  ;;  %v1734_v31 = vsel %vm1478_vm10, %v1250_v9, %v1606_v23  ;;  %vm1476_vm12 = vcmp.ge.f32.partialorder %v1242_v25, 0.0 }
 0x12b   : > { %v1668_v32 = vsel %vm1412_vm11, %v986_v15, %v1540_v24  ;;  %v1604_v33 = vmul.f32 0.01, %v1242_v25  ;;  %vm1415_vm13 = vcmp.ge.f32.partialorder %v997_v27, 0.0  ;;  %v1543_v34 = vmul.f32 0.01, %v997_v27 }
 0x12c   : > { %vm1479_vm14 = vcmp.ge.f32.partialorder %v1253_v28, 0.0  ;;  %v1607_v35 = vmul.f32 0.01, %v1253_v28  ;;  %vm1413_vm15 = vcmp.ge.f32.partialorder %v989_v29, 0.0  ;;  %v1541_v37 = vmul.f32 0.01, %v989_v29 }
 0x12d   : > { %v1732_v36 = vsel %vm1476_vm12, %v1242_v25, %v1604_v33  ;;  %vm1477_vm0 = vcmp.ge.f32.partialorder %v1245_v30, 0.0  ;;  %v3353_v38 = vpop.f32.mrb[36].mxu0  ;;  %v1671_v39 = vsel %vm1415_vm13, %v997_v27, %v1543_v34  ;;  %v1605_v41 = vmul.f32 0.01, %v1245_v30 }
 0x12e   : > { %v1735_v40 = vsel %vm1479_vm14, %v1253_v28, %v1607_v35  ;;  %v1010_v42 = vadd.f32 %v3349_v6, %v3705_v2  ;;  %v3417_v43 = vpop.f32.mrb[36].mxu1  ;;  %v3812_v44 = vpop.f32.mrb[37].mxu0  ;;  %v2940_v45 = vpack.c.bf16 %v1671_v39, %v1670_v20  ;;  %v1669_v47 = vsel %vm1413_vm15, %v989_v29, %v1541_v37 }
 0x12f   : > { %v3100_v46 = vpack.c.bf16 %v1735_v40, %v1734_v31  ;;  %v1266_v48 = vadd.f32 %v3413_v10, %v3705_v2  ;;  %v1273_v49 = vpop.f32.mrb[37].mxu1  ;;  %v3815_v50 = vpop.f32.mrb[38].mxu0  ;;  %v2935_v51 = vpack.c.bf16 %v1669_v47, %v1668_v32  ;;  %v1733_v52 = vsel %vm1477_vm0, %v1245_v30, %v1605_v41 }
 0x130   : > { %vm1418_vm1 = vcmp.ge.f32.partialorder %v1010_v42, 0.0  ;;  %v1546_v53 = vmul.f32 0.01, %v1010_v42  ;;  %v3418_v54 = vpop.f32.mrb[38].mxu1  ;;  %v3817_v55 = vpop.f32.mrb[39].mxu0  ;;  %3196 = vst [vmem:[%s3720_s27 + $0x78] sm:$0xff] %v2940_v45   ;;  %v3095_v56 = vpack.c.bf16 %v1733_v52, %v1732_v36  ;;  %v1002_v58 = vadd.f32 %v3705_v2, %v1001_v11 }
 0x131   : > { %3228 = vst [vmem:[%s3720_s27 + $0x178] sm:$0xff] %v3100_v46   ;;  %vm1482_vm2 = vcmp.ge.f32.partialorder %v1266_v48, 0.0  ;;  %v1610_v57 = vmul.f32 0.01, %v1266_v48  ;;  %v3822_v59 = vpop.f32.mrb[39].mxu1  ;;  %3195 = vst [vmem:[%s3720_s27 + $0x70] sm:$0xff] %v2935_v51   ;;  %v1258_v61 = vadd.f32 %v3705_v2, %v1257_v16  ;;  %v1013_v62 = vadd.f32 %v3350_v17, %v3705_v2 }
 0x132   : > { %v1674_v60 = vsel %vm1418_vm1, %v1010_v42, %v1546_v53  ;;  %v1269_v63 = vadd.f32 %v3414_v21, %v3705_v2  ;;  %3227 = vst [vmem:[%s3720_s27 + $0x170] sm:$0xff] %v3095_v56   ;;  %vm1416_vm3 = vcmp.ge.f32.partialorder %v1002_v58, 0.0  ;;  %v1544_v1 = vmul.f32 0.01, %v1002_v58 }
 0x133   : > { %v1738_v0 = vsel %vm1482_vm2, %v1266_v48, %v1610_v57  ;;  %v1005_v3 = vadd.f32 %v3705_v2, %v1004_v22  ;;  %vm1480_vm4 = vcmp.ge.f32.partialorder %v1258_v61, 0.0  ;;  %v1608_v4 = vmul.f32 0.01, %v1258_v61 }
 0x134   : > { %vm1419_vm5 = vcmp.ge.f32.partialorder %v1013_v62, 0.0  ;;  %v1547_v5 = vmul.f32 0.01, %v1013_v62  ;;  %v1672_v6 = vsel %vm1416_vm3, %v1002_v58, %v1544_v1  ;;  %vm1483_vm6 = vcmp.ge.f32.partialorder %v1269_v63, 0.0 }
 0x135   : > { %v1611_v7 = vmul.f32 0.01, %v1269_v63  ;;  %vm1417_vm7 = vcmp.ge.f32.partialorder %v1005_v3, 0.0  ;;  %v3357_v8 = vpop.f32.mrb[40].mxu0  ;;  %v1736_v9 = vsel %vm1480_vm4, %v1258_v61, %v1608_v4  ;;  %v1545_v11 = vmul.f32 0.01, %v1005_v3 }
 0x136   : > { %v1675_v10 = vsel %vm1419_vm5, %v1013_v62, %v1547_v5  ;;  %v1261_v12 = vadd.f32 %v3705_v2, %v3803_v26  ;;  %v3421_v13 = vpop.f32.mrb[40].mxu1  ;;  %v3832_v14 = vpop.f32.mrb[41].mxu0  ;;  %v1026_v17 = vadd.f32 %v3353_v38, %v3705_v2  ;;  %v1282_v18 = vadd.f32 %v3417_v43, %v3705_v2 }
 0x137   : > { %v2950_v15 = vpack.c.bf16 %v1675_v10, %v1674_v60  ;;  %v1739_v16 = vsel %vm1483_vm6, %v1269_v63, %v1611_v7  ;;  %v3836_v19 = vpop.f32.mrb[41].mxu1  ;;  %v3838_v20 = vpop.f32.mrb[42].mxu0  ;;  %v1673_v22 = vsel %vm1417_vm7, %v1005_v3, %v1545_v11  ;;  %v1018_v31 = vadd.f32 %v3705_v2, %v3812_v44 }
 0x138   : > { %v3110_v21 = vpack.c.bf16 %v1739_v16, %v1738_v0  ;;  %vm1481_vm8 = vcmp.ge.f32.partialorder %v1261_v12, 0.0  ;;  %v1609_v23 = vmul.f32 0.01, %v1261_v12  ;;  %v3840_v24 = vpop.f32.mrb[42].mxu1  ;;  %v3842_v25 = vpop.f32.mrb[43].mxu0  ;;  %v2945_v26 = vpack.c.bf16 %v1673_v22, %v1672_v6 }
 0x139   : > { %3198 = vst [vmem:[%s3720_s27 + $0x88] sm:$0xff] %v2950_v15   ;;  %vm1422_vm9 = vcmp.ge.f32.partialorder %v1026_v17, 0.0  ;;  %v1550_v27 = vmul.f32 0.01, %v1026_v17  ;;  %vm1486_vm10 = vcmp.ge.f32.partialorder %v1282_v18, 0.0  ;;  %v3845_v28 = vpop.f32.mrb[43].mxu1  ;;  %v1274_v32 = vadd.f32 %v3705_v2, %v1273_v49 }
 0x13a   : > { %3230 = vst [vmem:[%s3720_s27 + $0x188] sm:$0xff] %v3110_v21   ;;  %v1737_v29 = vsel %vm1481_vm8, %v1261_v12, %v1609_v23  ;;  %v1614_v30 = vmul.f32 0.01, %v1282_v18  ;;  %3197 = vst [vmem:[%s3720_s27 + $0x80] sm:$0xff] %v2945_v26   ;;  %v1029_v35 = vadd.f32 %v3815_v50, %v3705_v2  ;;  %v1285_v36 = vadd.f32 %v3418_v54, %v3705_v2 }
 0x13b   : > { %v3105_v33 = vpack.c.bf16 %v1737_v29, %v1736_v9  ;;  %v1678_v34 = vsel %vm1422_vm9, %v1026_v17, %v1550_v27  ;;  %vm1420_vm11 = vcmp.ge.f32.partialorder %v1018_v31, 0.0  ;;  %v1548_v38 = vmul.f32 0.01, %v1018_v31 }
 0x13c   : > { %v1742_v37 = vsel %vm1486_vm10, %v1282_v18, %v1614_v30  ;;  %vm1484_vm12 = vcmp.ge.f32.partialorder %v1274_v32, 0.0  ;;  %v1612_v39 = vmul.f32 0.01, %v1274_v32  ;;  %vm1423_vm13 = vcmp.ge.f32.partialorder %v1029_v35, 0.0 }
 0x13d   : > { %3229 = vst [vmem:[%s3720_s27 + $0x180] sm:$0xff] %v3105_v33   ;;  %v1551_v40 = vmul.f32 0.01, %v1029_v35  ;;  %vm1487_vm14 = vcmp.ge.f32.partialorder %v1285_v36, 0.0  ;;  %v1676_v41 = vsel %vm1420_vm11, %v1018_v31, %v1548_v38  ;;  %v1615_v42 = vmul.f32 0.01, %v1285_v36 }
 0x13e   : > { %v1021_v43 = vadd.f32 %v3705_v2, %v3817_v55  ;;  %v1277_v44 = vadd.f32 %v3705_v2, %v3822_v59  ;;  %v3361_v45 = vpop.f32.mrb[44].mxu0  ;;  %v3860_v46 = vpop.f32.mrb[44].mxu1  ;;  %v1740_v47 = vsel %vm1484_vm12, %v1274_v32, %v1612_v39  ;;  %v1042_v49 = vadd.f32 %v3357_v8, %v3705_v2 }
 0x13f   : > { %v1679_v48 = vsel %vm1423_vm13, %v1029_v35, %v1551_v40  ;;  %v1298_v50 = vadd.f32 %v3421_v13, %v3705_v2  ;;  %v3864_v51 = vpop.f32.mrb[45].mxu0  ;;  %v3866_v52 = vpop.f32.mrb[45].mxu1  ;;  %v1743_v54 = vsel %vm1487_vm14, %v1285_v36, %v1615_v42  ;;  %v1034_v4 = vadd.f32 %v3705_v2, %v3832_v14  ;;  %v3889_v13 = vld [vmem:[%s4070_s2] ss:$0 sm:$0xff] }
 0x140   : > { %v2960_v53 = vpack.c.bf16 %v1679_v48, %v1678_v34  ;;  %vm1421_vm15 = vcmp.ge.f32.partialorder %v1021_v43, 0.0  ;;  %v1549_v55 = vmul.f32 0.01, %v1021_v43  ;;  %v3868_v56 = vpop.f32.mrb[46].mxu0  ;;  %v3870_v57 = vpop.f32.mrb[46].mxu1  ;;  %v3120_v58 = vpack.c.bf16 %v1743_v54, %v1742_v37 }
 0x141   : > { %vm1485_vm0 = vcmp.ge.f32.partialorder %v1277_v44, 0.0  ;;  %v1613_v59 = vmul.f32 0.01, %v1277_v44  ;;  %vm1426_vm1 = vcmp.ge.f32.partialorder %v1042_v49, 0.0  ;;  %v3872_v60 = vpop.f32.mrb[47].mxu0  ;;  %v3874_v61 = vpop.f32.mrb[47].mxu1  ;;  %v1290_v5 = vadd.f32 %v3705_v2, %v3836_v19 }
 0x142   : > { %3200 = vst [vmem:[%s3720_s27 + $0x98] sm:$0xff] %v2960_v53   ;;  %v1677_v62 = vsel %vm1421_vm15, %v1021_v43, %v1549_v55  ;;  %v1554_v63 = vmul.f32 0.01, %v1042_v49  ;;  %vm1490_vm2 = vcmp.ge.f32.partialorder %v1298_v50, 0.0  ;;  %v1618_v0 = vmul.f32 0.01, %v1298_v50 }
 0x143   : > { %3232 = vst [vmem:[%s3720_s27 + $0x198] sm:$0xff] %v3120_v58   ;;  %v2955_v1 = vpack.c.bf16 %v1677_v62, %v1676_v41  ;;  %v1741_v3 = vsel %vm1485_vm0, %v1277_v44, %v1613_v59  ;;  %v1045_v9 = vadd.f32 %v3838_v20, %v3705_v2  ;;  %vm1424_vm3 = vcmp.ge.f32.partialorder %v1034_v4, 0.0 }
 0x144   : > { %v3115_v6 = vpack.c.bf16 %v1741_v3, %v1740_v47  ;;  %v1682_v7 = vsel %vm1426_vm1, %v1042_v49, %v1554_v63  ;;  %v1746_v8 = vsel %vm1490_vm2, %v1298_v50, %v1618_v0  ;;  %v1552_v10 = vmul.f32 0.01, %v1034_v4 }
 0x145   : > { %3199 = vst [vmem:[%s3720_s27 + $0x90] sm:$0xff] %v2955_v1   ;;  %vm1488_vm4 = vcmp.ge.f32.partialorder %v1290_v5, 0.0  ;;  %v1616_v11 = vmul.f32 0.01, %v1290_v5  ;;  %vm1427_vm5 = vcmp.ge.f32.partialorder %v1045_v9, 0.0  ;;  %v1301_v14 = vadd.f32 %v3889_v13, %v3840_v24  ;;  %v3895_v2 = vpop.f32.mrb[48].mxu0 }
 0x146   : > { %3231 = vst [vmem:[%s3720_s27 + $0x190] sm:$0xff] %v3115_v6   ;;  %v1555_v12 = vmul.f32 0.01, %v1045_v9  ;;  %v1037_v15 = vadd.f32 %v3889_v13, %v3842_v25  ;;  %v3897_v16 = vpop.f32.mrb[48].mxu1  ;;  %v1680_v17 = vsel %vm1424_vm3, %v1034_v4, %v1552_v10  ;;  %v1293_v19 = vadd.f32 %v3889_v13, %v3845_v28  ;;  %v3902_v21 = vpop.f32.mrb[49].mxu0 }
 0x147   : > { %v1744_v18 = vsel %vm1488_vm4, %v1290_v5, %v1616_v11  ;;  %v1058_v20 = vadd.f32 %v3889_v13, %v3361_v45  ;;  %v3904_v22 = vpop.f32.mrb[49].mxu1  ;;  %vm1491_vm6 = vcmp.ge.f32.partialorder %v1301_v14, 0.0  ;;  %v1619_v24 = vmul.f32 0.01, %v1301_v14  ;;  %v3906_v25 = vpop.f32.mrb[50].mxu0 }
 0x148   : > { %v1683_v23 = vsel %vm1427_vm5, %v1045_v9, %v1555_v12  ;;  %vm1425_vm7 = vcmp.ge.f32.partialorder %v1037_v15, 0.0  ;;  %v3908_v26 = vpop.f32.mrb[50].mxu1  ;;  %v1553_v29 = vmul.f32 0.01, %v1037_v15  ;;  %vm1489_vm8 = vcmp.ge.f32.partialorder %v1293_v19, 0.0  ;;  %v3910_v28 = vpop.f32.mrb[51].mxu0 }
 0x149   : > { %v2970_v27 = vpack.c.bf16 %v1683_v23, %v1682_v7  ;;  %v1617_v30 = vmul.f32 0.01, %v1293_v19  ;;  %v1747_v31 = vsel %vm1491_vm6, %v1301_v14, %v1619_v24  ;;  %vm1430_vm9 = vcmp.ge.f32.partialorder %v1058_v20, 0.0  ;;  %v3914_v34 = vpop.f32.mrb[51].mxu1 }
 0x14a   : > { %v1558_v32 = vmul.f32 0.01, %v1058_v20  ;;  %v1314_v33 = vadd.f32 %v3889_v13, %v3860_v46  ;;  %v3130_v35 = vpack.c.bf16 %v1747_v31, %v1746_v8  ;;  %v1681_v36 = vsel %vm1425_vm7, %v1037_v15, %v1553_v29 }
 0x14b   : > { %3202 = vst [vmem:[%s3720_s27 + $0xa8] sm:$0xff] %v2970_v27   ;;  %v1745_v37 = vsel %vm1489_vm8, %v1293_v19, %v1617_v30  ;;  %v1050_v38 = vadd.f32 %v3889_v13, %v3864_v51  ;;  %v2965_v39 = vpack.c.bf16 %v1681_v36, %v1680_v17  ;;  %v1306_v44 = vadd.f32 %v3889_v13, %v3866_v52 }
 0x14c   : > { %v3125_v40 = vpack.c.bf16 %v1745_v37, %v1744_v18  ;;  %v1686_v41 = vsel %vm1430_vm9, %v1058_v20, %v1558_v32  ;;  %vm1494_vm10 = vcmp.ge.f32.partialorder %v1314_v33, 0.0  ;;  %3234 = vst [vmem:[%s3720_s27 + $0x1a8] sm:$0xff] %v3130_v35   ;;  %v1622_v42 = vmul.f32 0.01, %v1314_v33 }
 0x14d   : > { %vm1428_vm11 = vcmp.ge.f32.partialorder %v1050_v38, 0.0  ;;  %v1556_v43 = vmul.f32 0.01, %v1050_v38  ;;  %v3922_v45 = vpop.f32.mrb[52].mxu0  ;;  %3201 = vst [vmem:[%s3720_s27 + $0xa0] sm:$0xff] %v2965_v39   ;;  %v1061_v46 = vadd.f32 %v3889_v13, %v3868_v56  ;;  %v1317_v47 = vadd.f32 %v3889_v13, %v3870_v57 }
 0x14e   : > { %3233 = vst [vmem:[%s3720_s27 + $0x1a0] sm:$0xff] %v3125_v40   ;;  %v1053_v48 = vadd.f32 %v3889_v13, %v3872_v60  ;;  %v1309_v49 = vadd.f32 %v3889_v13, %v3874_v61  ;;  %v3934_v50 = vpop.f32.mrb[52].mxu1  ;;  %v3936_v51 = vpop.f32.mrb[53].mxu0  ;;  %v1750_v52 = vsel %vm1494_vm10, %v1314_v33, %v1622_v42  ;;  %vm1492_vm12 = vcmp.ge.f32.partialorder %v1306_v44, 0.0 }
 0x14f   : > { %v1684_v53 = vsel %vm1428_vm11, %v1050_v38, %v1556_v43  ;;  %v1620_v54 = vmul.f32 0.01, %v1306_v44  ;;  %v3938_v55 = vpop.f32.mrb[53].mxu1  ;;  %v3940_v56 = vpop.f32.mrb[54].mxu0  ;;  %vm1431_vm13 = vcmp.ge.f32.partialorder %v1061_v46, 0.0  ;;  %vm1495_vm14 = vcmp.ge.f32.partialorder %v1317_v47, 0.0 }
 0x150   : > { %v1559_v57 = vmul.f32 0.01, %v1061_v46  ;;  %v1623_v58 = vmul.f32 0.01, %v1317_v47  ;;  %vm1429_vm15 = vcmp.ge.f32.partialorder %v1053_v48, 0.0  ;;  %vm1493_vm0 = vcmp.ge.f32.partialorder %v1309_v49, 0.0 }
 0x151   : > { %v1748_v59 = vsel %vm1492_vm12, %v1306_v44, %v1620_v54  ;;  %v1557_v60 = vmul.f32 0.01, %v1053_v48  ;;  %v3942_v61 = vpop.f32.mrb[54].mxu1  ;;  %v3944_v62 = vpop.f32.mrb[55].mxu0  ;;  %v1621_v1 = vmul.f32 0.01, %v1309_v49  ;;  %v1074_v3 = vadd.f32 %v3889_v13, %v3895_v2 }
 0x152   : > { %v1687_v63 = vsel %vm1431_vm13, %v1061_v46, %v1559_v57  ;;  %v1751_v0 = vsel %vm1495_vm14, %v1317_v47, %v1623_v58  ;;  %v3948_v4 = vpop.f32.mrb[55].mxu1  ;;  %v1330_v8 = vadd.f32 %v3889_v13, %v3897_v16  ;;  %v1066_v15 = vadd.f32 %v3889_v13, %v3902_v21 }
 0x153   : > { %v2980_v5 = vpack.c.bf16 %v1687_v63, %v1686_v41  ;;  %v3140_v6 = vpack.c.bf16 %v1751_v0, %v1750_v52  ;;  %v1685_v7 = vsel %vm1429_vm15, %v1053_v48, %v1557_v60  ;;  %v1749_v10 = vsel %vm1493_vm0, %v1309_v49, %v1621_v1 }
 0x154   : > { %v2975_v9 = vpack.c.bf16 %v1685_v7, %v1684_v53  ;;  %vm1434_vm1 = vcmp.ge.f32.partialorder %v1074_v3, 0.0  ;;  %v1562_v11 = vmul.f32 0.01, %v1074_v3  ;;  %v3135_v12 = vpack.c.bf16 %v1749_v10, %v1748_v59 }
 0x155   : > { %3204 = vst [vmem:[%s3720_s27 + $0xb8] sm:$0xff] %v2980_v5   ;;  %3236 = vst [vmem:[%s3720_s27 + $0x1b8] sm:$0xff] %v3140_v6   ;;  %vm1498_vm2 = vcmp.ge.f32.partialorder %v1330_v8, 0.0  ;;  %v1626_v14 = vmul.f32 0.01, %v1330_v8  ;;  %v3956_v2 = vpop.f32.mrb[56].mxu0  ;;  %v1322_v16 = vadd.f32 %v3889_v13, %v3904_v22  ;;  %v1077_v18 = vadd.f32 %v3889_v13, %v3906_v25 }
 0x156   : > { %3203 = vst [vmem:[%s3720_s27 + $0xb0] sm:$0xff] %v2975_v9   ;;  %v1690_v17 = vsel %vm1434_vm1, %v1074_v3, %v1562_v11  ;;  %v1333_v19 = vadd.f32 %v3889_v13, %v3908_v26  ;;  %v3965_v20 = vpop.f32.mrb[56].mxu1  ;;  %v3967_v23 = vpop.f32.mrb[57].mxu0  ;;  %3235 = vst [vmem:[%s3720_s27 + $0x1b0] sm:$0xff] %v3135_v12   ;;  %vm1432_vm3 = vcmp.ge.f32.partialorder %v1066_v15, 0.0  ;;  %v1069_v27 = vadd.f32 %v3889_v13, %v3910_v28 }
 0x157   : > { %v1754_v24 = vsel %vm1498_vm2, %v1330_v8, %v1626_v14  ;;  %v1560_v21 = vmul.f32 0.01, %v1066_v15  ;;  %v3972_v29 = vpop.f32.mrb[57].mxu1  ;;  %v3974_v22 = vpop.f32.mrb[58].mxu0  ;;  %vm1496_vm4 = vcmp.ge.f32.partialorder %v1322_v16, 0.0  ;;  %vm1435_vm5 = vcmp.ge.f32.partialorder %v1077_v18, 0.0 }
 0x158   : > { %v1624_v25 = vmul.f32 0.01, %v1322_v16  ;;  %v1563_v30 = vmul.f32 0.01, %v1077_v18  ;;  %vm1499_vm6 = vcmp.ge.f32.partialorder %v1333_v19, 0.0  ;;  %vm1433_vm7 = vcmp.ge.f32.partialorder %v1069_v27, 0.0 }
 0x159   : > { %v1688_v26 = vsel %vm1432_vm3, %v1066_v15, %v1560_v21  ;;  %v1627_v31 = vmul.f32 0.01, %v1333_v19  ;;  %v3976_v32 = vpop.f32.mrb[58].mxu1  ;;  %v3978_v33 = vpop.f32.mrb[59].mxu0  ;;  %v1561_v28 = vmul.f32 0.01, %v1069_v27  ;;  %v1325_v37 = vadd.f32 %v3889_v13, %v3914_v34 }
 0x15a   : > { %v1752_v35 = vsel %vm1496_vm4, %v1322_v16, %v1624_v25  ;;  %v1691_v36 = vsel %vm1435_vm5, %v1077_v18, %v1563_v30  ;;  %v3982_v38 = vpop.f32.mrb[59].mxu1  ;;  %v1090_v41 = vadd.f32 %v3889_v13, %v3922_v45  ;;  %v1346_v42 = vadd.f32 %v3889_v13, %v3934_v50 }
 0x15b   : > { %v2990_v39 = vpack.c.bf16 %v1691_v36, %v1690_v17  ;;  %v1755_v40 = vsel %vm1499_vm6, %v1333_v19, %v1627_v31  ;;  %v1689_v44 = vsel %vm1433_vm7, %v1069_v27, %v1561_v28  ;;  %vm1497_vm8 = vcmp.ge.f32.partialorder %v1325_v37, 0.0 }
 0x15c   : > { %v3150_v43 = vpack.c.bf16 %v1755_v40, %v1754_v24  ;;  %v1625_v46 = vmul.f32 0.01, %v1325_v37  ;;  %v2985_v47 = vpack.c.bf16 %v1689_v44, %v1688_v26  ;;  %vm1438_vm9 = vcmp.ge.f32.partialorder %v1090_v41, 0.0 }
 0x15d   : > { %3206 = vst [vmem:[%s3720_s27 + $0xc8] sm:$0xff] %v2990_v39   ;;  %v1566_v34 = vmul.f32 0.01, %v1090_v41  ;;  %vm1502_vm10 = vcmp.ge.f32.partialorder %v1346_v42, 0.0  ;;  %v3989_v48 = vpop.f32.mrb[60].mxu0  ;;  %v1082_v45 = vadd.f32 %v3889_v13, %v3936_v51  ;;  %v1338_v50 = vadd.f32 %v3889_v13, %v3938_v55 }
 0x15e   : > { %3238 = vst [vmem:[%s3720_s27 + $0x1c8] sm:$0xff] %v3150_v43   ;;  %v1753_v49 = vsel %vm1497_vm8, %v1325_v37, %v1625_v46  ;;  %v1630_v52 = vmul.f32 0.01, %v1346_v42  ;;  %v3996_v53 = vpop.f32.mrb[60].mxu1  ;;  %v3998_v54 = vpop.f32.mrb[61].mxu0  ;;  %3205 = vst [vmem:[%s3720_s27 + $0xc0] sm:$0xff] %v2985_v47   ;;  %v1093_v59 = vadd.f32 %v3889_v13, %v3940_v56  ;;  %v1349_v60 = vadd.f32 %v3889_v13, %v3942_v61 }
 0x15f   : > { %v3145_v57 = vpack.c.bf16 %v1753_v49, %v1752_v35  ;;  %v1694_v58 = vsel %vm1438_vm9, %v1090_v41, %v1566_v34  ;;  %v4005_v63 = vpop.f32.mrb[61].mxu1  ;;  %v4007_v51 = vpop.f32.mrb[62].mxu0  ;;  %vm1436_vm11 = vcmp.ge.f32.partialorder %v1082_v45, 0.0  ;;  %v1564_v0 = vmul.f32 0.01, %v1082_v45 }
 0x160   : > { %v1758_v55 = vsel %vm1502_vm10, %v1346_v42, %v1630_v52  ;;  %vm1500_vm12 = vcmp.ge.f32.partialorder %v1338_v50, 0.0  ;;  %v4010_v1 = vpop.f32.mrb[62].mxu1  ;;  %v4012_v3 = vpop.f32.mrb[63].mxu0  ;;  %v1628_v5 = vmul.f32 0.01, %v1338_v50  ;;  %vm1439_vm13 = vcmp.ge.f32.partialorder %v1093_v59, 0.0 }
 0x161   : > { %3237 = vst [vmem:[%s3720_s27 + $0x1c0] sm:$0xff] %v3145_v57   ;;  %v1567_v56 = vmul.f32 0.01, %v1093_v59  ;;  %vm1503_vm14 = vcmp.ge.f32.partialorder %v1349_v60, 0.0  ;;  %v1692_v6 = vsel %vm1436_vm11, %v1082_v45, %v1564_v0  ;;  %v1631_v61 = vmul.f32 0.01, %v1349_v60 }
 0x162   : > { %v1085_v7 = vadd.f32 %v3889_v13, %v3944_v62  ;;  %v1341_v8 = vadd.f32 %v3889_v13, %v3948_v4  ;;  %v4019_v9 = vpop.f32.mrb[63].mxu1  ;;  %v1756_v10 = vsel %vm1500_vm12, %v1338_v50, %v1628_v5  ;;  %v1106_v12 = vadd.f32 %v3889_v13, %v3956_v2 }
 0x163   : > { %v1695_v11 = vsel %vm1439_vm13, %v1093_v59, %v1567_v56  ;;  %v1362_v14 = vadd.f32 %v3889_v13, %v3965_v20  ;;  %v1759_v17 = vsel %vm1503_vm14, %v1349_v60, %v1631_v61  ;;  %v1098_v20 = vadd.f32 %v3889_v13, %v3967_v23 }
 0x164   : > { %v3000_v15 = vpack.c.bf16 %v1695_v11, %v1694_v58  ;;  %vm1437_vm15 = vcmp.ge.f32.partialorder %v1085_v7, 0.0  ;;  %v1565_v16 = vmul.f32 0.01, %v1085_v7  ;;  %v3160_v18 = vpack.c.bf16 %v1759_v17, %v1758_v55 }
 0x165   : > { %vm1501_vm0 = vcmp.ge.f32.partialorder %v1341_v8, 0.0  ;;  %v1629_v62 = vmul.f32 0.01, %v1341_v8  ;;  %vm1442_vm1 = vcmp.ge.f32.partialorder %v1106_v12, 0.0  ;;  %v1570_v19 = vmul.f32 0.01, %v1106_v12 }
 0x166   : > { %3208 = vst [vmem:[%s3720_s27 + $0xd8] sm:$0xff] %v3000_v15   ;;  %v1693_v4 = vsel %vm1437_vm15, %v1085_v7, %v1565_v16  ;;  %vm1506_vm2 = vcmp.ge.f32.partialorder %v1362_v14, 0.0  ;;  %v1634_v24 = vmul.f32 0.01, %v1362_v14  ;;  %3240 = vst [vmem:[%s3720_s27 + $0x1d8] sm:$0xff] %v3160_v18   ;;  %v1354_v27 = vadd.f32 %v3889_v13, %v3972_v29 }
 0x167   : > { %v2995_v2 = vpack.c.bf16 %v1693_v4, %v1692_v6  ;;  %v1757_v21 = vsel %vm1501_vm0, %v1341_v8, %v1629_v62  ;;  %v1698_v30 = vsel %vm1442_vm1, %v1106_v12, %v1570_v19  ;;  %v1109_v31 = vadd.f32 %v3889_v13, %v3974_v22 }
 0x168   : > { %v3155_v25 = vpack.c.bf16 %v1757_v21, %v1756_v10  ;;  %v1762_v26 = vsel %vm1506_vm2, %v1362_v14, %v1634_v24  ;;  %vm1440_vm3 = vcmp.ge.f32.partialorder %v1098_v20, 0.0  ;;  %v1568_v35 = vmul.f32 0.01, %v1098_v20 }
 0x169   : > { %3207 = vst [vmem:[%s3720_s27 + $0xd0] sm:$0xff] %v2995_v2   ;;  %vm1504_vm4 = vcmp.ge.f32.partialorder %v1354_v27, 0.0  ;;  %v1632_v36 = vmul.f32 0.01, %v1354_v27  ;;  %vm1443_vm5 = vcmp.ge.f32.partialorder %v1109_v31, 0.0  ;;  %v1365_v23 = vadd.f32 %v3889_v13, %v3976_v32 }
 0x16a   : > { %3239 = vst [vmem:[%s3720_s27 + $0x1d0] sm:$0xff] %v3155_v25   ;;  %v1571_v28 = vmul.f32 0.01, %v1109_v31  ;;  %v1101_v29 = vadd.f32 %v3889_v13, %v3978_v33  ;;  %v1696_v37 = vsel %vm1440_vm3, %v1098_v20, %v1568_v35  ;;  %v1357_v22 = vadd.f32 %v3889_v13, %v3982_v38 }
 0x16b   : > { %v1760_v39 = vsel %vm1504_vm4, %v1354_v27, %v1632_v36  ;;  %v1122_v40 = vadd.f32 %v3889_v13, %v3989_v48  ;;  %vm1507_vm6 = vcmp.ge.f32.partialorder %v1365_v23, 0.0  ;;  %v1635_v42 = vmul.f32 0.01, %v1365_v23 }
 0x16c   : > { %v1699_v41 = vsel %vm1443_vm5, %v1109_v31, %v1571_v28  ;;  %vm1441_vm7 = vcmp.ge.f32.partialorder %v1101_v29, 0.0  ;;  %v1569_v44 = vmul.f32 0.01, %v1101_v29  ;;  %vm1505_vm8 = vcmp.ge.f32.partialorder %v1357_v22, 0.0 }
 0x16d   : > { %v3010_v43 = vpack.c.bf16 %v1699_v41, %v1698_v30  ;;  %v1633_v32 = vmul.f32 0.01, %v1357_v22  ;;  %v1763_v33 = vsel %vm1507_vm6, %v1365_v23, %v1635_v42  ;;  %vm1446_vm9 = vcmp.ge.f32.partialorder %v1122_v40, 0.0 }
 0x16e   : > { %v1574_v46 = vmul.f32 0.01, %v1122_v40  ;;  %v1378_v38 = vadd.f32 %v3889_v13, %v3996_v53  ;;  %v3170_v47 = vpack.c.bf16 %v1763_v33, %v1762_v26  ;;  %v1697_v34 = vsel %vm1441_vm7, %v1101_v29, %v1569_v44 }
 0x16f   : > { %3210 = vst [vmem:[%s3720_s27 + $0xe8] sm:$0xff] %v3010_v43   ;;  %v1761_v48 = vsel %vm1505_vm8, %v1357_v22, %v1633_v32  ;;  %v1114_v49 = vadd.f32 %v3889_v13, %v3998_v54  ;;  %v3005_v52 = vpack.c.bf16 %v1697_v34, %v1696_v37  ;;  %v1370_v58 = vadd.f32 %v3889_v13, %v4005_v63 }
 0x170   : > { %v3165_v45 = vpack.c.bf16 %v1761_v48, %v1760_v39  ;;  %3242 = vst [vmem:[%s3720_s27 + $0x1e8] sm:$0xff] %v3170_v47   ;;  %v1702_v50 = vsel %vm1446_vm9, %v1122_v40, %v1574_v46  ;;  %v1638_v57 = vmul.f32 0.01, %v1378_v38  ;;  %v1125_v53 = vadd.f32 %v3889_v13, %v4007_v51 }
 0x171   : > { %3209 = vst [vmem:[%s3720_s27 + $0xe0] sm:$0xff] %v3005_v52   ;;  %v1381_v59 = vadd.f32 %v3889_v13, %v4010_v1  ;;  %v1117_v60 = vadd.f32 %v3889_v13, %v4012_v3  ;;  %v1373_v54 = vadd.f32 %v3889_v13, %v4019_v9  ;;  %vm1510_vm10 = vcmp.ge.f32.partialorder %v1378_v38, 0.0 }
 0x172   : > { %3241 = vst [vmem:[%s3720_s27 + $0x1e0] sm:$0xff] %v3165_v45   ;;  %vm1444_vm11 = vcmp.ge.f32.partialorder %v1114_v49, 0.0  ;;  %v1572_v55 = vmul.f32 0.01, %v1114_v49  ;;  %v1636_v0 = vmul.f32 0.01, %v1370_v58  ;;  %v1766_v1 = vsel %vm1510_vm10, %v1378_v38, %v1638_v57 }
 0x173   : > { %vm1447_vm12 = vcmp.ge.f32.partialorder %v1125_v53, 0.0  ;;  %v1575_v63 = vmul.f32 0.01, %v1125_v53  ;;  %vm1511_vm13 = vcmp.ge.f32.partialorder %v1381_v59, 0.0  ;;  %v1639_v5 = vmul.f32 0.01, %v1381_v59 }
 0x174   : > { %vm1508_vm14 = vcmp.ge.f32.partialorder %v1370_v58, 0.0  ;;  %vm1445_vm15 = vcmp.ge.f32.partialorder %v1117_v60, 0.0  ;;  %v1573_v51 = vmul.f32 0.01, %v1117_v60  ;;  %vm1509_vm0 = vcmp.ge.f32.partialorder %v1373_v54, 0.0 }
 0x175   : > { %v1703_v3 = vsel %vm1447_vm12, %v1125_v53, %v1575_v63  ;;  %v1767_v56 = vsel %vm1511_vm13, %v1381_v59, %v1639_v5  ;;  %v1637_v13 = vmul.f32 0.01, %v1373_v54  ;;  %v1700_v6 = vsel %vm1444_vm11, %v1114_v49, %v1572_v55 }
 0x176   : > { %v3020_v61 = vpack.c.bf16 %v1703_v3, %v1702_v50  ;;  %v3180_v7 = vpack.c.bf16 %v1767_v56, %v1766_v1  ;;  %v1701_v8 = vsel %vm1445_vm15, %v1117_v60, %v1573_v51  ;;  %v1764_v9 = vsel %vm1508_vm14, %v1370_v58, %v1636_v0 }
 0x177   : > { %v3015_v10 = vpack.c.bf16 %v1701_v8, %v1700_v6  ;;  %v1765_v11 = vsel %vm1509_vm0, %v1373_v54, %v1637_v13 }
 0x178   : > { %3212 = vst [vmem:[%s3720_s27 + $0xf8] sm:$0xff] %v3020_v61   ;;  %3244 = vst [vmem:[%s3720_s27 + $0x1f8] sm:$0xff] %v3180_v7   ;;  %v3175_v12 = vpack.c.bf16 %v1765_v11, %v1764_v9 }
 0x179   : > { %3211 = vst [vmem:[%s3720_s27 + $0xf0] sm:$0xff] %v3015_v10  }
 0x17a   : > { %3243 = vst [vmem:[%s3720_s27 + $0x1f0] sm:$0xff] %v3175_v12  }
 0x17b PF: > { %s13_s12 = sadd.s32 1, %s3528_s12  }
 0x17c   : > { %p10_p4 = scmp.ge.s32.totalorder %s13_s12, 4  }
 0x17e   :  { %12 = sbr.rel (!%p10_p4) target bundleno = 1 (0x1), region = 62 }

// kernel: forward.7
= control target key start
LH: loop header
LB: loop body
LE: loop exit
PB: predicated region body
PF: predicated region fallthrough
CT: control target
= control target key end

     0   :  { %s7054_s12 = smov 0   ;;  %s8650_s0 = inlined_call_operand.vmem [shape: bf16[8192,80], index: 0, kind: input, shape index: {}]   ;;  %s8651_s1 = inlined_call_operand.vmem [shape: bf16[80,128], index: 1, kind: input, shape index: {}]   ;;  %s8652_s2 = inlined_call_operand.vmem [shape: f32[1,128], index: 2, kind: input, shape index: {}]   ;;  %s8653_s3 = inlined_call_operand.vmem [shape: f32[8192,128], index: 3, kind: output, shape index: {}]  }
   0x1 LB: > { %s5432_s13 = sadd.s32 4294967295, %s7032_s12   ;;  %p5436_p0 = scmp.ge.s32.totalorder %s7032_s12, 1  ;;  %s7032_s12 = sphi %s7054_s12, %s13_s12  }
   0x2   : > { %p138_p1 = scmp.lt.s32.totalorder %s7032_s12, 3 }
   0x4   : > { %p139_p2 = pnand %p5436_p0, %p138_p1 }
   0x5   : > { %v6762_v0 = vld [vmem:[%s8651_s1] sm:$0xff] (!%p139_p2)   ;;  %s5437_s16 = sshll.u32 (!%p139_p2), %s5432_s13, 9  ;;  %v6763_v1 = vld [vmem:[%s8651_s1 + $0x8] sm:$0xff] (!%p139_p2)   ;;  %v6764_v2 = vld [vmem:[%s8651_s1 + $0x10] sm:$0xff] (!%p139_p2)   ;;  %vm2014_vm0 = vcmask (!%p139_p2), 654336  }
   0x6   : > { %142 = sbr.rel (%p139_p2) target bundleno = 748 (0x2ec), region = 32  ;;  %p163_p3 = scmp.lt.s32.totalorder (!%p139_p2), %s5437_s16, 1023  ;;  %6222 = vmatprep.subr.bf16.mxu0 (!%p139_p2), %v6762_v0  ;;  %6744 = vmatprep.subr.bf16.mxu1 (!%p139_p2), %v6762_v0  ;;  %v6765_v3 = vld [vmem:[%s8651_s1 + $0x18] sm:$0xff] (!%p139_p2)   ;;  %v6766_v6 = vld [vmem:[%s8651_s1 + $0x20] sm:$0xff] (!%p139_p2)  }
   0x7   : > { %6223 = vmatpush3.bf16.msra.mxu0 (!%p139_p2), %v6762_v0  ;;  %6749 = vmatpush3.bf16.msra.mxu1 (!%p139_p2), %v6762_v0 }
   0x8   : > { %6224 = vmatprep.subr.bf16.mxu0 (!%p139_p2), %v6763_v1  ;;  %6745 = vmatprep.subr.bf16.mxu1 (!%p139_p2), %v6763_v1 }
   0xb   : > { %6225 = vmatpush3.bf16.msra.mxu0 (!%p139_p2), %v6763_v1  ;;  %6750 = vmatpush3.bf16.msra.mxu1 (!%p139_p2), %v6763_v1 }
   0xc   : > { %6226 = vmatprep.subr.bf16.mxu0 (!%p139_p2), %v6764_v2  ;;  %6746 = vmatprep.subr.bf16.mxu1 (!%p139_p2), %v6764_v2 }
   0xd   : > { %s8655_s16 = smov (!%p163_p3, %s5437_s16), 1023 }
   0xe   : > { %s5438_s21 = sshll.u32 %s8655_s16, 2  ;;  %s5440_s29 = sshll.u32 %s8655_s16, 3 }
   0xf   : > { %s7080_s26 = scalar_lea.vmem %s8650_s0, %s5438_s21  ;;  %6227 = vmatpush3.bf16.msra.mxu0 %v6764_v2  ;;  %6751 = vmatpush3.bf16.msra.mxu1 %v6764_v2  ;;  %s7316_s7 = scalar_lea.vmem %s8653_s3, %s5440_s29 }
  0x10   : > { %v6767_v4 = vld [vmem:[%s7080_s26] sm:$0xff]   ;;  %6228 = vmatprep.subr.bf16.mxu0 %v6765_v3  ;;  %6747 = vmatprep.subr.bf16.mxu1 %v6765_v3  ;;  %v6769_v7 = vld [vmem:[%s7080_s26 + $0x8] sm:$0xff]   ;;  %v6771_v9 = vld [vmem:[%s7080_s26 + $0x10] sm:$0xff]  }
  0x11   : > { %v6768_v5 = vld [vmem:[%s7080_s26 + $0x400] sm:$0xff]   ;;  %6232 = vmatprep.mubr.msk.bf16.mxu0 %vm2014_vm0, %v6767_v4  ;;  %v6770_v8 = vld [vmem:[%s7080_s26 + $0x408] sm:$0xff]   ;;  %v6772_v10 = vld [vmem:[%s7080_s26 + $0x410] sm:$0xff]  }
  0x12   : > { %6488 = vmatprep.mubr.msk.bf16.mxu1 %vm2014_vm0, %v6768_v5  ;;  %v6773_v11 = vld [vmem:[%s7080_s26 + $0x18] sm:$0xff]   ;;  %v6775_v13 = vld [vmem:[%s7080_s26 + $0x20] sm:$0xff]   ;;  %v6777_v15 = vld [vmem:[%s7080_s26 + $0x28] sm:$0xff]  }
  0x13   : > { %6229 = vmatpush3.bf16.msra.mxu0 %v6765_v3  ;;  %6752 = vmatpush3.bf16.msra.mxu1 %v6765_v3  ;;  %v6774_v12 = vld [vmem:[%s7080_s26 + $0x418] sm:$0xff]   ;;  %v6776_v14 = vld [vmem:[%s7080_s26 + $0x420] sm:$0xff]   ;;  %v6778_v16 = vld [vmem:[%s7080_s26 + $0x428] sm:$0xff]  }
  0x14   : > { %6230 = vmatprep.subr.bf16.mxu0 %v6766_v6  ;;  %6748 = vmatprep.subr.bf16.mxu1 %v6766_v6  ;;  %v6779_v17 = vld [vmem:[%s7080_s26 + $0x30] sm:$0xff]   ;;  %v6781_v19 = vld [vmem:[%s7080_s26 + $0x38] sm:$0xff]   ;;  %v6783_v21 = vld [vmem:[%s7080_s26 + $0x40] sm:$0xff]  }
  0x15   : > { %v6780_v18 = vld [vmem:[%s7080_s26 + $0x430] sm:$0xff]   ;;  %v6782_v20 = vld [vmem:[%s7080_s26 + $0x438] sm:$0xff]   ;;  %v6784_v22 = vld [vmem:[%s7080_s26 + $0x440] sm:$0xff]  }
  0x16   : > { %v6785_v23 = vld [vmem:[%s7080_s26 + $0x48] sm:$0xff]   ;;  %v6787_v25 = vld [vmem:[%s7080_s26 + $0x50] sm:$0xff]   ;;  %v6789_v27 = vld [vmem:[%s7080_s26 + $0x58] sm:$0xff]  }
  0x17   : > { %6231 = vmatpush3.bf16.msra.mxu0 %v6766_v6  ;;  %6753 = vmatpush3.bf16.msra.mxu1 %v6766_v6  ;;  %v6786_v24 = vld [vmem:[%s7080_s26 + $0x448] sm:$0xff]   ;;  %v6788_v26 = vld [vmem:[%s7080_s26 + $0x450] sm:$0xff]   ;;  %v6790_v28 = vld [vmem:[%s7080_s26 + $0x458] sm:$0xff]  }
  0x18   : > { %v6791_v29 = vld [vmem:[%s7080_s26 + $0x60] sm:$0xff]   ;;  %v6793_v31 = vld [vmem:[%s7080_s26 + $0x68] sm:$0xff]   ;;  %v6795_v33 = vld [vmem:[%s7080_s26 + $0x70] sm:$0xff]  }
  0x19   : > { %v6792_v30 = vld [vmem:[%s7080_s26 + $0x460] sm:$0xff]   ;;  %v6794_v32 = vld [vmem:[%s7080_s26 + $0x468] sm:$0xff]   ;;  %v6796_v34 = vld [vmem:[%s7080_s26 + $0x470] sm:$0xff]  }
  0x1a   : > { %6233 = vmatmul.mubr.msk.bf16.vlgmr.msra.gmra.mrb[0].mxu0 %vm2014_vm0, %v6769_v7  ;;  %6489 = vmatmul.mubr.msk.bf16.vlgmr.msra.gmra.mrb[0].mxu1 %vm2014_vm0, %v6770_v8  ;;  %v6797_v35 = vld [vmem:[%s7080_s26 + $0x78] sm:$0xff]   ;;  %v6799_v37 = vld [vmem:[%s7080_s26 + $0x80] sm:$0xff]   ;;  %v6801_v39 = vld [vmem:[%s7080_s26 + $0x88] sm:$0xff]  }
  0x1b   : > { %6236 = vmatprep.mubr.msk.bf16.mxu0 %vm2014_vm0, %v6771_v9  ;;  %6492 = vmatprep.mubr.msk.bf16.mxu1 %vm2014_vm0, %v6772_v10  ;;  %v6798_v36 = vld [vmem:[%s7080_s26 + $0x478] sm:$0xff]   ;;  %v6800_v38 = vld [vmem:[%s7080_s26 + $0x480] sm:$0xff]   ;;  %v6802_v40 = vld [vmem:[%s7080_s26 + $0x488] sm:$0xff]  }
  0x1c   : > { %v6803_v41 = vld [vmem:[%s7080_s26 + $0x90] sm:$0xff]   ;;  %v6805_v43 = vld [vmem:[%s7080_s26 + $0x98] sm:$0xff]   ;;  %v6807_v45 = vld [vmem:[%s7080_s26 + $0xa0] sm:$0xff]  }
  0x1d   : > { %v6804_v42 = vld [vmem:[%s7080_s26 + $0x490] sm:$0xff]   ;;  %v6806_v44 = vld [vmem:[%s7080_s26 + $0x498] sm:$0xff]   ;;  %v6808_v46 = vld [vmem:[%s7080_s26 + $0x4a0] sm:$0xff]  }
  0x1e   : > { %v6809_v47 = vld [vmem:[%s7080_s26 + $0xa8] sm:$0xff]   ;;  %v6811_v49 = vld [vmem:[%s7080_s26 + $0xb0] sm:$0xff]   ;;  %v6813_v51 = vld [vmem:[%s7080_s26 + $0xb8] sm:$0xff]  }
  0x1f   : > { %v6810_v48 = vld [vmem:[%s7080_s26 + $0x4a8] sm:$0xff]   ;;  %v6812_v50 = vld [vmem:[%s7080_s26 + $0x4b0] sm:$0xff]   ;;  %v6814_v52 = vld [vmem:[%s7080_s26 + $0x4b8] sm:$0xff]  }
  0x20   : > { %v6815_v53 = vld [vmem:[%s7080_s26 + $0xc0] sm:$0xff]   ;;  %v6817_v55 = vld [vmem:[%s7080_s26 + $0xc8] sm:$0xff]   ;;  %v6819_v57 = vld [vmem:[%s7080_s26 + $0xd0] sm:$0xff]  }
  0x21   : > { %v6816_v54 = vld [vmem:[%s7080_s26 + $0x4c0] sm:$0xff]   ;;  %v6818_v56 = vld [vmem:[%s7080_s26 + $0x4c8] sm:$0xff]   ;;  %v6820_v58 = vld [vmem:[%s7080_s26 + $0x4d0] sm:$0xff]  }
  0x22   : > { %6237 = vmatmul.mubr.msk.bf16.gmra.mrb[4].mxu0 %vm2014_vm0, %v6773_v11  ;;  %6493 = vmatmul.mubr.msk.bf16.gmra.mrb[4].mxu1 %vm2014_vm0, %v6774_v12  ;;  %v6821_v59 = vld [vmem:[%s7080_s26 + $0xd8] sm:$0xff]   ;;  %v6823_v61 = vld [vmem:[%s7080_s26 + $0xe0] sm:$0xff]   ;;  %v6825_v63 = vld [vmem:[%s7080_s26 + $0xe8] sm:$0xff]  }
  0x23   : > { %6240 = vmatprep.mubr.msk.bf16.mxu0 %vm2014_vm0, %v6775_v13  ;;  %6496 = vmatprep.mubr.msk.bf16.mxu1 %vm2014_vm0, %v6776_v14  ;;  %v6822_v60 = vld [vmem:[%s7080_s26 + $0x4d8] sm:$0xff]   ;;  %v6824_v62 = vld [vmem:[%s7080_s26 + $0x4e0] sm:$0xff]   ;;  %v6826_v0 = vld [vmem:[%s7080_s26 + $0x4e8] sm:$0xff]  }
  0x24   : > { %v6827_v1 = vld [vmem:[%s7080_s26 + $0xf0] sm:$0xff]   ;;  %v6829_v3 = vld [vmem:[%s7080_s26 + $0xf8] sm:$0xff]   ;;  %v6831_v5 = vld [vmem:[%s7080_s26 + $0x100] sm:$0xff]  }
  0x25   : > { %v6828_v2 = vld [vmem:[%s7080_s26 + $0x4f0] sm:$0xff]   ;;  %v6830_v4 = vld [vmem:[%s7080_s26 + $0x4f8] sm:$0xff]   ;;  %v6832_v6 = vld [vmem:[%s7080_s26 + $0x500] sm:$0xff]  }
  0x26   : > { %v6833_v7 = vld [vmem:[%s7080_s26 + $0x108] sm:$0xff]   ;;  %v6835_v9 = vld [vmem:[%s7080_s26 + $0x110] sm:$0xff]   ;;  %v6837_v11 = vld [vmem:[%s7080_s26 + $0x118] sm:$0xff]  }
  0x27   : > { %v6834_v8 = vld [vmem:[%s7080_s26 + $0x508] sm:$0xff]   ;;  %v6836_v10 = vld [vmem:[%s7080_s26 + $0x510] sm:$0xff]   ;;  %v6838_v12 = vld [vmem:[%s7080_s26 + $0x518] sm:$0xff]  }
  0x28   : > { %v6839_v13 = vld [vmem:[%s7080_s26 + $0x120] sm:$0xff]  }
  0x29   : > { %v6840_v14 = vld [vmem:[%s7080_s26 + $0x520] sm:$0xff]  }
  0x2a   : > { %6241 = vmatmul.mubr.msk.bf16.gmra.mrb[8].mxu0 %vm2014_vm0, %v6777_v15  ;;  %6497 = vmatmul.mubr.msk.bf16.gmra.mrb[8].mxu1 %vm2014_vm0, %v6778_v16  ;;  %v6841_v15 = vld [vmem:[%s7080_s26 + $0x128] sm:$0xff]  }
  0x2b   : > { %6244 = vmatprep.mubr.msk.bf16.mxu0 %vm2014_vm0, %v6779_v17  ;;  %6500 = vmatprep.mubr.msk.bf16.mxu1 %vm2014_vm0, %v6780_v18  ;;  %v6842_v16 = vld [vmem:[%s7080_s26 + $0x528] sm:$0xff]   ;;  %v6843_v17 = vld [vmem:[%s7080_s26 + $0x130] sm:$0xff]  }
  0x2c   : > { %v6844_v18 = vld [vmem:[%s7080_s26 + $0x530] sm:$0xff]  }
  0x32   : > { %6245 = vmatmul.mubr.msk.bf16.gmra.mrb[12].mxu0 %vm2014_vm0, %v6781_v19  ;;  %6501 = vmatmul.mubr.msk.bf16.gmra.mrb[12].mxu1 %vm2014_vm0, %v6782_v20  ;;  %v6845_v19 = vld [vmem:[%s7080_s26 + $0x138] sm:$0xff]  }
  0x33   : > { %6248 = vmatprep.mubr.msk.bf16.mxu0 %vm2014_vm0, %v6783_v21  ;;  %6504 = vmatprep.mubr.msk.bf16.mxu1 %vm2014_vm0, %v6784_v22  ;;  %v6846_v20 = vld [vmem:[%s7080_s26 + $0x538] sm:$0xff]   ;;  %v6847_v21 = vld [vmem:[%s7080_s26 + $0x140] sm:$0xff]  }
  0x34   : > { %v6848_v22 = vld [vmem:[%s7080_s26 + $0x540] sm:$0xff]  }
  0x3a   : > { %6249 = vmatmul.mubr.msk.bf16.gmra.mrb[16].mxu0 %vm2014_vm0, %v6785_v23  ;;  %6505 = vmatmul.mubr.msk.bf16.gmra.mrb[16].mxu1 %vm2014_vm0, %v6786_v24  ;;  %v6849_v23 = vld [vmem:[%s7080_s26 + $0x148] sm:$0xff]  }
  0x3b   : > { %6252 = vmatprep.mubr.msk.bf16.mxu0 %vm2014_vm0, %v6787_v25  ;;  %6508 = vmatprep.mubr.msk.bf16.mxu1 %vm2014_vm0, %v6788_v26  ;;  %v6850_v24 = vld [vmem:[%s7080_s26 + $0x548] sm:$0xff]   ;;  %v6851_v25 = vld [vmem:[%s7080_s26 + $0x150] sm:$0xff]  }
  0x3c   : > { %v6852_v26 = vld [vmem:[%s7080_s26 + $0x550] sm:$0xff]  }
  0x42   : > { %6253 = vmatmul.mubr.msk.bf16.gmra.mrb[20].mxu0 %vm2014_vm0, %v6789_v27  ;;  %6509 = vmatmul.mubr.msk.bf16.gmra.mrb[20].mxu1 %vm2014_vm0, %v6790_v28  ;;  %v6853_v27 = vld [vmem:[%s7080_s26 + $0x158] sm:$0xff]  }
  0x43   : > { %6256 = vmatprep.mubr.msk.bf16.mxu0 %vm2014_vm0, %v6791_v29  ;;  %6512 = vmatprep.mubr.msk.bf16.mxu1 %vm2014_vm0, %v6792_v30  ;;  %v6854_v28 = vld [vmem:[%s7080_s26 + $0x558] sm:$0xff]   ;;  %v6855_v29 = vld [vmem:[%s7080_s26 + $0x160] sm:$0xff]  }
  0x44   : > { %v6856_v30 = vld [vmem:[%s7080_s26 + $0x560] sm:$0xff]  }
  0x4a   : > { %6257 = vmatmul.mubr.msk.bf16.gmra.mrb[24].mxu0 %vm2014_vm0, %v6793_v31  ;;  %6513 = vmatmul.mubr.msk.bf16.gmra.mrb[24].mxu1 %vm2014_vm0, %v6794_v32  ;;  %v6857_v31 = vld [vmem:[%s7080_s26 + $0x168] sm:$0xff]  }
  0x4b   : > { %6260 = vmatprep.mubr.msk.bf16.mxu0 %vm2014_vm0, %v6795_v33  ;;  %6516 = vmatprep.mubr.msk.bf16.mxu1 %vm2014_vm0, %v6796_v34  ;;  %v6858_v32 = vld [vmem:[%s7080_s26 + $0x568] sm:$0xff]   ;;  %v6859_v33 = vld [vmem:[%s7080_s26 + $0x170] sm:$0xff]  }
  0x4c   : > { %v6860_v34 = vld [vmem:[%s7080_s26 + $0x570] sm:$0xff]  }
  0x52   : > { %6261 = vmatmul.mubr.msk.bf16.gmra.mrb[28].mxu0 %vm2014_vm0, %v6797_v35  ;;  %6517 = vmatmul.mubr.msk.bf16.gmra.mrb[28].mxu1 %vm2014_vm0, %v6798_v36  ;;  %v6861_v35 = vld [vmem:[%s7080_s26 + $0x178] sm:$0xff]  }
  0x53   : > { %6264 = vmatprep.mubr.msk.bf16.mxu0 %vm2014_vm0, %v6799_v37  ;;  %6520 = vmatprep.mubr.msk.bf16.mxu1 %vm2014_vm0, %v6800_v38  ;;  %v6862_v36 = vld [vmem:[%s7080_s26 + $0x578] sm:$0xff]   ;;  %v6863_v37 = vld [vmem:[%s7080_s26 + $0x180] sm:$0xff]  }
  0x54   : > { %v6864_v38 = vld [vmem:[%s7080_s26 + $0x580] sm:$0xff]  }
  0x5a   : > { %6265 = vmatmul.mubr.msk.bf16.gmra.mrb[32].mxu0 %vm2014_vm0, %v6801_v39  ;;  %6521 = vmatmul.mubr.msk.bf16.gmra.mrb[32].mxu1 %vm2014_vm0, %v6802_v40  ;;  %v6865_v39 = vld [vmem:[%s7080_s26 + $0x188] sm:$0xff]  }
  0x5b   : > { %6268 = vmatprep.mubr.msk.bf16.mxu0 %vm2014_vm0, %v6803_v41  ;;  %6524 = vmatprep.mubr.msk.bf16.mxu1 %vm2014_vm0, %v6804_v42  ;;  %v6866_v40 = vld [vmem:[%s7080_s26 + $0x588] sm:$0xff]   ;;  %v6867_v41 = vld [vmem:[%s7080_s26 + $0x190] sm:$0xff]  }
  0x5c   : > { %v6868_v42 = vld [vmem:[%s7080_s26 + $0x590] sm:$0xff]  }
  0x62   : > { %6269 = vmatmul.mubr.msk.bf16.gmra.mrb[36].mxu0 %vm2014_vm0, %v6805_v43  ;;  %6525 = vmatmul.mubr.msk.bf16.gmra.mrb[36].mxu1 %vm2014_vm0, %v6806_v44  ;;  %v6869_v43 = vld [vmem:[%s7080_s26 + $0x198] sm:$0xff]  }
  0x63   : > { %6272 = vmatprep.mubr.msk.bf16.mxu0 %vm2014_vm0, %v6807_v45  ;;  %6528 = vmatprep.mubr.msk.bf16.mxu1 %vm2014_vm0, %v6808_v46  ;;  %v6870_v44 = vld [vmem:[%s7080_s26 + $0x598] sm:$0xff]   ;;  %v6871_v45 = vld [vmem:[%s7080_s26 + $0x1a0] sm:$0xff]  }
  0x64   : > { %v6872_v46 = vld [vmem:[%s7080_s26 + $0x5a0] sm:$0xff]  }
  0x6a   : > { %6273 = vmatmul.mubr.msk.bf16.gmra.mrb[40].mxu0 %vm2014_vm0, %v6809_v47  ;;  %6529 = vmatmul.mubr.msk.bf16.gmra.mrb[40].mxu1 %vm2014_vm0, %v6810_v48  ;;  %v6873_v47 = vld [vmem:[%s7080_s26 + $0x1a8] sm:$0xff]  }
  0x6b   : > { %6276 = vmatprep.mubr.msk.bf16.mxu0 %vm2014_vm0, %v6811_v49  ;;  %6532 = vmatprep.mubr.msk.bf16.mxu1 %vm2014_vm0, %v6812_v50  ;;  %v6874_v48 = vld [vmem:[%s7080_s26 + $0x5a8] sm:$0xff]   ;;  %v6875_v49 = vld [vmem:[%s7080_s26 + $0x1b0] sm:$0xff]  }
  0x6c   : > { %v6876_v50 = vld [vmem:[%s7080_s26 + $0x5b0] sm:$0xff]  }
  0x72   : > { %6277 = vmatmul.mubr.msk.bf16.gmra.mrb[44].mxu0 %vm2014_vm0, %v6813_v51  ;;  %6533 = vmatmul.mubr.msk.bf16.gmra.mrb[44].mxu1 %vm2014_vm0, %v6814_v52  ;;  %v7305_v51 = vld [vmem:[%s8652_s2] ss:$0 sm:$0xff]  ;;  %v6877_v52 = vld [vmem:[%s7080_s26 + $0x1b8] sm:$0xff]  }
  0x73   : > { %6280 = vmatprep.mubr.msk.bf16.mxu0 %vm2014_vm0, %v6815_v53  ;;  %6536 = vmatprep.mubr.msk.bf16.mxu1 %vm2014_vm0, %v6816_v54  ;;  %v6878_v53 = vld [vmem:[%s7080_s26 + $0x5b8] sm:$0xff]  }
  0x7a   : > { %6281 = vmatmul.mubr.msk.bf16.gmra.mrb[48].mxu0 %vm2014_vm0, %v6817_v55  ;;  %6537 = vmatmul.mubr.msk.bf16.gmra.mrb[48].mxu1 %vm2014_vm0, %v6818_v56 }
  0x7b   : > { %6284 = vmatprep.mubr.msk.bf16.mxu0 %vm2014_vm0, %v6819_v57  ;;  %6540 = vmatprep.mubr.msk.bf16.mxu1 %vm2014_vm0, %v6820_v58 }
  0x82   : > { %6285 = vmatmul.mubr.msk.bf16.gmra.mrb[52].mxu0 %vm2014_vm0, %v6821_v59  ;;  %6541 = vmatmul.mubr.msk.bf16.gmra.mrb[52].mxu1 %vm2014_vm0, %v6822_v60 }
  0x83   : > { %6288 = vmatprep.mubr.msk.bf16.mxu0 %vm2014_vm0, %v6823_v61  ;;  %6544 = vmatprep.mubr.msk.bf16.mxu1 %vm2014_vm0, %v6824_v62 }
  0x8a   : > { %6289 = vmatmul.mubr.msk.bf16.gmra.mrb[56].mxu0 %vm2014_vm0, %v6825_v63  ;;  %6545 = vmatmul.mubr.msk.bf16.gmra.mrb[56].mxu1 %vm2014_vm0, %v6826_v0  ;;  %v6879_v0 = vld [vmem:[%s7080_s26 + $0x1c0] sm:$0xff]  }
  0x8b   : > { %6292 = vmatprep.mubr.msk.bf16.mxu0 %vm2014_vm0, %v6827_v1  ;;  %6548 = vmatprep.mubr.msk.bf16.mxu1 %vm2014_vm0, %v6828_v2  ;;  %v6880_v1 = vld [vmem:[%s7080_s26 + $0x5c0] sm:$0xff]  }
  0x92   : > { %6293 = vmatmul.mubr.msk.bf16.gmra.mrb[60].mxu0 %vm2014_vm0, %v6829_v3  ;;  %6549 = vmatmul.mubr.msk.bf16.gmra.mrb[60].mxu1 %vm2014_vm0, %v6830_v4 }
  0x93   : > { %6296 = vmatprep.mubr.msk.bf16.mxu0 %vm2014_vm0, %v6831_v5  ;;  %6552 = vmatprep.mubr.msk.bf16.mxu1 %vm2014_vm0, %v6832_v6 }
  0x9a   : > { %6297 = vmatmul.mubr.msk.bf16.gmra.mrb[64].mxu0 %vm2014_vm0, %v6833_v7  ;;  %6553 = vmatmul.mubr.msk.bf16.gmra.mrb[64].mxu1 %vm2014_vm0, %v6834_v8 }
  0x9b   : > { %6300 = vmatprep.mubr.msk.bf16.mxu0 %vm2014_vm0, %v6835_v9  ;;  %6556 = vmatprep.mubr.msk.bf16.mxu1 %vm2014_vm0, %v6836_v10 }
  0xa2   : > { %6301 = vmatmul.mubr.msk.bf16.gmra.mrb[68].mxu0 %vm2014_vm0, %v6837_v11  ;;  %6557 = vmatmul.mubr.msk.bf16.gmra.mrb[68].mxu1 %vm2014_vm0, %v6838_v12 }
  0xa3   : > { %6304 = vmatprep.mubr.msk.bf16.mxu0 %vm2014_vm0, %v6839_v13  ;;  %6560 = vmatprep.mubr.msk.bf16.mxu1 %vm2014_vm0, %v6840_v14  ;;  %v6881_v14 = vld [vmem:[%s7080_s26 + $0x1c8] sm:$0xff]  }
  0xaa   : > { %6305 = vmatmul.mubr.msk.bf16.gmra.mrb[72].mxu0 %vm2014_vm0, %v6841_v15  ;;  %6561 = vmatmul.mubr.msk.bf16.gmra.mrb[72].mxu1 %vm2014_vm0, %v6842_v16  ;;  %v6882_v15 = vld [vmem:[%s7080_s26 + $0x5c8] sm:$0xff]  }
  0xab   : > { %6308 = vmatprep.mubr.msk.bf16.mxu0 %vm2014_vm0, %v6843_v17  ;;  %6564 = vmatprep.mubr.msk.bf16.mxu1 %vm2014_vm0, %v6844_v18 }
  0xb2   : > { %6309 = vmatmul.mubr.msk.bf16.gmra.mrb[76].mxu0 %vm2014_vm0, %v6845_v19  ;;  %6565 = vmatmul.mubr.msk.bf16.gmra.mrb[76].mxu1 %vm2014_vm0, %v6846_v20  ;;  %v6883_v20 = vld [vmem:[%s7080_s26 + $0x1d0] sm:$0xff]  }
  0xb3   : > { %6312 = vmatprep.mubr.msk.bf16.mxu0 %vm2014_vm0, %v6847_v21  ;;  %6568 = vmatprep.mubr.msk.bf16.mxu1 %vm2014_vm0, %v6848_v22  ;;  %v6884_v21 = vld [vmem:[%s7080_s26 + $0x5d0] sm:$0xff]  }
  0xba   : > { %6313 = vmatmul.mubr.msk.bf16.gmra.mrb[80].mxu0 %vm2014_vm0, %v6849_v23  ;;  %6569 = vmatmul.mubr.msk.bf16.gmra.mrb[80].mxu1 %vm2014_vm0, %v6850_v24 }
  0xbb   : > { %6316 = vmatprep.mubr.msk.bf16.mxu0 %vm2014_vm0, %v6851_v25  ;;  %6572 = vmatprep.mubr.msk.bf16.mxu1 %vm2014_vm0, %v6852_v26 }
  0xc2   : > { %6317 = vmatmul.mubr.msk.bf16.gmra.mrb[84].mxu0 %vm2014_vm0, %v6853_v27  ;;  %6573 = vmatmul.mubr.msk.bf16.gmra.mrb[84].mxu1 %vm2014_vm0, %v6854_v28 }
  0xc3   : > { %6320 = vmatprep.mubr.msk.bf16.mxu0 %vm2014_vm0, %v6855_v29  ;;  %6576 = vmatprep.mubr.msk.bf16.mxu1 %vm2014_vm0, %v6856_v30 }
  0xca   : > { %6321 = vmatmul.mubr.msk.bf16.gmra.mrb[88].mxu0 %vm2014_vm0, %v6857_v31  ;;  %6577 = vmatmul.mubr.msk.bf16.gmra.mrb[88].mxu1 %vm2014_vm0, %v6858_v32 }
  0xcb   : > { %6324 = vmatprep.mubr.msk.bf16.mxu0 %vm2014_vm0, %v6859_v33  ;;  %6580 = vmatprep.mubr.msk.bf16.mxu1 %vm2014_vm0, %v6860_v34  ;;  %v6885_v34 = vld [vmem:[%s7080_s26 + $0x1d8] sm:$0xff]  }
  0xd2   : > { %6325 = vmatmul.mubr.msk.bf16.gmra.mrb[92].mxu0 %vm2014_vm0, %v6861_v35  ;;  %6581 = vmatmul.mubr.msk.bf16.gmra.mrb[92].mxu1 %vm2014_vm0, %v6862_v36  ;;  %v6886_v35 = vld [vmem:[%s7080_s26 + $0x5d8] sm:$0xff]  }
  0xd3   : > { %6328 = vmatprep.mubr.msk.bf16.mxu0 %vm2014_vm0, %v6863_v37  ;;  %6584 = vmatprep.mubr.msk.bf16.mxu1 %vm2014_vm0, %v6864_v38 }
  0xda   : > { %6329 = vmatmul.mubr.msk.bf16.gmra.mrb[96].mxu0 %vm2014_vm0, %v6865_v39  ;;  %6585 = vmatmul.mubr.msk.bf16.gmra.mrb[96].mxu1 %vm2014_vm0, %v6866_v40  ;;  %v6887_v40 = vld [vmem:[%s7080_s26 + $0x1e0] sm:$0xff]  }
  0xdb   : > { %6332 = vmatprep.mubr.msk.bf16.mxu0 %vm2014_vm0, %v6867_v41  ;;  %6588 = vmatprep.mubr.msk.bf16.mxu1 %vm2014_vm0, %v6868_v42  ;;  %v6888_v41 = vld [vmem:[%s7080_s26 + $0x5e0] sm:$0xff]  }
  0xe2   : > { %6333 = vmatmul.mubr.msk.bf16.gmra.mrb[100].mxu0 %vm2014_vm0, %v6869_v43  ;;  %6589 = vmatmul.mubr.msk.bf16.gmra.mrb[100].mxu1 %vm2014_vm0, %v6870_v44 }
  0xe3   : > { %6336 = vmatprep.mubr.msk.bf16.mxu0 %vm2014_vm0, %v6871_v45  ;;  %6592 = vmatprep.mubr.msk.bf16.mxu1 %vm2014_vm0, %v6872_v46 }
  0xea   : > { %6337 = vmatmul.mubr.msk.bf16.gmra.mrb[104].mxu0 %vm2014_vm0, %v6873_v47  ;;  %6593 = vmatmul.mubr.msk.bf16.gmra.mrb[104].mxu1 %vm2014_vm0, %v6874_v48 }
  0xeb   : > { %6340 = vmatprep.mubr.msk.bf16.mxu0 %vm2014_vm0, %v6875_v49  ;;  %6596 = vmatprep.mubr.msk.bf16.mxu1 %vm2014_vm0, %v6876_v50 }
  0xed   : > { %v6234_v54 = vpop.f32.mrb[0].mxu0  ;;  %v6490_v55 = vpop.f32.mrb[0].mxu1 }
  0xee   : > { %v2826_v56 = vadd.f32 %v6234_v54, %v7305_v51  ;;  %v3850_v57 = vadd.f32 %v6490_v55, %v7305_v51  ;;  %v2817_v58 = vpop.f32.mrb[1].mxu0  ;;  %v3841_v59 = vpop.f32.mrb[1].mxu1  ;;  %v6889_v55 = vld [vmem:[%s7080_s26 + $0x1e8] sm:$0xff]  }
  0xef   : > { %v2818_v60 = vadd.f32 %v7305_v51, %v2817_v58  ;;  %v3842_v61 = vadd.f32 %v7305_v51, %v3841_v59  ;;  %v6235_v62 = vpop.f32.mrb[2].mxu0  ;;  %v6491_v63 = vpop.f32.mrb[2].mxu1 }
  0xf0   : > { %4866 = vst [vmem:[%s7316_s7 + $0x10] sm:$0xff] %v2826_v56  ;;  %5122 = vst [vmem:[%s7316_s7 + $0x810] sm:$0xff] %v3850_v57  ;;  %v2829_v2 = vadd.f32 %v6235_v62, %v7305_v51  ;;  %v3853_v3 = vadd.f32 %v6491_v63, %v7305_v51  ;;  %v2820_v4 = vpop.f32.mrb[3].mxu0  ;;  %v3844_v5 = vpop.f32.mrb[3].mxu1  ;;  %v6890_v56 = vld [vmem:[%s7080_s26 + $0x5e8] sm:$0xff]   ;;  %v6892_v62 = vld [vmem:[%s7080_s26 + $0x5f0] sm:$0xff]  }
  0xf1   : > { %4864 = vst [vmem:[%s7316_s7] sm:$0xff] %v2818_v60  ;;  %5120 = vst [vmem:[%s7316_s7 + $0x800] sm:$0xff] %v3842_v61  ;;  %v2821_v6 = vadd.f32 %v7305_v51, %v2820_v4  ;;  %v3845_v7 = vadd.f32 %v7305_v51, %v3844_v5  ;;  %v6891_v61 = vld [vmem:[%s7080_s26 + $0x1f0] sm:$0xff]  }
  0xf2   : > { %4867 = vst [vmem:[%s7316_s7 + $0x18] sm:$0xff] %v2829_v2  ;;  %5123 = vst [vmem:[%s7316_s7 + $0x818] sm:$0xff] %v3853_v3  ;;  %6341 = vmatmul.mubr.msk.bf16.gmra.mrb[108].mxu0 %vm2014_vm0, %v6877_v52  ;;  %6597 = vmatmul.mubr.msk.bf16.gmra.mrb[108].mxu1 %vm2014_vm0, %v6878_v53 }
  0xf3   : > { %4865 = vst [vmem:[%s7316_s7 + $0x8] sm:$0xff] %v2821_v6  ;;  %5121 = vst [vmem:[%s7316_s7 + $0x808] sm:$0xff] %v3845_v7  ;;  %6344 = vmatprep.mubr.msk.bf16.mxu0 %vm2014_vm0, %v6879_v0  ;;  %6600 = vmatprep.mubr.msk.bf16.mxu1 %vm2014_vm0, %v6880_v1 }
  0xf5   : > { %v6238_v8 = vpop.f32.mrb[4].mxu0  ;;  %v6494_v9 = vpop.f32.mrb[4].mxu1 }
  0xf6   : > { %v2842_v10 = vadd.f32 %v6238_v8, %v7305_v51  ;;  %v3866_v11 = vadd.f32 %v6494_v9, %v7305_v51  ;;  %v2833_v12 = vpop.f32.mrb[5].mxu0  ;;  %v3857_v13 = vpop.f32.mrb[5].mxu1 }
  0xf7   : > { %v2834_v16 = vadd.f32 %v7305_v51, %v2833_v12  ;;  %v3858_v17 = vadd.f32 %v7305_v51, %v3857_v13  ;;  %v6239_v18 = vpop.f32.mrb[6].mxu0  ;;  %v6495_v19 = vpop.f32.mrb[6].mxu1  ;;  %v6894_v12 = vld [vmem:[%s7080_s26 + $0x5f8] sm:$0xff]  }
  0xf8   : > { %4870 = vst [vmem:[%s7316_s7 + $0x30] sm:$0xff] %v2842_v10  ;;  %5126 = vst [vmem:[%s7316_s7 + $0x830] sm:$0xff] %v3866_v11  ;;  %v2845_v22 = vadd.f32 %v6239_v18, %v7305_v51  ;;  %v3869_v23 = vadd.f32 %v6495_v19, %v7305_v51  ;;  %v2836_v24 = vpop.f32.mrb[7].mxu0  ;;  %v3860_v25 = vpop.f32.mrb[7].mxu1  ;;  %v6893_v11 = vld [vmem:[%s7080_s26 + $0x1f8] sm:$0xff]   ;;  %v6896_v18 = vld [vmem:[%s7080_s26 + $0x600] sm:$0xff]  }
  0xf9   : > { %4868 = vst [vmem:[%s7316_s7 + $0x20] sm:$0xff] %v2834_v16  ;;  %5124 = vst [vmem:[%s7316_s7 + $0x820] sm:$0xff] %v3858_v17  ;;  %v2837_v26 = vadd.f32 %v7305_v51, %v2836_v24  ;;  %v3861_v27 = vadd.f32 %v7305_v51, %v3860_v25  ;;  %v6895_v17 = vld [vmem:[%s7080_s26 + $0x200] sm:$0xff]  }
  0xfa   : > { %4871 = vst [vmem:[%s7316_s7 + $0x38] sm:$0xff] %v2845_v22  ;;  %5127 = vst [vmem:[%s7316_s7 + $0x838] sm:$0xff] %v3869_v23  ;;  %6345 = vmatmul.mubr.msk.bf16.gmra.mrb[112].mxu0 %vm2014_vm0, %v6881_v14  ;;  %6601 = vmatmul.mubr.msk.bf16.gmra.mrb[112].mxu1 %vm2014_vm0, %v6882_v15 }
  0xfb   : > { %4869 = vst [vmem:[%s7316_s7 + $0x28] sm:$0xff] %v2837_v26  ;;  %5125 = vst [vmem:[%s7316_s7 + $0x828] sm:$0xff] %v3861_v27  ;;  %6348 = vmatprep.mubr.msk.bf16.mxu0 %vm2014_vm0, %v6883_v20  ;;  %6604 = vmatprep.mubr.msk.bf16.mxu1 %vm2014_vm0, %v6884_v21 }
  0xfd   : > { %v6242_v28 = vpop.f32.mrb[8].mxu0  ;;  %v6498_v29 = vpop.f32.mrb[8].mxu1 }
  0xfe   : > { %v2858_v30 = vadd.f32 %v6242_v28, %v7305_v51  ;;  %v3882_v31 = vadd.f32 %v6498_v29, %v7305_v51  ;;  %v2849_v32 = vpop.f32.mrb[9].mxu0  ;;  %v3873_v33 = vpop.f32.mrb[9].mxu1 }
  0xff   : > { %v2850_v36 = vadd.f32 %v7305_v51, %v2849_v32  ;;  %v3874_v37 = vadd.f32 %v7305_v51, %v3873_v33  ;;  %v6243_v38 = vpop.f32.mrb[10].mxu0  ;;  %v6499_v39 = vpop.f32.mrb[10].mxu1  ;;  %v6898_v32 = vld [vmem:[%s7080_s26 + $0x608] sm:$0xff]  }
 0x100   : > { %4874 = vst [vmem:[%s7316_s7 + $0x50] sm:$0xff] %v2858_v30  ;;  %5130 = vst [vmem:[%s7316_s7 + $0x850] sm:$0xff] %v3882_v31  ;;  %v2861_v42 = vadd.f32 %v6243_v38, %v7305_v51  ;;  %v3885_v43 = vadd.f32 %v6499_v39, %v7305_v51  ;;  %v2852_v44 = vpop.f32.mrb[11].mxu0  ;;  %v3876_v45 = vpop.f32.mrb[11].mxu1  ;;  %v6897_v31 = vld [vmem:[%s7080_s26 + $0x208] sm:$0xff]   ;;  %v6900_v38 = vld [vmem:[%s7080_s26 + $0x610] sm:$0xff]  }
 0x101   : > { %4872 = vst [vmem:[%s7316_s7 + $0x40] sm:$0xff] %v2850_v36  ;;  %5128 = vst [vmem:[%s7316_s7 + $0x840] sm:$0xff] %v3874_v37  ;;  %v2853_v46 = vadd.f32 %v7305_v51, %v2852_v44  ;;  %v3877_v47 = vadd.f32 %v7305_v51, %v3876_v45  ;;  %v6899_v37 = vld [vmem:[%s7080_s26 + $0x210] sm:$0xff]  }
 0x102   : > { %4875 = vst [vmem:[%s7316_s7 + $0x58] sm:$0xff] %v2861_v42  ;;  %5131 = vst [vmem:[%s7316_s7 + $0x858] sm:$0xff] %v3885_v43  ;;  %6349 = vmatmul.mubr.msk.bf16.gmra.mrb[116].mxu0 %vm2014_vm0, %v6885_v34  ;;  %6605 = vmatmul.mubr.msk.bf16.gmra.mrb[116].mxu1 %vm2014_vm0, %v6886_v35 }
 0x103   : > { %4873 = vst [vmem:[%s7316_s7 + $0x48] sm:$0xff] %v2853_v46  ;;  %5129 = vst [vmem:[%s7316_s7 + $0x848] sm:$0xff] %v3877_v47  ;;  %6352 = vmatprep.mubr.msk.bf16.mxu0 %vm2014_vm0, %v6887_v40  ;;  %6608 = vmatprep.mubr.msk.bf16.mxu1 %vm2014_vm0, %v6888_v41 }
 0x105   : > { %v6246_v48 = vpop.f32.mrb[12].mxu0  ;;  %v6502_v49 = vpop.f32.mrb[12].mxu1 }
 0x106   : > { %v2874_v50 = vadd.f32 %v6246_v48, %v7305_v51  ;;  %v3898_v52 = vadd.f32 %v6502_v49, %v7305_v51  ;;  %v2865_v53 = vpop.f32.mrb[13].mxu0  ;;  %v3889_v54 = vpop.f32.mrb[13].mxu1 }
 0x107   : > { %v2866_v57 = vadd.f32 %v7305_v51, %v2865_v53  ;;  %v3890_v58 = vadd.f32 %v7305_v51, %v3889_v54  ;;  %v6247_v59 = vpop.f32.mrb[14].mxu0  ;;  %v6503_v60 = vpop.f32.mrb[14].mxu1  ;;  %v6902_v53 = vld [vmem:[%s7080_s26 + $0x618] sm:$0xff]  }
 0x108   : > { %4878 = vst [vmem:[%s7316_s7 + $0x70] sm:$0xff] %v2874_v50  ;;  %5134 = vst [vmem:[%s7316_s7 + $0x870] sm:$0xff] %v3898_v52  ;;  %v2877_v63 = vadd.f32 %v6247_v59, %v7305_v51  ;;  %v3901_v0 = vadd.f32 %v6503_v60, %v7305_v51  ;;  %v2868_v1 = vpop.f32.mrb[15].mxu0  ;;  %v3892_v2 = vpop.f32.mrb[15].mxu1  ;;  %v6901_v52 = vld [vmem:[%s7080_s26 + $0x218] sm:$0xff]   ;;  %v6904_v59 = vld [vmem:[%s7080_s26 + $0x620] sm:$0xff]  }
 0x109   : > { %4876 = vst [vmem:[%s7316_s7 + $0x60] sm:$0xff] %v2866_v57  ;;  %5132 = vst [vmem:[%s7316_s7 + $0x860] sm:$0xff] %v3890_v58  ;;  %v2869_v3 = vadd.f32 %v7305_v51, %v2868_v1  ;;  %v3893_v4 = vadd.f32 %v7305_v51, %v3892_v2  ;;  %v6903_v58 = vld [vmem:[%s7080_s26 + $0x220] sm:$0xff]  }
 0x10a   : > { %4879 = vst [vmem:[%s7316_s7 + $0x78] sm:$0xff] %v2877_v63  ;;  %5135 = vst [vmem:[%s7316_s7 + $0x878] sm:$0xff] %v3901_v0  ;;  %6353 = vmatmul.mubr.msk.bf16.gmra.mrb[120].mxu0 %vm2014_vm0, %v6889_v55  ;;  %6609 = vmatmul.mubr.msk.bf16.gmra.mrb[120].mxu1 %vm2014_vm0, %v6890_v56 }
 0x10b   : > { %4877 = vst [vmem:[%s7316_s7 + $0x68] sm:$0xff] %v2869_v3  ;;  %5133 = vst [vmem:[%s7316_s7 + $0x868] sm:$0xff] %v3893_v4  ;;  %6356 = vmatprep.mubr.msk.bf16.mxu0 %vm2014_vm0, %v6891_v61  ;;  %6612 = vmatprep.mubr.msk.bf16.mxu1 %vm2014_vm0, %v6892_v62 }
 0x10d   : > { %v6250_v5 = vpop.f32.mrb[16].mxu0  ;;  %v6506_v6 = vpop.f32.mrb[16].mxu1 }
 0x10e   : > { %v2890_v7 = vadd.f32 %v6250_v5, %v7305_v51  ;;  %v3914_v8 = vadd.f32 %v6506_v6, %v7305_v51  ;;  %v2881_v9 = vpop.f32.mrb[17].mxu0  ;;  %v3905_v10 = vpop.f32.mrb[17].mxu1 }
 0x10f   : > { %v2882_v13 = vadd.f32 %v7305_v51, %v2881_v9  ;;  %v3906_v14 = vadd.f32 %v7305_v51, %v3905_v10  ;;  %v6251_v15 = vpop.f32.mrb[18].mxu0  ;;  %v6507_v16 = vpop.f32.mrb[18].mxu1  ;;  %v6906_v9 = vld [vmem:[%s7080_s26 + $0x628] sm:$0xff]  }
 0x110   : > { %4882 = vst [vmem:[%s7316_s7 + $0x90] sm:$0xff] %v2890_v7  ;;  %5138 = vst [vmem:[%s7316_s7 + $0x890] sm:$0xff] %v3914_v8  ;;  %v2893_v19 = vadd.f32 %v6251_v15, %v7305_v51  ;;  %v3917_v20 = vadd.f32 %v6507_v16, %v7305_v51  ;;  %v2884_v21 = vpop.f32.mrb[19].mxu0  ;;  %v3908_v22 = vpop.f32.mrb[19].mxu1  ;;  %v6905_v8 = vld [vmem:[%s7080_s26 + $0x228] sm:$0xff]   ;;  %v6908_v15 = vld [vmem:[%s7080_s26 + $0x630] sm:$0xff]  }
 0x111   : > { %4880 = vst [vmem:[%s7316_s7 + $0x80] sm:$0xff] %v2882_v13  ;;  %5136 = vst [vmem:[%s7316_s7 + $0x880] sm:$0xff] %v3906_v14  ;;  %v2885_v23 = vadd.f32 %v7305_v51, %v2884_v21  ;;  %v3909_v24 = vadd.f32 %v7305_v51, %v3908_v22  ;;  %v6907_v14 = vld [vmem:[%s7080_s26 + $0x230] sm:$0xff]  }
 0x112   : > { %4883 = vst [vmem:[%s7316_s7 + $0x98] sm:$0xff] %v2893_v19  ;;  %5139 = vst [vmem:[%s7316_s7 + $0x898] sm:$0xff] %v3917_v20  ;;  %6357 = vmatmul.mubr.msk.bf16.gmra.mrb[124].mxu0 %vm2014_vm0, %v6893_v11  ;;  %6613 = vmatmul.mubr.msk.bf16.gmra.mrb[124].mxu1 %vm2014_vm0, %v6894_v12 }
 0x113   : > { %4881 = vst [vmem:[%s7316_s7 + $0x88] sm:$0xff] %v2885_v23  ;;  %5137 = vst [vmem:[%s7316_s7 + $0x888] sm:$0xff] %v3909_v24  ;;  %6360 = vmatprep.mubr.msk.bf16.mxu0 %vm2014_vm0, %v6895_v17  ;;  %6616 = vmatprep.mubr.msk.bf16.mxu1 %vm2014_vm0, %v6896_v18 }
 0x115   : > { %v6254_v25 = vpop.f32.mrb[20].mxu0  ;;  %v6510_v26 = vpop.f32.mrb[20].mxu1 }
 0x116   : > { %v2906_v27 = vadd.f32 %v6254_v25, %v7305_v51  ;;  %v3930_v28 = vadd.f32 %v6510_v26, %v7305_v51  ;;  %v2897_v29 = vpop.f32.mrb[21].mxu0  ;;  %v3921_v30 = vpop.f32.mrb[21].mxu1 }
 0x117   : > { %v2898_v33 = vadd.f32 %v7305_v51, %v2897_v29  ;;  %v3922_v34 = vadd.f32 %v7305_v51, %v3921_v30  ;;  %v6255_v35 = vpop.f32.mrb[22].mxu0  ;;  %v6511_v36 = vpop.f32.mrb[22].mxu1  ;;  %v6910_v29 = vld [vmem:[%s7080_s26 + $0x638] sm:$0xff]  }
 0x118   : > { %4886 = vst [vmem:[%s7316_s7 + $0xb0] sm:$0xff] %v2906_v27  ;;  %5142 = vst [vmem:[%s7316_s7 + $0x8b0] sm:$0xff] %v3930_v28  ;;  %v2909_v39 = vadd.f32 %v6255_v35, %v7305_v51  ;;  %v3933_v40 = vadd.f32 %v6511_v36, %v7305_v51  ;;  %v2900_v41 = vpop.f32.mrb[23].mxu0  ;;  %v3924_v42 = vpop.f32.mrb[23].mxu1  ;;  %v6909_v28 = vld [vmem:[%s7080_s26 + $0x238] sm:$0xff]   ;;  %v6912_v35 = vld [vmem:[%s7080_s26 + $0x640] sm:$0xff]  }
 0x119   : > { %4884 = vst [vmem:[%s7316_s7 + $0xa0] sm:$0xff] %v2898_v33  ;;  %5140 = vst [vmem:[%s7316_s7 + $0x8a0] sm:$0xff] %v3922_v34  ;;  %v2901_v43 = vadd.f32 %v7305_v51, %v2900_v41  ;;  %v3925_v44 = vadd.f32 %v7305_v51, %v3924_v42  ;;  %v6911_v34 = vld [vmem:[%s7080_s26 + $0x240] sm:$0xff]  }
 0x11a   : > { %4887 = vst [vmem:[%s7316_s7 + $0xb8] sm:$0xff] %v2909_v39  ;;  %5143 = vst [vmem:[%s7316_s7 + $0x8b8] sm:$0xff] %v3933_v40  ;;  %6361 = vmatmul.mubr.msk.bf16.gmra.mrb[128].mxu0 %vm2014_vm0, %v6897_v31  ;;  %6617 = vmatmul.mubr.msk.bf16.gmra.mrb[128].mxu1 %vm2014_vm0, %v6898_v32 }
 0x11b   : > { %4885 = vst [vmem:[%s7316_s7 + $0xa8] sm:$0xff] %v2901_v43  ;;  %5141 = vst [vmem:[%s7316_s7 + $0x8a8] sm:$0xff] %v3925_v44  ;;  %6364 = vmatprep.mubr.msk.bf16.mxu0 %vm2014_vm0, %v6899_v37  ;;  %6620 = vmatprep.mubr.msk.bf16.mxu1 %vm2014_vm0, %v6900_v38 }
 0x11d   : > { %v6258_v45 = vpop.f32.mrb[24].mxu0  ;;  %v6514_v46 = vpop.f32.mrb[24].mxu1 }
 0x11e   : > { %v2922_v47 = vadd.f32 %v6258_v45, %v7305_v51  ;;  %v3946_v48 = vadd.f32 %v6514_v46, %v7305_v51  ;;  %v2913_v49 = vpop.f32.mrb[25].mxu0  ;;  %v3937_v50 = vpop.f32.mrb[25].mxu1 }
 0x11f   : > { %v2914_v54 = vadd.f32 %v7305_v51, %v2913_v49  ;;  %v3938_v55 = vadd.f32 %v7305_v51, %v3937_v50  ;;  %v6259_v56 = vpop.f32.mrb[26].mxu0  ;;  %v6515_v57 = vpop.f32.mrb[26].mxu1  ;;  %v6914_v49 = vld [vmem:[%s7080_s26 + $0x648] sm:$0xff]  }
 0x120   : > { %4890 = vst [vmem:[%s7316_s7 + $0xd0] sm:$0xff] %v2922_v47  ;;  %5146 = vst [vmem:[%s7316_s7 + $0x8d0] sm:$0xff] %v3946_v48  ;;  %v2925_v60 = vadd.f32 %v6259_v56, %v7305_v51  ;;  %v3949_v61 = vadd.f32 %v6515_v57, %v7305_v51  ;;  %v2916_v62 = vpop.f32.mrb[27].mxu0  ;;  %v3940_v63 = vpop.f32.mrb[27].mxu1  ;;  %v6913_v48 = vld [vmem:[%s7080_s26 + $0x248] sm:$0xff]   ;;  %v6916_v56 = vld [vmem:[%s7080_s26 + $0x650] sm:$0xff]  }
 0x121   : > { %4888 = vst [vmem:[%s7316_s7 + $0xc0] sm:$0xff] %v2914_v54  ;;  %5144 = vst [vmem:[%s7316_s7 + $0x8c0] sm:$0xff] %v3938_v55  ;;  %v2917_v0 = vadd.f32 %v7305_v51, %v2916_v62  ;;  %v3941_v1 = vadd.f32 %v7305_v51, %v3940_v63  ;;  %v6915_v55 = vld [vmem:[%s7080_s26 + $0x250] sm:$0xff]  }
 0x122   : > { %4891 = vst [vmem:[%s7316_s7 + $0xd8] sm:$0xff] %v2925_v60  ;;  %5147 = vst [vmem:[%s7316_s7 + $0x8d8] sm:$0xff] %v3949_v61  ;;  %6365 = vmatmul.mubr.msk.bf16.gmra.mrb[132].mxu0 %vm2014_vm0, %v6901_v52  ;;  %6621 = vmatmul.mubr.msk.bf16.gmra.mrb[132].mxu1 %vm2014_vm0, %v6902_v53 }
 0x123   : > { %4889 = vst [vmem:[%s7316_s7 + $0xc8] sm:$0xff] %v2917_v0  ;;  %5145 = vst [vmem:[%s7316_s7 + $0x8c8] sm:$0xff] %v3941_v1  ;;  %6368 = vmatprep.mubr.msk.bf16.mxu0 %vm2014_vm0, %v6903_v58  ;;  %6624 = vmatprep.mubr.msk.bf16.mxu1 %vm2014_vm0, %v6904_v59 }
 0x125   : > { %v6262_v2 = vpop.f32.mrb[28].mxu0  ;;  %v6518_v3 = vpop.f32.mrb[28].mxu1 }
 0x126   : > { %v2938_v4 = vadd.f32 %v6262_v2, %v7305_v51  ;;  %v3962_v5 = vadd.f32 %v6518_v3, %v7305_v51  ;;  %v2929_v6 = vpop.f32.mrb[29].mxu0  ;;  %v3953_v7 = vpop.f32.mrb[29].mxu1 }
 0x127   : > { %v2930_v10 = vadd.f32 %v7305_v51, %v2929_v6  ;;  %v3954_v11 = vadd.f32 %v7305_v51, %v3953_v7  ;;  %v6263_v12 = vpop.f32.mrb[30].mxu0  ;;  %v6519_v13 = vpop.f32.mrb[30].mxu1  ;;  %v6918_v6 = vld [vmem:[%s7080_s26 + $0x658] sm:$0xff]  }
 0x128   : > { %4894 = vst [vmem:[%s7316_s7 + $0xf0] sm:$0xff] %v2938_v4  ;;  %5150 = vst [vmem:[%s7316_s7 + $0x8f0] sm:$0xff] %v3962_v5  ;;  %v2941_v16 = vadd.f32 %v6263_v12, %v7305_v51  ;;  %v3965_v17 = vadd.f32 %v6519_v13, %v7305_v51  ;;  %v2932_v18 = vpop.f32.mrb[31].mxu0  ;;  %v3956_v19 = vpop.f32.mrb[31].mxu1  ;;  %v6917_v5 = vld [vmem:[%s7080_s26 + $0x258] sm:$0xff]   ;;  %v6920_v12 = vld [vmem:[%s7080_s26 + $0x660] sm:$0xff]  }
 0x129   : > { %4892 = vst [vmem:[%s7316_s7 + $0xe0] sm:$0xff] %v2930_v10  ;;  %5148 = vst [vmem:[%s7316_s7 + $0x8e0] sm:$0xff] %v3954_v11  ;;  %v2933_v20 = vadd.f32 %v7305_v51, %v2932_v18  ;;  %v3957_v21 = vadd.f32 %v7305_v51, %v3956_v19  ;;  %v6919_v11 = vld [vmem:[%s7080_s26 + $0x260] sm:$0xff]  }
 0x12a   : > { %4895 = vst [vmem:[%s7316_s7 + $0xf8] sm:$0xff] %v2941_v16  ;;  %5151 = vst [vmem:[%s7316_s7 + $0x8f8] sm:$0xff] %v3965_v17  ;;  %6369 = vmatmul.mubr.msk.bf16.gmra.mrb[136].mxu0 %vm2014_vm0, %v6905_v8  ;;  %6625 = vmatmul.mubr.msk.bf16.gmra.mrb[136].mxu1 %vm2014_vm0, %v6906_v9 }
 0x12b   : > { %4893 = vst [vmem:[%s7316_s7 + $0xe8] sm:$0xff] %v2933_v20  ;;  %5149 = vst [vmem:[%s7316_s7 + $0x8e8] sm:$0xff] %v3957_v21  ;;  %6372 = vmatprep.mubr.msk.bf16.mxu0 %vm2014_vm0, %v6907_v14  ;;  %6628 = vmatprep.mubr.msk.bf16.mxu1 %vm2014_vm0, %v6908_v15 }
 0x12d   : > { %v6266_v22 = vpop.f32.mrb[32].mxu0  ;;  %v6522_v23 = vpop.f32.mrb[32].mxu1 }
 0x12e   : > { %v2954_v24 = vadd.f32 %v6266_v22, %v7305_v51  ;;  %v3978_v25 = vadd.f32 %v6522_v23, %v7305_v51  ;;  %v2945_v26 = vpop.f32.mrb[33].mxu0  ;;  %v3969_v27 = vpop.f32.mrb[33].mxu1 }
 0x12f   : > { %v2946_v30 = vadd.f32 %v7305_v51, %v2945_v26  ;;  %v3970_v31 = vadd.f32 %v7305_v51, %v3969_v27  ;;  %v6267_v32 = vpop.f32.mrb[34].mxu0  ;;  %v6523_v33 = vpop.f32.mrb[34].mxu1  ;;  %v6922_v26 = vld [vmem:[%s7080_s26 + $0x668] sm:$0xff]  }
 0x130   : > { %4898 = vst [vmem:[%s7316_s7 + $0x110] sm:$0xff] %v2954_v24  ;;  %5154 = vst [vmem:[%s7316_s7 + $0x910] sm:$0xff] %v3978_v25  ;;  %v2957_v36 = vadd.f32 %v6267_v32, %v7305_v51  ;;  %v3981_v37 = vadd.f32 %v6523_v33, %v7305_v51  ;;  %v2948_v38 = vpop.f32.mrb[35].mxu0  ;;  %v3972_v39 = vpop.f32.mrb[35].mxu1  ;;  %v6921_v25 = vld [vmem:[%s7080_s26 + $0x268] sm:$0xff]   ;;  %v6924_v32 = vld [vmem:[%s7080_s26 + $0x670] sm:$0xff]  }
 0x131   : > { %4896 = vst [vmem:[%s7316_s7 + $0x100] sm:$0xff] %v2946_v30  ;;  %5152 = vst [vmem:[%s7316_s7 + $0x900] sm:$0xff] %v3970_v31  ;;  %v2949_v40 = vadd.f32 %v7305_v51, %v2948_v38  ;;  %v3973_v41 = vadd.f32 %v7305_v51, %v3972_v39  ;;  %v6923_v31 = vld [vmem:[%s7080_s26 + $0x270] sm:$0xff]  }
 0x132   : > { %4899 = vst [vmem:[%s7316_s7 + $0x118] sm:$0xff] %v2957_v36  ;;  %5155 = vst [vmem:[%s7316_s7 + $0x918] sm:$0xff] %v3981_v37  ;;  %6373 = vmatmul.mubr.msk.bf16.gmra.mrb[140].mxu0 %vm2014_vm0, %v6909_v28  ;;  %6629 = vmatmul.mubr.msk.bf16.gmra.mrb[140].mxu1 %vm2014_vm0, %v6910_v29 }
 0x133   : > { %4897 = vst [vmem:[%s7316_s7 + $0x108] sm:$0xff] %v2949_v40  ;;  %5153 = vst [vmem:[%s7316_s7 + $0x908] sm:$0xff] %v3973_v41  ;;  %6376 = vmatprep.mubr.msk.bf16.mxu0 %vm2014_vm0, %v6911_v34  ;;  %6632 = vmatprep.mubr.msk.bf16.mxu1 %vm2014_vm0, %v6912_v35 }
 0x135   : > { %v6270_v42 = vpop.f32.mrb[36].mxu0  ;;  %v6526_v43 = vpop.f32.mrb[36].mxu1 }
 0x136   : > { %v2970_v44 = vadd.f32 %v6270_v42, %v7305_v51  ;;  %v3994_v45 = vadd.f32 %v6526_v43, %v7305_v51  ;;  %v2961_v46 = vpop.f32.mrb[37].mxu0  ;;  %v3985_v47 = vpop.f32.mrb[37].mxu1 }
 0x137   : > { %v2962_v50 = vadd.f32 %v7305_v51, %v2961_v46  ;;  %v3986_v52 = vadd.f32 %v7305_v51, %v3985_v47  ;;  %v6271_v53 = vpop.f32.mrb[38].mxu0  ;;  %v6527_v54 = vpop.f32.mrb[38].mxu1  ;;  %v6926_v46 = vld [vmem:[%s7080_s26 + $0x678] sm:$0xff]  }
 0x138   : > { %4902 = vst [vmem:[%s7316_s7 + $0x130] sm:$0xff] %v2970_v44  ;;  %5158 = vst [vmem:[%s7316_s7 + $0x930] sm:$0xff] %v3994_v45  ;;  %v2973_v57 = vadd.f32 %v6271_v53, %v7305_v51  ;;  %v3997_v58 = vadd.f32 %v6527_v54, %v7305_v51  ;;  %v2964_v59 = vpop.f32.mrb[39].mxu0  ;;  %v3988_v60 = vpop.f32.mrb[39].mxu1  ;;  %v6925_v45 = vld [vmem:[%s7080_s26 + $0x278] sm:$0xff]   ;;  %v6928_v53 = vld [vmem:[%s7080_s26 + $0x680] sm:$0xff]  }
 0x139   : > { %4900 = vst [vmem:[%s7316_s7 + $0x120] sm:$0xff] %v2962_v50  ;;  %5156 = vst [vmem:[%s7316_s7 + $0x920] sm:$0xff] %v3986_v52  ;;  %v2965_v61 = vadd.f32 %v7305_v51, %v2964_v59  ;;  %v3989_v62 = vadd.f32 %v7305_v51, %v3988_v60  ;;  %v6927_v52 = vld [vmem:[%s7080_s26 + $0x280] sm:$0xff]  }
 0x13a   : > { %4903 = vst [vmem:[%s7316_s7 + $0x138] sm:$0xff] %v2973_v57  ;;  %5159 = vst [vmem:[%s7316_s7 + $0x938] sm:$0xff] %v3997_v58  ;;  %6377 = vmatmul.mubr.msk.bf16.gmra.mrb[144].mxu0 %vm2014_vm0, %v6913_v48  ;;  %6633 = vmatmul.mubr.msk.bf16.gmra.mrb[144].mxu1 %vm2014_vm0, %v6914_v49 }
 0x13b   : > { %4901 = vst [vmem:[%s7316_s7 + $0x128] sm:$0xff] %v2965_v61  ;;  %5157 = vst [vmem:[%s7316_s7 + $0x928] sm:$0xff] %v3989_v62  ;;  %6380 = vmatprep.mubr.msk.bf16.mxu0 %vm2014_vm0, %v6915_v55  ;;  %6636 = vmatprep.mubr.msk.bf16.mxu1 %vm2014_vm0, %v6916_v56 }
 0x13d   : > { %v6274_v63 = vpop.f32.mrb[40].mxu0  ;;  %v6530_v0 = vpop.f32.mrb[40].mxu1 }
 0x13e   : > { %v2986_v1 = vadd.f32 %v6274_v63, %v7305_v51  ;;  %v4010_v2 = vadd.f32 %v6530_v0, %v7305_v51  ;;  %v2977_v3 = vpop.f32.mrb[41].mxu0  ;;  %v4001_v4 = vpop.f32.mrb[41].mxu1 }
 0x13f   : > { %v2978_v7 = vadd.f32 %v7305_v51, %v2977_v3  ;;  %v4002_v8 = vadd.f32 %v7305_v51, %v4001_v4  ;;  %v6275_v9 = vpop.f32.mrb[42].mxu0  ;;  %v6531_v10 = vpop.f32.mrb[42].mxu1  ;;  %v6930_v3 = vld [vmem:[%s7080_s26 + $0x688] sm:$0xff]  }
 0x140   : > { %4906 = vst [vmem:[%s7316_s7 + $0x150] sm:$0xff] %v2986_v1  ;;  %5162 = vst [vmem:[%s7316_s7 + $0x950] sm:$0xff] %v4010_v2  ;;  %v2989_v13 = vadd.f32 %v6275_v9, %v7305_v51  ;;  %v4013_v14 = vadd.f32 %v6531_v10, %v7305_v51  ;;  %v2980_v15 = vpop.f32.mrb[43].mxu0  ;;  %v4004_v16 = vpop.f32.mrb[43].mxu1  ;;  %v6929_v2 = vld [vmem:[%s7080_s26 + $0x288] sm:$0xff]   ;;  %v6932_v9 = vld [vmem:[%s7080_s26 + $0x690] sm:$0xff]  }
 0x141   : > { %4904 = vst [vmem:[%s7316_s7 + $0x140] sm:$0xff] %v2978_v7  ;;  %5160 = vst [vmem:[%s7316_s7 + $0x940] sm:$0xff] %v4002_v8  ;;  %v2981_v17 = vadd.f32 %v7305_v51, %v2980_v15  ;;  %v4005_v18 = vadd.f32 %v7305_v51, %v4004_v16  ;;  %v6931_v8 = vld [vmem:[%s7080_s26 + $0x290] sm:$0xff]  }
 0x142   : > { %4907 = vst [vmem:[%s7316_s7 + $0x158] sm:$0xff] %v2989_v13  ;;  %5163 = vst [vmem:[%s7316_s7 + $0x958] sm:$0xff] %v4013_v14  ;;  %6381 = vmatmul.mubr.msk.bf16.gmra.mrb[148].mxu0 %vm2014_vm0, %v6917_v5  ;;  %6637 = vmatmul.mubr.msk.bf16.gmra.mrb[148].mxu1 %vm2014_vm0, %v6918_v6 }
 0x143   : > { %4905 = vst [vmem:[%s7316_s7 + $0x148] sm:$0xff] %v2981_v17  ;;  %5161 = vst [vmem:[%s7316_s7 + $0x948] sm:$0xff] %v4005_v18  ;;  %6384 = vmatprep.mubr.msk.bf16.mxu0 %vm2014_vm0, %v6919_v11  ;;  %6640 = vmatprep.mubr.msk.bf16.mxu1 %vm2014_vm0, %v6920_v12 }
 0x145   : > { %v6278_v19 = vpop.f32.mrb[44].mxu0  ;;  %v6534_v20 = vpop.f32.mrb[44].mxu1 }
 0x146   : > { %v3002_v21 = vadd.f32 %v6278_v19, %v7305_v51  ;;  %v4026_v22 = vadd.f32 %v6534_v20, %v7305_v51  ;;  %v2993_v23 = vpop.f32.mrb[45].mxu0  ;;  %v4017_v24 = vpop.f32.mrb[45].mxu1 }
 0x147   : > { %v2994_v27 = vadd.f32 %v7305_v51, %v2993_v23  ;;  %v4018_v28 = vadd.f32 %v7305_v51, %v4017_v24  ;;  %v6279_v29 = vpop.f32.mrb[46].mxu0  ;;  %v6535_v30 = vpop.f32.mrb[46].mxu1  ;;  %v6934_v23 = vld [vmem:[%s7080_s26 + $0x698] sm:$0xff]  }
 0x148   : > { %4910 = vst [vmem:[%s7316_s7 + $0x170] sm:$0xff] %v3002_v21  ;;  %5166 = vst [vmem:[%s7316_s7 + $0x970] sm:$0xff] %v4026_v22  ;;  %v3005_v33 = vadd.f32 %v6279_v29, %v7305_v51  ;;  %v4029_v34 = vadd.f32 %v6535_v30, %v7305_v51  ;;  %v2996_v35 = vpop.f32.mrb[47].mxu0  ;;  %v4020_v36 = vpop.f32.mrb[47].mxu1  ;;  %v6933_v22 = vld [vmem:[%s7080_s26 + $0x298] sm:$0xff]   ;;  %v6936_v29 = vld [vmem:[%s7080_s26 + $0x6a0] sm:$0xff]  }
 0x149   : > { %4908 = vst [vmem:[%s7316_s7 + $0x160] sm:$0xff] %v2994_v27  ;;  %5164 = vst [vmem:[%s7316_s7 + $0x960] sm:$0xff] %v4018_v28  ;;  %v2997_v37 = vadd.f32 %v7305_v51, %v2996_v35  ;;  %v4021_v38 = vadd.f32 %v7305_v51, %v4020_v36  ;;  %v6935_v28 = vld [vmem:[%s7080_s26 + $0x2a0] sm:$0xff]  }
 0x14a   : > { %4911 = vst [vmem:[%s7316_s7 + $0x178] sm:$0xff] %v3005_v33  ;;  %5167 = vst [vmem:[%s7316_s7 + $0x978] sm:$0xff] %v4029_v34  ;;  %6385 = vmatmul.mubr.msk.bf16.gmra.mrb[152].mxu0 %vm2014_vm0, %v6921_v25  ;;  %6641 = vmatmul.mubr.msk.bf16.gmra.mrb[152].mxu1 %vm2014_vm0, %v6922_v26 }
 0x14b   : > { %4909 = vst [vmem:[%s7316_s7 + $0x168] sm:$0xff] %v2997_v37  ;;  %5165 = vst [vmem:[%s7316_s7 + $0x968] sm:$0xff] %v4021_v38  ;;  %6388 = vmatprep.mubr.msk.bf16.mxu0 %vm2014_vm0, %v6923_v31  ;;  %6644 = vmatprep.mubr.msk.bf16.mxu1 %vm2014_vm0, %v6924_v32 }
 0x14d   : > { %v6282_v39 = vpop.f32.mrb[48].mxu0  ;;  %v6538_v40 = vpop.f32.mrb[48].mxu1 }
 0x14e   : > { %v3018_v41 = vadd.f32 %v6282_v39, %v7305_v51  ;;  %v4042_v42 = vadd.f32 %v6538_v40, %v7305_v51  ;;  %v3009_v43 = vpop.f32.mrb[49].mxu0  ;;  %v4033_v44 = vpop.f32.mrb[49].mxu1 }
 0x14f   : > { %v3010_v47 = vadd.f32 %v7305_v51, %v3009_v43  ;;  %v4034_v48 = vadd.f32 %v7305_v51, %v4033_v44  ;;  %v6283_v49 = vpop.f32.mrb[50].mxu0  ;;  %v6539_v50 = vpop.f32.mrb[50].mxu1  ;;  %v6938_v43 = vld [vmem:[%s7080_s26 + $0x6a8] sm:$0xff]   ;;  %v7683_v44 = vld [vmem:[%s8652_s2] ss:$0 sm:$0xff] }
 0x150   : > { %4914 = vst [vmem:[%s7316_s7 + $0x190] sm:$0xff] %v3018_v41  ;;  %5170 = vst [vmem:[%s7316_s7 + $0x990] sm:$0xff] %v4042_v42  ;;  %v3021_v54 = vadd.f32 %v6283_v49, %v7305_v51  ;;  %v4045_v55 = vadd.f32 %v6539_v50, %v7305_v51  ;;  %v3012_v56 = vpop.f32.mrb[51].mxu0  ;;  %v4036_v57 = vpop.f32.mrb[51].mxu1  ;;  %v6937_v42 = vld [vmem:[%s7080_s26 + $0x2a8] sm:$0xff]   ;;  %v6940_v49 = vld [vmem:[%s7080_s26 + $0x6b0] sm:$0xff]  }
 0x151   : > { %4912 = vst [vmem:[%s7316_s7 + $0x180] sm:$0xff] %v3010_v47  ;;  %5168 = vst [vmem:[%s7316_s7 + $0x980] sm:$0xff] %v4034_v48  ;;  %v3013_v58 = vadd.f32 %v7305_v51, %v3012_v56  ;;  %v4037_v59 = vadd.f32 %v7305_v51, %v4036_v57 }
 0x152   : > { %4915 = vst [vmem:[%s7316_s7 + $0x198] sm:$0xff] %v3021_v54  ;;  %5171 = vst [vmem:[%s7316_s7 + $0x998] sm:$0xff] %v4045_v55  ;;  %6389 = vmatmul.mubr.msk.bf16.gmra.mrb[156].mxu0 %vm2014_vm0, %v6925_v45  ;;  %6645 = vmatmul.mubr.msk.bf16.gmra.mrb[156].mxu1 %vm2014_vm0, %v6926_v46 }
 0x153   : > { %4913 = vst [vmem:[%s7316_s7 + $0x188] sm:$0xff] %v3013_v58  ;;  %5169 = vst [vmem:[%s7316_s7 + $0x988] sm:$0xff] %v4037_v59  ;;  %6392 = vmatprep.mubr.msk.bf16.mxu0 %vm2014_vm0, %v6927_v52  ;;  %6648 = vmatprep.mubr.msk.bf16.mxu1 %vm2014_vm0, %v6928_v53 }
 0x155   : > { %v6286_v60 = vpop.f32.mrb[52].mxu0  ;;  %v6542_v61 = vpop.f32.mrb[52].mxu1 }
 0x156   : > { %v3034_v62 = vadd.f32 %v6286_v60, %v7305_v51  ;;  %v4058_v63 = vadd.f32 %v6542_v61, %v7305_v51  ;;  %v3025_v0 = vpop.f32.mrb[53].mxu0  ;;  %v4049_v1 = vpop.f32.mrb[53].mxu1 }
 0x157   : > { %v3026_v4 = vadd.f32 %v7305_v51, %v3025_v0  ;;  %v4050_v5 = vadd.f32 %v7305_v51, %v4049_v1  ;;  %v6287_v6 = vpop.f32.mrb[54].mxu0  ;;  %v6543_v7 = vpop.f32.mrb[54].mxu1  ;;  %v6942_v0 = vld [vmem:[%s7080_s26 + $0x6b8] sm:$0xff]  }
 0x158   : > { %4918 = vst [vmem:[%s7316_s7 + $0x1b0] sm:$0xff] %v3034_v62  ;;  %5174 = vst [vmem:[%s7316_s7 + $0x9b0] sm:$0xff] %v4058_v63  ;;  %v3037_v10 = vadd.f32 %v6287_v6, %v7305_v51  ;;  %v4061_v11 = vadd.f32 %v6543_v7, %v7305_v51  ;;  %v3028_v12 = vpop.f32.mrb[55].mxu0  ;;  %v4052_v13 = vpop.f32.mrb[55].mxu1  ;;  %v6941_v63 = vld [vmem:[%s7080_s26 + $0x2b8] sm:$0xff]   ;;  %v6944_v6 = vld [vmem:[%s7080_s26 + $0x6c0] sm:$0xff]  }
 0x159   : > { %4916 = vst [vmem:[%s7316_s7 + $0x1a0] sm:$0xff] %v3026_v4  ;;  %5172 = vst [vmem:[%s7316_s7 + $0x9a0] sm:$0xff] %v4050_v5  ;;  %v3029_v14 = vadd.f32 %v7305_v51, %v3028_v12  ;;  %v4053_v15 = vadd.f32 %v7305_v51, %v4052_v13  ;;  %v6943_v5 = vld [vmem:[%s7080_s26 + $0x2c0] sm:$0xff]  }
 0x15a   : > { %4919 = vst [vmem:[%s7316_s7 + $0x1b8] sm:$0xff] %v3037_v10  ;;  %5175 = vst [vmem:[%s7316_s7 + $0x9b8] sm:$0xff] %v4061_v11  ;;  %6393 = vmatmul.mubr.msk.bf16.gmra.mrb[160].mxu0 %vm2014_vm0, %v6929_v2  ;;  %6649 = vmatmul.mubr.msk.bf16.gmra.mrb[160].mxu1 %vm2014_vm0, %v6930_v3 }
 0x15b   : > { %4917 = vst [vmem:[%s7316_s7 + $0x1a8] sm:$0xff] %v3029_v14  ;;  %5173 = vst [vmem:[%s7316_s7 + $0x9a8] sm:$0xff] %v4053_v15  ;;  %6396 = vmatprep.mubr.msk.bf16.mxu0 %vm2014_vm0, %v6931_v8  ;;  %6652 = vmatprep.mubr.msk.bf16.mxu1 %vm2014_vm0, %v6932_v9 }
 0x15d   : > { %v6290_v16 = vpop.f32.mrb[56].mxu0  ;;  %v6546_v17 = vpop.f32.mrb[56].mxu1 }
 0x15e   : > { %v3050_v18 = vadd.f32 %v6290_v16, %v7305_v51  ;;  %v4074_v19 = vadd.f32 %v6546_v17, %v7305_v51  ;;  %v3041_v20 = vpop.f32.mrb[57].mxu0  ;;  %v4065_v21 = vpop.f32.mrb[57].mxu1 }
 0x15f   : > { %v3042_v24 = vadd.f32 %v7305_v51, %v3041_v20  ;;  %v4066_v25 = vadd.f32 %v7305_v51, %v4065_v21  ;;  %v6291_v26 = vpop.f32.mrb[58].mxu0  ;;  %v6547_v27 = vpop.f32.mrb[58].mxu1  ;;  %v6946_v20 = vld [vmem:[%s7080_s26 + $0x6c8] sm:$0xff]  }
 0x160   : > { %4922 = vst [vmem:[%s7316_s7 + $0x1d0] sm:$0xff] %v3050_v18  ;;  %5178 = vst [vmem:[%s7316_s7 + $0x9d0] sm:$0xff] %v4074_v19  ;;  %v3053_v30 = vadd.f32 %v6291_v26, %v7305_v51  ;;  %v4077_v31 = vadd.f32 %v6547_v27, %v7305_v51  ;;  %v3044_v32 = vpop.f32.mrb[59].mxu0  ;;  %v4068_v33 = vpop.f32.mrb[59].mxu1  ;;  %v6945_v19 = vld [vmem:[%s7080_s26 + $0x2c8] sm:$0xff]   ;;  %v6948_v26 = vld [vmem:[%s7080_s26 + $0x6d0] sm:$0xff]  }
 0x161   : > { %4920 = vst [vmem:[%s7316_s7 + $0x1c0] sm:$0xff] %v3042_v24  ;;  %5176 = vst [vmem:[%s7316_s7 + $0x9c0] sm:$0xff] %v4066_v25  ;;  %v3045_v34 = vadd.f32 %v7305_v51, %v3044_v32  ;;  %v4069_v35 = vadd.f32 %v7305_v51, %v4068_v33  ;;  %v6947_v25 = vld [vmem:[%s7080_s26 + $0x2d0] sm:$0xff]  }
 0x162   : > { %4923 = vst [vmem:[%s7316_s7 + $0x1d8] sm:$0xff] %v3053_v30  ;;  %5179 = vst [vmem:[%s7316_s7 + $0x9d8] sm:$0xff] %v4077_v31  ;;  %6397 = vmatmul.mubr.msk.bf16.gmra.mrb[164].mxu0 %vm2014_vm0, %v6933_v22  ;;  %6653 = vmatmul.mubr.msk.bf16.gmra.mrb[164].mxu1 %vm2014_vm0, %v6934_v23 }
 0x163   : > { %4921 = vst [vmem:[%s7316_s7 + $0x1c8] sm:$0xff] %v3045_v34  ;;  %5177 = vst [vmem:[%s7316_s7 + $0x9c8] sm:$0xff] %v4069_v35  ;;  %6400 = vmatprep.mubr.msk.bf16.mxu0 %vm2014_vm0, %v6935_v28  ;;  %6656 = vmatprep.mubr.msk.bf16.mxu1 %vm2014_vm0, %v6936_v29 }
 0x165   : > { %v6294_v36 = vpop.f32.mrb[60].mxu0  ;;  %v6550_v37 = vpop.f32.mrb[60].mxu1 }
 0x166   : > { %v3066_v38 = vadd.f32 %v6294_v36, %v7305_v51  ;;  %v4090_v39 = vadd.f32 %v6550_v37, %v7305_v51  ;;  %v3057_v40 = vpop.f32.mrb[61].mxu0  ;;  %v4081_v41 = vpop.f32.mrb[61].mxu1  ;;  %v6939_v51 = vld [vmem:[%s7080_s26 + $0x2b0] sm:$0xff]  }
 0x167   : > { %v3058_v45 = vadd.f32 %v7683_v44, %v3057_v40  ;;  %v4082_v46 = vadd.f32 %v7683_v44, %v4081_v41  ;;  %v6295_v47 = vpop.f32.mrb[62].mxu0  ;;  %v6551_v48 = vpop.f32.mrb[62].mxu1  ;;  %v6950_v40 = vld [vmem:[%s7080_s26 + $0x6d8] sm:$0xff]  }
 0x168   : > { %4926 = vst [vmem:[%s7316_s7 + $0x1f0] sm:$0xff] %v3066_v38  ;;  %5182 = vst [vmem:[%s7316_s7 + $0x9f0] sm:$0xff] %v4090_v39  ;;  %v3069_v50 = vadd.f32 %v7683_v44, %v6295_v47  ;;  %v4093_v52 = vadd.f32 %v7683_v44, %v6551_v48  ;;  %v3060_v53 = vpop.f32.mrb[63].mxu0  ;;  %v4084_v54 = vpop.f32.mrb[63].mxu1  ;;  %v6949_v39 = vld [vmem:[%s7080_s26 + $0x2d8] sm:$0xff]   ;;  %v6952_v47 = vld [vmem:[%s7080_s26 + $0x6e0] sm:$0xff]  }
 0x169   : > { %4924 = vst [vmem:[%s7316_s7 + $0x1e0] sm:$0xff] %v3058_v45  ;;  %5180 = vst [vmem:[%s7316_s7 + $0x9e0] sm:$0xff] %v4082_v46  ;;  %v3061_v55 = vadd.f32 %v7683_v44, %v3060_v53  ;;  %v4085_v56 = vadd.f32 %v7683_v44, %v4084_v54  ;;  %v6951_v46 = vld [vmem:[%s7080_s26 + $0x2e0] sm:$0xff]  }
 0x16a   : > { %4927 = vst [vmem:[%s7316_s7 + $0x1f8] sm:$0xff] %v3069_v50  ;;  %5183 = vst [vmem:[%s7316_s7 + $0x9f8] sm:$0xff] %v4093_v52  ;;  %6401 = vmatmul.mubr.msk.bf16.gmra.mrb[168].mxu0 %vm2014_vm0, %v6937_v42  ;;  %6657 = vmatmul.mubr.msk.bf16.gmra.mrb[168].mxu1 %vm2014_vm0, %v6938_v43 }
 0x16b   : > { %4925 = vst [vmem:[%s7316_s7 + $0x1e8] sm:$0xff] %v3061_v55  ;;  %5181 = vst [vmem:[%s7316_s7 + $0x9e8] sm:$0xff] %v4085_v56  ;;  %6404 = vmatprep.mubr.msk.bf16.mxu0 %vm2014_vm0, %v6939_v51  ;;  %6660 = vmatprep.mubr.msk.bf16.mxu1 %vm2014_vm0, %v6940_v49 }
 0x16d   : > { %v6298_v57 = vpop.f32.mrb[64].mxu0  ;;  %v6554_v58 = vpop.f32.mrb[64].mxu1 }
 0x16e   : > { %v3082_v59 = vadd.f32 %v7683_v44, %v6298_v57  ;;  %v4106_v60 = vadd.f32 %v7683_v44, %v6554_v58  ;;  %v3073_v61 = vpop.f32.mrb[65].mxu0  ;;  %v4097_v62 = vpop.f32.mrb[65].mxu1 }
 0x16f   : > { %v3074_v1 = vadd.f32 %v7683_v44, %v3073_v61  ;;  %v4098_v2 = vadd.f32 %v7683_v44, %v4097_v62  ;;  %v6299_v3 = vpop.f32.mrb[66].mxu0  ;;  %v6555_v4 = vpop.f32.mrb[66].mxu1  ;;  %v6954_v61 = vld [vmem:[%s7080_s26 + $0x6e8] sm:$0xff]  }
 0x170   : > { %4930 = vst [vmem:[%s7316_s7 + $0x210] sm:$0xff] %v3082_v59  ;;  %5186 = vst [vmem:[%s7316_s7 + $0xa10] sm:$0xff] %v4106_v60  ;;  %v3085_v7 = vadd.f32 %v7683_v44, %v6299_v3  ;;  %v4109_v8 = vadd.f32 %v7683_v44, %v6555_v4  ;;  %v3076_v9 = vpop.f32.mrb[67].mxu0  ;;  %v4100_v10 = vpop.f32.mrb[67].mxu1  ;;  %v6953_v60 = vld [vmem:[%s7080_s26 + $0x2e8] sm:$0xff]   ;;  %v6956_v3 = vld [vmem:[%s7080_s26 + $0x6f0] sm:$0xff]  }
 0x171   : > { %4928 = vst [vmem:[%s7316_s7 + $0x200] sm:$0xff] %v3074_v1  ;;  %5184 = vst [vmem:[%s7316_s7 + $0xa00] sm:$0xff] %v4098_v2  ;;  %v3077_v11 = vadd.f32 %v7683_v44, %v3076_v9  ;;  %v4101_v12 = vadd.f32 %v7683_v44, %v4100_v10  ;;  %v6955_v2 = vld [vmem:[%s7080_s26 + $0x2f0] sm:$0xff]  }
 0x172   : > { %4931 = vst [vmem:[%s7316_s7 + $0x218] sm:$0xff] %v3085_v7  ;;  %5187 = vst [vmem:[%s7316_s7 + $0xa18] sm:$0xff] %v4109_v8  ;;  %6405 = vmatmul.mubr.msk.bf16.gmra.mrb[172].mxu0 %vm2014_vm0, %v6941_v63  ;;  %6661 = vmatmul.mubr.msk.bf16.gmra.mrb[172].mxu1 %vm2014_vm0, %v6942_v0 }
 0x173   : > { %4929 = vst [vmem:[%s7316_s7 + $0x208] sm:$0xff] %v3077_v11  ;;  %5185 = vst [vmem:[%s7316_s7 + $0xa08] sm:$0xff] %v4101_v12  ;;  %6408 = vmatprep.mubr.msk.bf16.mxu0 %vm2014_vm0, %v6943_v5  ;;  %6664 = vmatprep.mubr.msk.bf16.mxu1 %vm2014_vm0, %v6944_v6 }
 0x175   : > { %v6302_v13 = vpop.f32.mrb[68].mxu0  ;;  %v6558_v14 = vpop.f32.mrb[68].mxu1 }
 0x176   : > { %v3098_v15 = vadd.f32 %v7683_v44, %v6302_v13  ;;  %v4122_v16 = vadd.f32 %v7683_v44, %v6558_v14  ;;  %v3089_v17 = vpop.f32.mrb[69].mxu0  ;;  %v4113_v18 = vpop.f32.mrb[69].mxu1 }
 0x177   : > { %v3090_v21 = vadd.f32 %v7683_v44, %v3089_v17  ;;  %v4114_v22 = vadd.f32 %v7683_v44, %v4113_v18  ;;  %v6303_v23 = vpop.f32.mrb[70].mxu0  ;;  %v6559_v24 = vpop.f32.mrb[70].mxu1  ;;  %v6958_v17 = vld [vmem:[%s7080_s26 + $0x6f8] sm:$0xff]  }
 0x178   : > { %4934 = vst [vmem:[%s7316_s7 + $0x230] sm:$0xff] %v3098_v15  ;;  %5190 = vst [vmem:[%s7316_s7 + $0xa30] sm:$0xff] %v4122_v16  ;;  %v3101_v27 = vadd.f32 %v7683_v44, %v6303_v23  ;;  %v4125_v28 = vadd.f32 %v7683_v44, %v6559_v24  ;;  %v3092_v29 = vpop.f32.mrb[71].mxu0  ;;  %v4116_v30 = vpop.f32.mrb[71].mxu1  ;;  %v6957_v16 = vld [vmem:[%s7080_s26 + $0x2f8] sm:$0xff]   ;;  %v6960_v23 = vld [vmem:[%s7080_s26 + $0x700] sm:$0xff]  }
 0x179   : > { %4932 = vst [vmem:[%s7316_s7 + $0x220] sm:$0xff] %v3090_v21  ;;  %5188 = vst [vmem:[%s7316_s7 + $0xa20] sm:$0xff] %v4114_v22  ;;  %v3093_v31 = vadd.f32 %v7683_v44, %v3092_v29  ;;  %v4117_v32 = vadd.f32 %v7683_v44, %v4116_v30  ;;  %v6959_v22 = vld [vmem:[%s7080_s26 + $0x300] sm:$0xff]  }
 0x17a   : > { %4935 = vst [vmem:[%s7316_s7 + $0x238] sm:$0xff] %v3101_v27  ;;  %5191 = vst [vmem:[%s7316_s7 + $0xa38] sm:$0xff] %v4125_v28  ;;  %6409 = vmatmul.mubr.msk.bf16.gmra.mrb[176].mxu0 %vm2014_vm0, %v6945_v19  ;;  %6665 = vmatmul.mubr.msk.bf16.gmra.mrb[176].mxu1 %vm2014_vm0, %v6946_v20 }
 0x17b   : > { %4933 = vst [vmem:[%s7316_s7 + $0x228] sm:$0xff] %v3093_v31  ;;  %5189 = vst [vmem:[%s7316_s7 + $0xa28] sm:$0xff] %v4117_v32  ;;  %6412 = vmatprep.mubr.msk.bf16.mxu0 %vm2014_vm0, %v6947_v25  ;;  %6668 = vmatprep.mubr.msk.bf16.mxu1 %vm2014_vm0, %v6948_v26 }
 0x17d   : > { %v6306_v33 = vpop.f32.mrb[72].mxu0  ;;  %v6562_v34 = vpop.f32.mrb[72].mxu1 }
 0x17e   : > { %v3114_v35 = vadd.f32 %v7683_v44, %v6306_v33  ;;  %v4138_v36 = vadd.f32 %v7683_v44, %v6562_v34  ;;  %v3105_v37 = vpop.f32.mrb[73].mxu0  ;;  %v4129_v38 = vpop.f32.mrb[73].mxu1 }
 0x17f   : > { %v3106_v41 = vadd.f32 %v7683_v44, %v3105_v37  ;;  %v4130_v42 = vadd.f32 %v7683_v44, %v4129_v38  ;;  %v6307_v43 = vpop.f32.mrb[74].mxu0  ;;  %v6563_v45 = vpop.f32.mrb[74].mxu1  ;;  %v6962_v37 = vld [vmem:[%s7080_s26 + $0x708] sm:$0xff]  }
 0x180   : > { %4938 = vst [vmem:[%s7316_s7 + $0x250] sm:$0xff] %v3114_v35  ;;  %5194 = vst [vmem:[%s7316_s7 + $0xa50] sm:$0xff] %v4138_v36  ;;  %v3117_v48 = vadd.f32 %v7683_v44, %v6307_v43  ;;  %v4141_v51 = vadd.f32 %v7683_v44, %v6563_v45  ;;  %v3108_v49 = vpop.f32.mrb[75].mxu0  ;;  %v4132_v50 = vpop.f32.mrb[75].mxu1  ;;  %v6961_v36 = vld [vmem:[%s7080_s26 + $0x308] sm:$0xff]   ;;  %v6964_v43 = vld [vmem:[%s7080_s26 + $0x710] sm:$0xff]  }
 0x181   : > { %4936 = vst [vmem:[%s7316_s7 + $0x240] sm:$0xff] %v3106_v41  ;;  %5192 = vst [vmem:[%s7316_s7 + $0xa40] sm:$0xff] %v4130_v42  ;;  %v3109_v52 = vadd.f32 %v7683_v44, %v3108_v49  ;;  %v4133_v53 = vadd.f32 %v7683_v44, %v4132_v50  ;;  %v6963_v42 = vld [vmem:[%s7080_s26 + $0x310] sm:$0xff]  }
 0x182   : > { %4939 = vst [vmem:[%s7316_s7 + $0x258] sm:$0xff] %v3117_v48  ;;  %5195 = vst [vmem:[%s7316_s7 + $0xa58] sm:$0xff] %v4141_v51  ;;  %6413 = vmatmul.mubr.msk.bf16.gmra.mrb[180].mxu0 %vm2014_vm0, %v6949_v39  ;;  %6669 = vmatmul.mubr.msk.bf16.gmra.mrb[180].mxu1 %vm2014_vm0, %v6950_v40 }
 0x183   : > { %4937 = vst [vmem:[%s7316_s7 + $0x248] sm:$0xff] %v3109_v52  ;;  %5193 = vst [vmem:[%s7316_s7 + $0xa48] sm:$0xff] %v4133_v53  ;;  %6416 = vmatprep.mubr.msk.bf16.mxu0 %vm2014_vm0, %v6951_v46  ;;  %6672 = vmatprep.mubr.msk.bf16.mxu1 %vm2014_vm0, %v6952_v47 }
 0x185   : > { %v6310_v54 = vpop.f32.mrb[76].mxu0  ;;  %v6566_v55 = vpop.f32.mrb[76].mxu1 }
 0x186   : > { %v3130_v56 = vadd.f32 %v7683_v44, %v6310_v54  ;;  %v4154_v57 = vadd.f32 %v7683_v44, %v6566_v55  ;;  %v3121_v58 = vpop.f32.mrb[77].mxu0  ;;  %v4145_v59 = vpop.f32.mrb[77].mxu1 }
 0x187   : > { %v3122_v62 = vadd.f32 %v7683_v44, %v3121_v58  ;;  %v4146_v63 = vadd.f32 %v7683_v44, %v4145_v59  ;;  %v6311_v0 = vpop.f32.mrb[78].mxu0  ;;  %v6567_v1 = vpop.f32.mrb[78].mxu1  ;;  %v6966_v58 = vld [vmem:[%s7080_s26 + $0x718] sm:$0xff]  }
 0x188   : > { %4942 = vst [vmem:[%s7316_s7 + $0x270] sm:$0xff] %v3130_v56  ;;  %5198 = vst [vmem:[%s7316_s7 + $0xa70] sm:$0xff] %v4154_v57  ;;  %v3133_v4 = vadd.f32 %v7683_v44, %v6311_v0  ;;  %v4157_v5 = vadd.f32 %v7683_v44, %v6567_v1  ;;  %v3124_v6 = vpop.f32.mrb[79].mxu0  ;;  %v4148_v7 = vpop.f32.mrb[79].mxu1  ;;  %v6965_v57 = vld [vmem:[%s7080_s26 + $0x318] sm:$0xff]   ;;  %v6968_v0 = vld [vmem:[%s7080_s26 + $0x720] sm:$0xff]  }
 0x189   : > { %4940 = vst [vmem:[%s7316_s7 + $0x260] sm:$0xff] %v3122_v62  ;;  %5196 = vst [vmem:[%s7316_s7 + $0xa60] sm:$0xff] %v4146_v63  ;;  %v3125_v8 = vadd.f32 %v7683_v44, %v3124_v6  ;;  %v4149_v9 = vadd.f32 %v7683_v44, %v4148_v7  ;;  %v6967_v63 = vld [vmem:[%s7080_s26 + $0x320] sm:$0xff]  }
 0x18a   : > { %4943 = vst [vmem:[%s7316_s7 + $0x278] sm:$0xff] %v3133_v4  ;;  %5199 = vst [vmem:[%s7316_s7 + $0xa78] sm:$0xff] %v4157_v5  ;;  %6417 = vmatmul.mubr.msk.bf16.gmra.mrb[184].mxu0 %vm2014_vm0, %v6953_v60  ;;  %6673 = vmatmul.mubr.msk.bf16.gmra.mrb[184].mxu1 %vm2014_vm0, %v6954_v61 }
 0x18b   : > { %4941 = vst [vmem:[%s7316_s7 + $0x268] sm:$0xff] %v3125_v8  ;;  %5197 = vst [vmem:[%s7316_s7 + $0xa68] sm:$0xff] %v4149_v9  ;;  %6420 = vmatprep.mubr.msk.bf16.mxu0 %vm2014_vm0, %v6955_v2  ;;  %6676 = vmatprep.mubr.msk.bf16.mxu1 %vm2014_vm0, %v6956_v3 }
 0x18d   : > { %v6314_v10 = vpop.f32.mrb[80].mxu0  ;;  %v6570_v11 = vpop.f32.mrb[80].mxu1 }
 0x18e   : > { %v3146_v12 = vadd.f32 %v7683_v44, %v6314_v10  ;;  %v4170_v13 = vadd.f32 %v7683_v44, %v6570_v11  ;;  %v3137_v14 = vpop.f32.mrb[81].mxu0  ;;  %v4161_v15 = vpop.f32.mrb[81].mxu1 }
 0x18f   : > { %v3138_v18 = vadd.f32 %v7683_v44, %v3137_v14  ;;  %v4162_v19 = vadd.f32 %v7683_v44, %v4161_v15  ;;  %v6315_v20 = vpop.f32.mrb[82].mxu0  ;;  %v6571_v21 = vpop.f32.mrb[82].mxu1  ;;  %v6970_v14 = vld [vmem:[%s7080_s26 + $0x728] sm:$0xff]  }
 0x190   : > { %4946 = vst [vmem:[%s7316_s7 + $0x290] sm:$0xff] %v3146_v12  ;;  %5202 = vst [vmem:[%s7316_s7 + $0xa90] sm:$0xff] %v4170_v13  ;;  %v3149_v24 = vadd.f32 %v7683_v44, %v6315_v20  ;;  %v4173_v25 = vadd.f32 %v7683_v44, %v6571_v21  ;;  %v3140_v26 = vpop.f32.mrb[83].mxu0  ;;  %v4164_v27 = vpop.f32.mrb[83].mxu1  ;;  %v6969_v13 = vld [vmem:[%s7080_s26 + $0x328] sm:$0xff]   ;;  %v6972_v20 = vld [vmem:[%s7080_s26 + $0x730] sm:$0xff]  }
 0x191   : > { %4944 = vst [vmem:[%s7316_s7 + $0x280] sm:$0xff] %v3138_v18  ;;  %5200 = vst [vmem:[%s7316_s7 + $0xa80] sm:$0xff] %v4162_v19  ;;  %v3141_v28 = vadd.f32 %v7683_v44, %v3140_v26  ;;  %v4165_v29 = vadd.f32 %v7683_v44, %v4164_v27  ;;  %v6971_v19 = vld [vmem:[%s7080_s26 + $0x330] sm:$0xff]  }
 0x192   : > { %4947 = vst [vmem:[%s7316_s7 + $0x298] sm:$0xff] %v3149_v24  ;;  %5203 = vst [vmem:[%s7316_s7 + $0xa98] sm:$0xff] %v4173_v25  ;;  %6421 = vmatmul.mubr.msk.bf16.gmra.mrb[188].mxu0 %vm2014_vm0, %v6957_v16  ;;  %6677 = vmatmul.mubr.msk.bf16.gmra.mrb[188].mxu1 %vm2014_vm0, %v6958_v17 }
 0x193   : > { %4945 = vst [vmem:[%s7316_s7 + $0x288] sm:$0xff] %v3141_v28  ;;  %5201 = vst [vmem:[%s7316_s7 + $0xa88] sm:$0xff] %v4165_v29  ;;  %6424 = vmatprep.mubr.msk.bf16.mxu0 %vm2014_vm0, %v6959_v22  ;;  %6680 = vmatprep.mubr.msk.bf16.mxu1 %vm2014_vm0, %v6960_v23 }
 0x195   : > { %v6318_v30 = vpop.f32.mrb[84].mxu0  ;;  %v6574_v31 = vpop.f32.mrb[84].mxu1 }
 0x196   : > { %v3162_v32 = vadd.f32 %v7683_v44, %v6318_v30  ;;  %v4186_v33 = vadd.f32 %v7683_v44, %v6574_v31  ;;  %v3153_v34 = vpop.f32.mrb[85].mxu0  ;;  %v4177_v35 = vpop.f32.mrb[85].mxu1 }
 0x197   : > { %v3154_v38 = vadd.f32 %v7683_v44, %v3153_v34  ;;  %v4178_v39 = vadd.f32 %v7683_v44, %v4177_v35  ;;  %v6319_v40 = vpop.f32.mrb[86].mxu0  ;;  %v6575_v41 = vpop.f32.mrb[86].mxu1  ;;  %v6974_v34 = vld [vmem:[%s7080_s26 + $0x738] sm:$0xff]  }
 0x198   : > { %4950 = vst [vmem:[%s7316_s7 + $0x2b0] sm:$0xff] %v3162_v32  ;;  %5206 = vst [vmem:[%s7316_s7 + $0xab0] sm:$0xff] %v4186_v33  ;;  %v3165_v45 = vadd.f32 %v7683_v44, %v6319_v40  ;;  %v4189_v46 = vadd.f32 %v7683_v44, %v6575_v41  ;;  %v3156_v47 = vpop.f32.mrb[87].mxu0  ;;  %v4180_v48 = vpop.f32.mrb[87].mxu1  ;;  %v6973_v33 = vld [vmem:[%s7080_s26 + $0x338] sm:$0xff]   ;;  %v6976_v40 = vld [vmem:[%s7080_s26 + $0x740] sm:$0xff]  }
 0x199   : > { %4948 = vst [vmem:[%s7316_s7 + $0x2a0] sm:$0xff] %v3154_v38  ;;  %5204 = vst [vmem:[%s7316_s7 + $0xaa0] sm:$0xff] %v4178_v39  ;;  %v3157_v51 = vadd.f32 %v7683_v44, %v3156_v47  ;;  %v4181_v49 = vadd.f32 %v7683_v44, %v4180_v48  ;;  %v6975_v39 = vld [vmem:[%s7080_s26 + $0x340] sm:$0xff]  }
 0x19a   : > { %4951 = vst [vmem:[%s7316_s7 + $0x2b8] sm:$0xff] %v3165_v45  ;;  %5207 = vst [vmem:[%s7316_s7 + $0xab8] sm:$0xff] %v4189_v46  ;;  %6425 = vmatmul.mubr.msk.bf16.gmra.mrb[192].mxu0 %vm2014_vm0, %v6961_v36  ;;  %6681 = vmatmul.mubr.msk.bf16.gmra.mrb[192].mxu1 %vm2014_vm0, %v6962_v37 }
 0x19b   : > { %4949 = vst [vmem:[%s7316_s7 + $0x2a8] sm:$0xff] %v3157_v51  ;;  %5205 = vst [vmem:[%s7316_s7 + $0xaa8] sm:$0xff] %v4181_v49  ;;  %6428 = vmatprep.mubr.msk.bf16.mxu0 %vm2014_vm0, %v6963_v42  ;;  %6684 = vmatprep.mubr.msk.bf16.mxu1 %vm2014_vm0, %v6964_v43 }
 0x19d   : > { %v6322_v50 = vpop.f32.mrb[88].mxu0  ;;  %v6578_v52 = vpop.f32.mrb[88].mxu1 }
 0x19e   : > { %v3178_v53 = vadd.f32 %v7683_v44, %v6322_v50  ;;  %v4202_v54 = vadd.f32 %v7683_v44, %v6578_v52  ;;  %v3169_v55 = vpop.f32.mrb[89].mxu0  ;;  %v4193_v56 = vpop.f32.mrb[89].mxu1 }
 0x19f   : > { %v3170_v59 = vadd.f32 %v7683_v44, %v3169_v55  ;;  %v4194_v60 = vadd.f32 %v7683_v44, %v4193_v56  ;;  %v6323_v61 = vpop.f32.mrb[90].mxu0  ;;  %v6579_v62 = vpop.f32.mrb[90].mxu1  ;;  %v6978_v55 = vld [vmem:[%s7080_s26 + $0x748] sm:$0xff]  }
 0x1a0   : > { %4954 = vst [vmem:[%s7316_s7 + $0x2d0] sm:$0xff] %v3178_v53  ;;  %5210 = vst [vmem:[%s7316_s7 + $0xad0] sm:$0xff] %v4202_v54  ;;  %v3181_v1 = vadd.f32 %v7683_v44, %v6323_v61  ;;  %v4205_v2 = vadd.f32 %v7683_v44, %v6579_v62  ;;  %v3172_v3 = vpop.f32.mrb[91].mxu0  ;;  %v4196_v4 = vpop.f32.mrb[91].mxu1  ;;  %v6977_v54 = vld [vmem:[%s7080_s26 + $0x348] sm:$0xff]   ;;  %v6980_v61 = vld [vmem:[%s7080_s26 + $0x750] sm:$0xff]  }
 0x1a1   : > { %4952 = vst [vmem:[%s7316_s7 + $0x2c0] sm:$0xff] %v3170_v59  ;;  %5208 = vst [vmem:[%s7316_s7 + $0xac0] sm:$0xff] %v4194_v60  ;;  %v3173_v5 = vadd.f32 %v7683_v44, %v3172_v3  ;;  %v4197_v6 = vadd.f32 %v7683_v44, %v4196_v4  ;;  %v6979_v60 = vld [vmem:[%s7080_s26 + $0x350] sm:$0xff]  }
 0x1a2   : > { %4955 = vst [vmem:[%s7316_s7 + $0x2d8] sm:$0xff] %v3181_v1  ;;  %5211 = vst [vmem:[%s7316_s7 + $0xad8] sm:$0xff] %v4205_v2  ;;  %6429 = vmatmul.mubr.msk.bf16.gmra.mrb[196].mxu0 %vm2014_vm0, %v6965_v57  ;;  %6685 = vmatmul.mubr.msk.bf16.gmra.mrb[196].mxu1 %vm2014_vm0, %v6966_v58 }
 0x1a3   : > { %4953 = vst [vmem:[%s7316_s7 + $0x2c8] sm:$0xff] %v3173_v5  ;;  %5209 = vst [vmem:[%s7316_s7 + $0xac8] sm:$0xff] %v4197_v6  ;;  %6432 = vmatprep.mubr.msk.bf16.mxu0 %vm2014_vm0, %v6967_v63  ;;  %6688 = vmatprep.mubr.msk.bf16.mxu1 %vm2014_vm0, %v6968_v0 }
 0x1a5   : > { %v6326_v7 = vpop.f32.mrb[92].mxu0  ;;  %v6582_v8 = vpop.f32.mrb[92].mxu1 }
 0x1a6   : > { %v3194_v9 = vadd.f32 %v7683_v44, %v6326_v7  ;;  %v4218_v10 = vadd.f32 %v7683_v44, %v6582_v8  ;;  %v3185_v11 = vpop.f32.mrb[93].mxu0  ;;  %v4209_v12 = vpop.f32.mrb[93].mxu1 }
 0x1a7   : > { %v3186_v15 = vadd.f32 %v7683_v44, %v3185_v11  ;;  %v4210_v16 = vadd.f32 %v7683_v44, %v4209_v12  ;;  %v6327_v17 = vpop.f32.mrb[94].mxu0  ;;  %v6583_v18 = vpop.f32.mrb[94].mxu1  ;;  %v6982_v11 = vld [vmem:[%s7080_s26 + $0x758] sm:$0xff]  }
 0x1a8   : > { %4958 = vst [vmem:[%s7316_s7 + $0x2f0] sm:$0xff] %v3194_v9  ;;  %5214 = vst [vmem:[%s7316_s7 + $0xaf0] sm:$0xff] %v4218_v10  ;;  %v3197_v21 = vadd.f32 %v7683_v44, %v6327_v17  ;;  %v4221_v22 = vadd.f32 %v7683_v44, %v6583_v18  ;;  %v3188_v23 = vpop.f32.mrb[95].mxu0  ;;  %v4212_v24 = vpop.f32.mrb[95].mxu1  ;;  %v6981_v10 = vld [vmem:[%s7080_s26 + $0x358] sm:$0xff]   ;;  %v6984_v17 = vld [vmem:[%s7080_s26 + $0x760] sm:$0xff]  }
 0x1a9   : > { %4956 = vst [vmem:[%s7316_s7 + $0x2e0] sm:$0xff] %v3186_v15  ;;  %5212 = vst [vmem:[%s7316_s7 + $0xae0] sm:$0xff] %v4210_v16  ;;  %v3189_v25 = vadd.f32 %v7683_v44, %v3188_v23  ;;  %v4213_v26 = vadd.f32 %v7683_v44, %v4212_v24  ;;  %v6983_v16 = vld [vmem:[%s7080_s26 + $0x360] sm:$0xff]  }
 0x1aa   : > { %4959 = vst [vmem:[%s7316_s7 + $0x2f8] sm:$0xff] %v3197_v21  ;;  %5215 = vst [vmem:[%s7316_s7 + $0xaf8] sm:$0xff] %v4221_v22  ;;  %6433 = vmatmul.mubr.msk.bf16.gmra.mrb[200].mxu0 %vm2014_vm0, %v6969_v13  ;;  %6689 = vmatmul.mubr.msk.bf16.gmra.mrb[200].mxu1 %vm2014_vm0, %v6970_v14 }
 0x1ab   : > { %4957 = vst [vmem:[%s7316_s7 + $0x2e8] sm:$0xff] %v3189_v25  ;;  %5213 = vst [vmem:[%s7316_s7 + $0xae8] sm:$0xff] %v4213_v26  ;;  %6436 = vmatprep.mubr.msk.bf16.mxu0 %vm2014_vm0, %v6971_v19  ;;  %6692 = vmatprep.mubr.msk.bf16.mxu1 %vm2014_vm0, %v6972_v20 }
 0x1ad   : > { %v6330_v27 = vpop.f32.mrb[96].mxu0  ;;  %v6586_v28 = vpop.f32.mrb[96].mxu1 }
 0x1ae   : > { %v3210_v29 = vadd.f32 %v7683_v44, %v6330_v27  ;;  %v4234_v30 = vadd.f32 %v7683_v44, %v6586_v28  ;;  %v3201_v31 = vpop.f32.mrb[97].mxu0  ;;  %v4225_v32 = vpop.f32.mrb[97].mxu1 }
 0x1af   : > { %v3202_v35 = vadd.f32 %v7683_v44, %v3201_v31  ;;  %v4226_v36 = vadd.f32 %v7683_v44, %v4225_v32  ;;  %v6331_v37 = vpop.f32.mrb[98].mxu0  ;;  %v6587_v38 = vpop.f32.mrb[98].mxu1  ;;  %v6986_v31 = vld [vmem:[%s7080_s26 + $0x768] sm:$0xff]  }
 0x1b0   : > { %4962 = vst [vmem:[%s7316_s7 + $0x310] sm:$0xff] %v3210_v29  ;;  %5218 = vst [vmem:[%s7316_s7 + $0xb10] sm:$0xff] %v4234_v30  ;;  %v3213_v41 = vadd.f32 %v7683_v44, %v6331_v37  ;;  %v4237_v42 = vadd.f32 %v7683_v44, %v6587_v38  ;;  %v3204_v43 = vpop.f32.mrb[99].mxu0  ;;  %v4228_v45 = vpop.f32.mrb[99].mxu1  ;;  %v6985_v30 = vld [vmem:[%s7080_s26 + $0x368] sm:$0xff]   ;;  %v6988_v37 = vld [vmem:[%s7080_s26 + $0x770] sm:$0xff]  }
 0x1b1   : > { %4960 = vst [vmem:[%s7316_s7 + $0x300] sm:$0xff] %v3202_v35  ;;  %5216 = vst [vmem:[%s7316_s7 + $0xb00] sm:$0xff] %v4226_v36  ;;  %v3205_v46 = vadd.f32 %v7683_v44, %v3204_v43  ;;  %v4229_v47 = vadd.f32 %v7683_v44, %v4228_v45  ;;  %v6987_v36 = vld [vmem:[%s7080_s26 + $0x370] sm:$0xff]  }
 0x1b2   : > { %4963 = vst [vmem:[%s7316_s7 + $0x318] sm:$0xff] %v3213_v41  ;;  %5219 = vst [vmem:[%s7316_s7 + $0xb18] sm:$0xff] %v4237_v42  ;;  %6437 = vmatmul.mubr.msk.bf16.gmra.mrb[204].mxu0 %vm2014_vm0, %v6973_v33  ;;  %6693 = vmatmul.mubr.msk.bf16.gmra.mrb[204].mxu1 %vm2014_vm0, %v6974_v34 }
 0x1b3   : > { %4961 = vst [vmem:[%s7316_s7 + $0x308] sm:$0xff] %v3205_v46  ;;  %5217 = vst [vmem:[%s7316_s7 + $0xb08] sm:$0xff] %v4229_v47  ;;  %6440 = vmatprep.mubr.msk.bf16.mxu0 %vm2014_vm0, %v6975_v39  ;;  %6696 = vmatprep.mubr.msk.bf16.mxu1 %vm2014_vm0, %v6976_v40 }
 0x1b5   : > { %v6334_v48 = vpop.f32.mrb[100].mxu0  ;;  %v6590_v51 = vpop.f32.mrb[100].mxu1 }
 0x1b6   : > { %v3226_v49 = vadd.f32 %v7683_v44, %v6334_v48  ;;  %v4250_v50 = vadd.f32 %v7683_v44, %v6590_v51  ;;  %v3217_v52 = vpop.f32.mrb[101].mxu0  ;;  %v4241_v53 = vpop.f32.mrb[101].mxu1 }
 0x1b7   : > { %v3218_v56 = vadd.f32 %v7683_v44, %v3217_v52  ;;  %v4242_v57 = vadd.f32 %v7683_v44, %v4241_v53  ;;  %v6335_v58 = vpop.f32.mrb[102].mxu0  ;;  %v6591_v59 = vpop.f32.mrb[102].mxu1  ;;  %v6990_v52 = vld [vmem:[%s7080_s26 + $0x778] sm:$0xff]  }
 0x1b8   : > { %4966 = vst [vmem:[%s7316_s7 + $0x330] sm:$0xff] %v3226_v49  ;;  %5222 = vst [vmem:[%s7316_s7 + $0xb30] sm:$0xff] %v4250_v50  ;;  %v3229_v62 = vadd.f32 %v7683_v44, %v6335_v58  ;;  %v4253_v63 = vadd.f32 %v7683_v44, %v6591_v59  ;;  %v3220_v0 = vpop.f32.mrb[103].mxu0  ;;  %v4244_v1 = vpop.f32.mrb[103].mxu1  ;;  %v6989_v50 = vld [vmem:[%s7080_s26 + $0x378] sm:$0xff]   ;;  %v6992_v58 = vld [vmem:[%s7080_s26 + $0x780] sm:$0xff]  }
 0x1b9   : > { %4964 = vst [vmem:[%s7316_s7 + $0x320] sm:$0xff] %v3218_v56  ;;  %5220 = vst [vmem:[%s7316_s7 + $0xb20] sm:$0xff] %v4242_v57  ;;  %v3221_v2 = vadd.f32 %v7683_v44, %v3220_v0  ;;  %v4245_v3 = vadd.f32 %v7683_v44, %v4244_v1  ;;  %v6991_v57 = vld [vmem:[%s7080_s26 + $0x380] sm:$0xff]  }
 0x1ba   : > { %4967 = vst [vmem:[%s7316_s7 + $0x338] sm:$0xff] %v3229_v62  ;;  %5223 = vst [vmem:[%s7316_s7 + $0xb38] sm:$0xff] %v4253_v63  ;;  %6441 = vmatmul.mubr.msk.bf16.gmra.mrb[208].mxu0 %vm2014_vm0, %v6977_v54  ;;  %6697 = vmatmul.mubr.msk.bf16.gmra.mrb[208].mxu1 %vm2014_vm0, %v6978_v55 }
 0x1bb   : > { %4965 = vst [vmem:[%s7316_s7 + $0x328] sm:$0xff] %v3221_v2  ;;  %5221 = vst [vmem:[%s7316_s7 + $0xb28] sm:$0xff] %v4245_v3  ;;  %6444 = vmatprep.mubr.msk.bf16.mxu0 %vm2014_vm0, %v6979_v60  ;;  %6700 = vmatprep.mubr.msk.bf16.mxu1 %vm2014_vm0, %v6980_v61 }
 0x1bd   : > { %v6338_v4 = vpop.f32.mrb[104].mxu0  ;;  %v6594_v5 = vpop.f32.mrb[104].mxu1 }
 0x1be   : > { %v3242_v6 = vadd.f32 %v7683_v44, %v6338_v4  ;;  %v4266_v7 = vadd.f32 %v7683_v44, %v6594_v5  ;;  %v3233_v8 = vpop.f32.mrb[105].mxu0  ;;  %v4257_v9 = vpop.f32.mrb[105].mxu1 }
 0x1bf   : > { %v3234_v12 = vadd.f32 %v7683_v44, %v3233_v8  ;;  %v4258_v13 = vadd.f32 %v7683_v44, %v4257_v9  ;;  %v6339_v14 = vpop.f32.mrb[106].mxu0  ;;  %v6595_v15 = vpop.f32.mrb[106].mxu1  ;;  %v6994_v8 = vld [vmem:[%s7080_s26 + $0x788] sm:$0xff]  }
 0x1c0   : > { %4970 = vst [vmem:[%s7316_s7 + $0x350] sm:$0xff] %v3242_v6  ;;  %5226 = vst [vmem:[%s7316_s7 + $0xb50] sm:$0xff] %v4266_v7  ;;  %v3245_v18 = vadd.f32 %v7683_v44, %v6339_v14  ;;  %v4269_v19 = vadd.f32 %v7683_v44, %v6595_v15  ;;  %v3236_v20 = vpop.f32.mrb[107].mxu0  ;;  %v4260_v21 = vpop.f32.mrb[107].mxu1  ;;  %v6993_v7 = vld [vmem:[%s7080_s26 + $0x388] sm:$0xff]   ;;  %v6996_v14 = vld [vmem:[%s7080_s26 + $0x790] sm:$0xff]  }
 0x1c1   : > { %4968 = vst [vmem:[%s7316_s7 + $0x340] sm:$0xff] %v3234_v12  ;;  %5224 = vst [vmem:[%s7316_s7 + $0xb40] sm:$0xff] %v4258_v13  ;;  %v3237_v22 = vadd.f32 %v7683_v44, %v3236_v20  ;;  %v4261_v23 = vadd.f32 %v7683_v44, %v4260_v21  ;;  %v6995_v13 = vld [vmem:[%s7080_s26 + $0x390] sm:$0xff]  }
 0x1c2   : > { %4971 = vst [vmem:[%s7316_s7 + $0x358] sm:$0xff] %v3245_v18  ;;  %5227 = vst [vmem:[%s7316_s7 + $0xb58] sm:$0xff] %v4269_v19  ;;  %6445 = vmatmul.mubr.msk.bf16.gmra.mrb[212].mxu0 %vm2014_vm0, %v6981_v10  ;;  %6701 = vmatmul.mubr.msk.bf16.gmra.mrb[212].mxu1 %vm2014_vm0, %v6982_v11 }
 0x1c3   : > { %4969 = vst [vmem:[%s7316_s7 + $0x348] sm:$0xff] %v3237_v22  ;;  %5225 = vst [vmem:[%s7316_s7 + $0xb48] sm:$0xff] %v4261_v23  ;;  %6448 = vmatprep.mubr.msk.bf16.mxu0 %vm2014_vm0, %v6983_v16  ;;  %6704 = vmatprep.mubr.msk.bf16.mxu1 %vm2014_vm0, %v6984_v17 }
 0x1c5   : > { %v6342_v24 = vpop.f32.mrb[108].mxu0  ;;  %v6598_v25 = vpop.f32.mrb[108].mxu1 }
 0x1c6   : > { %v3258_v26 = vadd.f32 %v7683_v44, %v6342_v24  ;;  %v4282_v27 = vadd.f32 %v7683_v44, %v6598_v25  ;;  %v3249_v28 = vpop.f32.mrb[109].mxu0  ;;  %v4273_v29 = vpop.f32.mrb[109].mxu1 }
 0x1c7   : > { %v3250_v32 = vadd.f32 %v7683_v44, %v3249_v28  ;;  %v4274_v33 = vadd.f32 %v7683_v44, %v4273_v29  ;;  %v6343_v34 = vpop.f32.mrb[110].mxu0  ;;  %v6599_v35 = vpop.f32.mrb[110].mxu1  ;;  %v6998_v28 = vld [vmem:[%s7080_s26 + $0x798] sm:$0xff]  }
 0x1c8   : > { %4974 = vst [vmem:[%s7316_s7 + $0x370] sm:$0xff] %v3258_v26  ;;  %5230 = vst [vmem:[%s7316_s7 + $0xb70] sm:$0xff] %v4282_v27  ;;  %v3261_v38 = vadd.f32 %v7683_v44, %v6343_v34  ;;  %v4285_v39 = vadd.f32 %v7683_v44, %v6599_v35  ;;  %v3252_v40 = vpop.f32.mrb[111].mxu0  ;;  %v4276_v41 = vpop.f32.mrb[111].mxu1  ;;  %v6997_v27 = vld [vmem:[%s7080_s26 + $0x398] sm:$0xff]   ;;  %v7000_v34 = vld [vmem:[%s7080_s26 + $0x7a0] sm:$0xff]  }
 0x1c9   : > { %4972 = vst [vmem:[%s7316_s7 + $0x360] sm:$0xff] %v3250_v32  ;;  %5228 = vst [vmem:[%s7316_s7 + $0xb60] sm:$0xff] %v4274_v33  ;;  %v3253_v42 = vadd.f32 %v7683_v44, %v3252_v40  ;;  %v4277_v43 = vadd.f32 %v7683_v44, %v4276_v41  ;;  %v6999_v33 = vld [vmem:[%s7080_s26 + $0x3a0] sm:$0xff]  }
 0x1ca   : > { %4975 = vst [vmem:[%s7316_s7 + $0x378] sm:$0xff] %v3261_v38  ;;  %5231 = vst [vmem:[%s7316_s7 + $0xb78] sm:$0xff] %v4285_v39  ;;  %6449 = vmatmul.mubr.msk.bf16.gmra.mrb[216].mxu0 %vm2014_vm0, %v6985_v30  ;;  %6705 = vmatmul.mubr.msk.bf16.gmra.mrb[216].mxu1 %vm2014_vm0, %v6986_v31 }
 0x1cb   : > { %4973 = vst [vmem:[%s7316_s7 + $0x368] sm:$0xff] %v3253_v42  ;;  %5229 = vst [vmem:[%s7316_s7 + $0xb68] sm:$0xff] %v4277_v43  ;;  %6452 = vmatprep.mubr.msk.bf16.mxu0 %vm2014_vm0, %v6987_v36  ;;  %6708 = vmatprep.mubr.msk.bf16.mxu1 %vm2014_vm0, %v6988_v37 }
 0x1cd   : > { %v6346_v45 = vpop.f32.mrb[112].mxu0  ;;  %v6602_v46 = vpop.f32.mrb[112].mxu1 }
 0x1ce   : > { %v3274_v47 = vadd.f32 %v7683_v44, %v6346_v45  ;;  %v4298_v48 = vadd.f32 %v7683_v44, %v6602_v46  ;;  %v3265_v51 = vpop.f32.mrb[113].mxu0  ;;  %v4289_v49 = vpop.f32.mrb[113].mxu1 }
 0x1cf   : > { %v3266_v53 = vadd.f32 %v7683_v44, %v3265_v51  ;;  %v4290_v54 = vadd.f32 %v7683_v44, %v4289_v49  ;;  %v6347_v55 = vpop.f32.mrb[114].mxu0  ;;  %v6603_v56 = vpop.f32.mrb[114].mxu1  ;;  %v7002_v51 = vld [vmem:[%s7080_s26 + $0x7a8] sm:$0xff]   ;;  %v8072_v49 = vld [vmem:[%s8652_s2] ss:$0 sm:$0xff] }
 0x1d0   : > { %4978 = vst [vmem:[%s7316_s7 + $0x390] sm:$0xff] %v3274_v47  ;;  %5234 = vst [vmem:[%s7316_s7 + $0xb90] sm:$0xff] %v4298_v48  ;;  %v3277_v59 = vadd.f32 %v7683_v44, %v6347_v55  ;;  %v4301_v60 = vadd.f32 %v7683_v44, %v6603_v56  ;;  %v3268_v61 = vpop.f32.mrb[115].mxu0  ;;  %v4292_v62 = vpop.f32.mrb[115].mxu1  ;;  %v7001_v48 = vld [vmem:[%s7080_s26 + $0x3a8] sm:$0xff]   ;;  %v7004_v55 = vld [vmem:[%s7080_s26 + $0x7b0] sm:$0xff]  }
 0x1d1   : > { %4976 = vst [vmem:[%s7316_s7 + $0x380] sm:$0xff] %v3266_v53  ;;  %5232 = vst [vmem:[%s7316_s7 + $0xb80] sm:$0xff] %v4290_v54  ;;  %v3269_v63 = vadd.f32 %v7683_v44, %v3268_v61  ;;  %v4293_v0 = vadd.f32 %v7683_v44, %v4292_v62 }
 0x1d2   : > { %4979 = vst [vmem:[%s7316_s7 + $0x398] sm:$0xff] %v3277_v59  ;;  %5235 = vst [vmem:[%s7316_s7 + $0xb98] sm:$0xff] %v4301_v60  ;;  %6453 = vmatmul.mubr.msk.bf16.gmra.mrb[220].mxu0 %vm2014_vm0, %v6989_v50  ;;  %6709 = vmatmul.mubr.msk.bf16.gmra.mrb[220].mxu1 %vm2014_vm0, %v6990_v52 }
 0x1d3   : > { %4977 = vst [vmem:[%s7316_s7 + $0x388] sm:$0xff] %v3269_v63  ;;  %5233 = vst [vmem:[%s7316_s7 + $0xb88] sm:$0xff] %v4293_v0  ;;  %6456 = vmatprep.mubr.msk.bf16.mxu0 %vm2014_vm0, %v6991_v57  ;;  %6712 = vmatprep.mubr.msk.bf16.mxu1 %vm2014_vm0, %v6992_v58 }
 0x1d5   : > { %v6350_v1 = vpop.f32.mrb[116].mxu0  ;;  %v6606_v2 = vpop.f32.mrb[116].mxu1 }
 0x1d6   : > { %v3290_v3 = vadd.f32 %v7683_v44, %v6350_v1  ;;  %v4314_v4 = vadd.f32 %v7683_v44, %v6606_v2  ;;  %v3281_v5 = vpop.f32.mrb[117].mxu0  ;;  %v4305_v6 = vpop.f32.mrb[117].mxu1 }
 0x1d7   : > { %v3282_v9 = vadd.f32 %v7683_v44, %v3281_v5  ;;  %v4306_v10 = vadd.f32 %v7683_v44, %v4305_v6  ;;  %v6351_v11 = vpop.f32.mrb[118].mxu0  ;;  %v6607_v12 = vpop.f32.mrb[118].mxu1  ;;  %v7006_v5 = vld [vmem:[%s7080_s26 + $0x7b8] sm:$0xff]  }
 0x1d8   : > { %4982 = vst [vmem:[%s7316_s7 + $0x3b0] sm:$0xff] %v3290_v3  ;;  %5238 = vst [vmem:[%s7316_s7 + $0xbb0] sm:$0xff] %v4314_v4  ;;  %v3293_v15 = vadd.f32 %v7683_v44, %v6351_v11  ;;  %v4317_v16 = vadd.f32 %v7683_v44, %v6607_v12  ;;  %v3284_v17 = vpop.f32.mrb[119].mxu0  ;;  %v4308_v18 = vpop.f32.mrb[119].mxu1  ;;  %v7005_v4 = vld [vmem:[%s7080_s26 + $0x3b8] sm:$0xff]   ;;  %v7008_v11 = vld [vmem:[%s7080_s26 + $0x7c0] sm:$0xff]  }
 0x1d9   : > { %4980 = vst [vmem:[%s7316_s7 + $0x3a0] sm:$0xff] %v3282_v9  ;;  %5236 = vst [vmem:[%s7316_s7 + $0xba0] sm:$0xff] %v4306_v10  ;;  %v3285_v19 = vadd.f32 %v7683_v44, %v3284_v17  ;;  %v4309_v20 = vadd.f32 %v7683_v44, %v4308_v18  ;;  %v7007_v10 = vld [vmem:[%s7080_s26 + $0x3c0] sm:$0xff]  }
 0x1da   : > { %4983 = vst [vmem:[%s7316_s7 + $0x3b8] sm:$0xff] %v3293_v15  ;;  %5239 = vst [vmem:[%s7316_s7 + $0xbb8] sm:$0xff] %v4317_v16  ;;  %6457 = vmatmul.mubr.msk.bf16.gmra.mrb[224].mxu0 %vm2014_vm0, %v6993_v7  ;;  %6713 = vmatmul.mubr.msk.bf16.gmra.mrb[224].mxu1 %vm2014_vm0, %v6994_v8 }
 0x1db   : > { %4981 = vst [vmem:[%s7316_s7 + $0x3a8] sm:$0xff] %v3285_v19  ;;  %5237 = vst [vmem:[%s7316_s7 + $0xba8] sm:$0xff] %v4309_v20  ;;  %6460 = vmatprep.mubr.msk.bf16.mxu0 %vm2014_vm0, %v6995_v13  ;;  %6716 = vmatprep.mubr.msk.bf16.mxu1 %vm2014_vm0, %v6996_v14 }
 0x1dd   : > { %v6354_v21 = vpop.f32.mrb[120].mxu0  ;;  %v6610_v22 = vpop.f32.mrb[120].mxu1 }
 0x1de   : > { %v3306_v23 = vadd.f32 %v7683_v44, %v6354_v21  ;;  %v4330_v24 = vadd.f32 %v7683_v44, %v6610_v22  ;;  %v3297_v25 = vpop.f32.mrb[121].mxu0  ;;  %v4321_v26 = vpop.f32.mrb[121].mxu1 }
 0x1df   : > { %v3298_v29 = vadd.f32 %v7683_v44, %v3297_v25  ;;  %v4322_v30 = vadd.f32 %v7683_v44, %v4321_v26  ;;  %v6355_v31 = vpop.f32.mrb[122].mxu0  ;;  %v6611_v32 = vpop.f32.mrb[122].mxu1  ;;  %v7010_v25 = vld [vmem:[%s7080_s26 + $0x7c8] sm:$0xff]  }
 0x1e0   : > { %4986 = vst [vmem:[%s7316_s7 + $0x3d0] sm:$0xff] %v3306_v23  ;;  %5242 = vst [vmem:[%s7316_s7 + $0xbd0] sm:$0xff] %v4330_v24  ;;  %v3309_v35 = vadd.f32 %v7683_v44, %v6355_v31  ;;  %v4333_v36 = vadd.f32 %v7683_v44, %v6611_v32  ;;  %v3300_v37 = vpop.f32.mrb[123].mxu0  ;;  %v4324_v38 = vpop.f32.mrb[123].mxu1  ;;  %v7009_v24 = vld [vmem:[%s7080_s26 + $0x3c8] sm:$0xff]   ;;  %v7012_v31 = vld [vmem:[%s7080_s26 + $0x7d0] sm:$0xff]  }
 0x1e1   : > { %4984 = vst [vmem:[%s7316_s7 + $0x3c0] sm:$0xff] %v3298_v29  ;;  %5240 = vst [vmem:[%s7316_s7 + $0xbc0] sm:$0xff] %v4322_v30  ;;  %v3301_v39 = vadd.f32 %v7683_v44, %v3300_v37  ;;  %v4325_v40 = vadd.f32 %v7683_v44, %v4324_v38  ;;  %v7011_v30 = vld [vmem:[%s7080_s26 + $0x3d0] sm:$0xff]  }
 0x1e2   : > { %4987 = vst [vmem:[%s7316_s7 + $0x3d8] sm:$0xff] %v3309_v35  ;;  %5243 = vst [vmem:[%s7316_s7 + $0xbd8] sm:$0xff] %v4333_v36  ;;  %6461 = vmatmul.mubr.msk.bf16.gmra.mrb[228].mxu0 %vm2014_vm0, %v6997_v27  ;;  %6717 = vmatmul.mubr.msk.bf16.gmra.mrb[228].mxu1 %vm2014_vm0, %v6998_v28 }
 0x1e3   : > { %4985 = vst [vmem:[%s7316_s7 + $0x3c8] sm:$0xff] %v3301_v39  ;;  %5241 = vst [vmem:[%s7316_s7 + $0xbc8] sm:$0xff] %v4325_v40  ;;  %6464 = vmatprep.mubr.msk.bf16.mxu0 %vm2014_vm0, %v6999_v33  ;;  %6720 = vmatprep.mubr.msk.bf16.mxu1 %vm2014_vm0, %v7000_v34 }
 0x1e5   : > { %v6358_v41 = vpop.f32.mrb[124].mxu0  ;;  %v6614_v42 = vpop.f32.mrb[124].mxu1 }
 0x1e6   : > { %v3322_v43 = vadd.f32 %v7683_v44, %v6358_v41  ;;  %v4346_v45 = vadd.f32 %v7683_v44, %v6614_v42  ;;  %v3313_v46 = vpop.f32.mrb[125].mxu0  ;;  %v4337_v47 = vpop.f32.mrb[125].mxu1  ;;  %v7003_v44 = vld [vmem:[%s7080_s26 + $0x3b0] sm:$0xff]  }
 0x1e7   : > { %v3314_v50 = vadd.f32 %v8072_v49, %v3313_v46  ;;  %v4338_v52 = vadd.f32 %v8072_v49, %v4337_v47  ;;  %v6359_v53 = vpop.f32.mrb[126].mxu0  ;;  %v6615_v54 = vpop.f32.mrb[126].mxu1  ;;  %v7014_v46 = vld [vmem:[%s7080_s26 + $0x7d8] sm:$0xff]  }
 0x1e8   : > { %4990 = vst [vmem:[%s7316_s7 + $0x3f0] sm:$0xff] %v3322_v43  ;;  %5246 = vst [vmem:[%s7316_s7 + $0xbf0] sm:$0xff] %v4346_v45  ;;  %v3325_v56 = vadd.f32 %v8072_v49, %v6359_v53  ;;  %v4349_v57 = vadd.f32 %v8072_v49, %v6615_v54  ;;  %v3316_v58 = vpop.f32.mrb[127].mxu0  ;;  %v4340_v59 = vpop.f32.mrb[127].mxu1  ;;  %v7013_v45 = vld [vmem:[%s7080_s26 + $0x3d8] sm:$0xff]   ;;  %v7016_v53 = vld [vmem:[%s7080_s26 + $0x7e0] sm:$0xff]  }
 0x1e9   : > { %4988 = vst [vmem:[%s7316_s7 + $0x3e0] sm:$0xff] %v3314_v50  ;;  %5244 = vst [vmem:[%s7316_s7 + $0xbe0] sm:$0xff] %v4338_v52  ;;  %v3317_v60 = vadd.f32 %v8072_v49, %v3316_v58  ;;  %v4341_v61 = vadd.f32 %v8072_v49, %v4340_v59  ;;  %v7015_v52 = vld [vmem:[%s7080_s26 + $0x3e0] sm:$0xff]  }
 0x1ea   : > { %4991 = vst [vmem:[%s7316_s7 + $0x3f8] sm:$0xff] %v3325_v56  ;;  %5247 = vst [vmem:[%s7316_s7 + $0xbf8] sm:$0xff] %v4349_v57  ;;  %6465 = vmatmul.mubr.msk.bf16.gmra.mrb[232].mxu0 %vm2014_vm0, %v7001_v48  ;;  %6721 = vmatmul.mubr.msk.bf16.gmra.mrb[232].mxu1 %vm2014_vm0, %v7002_v51 }
 0x1eb   : > { %4989 = vst [vmem:[%s7316_s7 + $0x3e8] sm:$0xff] %v3317_v60  ;;  %5245 = vst [vmem:[%s7316_s7 + $0xbe8] sm:$0xff] %v4341_v61  ;;  %6468 = vmatprep.mubr.msk.bf16.mxu0 %vm2014_vm0, %v7003_v44  ;;  %6724 = vmatprep.mubr.msk.bf16.mxu1 %vm2014_vm0, %v7004_v55 }
 0x1ed   : > { %v6362_v62 = vpop.f32.mrb[128].mxu0  ;;  %v6618_v63 = vpop.f32.mrb[128].mxu1 }
 0x1ee   : > { %v3338_v0 = vadd.f32 %v8072_v49, %v6362_v62  ;;  %v4362_v1 = vadd.f32 %v8072_v49, %v6618_v63  ;;  %v3329_v2 = vpop.f32.mrb[129].mxu0  ;;  %v4353_v3 = vpop.f32.mrb[129].mxu1 }
 0x1ef   : > { %v3330_v6 = vadd.f32 %v8072_v49, %v3329_v2  ;;  %v4354_v7 = vadd.f32 %v8072_v49, %v4353_v3  ;;  %v6363_v8 = vpop.f32.mrb[130].mxu0  ;;  %v6619_v9 = vpop.f32.mrb[130].mxu1  ;;  %v7018_v2 = vld [vmem:[%s7080_s26 + $0x7e8] sm:$0xff]  }
 0x1f0   : > { %4994 = vst [vmem:[%s7316_s7 + $0x410] sm:$0xff] %v3338_v0  ;;  %5250 = vst [vmem:[%s7316_s7 + $0xc10] sm:$0xff] %v4362_v1  ;;  %v3341_v12 = vadd.f32 %v8072_v49, %v6363_v8  ;;  %v4365_v13 = vadd.f32 %v8072_v49, %v6619_v9  ;;  %v3332_v14 = vpop.f32.mrb[131].mxu0  ;;  %v4356_v15 = vpop.f32.mrb[131].mxu1  ;;  %v7017_v1 = vld [vmem:[%s7080_s26 + $0x3e8] sm:$0xff]   ;;  %v7020_v8 = vld [vmem:[%s7080_s26 + $0x7f0] sm:$0xff]  }
 0x1f1   : > { %4992 = vst [vmem:[%s7316_s7 + $0x400] sm:$0xff] %v3330_v6  ;;  %5248 = vst [vmem:[%s7316_s7 + $0xc00] sm:$0xff] %v4354_v7  ;;  %v3333_v16 = vadd.f32 %v8072_v49, %v3332_v14  ;;  %v4357_v17 = vadd.f32 %v8072_v49, %v4356_v15  ;;  %v7019_v7 = vld [vmem:[%s7080_s26 + $0x3f0] sm:$0xff]  }
 0x1f2   : > { %4995 = vst [vmem:[%s7316_s7 + $0x418] sm:$0xff] %v3341_v12  ;;  %5251 = vst [vmem:[%s7316_s7 + $0xc18] sm:$0xff] %v4365_v13  ;;  %6469 = vmatmul.mubr.msk.bf16.gmra.mrb[236].mxu0 %vm2014_vm0, %v7005_v4  ;;  %6725 = vmatmul.mubr.msk.bf16.gmra.mrb[236].mxu1 %vm2014_vm0, %v7006_v5 }
 0x1f3   : > { %4993 = vst [vmem:[%s7316_s7 + $0x408] sm:$0xff] %v3333_v16  ;;  %5249 = vst [vmem:[%s7316_s7 + $0xc08] sm:$0xff] %v4357_v17  ;;  %6472 = vmatprep.mubr.msk.bf16.mxu0 %vm2014_vm0, %v7007_v10  ;;  %6728 = vmatprep.mubr.msk.bf16.mxu1 %vm2014_vm0, %v7008_v11 }
 0x1f5   : > { %v6366_v18 = vpop.f32.mrb[132].mxu0  ;;  %v6622_v19 = vpop.f32.mrb[132].mxu1 }
 0x1f6   : > { %v3354_v20 = vadd.f32 %v8072_v49, %v6366_v18  ;;  %v4378_v21 = vadd.f32 %v8072_v49, %v6622_v19  ;;  %v3345_v22 = vpop.f32.mrb[133].mxu0  ;;  %v4369_v23 = vpop.f32.mrb[133].mxu1 }
 0x1f7   : > { %v3346_v26 = vadd.f32 %v8072_v49, %v3345_v22  ;;  %v4370_v27 = vadd.f32 %v8072_v49, %v4369_v23  ;;  %v6367_v28 = vpop.f32.mrb[134].mxu0  ;;  %v6623_v29 = vpop.f32.mrb[134].mxu1  ;;  %v7022_v22 = vld [vmem:[%s7080_s26 + $0x7f8] sm:$0xff]  }
 0x1f8   : > { %4998 = vst [vmem:[%s7316_s7 + $0x430] sm:$0xff] %v3354_v20  ;;  %5254 = vst [vmem:[%s7316_s7 + $0xc30] sm:$0xff] %v4378_v21  ;;  %v3357_v32 = vadd.f32 %v8072_v49, %v6367_v28  ;;  %v4381_v33 = vadd.f32 %v8072_v49, %v6623_v29  ;;  %v3348_v34 = vpop.f32.mrb[135].mxu0  ;;  %v4372_v35 = vpop.f32.mrb[135].mxu1  ;;  %v7021_v21 = vld [vmem:[%s7080_s26 + $0x3f8] sm:$0xff]  }
 0x1f9   : > { %4996 = vst [vmem:[%s7316_s7 + $0x420] sm:$0xff] %v3346_v26  ;;  %5252 = vst [vmem:[%s7316_s7 + $0xc20] sm:$0xff] %v4370_v27  ;;  %v3349_v36 = vadd.f32 %v8072_v49, %v3348_v34  ;;  %v4373_v37 = vadd.f32 %v8072_v49, %v4372_v35 }
 0x1fa   : > { %4999 = vst [vmem:[%s7316_s7 + $0x438] sm:$0xff] %v3357_v32  ;;  %5255 = vst [vmem:[%s7316_s7 + $0xc38] sm:$0xff] %v4381_v33  ;;  %6473 = vmatmul.mubr.msk.bf16.gmra.mrb[240].mxu0 %vm2014_vm0, %v7009_v24  ;;  %6729 = vmatmul.mubr.msk.bf16.gmra.mrb[240].mxu1 %vm2014_vm0, %v7010_v25 }
 0x1fb   : > { %4997 = vst [vmem:[%s7316_s7 + $0x428] sm:$0xff] %v3349_v36  ;;  %5253 = vst [vmem:[%s7316_s7 + $0xc28] sm:$0xff] %v4373_v37  ;;  %6476 = vmatprep.mubr.msk.bf16.mxu0 %vm2014_vm0, %v7011_v30  ;;  %6732 = vmatprep.mubr.msk.bf16.mxu1 %vm2014_vm0, %v7012_v31 }
 0x1fd   : > { %v6370_v38 = vpop.f32.mrb[136].mxu0  ;;  %v6626_v39 = vpop.f32.mrb[136].mxu1 }
 0x1fe   : > { %v3370_v40 = vadd.f32 %v8072_v49, %v6370_v38  ;;  %v4394_v41 = vadd.f32 %v8072_v49, %v6626_v39  ;;  %v3361_v42 = vpop.f32.mrb[137].mxu0  ;;  %v4385_v43 = vpop.f32.mrb[137].mxu1 }
 0x1ff   : > { %v3362_v47 = vadd.f32 %v8072_v49, %v3361_v42  ;;  %v4386_v48 = vadd.f32 %v8072_v49, %v4385_v43  ;;  %v6371_v51 = vpop.f32.mrb[138].mxu0  ;;  %v6627_v50 = vpop.f32.mrb[138].mxu1 }
 0x200   : > { %5002 = vst [vmem:[%s7316_s7 + $0x450] sm:$0xff] %v3370_v40  ;;  %5258 = vst [vmem:[%s7316_s7 + $0xc50] sm:$0xff] %v4394_v41  ;;  %v3373_v54 = vadd.f32 %v8072_v49, %v6371_v51  ;;  %v4397_v44 = vadd.f32 %v8072_v49, %v6627_v50  ;;  %v3364_v55 = vpop.f32.mrb[139].mxu0  ;;  %v4388_v56 = vpop.f32.mrb[139].mxu1 }
 0x201   : > { %5000 = vst [vmem:[%s7316_s7 + $0x440] sm:$0xff] %v3362_v47  ;;  %5256 = vst [vmem:[%s7316_s7 + $0xc40] sm:$0xff] %v4386_v48  ;;  %v3365_v57 = vadd.f32 %v8072_v49, %v3364_v55  ;;  %v4389_v58 = vadd.f32 %v8072_v49, %v4388_v56 }
 0x202   : > { %5003 = vst [vmem:[%s7316_s7 + $0x458] sm:$0xff] %v3373_v54  ;;  %5259 = vst [vmem:[%s7316_s7 + $0xc58] sm:$0xff] %v4397_v44  ;;  %6477 = vmatmul.mubr.msk.bf16.gmra.mrb[244].mxu0 %vm2014_vm0, %v7013_v45  ;;  %6733 = vmatmul.mubr.msk.bf16.gmra.mrb[244].mxu1 %vm2014_vm0, %v7014_v46 }
 0x203   : > { %5001 = vst [vmem:[%s7316_s7 + $0x448] sm:$0xff] %v3365_v57  ;;  %5257 = vst [vmem:[%s7316_s7 + $0xc48] sm:$0xff] %v4389_v58  ;;  %6480 = vmatprep.mubr.msk.bf16.mxu0 %vm2014_vm0, %v7015_v52  ;;  %6736 = vmatprep.mubr.msk.bf16.mxu1 %vm2014_vm0, %v7016_v53 }
 0x205   : > { %v6374_v59 = vpop.f32.mrb[140].mxu0  ;;  %v6630_v60 = vpop.f32.mrb[140].mxu1 }
 0x206   : > { %v3386_v61 = vadd.f32 %v8072_v49, %v6374_v59  ;;  %v4410_v62 = vadd.f32 %v8072_v49, %v6630_v60  ;;  %v3377_v63 = vpop.f32.mrb[141].mxu0  ;;  %v4401_v0 = vpop.f32.mrb[141].mxu1 }
 0x207   : > { %v3378_v3 = vadd.f32 %v8072_v49, %v3377_v63  ;;  %v4402_v4 = vadd.f32 %v8072_v49, %v4401_v0  ;;  %v6375_v5 = vpop.f32.mrb[142].mxu0  ;;  %v6631_v6 = vpop.f32.mrb[142].mxu1 }
 0x208   : > { %5006 = vst [vmem:[%s7316_s7 + $0x470] sm:$0xff] %v3386_v61  ;;  %5262 = vst [vmem:[%s7316_s7 + $0xc70] sm:$0xff] %v4410_v62  ;;  %v3389_v9 = vadd.f32 %v8072_v49, %v6375_v5  ;;  %v4413_v10 = vadd.f32 %v8072_v49, %v6631_v6  ;;  %v3380_v11 = vpop.f32.mrb[143].mxu0  ;;  %v4404_v12 = vpop.f32.mrb[143].mxu1 }
 0x209   : > { %5004 = vst [vmem:[%s7316_s7 + $0x460] sm:$0xff] %v3378_v3  ;;  %5260 = vst [vmem:[%s7316_s7 + $0xc60] sm:$0xff] %v4402_v4  ;;  %v3381_v13 = vadd.f32 %v8072_v49, %v3380_v11  ;;  %v4405_v14 = vadd.f32 %v8072_v49, %v4404_v12 }
 0x20a   : > { %5007 = vst [vmem:[%s7316_s7 + $0x478] sm:$0xff] %v3389_v9  ;;  %5263 = vst [vmem:[%s7316_s7 + $0xc78] sm:$0xff] %v4413_v10  ;;  %6481 = vmatmul.mubr.msk.bf16.gmra.mrb[248].mxu0 %vm2014_vm0, %v7017_v1  ;;  %6737 = vmatmul.mubr.msk.bf16.gmra.mrb[248].mxu1 %vm2014_vm0, %v7018_v2 }
 0x20b   : > { %5005 = vst [vmem:[%s7316_s7 + $0x468] sm:$0xff] %v3381_v13  ;;  %5261 = vst [vmem:[%s7316_s7 + $0xc68] sm:$0xff] %v4405_v14  ;;  %6484 = vmatprep.mubr.msk.bf16.mxu0 %vm2014_vm0, %v7019_v7  ;;  %6740 = vmatprep.mubr.msk.bf16.mxu1 %vm2014_vm0, %v7020_v8 }
 0x20d   : > { %v6378_v15 = vpop.f32.mrb[144].mxu0  ;;  %v6634_v16 = vpop.f32.mrb[144].mxu1 }
 0x20e   : > { %v3402_v17 = vadd.f32 %v8072_v49, %v6378_v15  ;;  %v4426_v18 = vadd.f32 %v8072_v49, %v6634_v16  ;;  %v3393_v19 = vpop.f32.mrb[145].mxu0  ;;  %v4417_v20 = vpop.f32.mrb[145].mxu1 }
 0x20f   : > { %v3394_v23 = vadd.f32 %v8072_v49, %v3393_v19  ;;  %v4418_v24 = vadd.f32 %v8072_v49, %v4417_v20  ;;  %v6379_v25 = vpop.f32.mrb[146].mxu0  ;;  %v6635_v26 = vpop.f32.mrb[146].mxu1 }
 0x210   : > { %5010 = vst [vmem:[%s7316_s7 + $0x490] sm:$0xff] %v3402_v17  ;;  %5266 = vst [vmem:[%s7316_s7 + $0xc90] sm:$0xff] %v4426_v18  ;;  %v3405_v27 = vadd.f32 %v8072_v49, %v6379_v25  ;;  %v4429_v28 = vadd.f32 %v8072_v49, %v6635_v26  ;;  %v3396_v29 = vpop.f32.mrb[147].mxu0  ;;  %v4420_v30 = vpop.f32.mrb[147].mxu1 }
 0x211   : > { %5008 = vst [vmem:[%s7316_s7 + $0x480] sm:$0xff] %v3394_v23  ;;  %5264 = vst [vmem:[%s7316_s7 + $0xc80] sm:$0xff] %v4418_v24  ;;  %v3397_v31 = vadd.f32 %v8072_v49, %v3396_v29  ;;  %v4421_v32 = vadd.f32 %v8072_v49, %v4420_v30 }
 0x212   : > { %5011 = vst [vmem:[%s7316_s7 + $0x498] sm:$0xff] %v3405_v27  ;;  %5267 = vst [vmem:[%s7316_s7 + $0xc98] sm:$0xff] %v4429_v28  ;;  %6485 = vmatmul.mubr.msk.bf16.gmra.mrb[252].mxu0 %vm2014_vm0, %v7021_v21  ;;  %6741 = vmatmul.mubr.msk.bf16.gmra.mrb[252].mxu1 %vm2014_vm0, %v7022_v22 }
 0x213   : > { %5009 = vst [vmem:[%s7316_s7 + $0x488] sm:$0xff] %v3397_v31  ;;  %5265 = vst [vmem:[%s7316_s7 + $0xc88] sm:$0xff] %v4421_v32 }
 0x215   : > { %v6382_v33 = vpop.f32.mrb[148].mxu0  ;;  %v6638_v34 = vpop.f32.mrb[148].mxu1 }
 0x216   : > { %v3418_v35 = vadd.f32 %v8072_v49, %v6382_v33  ;;  %v4442_v36 = vadd.f32 %v8072_v49, %v6638_v34  ;;  %v3409_v37 = vpop.f32.mrb[149].mxu0  ;;  %v4433_v38 = vpop.f32.mrb[149].mxu1 }
 0x217   : > { %v3410_v39 = vadd.f32 %v8072_v49, %v3409_v37  ;;  %v4434_v40 = vadd.f32 %v8072_v49, %v4433_v38  ;;  %v6383_v41 = vpop.f32.mrb[150].mxu0  ;;  %v6639_v42 = vpop.f32.mrb[150].mxu1 }
 0x218   : > { %5014 = vst [vmem:[%s7316_s7 + $0x4b0] sm:$0xff] %v3418_v35  ;;  %5270 = vst [vmem:[%s7316_s7 + $0xcb0] sm:$0xff] %v4442_v36  ;;  %v3421_v43 = vadd.f32 %v8072_v49, %v6383_v41  ;;  %v4445_v45 = vadd.f32 %v8072_v49, %v6639_v42  ;;  %v3412_v46 = vpop.f32.mrb[151].mxu0  ;;  %v4436_v47 = vpop.f32.mrb[151].mxu1 }
 0x219   : > { %5012 = vst [vmem:[%s7316_s7 + $0x4a0] sm:$0xff] %v3410_v39  ;;  %5268 = vst [vmem:[%s7316_s7 + $0xca0] sm:$0xff] %v4434_v40  ;;  %v3413_v48 = vadd.f32 %v8072_v49, %v3412_v46  ;;  %v4437_v51 = vadd.f32 %v8072_v49, %v4436_v47 }
 0x21a   : > { %5015 = vst [vmem:[%s7316_s7 + $0x4b8] sm:$0xff] %v3421_v43  ;;  %5271 = vst [vmem:[%s7316_s7 + $0xcb8] sm:$0xff] %v4445_v45 }
 0x21b   : > { %5013 = vst [vmem:[%s7316_s7 + $0x4a8] sm:$0xff] %v3413_v48  ;;  %5269 = vst [vmem:[%s7316_s7 + $0xca8] sm:$0xff] %v4437_v51 }
 0x21d   : > { %v6386_v50 = vpop.f32.mrb[152].mxu0  ;;  %v6642_v52 = vpop.f32.mrb[152].mxu1 }
 0x21e   : > { %v3434_v53 = vadd.f32 %v8072_v49, %v6386_v50  ;;  %v4458_v54 = vadd.f32 %v8072_v49, %v6642_v52  ;;  %v3425_v44 = vpop.f32.mrb[153].mxu0  ;;  %v4449_v55 = vpop.f32.mrb[153].mxu1 }
 0x21f   : > { %v3426_v56 = vadd.f32 %v8072_v49, %v3425_v44  ;;  %v4450_v57 = vadd.f32 %v8072_v49, %v4449_v55  ;;  %v6387_v58 = vpop.f32.mrb[154].mxu0  ;;  %v6643_v59 = vpop.f32.mrb[154].mxu1 }
 0x220   : > { %5018 = vst [vmem:[%s7316_s7 + $0x4d0] sm:$0xff] %v3434_v53  ;;  %5274 = vst [vmem:[%s7316_s7 + $0xcd0] sm:$0xff] %v4458_v54  ;;  %v3437_v60 = vadd.f32 %v8072_v49, %v6387_v58  ;;  %v4461_v61 = vadd.f32 %v8072_v49, %v6643_v59  ;;  %v3428_v62 = vpop.f32.mrb[155].mxu0  ;;  %v4452_v63 = vpop.f32.mrb[155].mxu1 }
 0x221   : > { %5016 = vst [vmem:[%s7316_s7 + $0x4c0] sm:$0xff] %v3426_v56  ;;  %5272 = vst [vmem:[%s7316_s7 + $0xcc0] sm:$0xff] %v4450_v57  ;;  %v3429_v0 = vadd.f32 %v8072_v49, %v3428_v62  ;;  %v4453_v1 = vadd.f32 %v8072_v49, %v4452_v63 }
 0x222   : > { %5019 = vst [vmem:[%s7316_s7 + $0x4d8] sm:$0xff] %v3437_v60  ;;  %5275 = vst [vmem:[%s7316_s7 + $0xcd8] sm:$0xff] %v4461_v61 }
 0x223   : > { %5017 = vst [vmem:[%s7316_s7 + $0x4c8] sm:$0xff] %v3429_v0  ;;  %5273 = vst [vmem:[%s7316_s7 + $0xcc8] sm:$0xff] %v4453_v1 }
 0x225   : > { %v6390_v2 = vpop.f32.mrb[156].mxu0  ;;  %v6646_v3 = vpop.f32.mrb[156].mxu1 }
 0x226   : > { %v3450_v4 = vadd.f32 %v8072_v49, %v6390_v2  ;;  %v4474_v5 = vadd.f32 %v8072_v49, %v6646_v3  ;;  %v3441_v6 = vpop.f32.mrb[157].mxu0  ;;  %v4465_v7 = vpop.f32.mrb[157].mxu1 }
 0x227   : > { %v3442_v8 = vadd.f32 %v8072_v49, %v3441_v6  ;;  %v4466_v9 = vadd.f32 %v8072_v49, %v4465_v7  ;;  %v6391_v10 = vpop.f32.mrb[158].mxu0  ;;  %v6647_v11 = vpop.f32.mrb[158].mxu1 }
 0x228   : > { %5022 = vst [vmem:[%s7316_s7 + $0x4f0] sm:$0xff] %v3450_v4  ;;  %5278 = vst [vmem:[%s7316_s7 + $0xcf0] sm:$0xff] %v4474_v5  ;;  %v3453_v12 = vadd.f32 %v8072_v49, %v6391_v10  ;;  %v4477_v13 = vadd.f32 %v8072_v49, %v6647_v11  ;;  %v3444_v14 = vpop.f32.mrb[159].mxu0  ;;  %v4468_v15 = vpop.f32.mrb[159].mxu1 }
 0x229   : > { %5020 = vst [vmem:[%s7316_s7 + $0x4e0] sm:$0xff] %v3442_v8  ;;  %5276 = vst [vmem:[%s7316_s7 + $0xce0] sm:$0xff] %v4466_v9  ;;  %v3445_v16 = vadd.f32 %v8072_v49, %v3444_v14  ;;  %v4469_v17 = vadd.f32 %v8072_v49, %v4468_v15 }
 0x22a   : > { %5023 = vst [vmem:[%s7316_s7 + $0x4f8] sm:$0xff] %v3453_v12  ;;  %5279 = vst [vmem:[%s7316_s7 + $0xcf8] sm:$0xff] %v4477_v13 }
 0x22b   : > { %5021 = vst [vmem:[%s7316_s7 + $0x4e8] sm:$0xff] %v3445_v16  ;;  %5277 = vst [vmem:[%s7316_s7 + $0xce8] sm:$0xff] %v4469_v17 }
 0x22d   : > { %v6394_v18 = vpop.f32.mrb[160].mxu0  ;;  %v6650_v19 = vpop.f32.mrb[160].mxu1 }
 0x22e   : > { %v3466_v20 = vadd.f32 %v8072_v49, %v6394_v18  ;;  %v4490_v21 = vadd.f32 %v8072_v49, %v6650_v19  ;;  %v3457_v22 = vpop.f32.mrb[161].mxu0  ;;  %v4481_v23 = vpop.f32.mrb[161].mxu1 }
 0x22f   : > { %v3458_v24 = vadd.f32 %v8072_v49, %v3457_v22  ;;  %v4482_v25 = vadd.f32 %v8072_v49, %v4481_v23  ;;  %v6395_v26 = vpop.f32.mrb[162].mxu0  ;;  %v6651_v27 = vpop.f32.mrb[162].mxu1 }
 0x230   : > { %5026 = vst [vmem:[%s7316_s7 + $0x510] sm:$0xff] %v3466_v20  ;;  %5282 = vst [vmem:[%s7316_s7 + $0xd10] sm:$0xff] %v4490_v21  ;;  %v3469_v28 = vadd.f32 %v8072_v49, %v6395_v26  ;;  %v4493_v29 = vadd.f32 %v8072_v49, %v6651_v27  ;;  %v3460_v30 = vpop.f32.mrb[163].mxu0  ;;  %v4484_v31 = vpop.f32.mrb[163].mxu1 }
 0x231   : > { %5024 = vst [vmem:[%s7316_s7 + $0x500] sm:$0xff] %v3458_v24  ;;  %5280 = vst [vmem:[%s7316_s7 + $0xd00] sm:$0xff] %v4482_v25  ;;  %v3461_v32 = vadd.f32 %v8072_v49, %v3460_v30  ;;  %v4485_v33 = vadd.f32 %v8072_v49, %v4484_v31 }
 0x232   : > { %5027 = vst [vmem:[%s7316_s7 + $0x518] sm:$0xff] %v3469_v28  ;;  %5283 = vst [vmem:[%s7316_s7 + $0xd18] sm:$0xff] %v4493_v29 }
 0x233   : > { %5025 = vst [vmem:[%s7316_s7 + $0x508] sm:$0xff] %v3461_v32  ;;  %5281 = vst [vmem:[%s7316_s7 + $0xd08] sm:$0xff] %v4485_v33 }
 0x235   : > { %v6398_v34 = vpop.f32.mrb[164].mxu0  ;;  %v6654_v35 = vpop.f32.mrb[164].mxu1 }
 0x236   : > { %v3482_v36 = vadd.f32 %v8072_v49, %v6398_v34  ;;  %v4506_v37 = vadd.f32 %v8072_v49, %v6654_v35  ;;  %v3473_v38 = vpop.f32.mrb[165].mxu0  ;;  %v4497_v39 = vpop.f32.mrb[165].mxu1 }
 0x237   : > { %v3474_v40 = vadd.f32 %v8072_v49, %v3473_v38  ;;  %v4498_v41 = vadd.f32 %v8072_v49, %v4497_v39  ;;  %v6399_v42 = vpop.f32.mrb[166].mxu0  ;;  %v6655_v43 = vpop.f32.mrb[166].mxu1 }
 0x238   : > { %5030 = vst [vmem:[%s7316_s7 + $0x530] sm:$0xff] %v3482_v36  ;;  %5286 = vst [vmem:[%s7316_s7 + $0xd30] sm:$0xff] %v4506_v37  ;;  %v3485_v45 = vadd.f32 %v8072_v49, %v6399_v42  ;;  %v4509_v46 = vadd.f32 %v8072_v49, %v6655_v43  ;;  %v3476_v47 = vpop.f32.mrb[167].mxu0  ;;  %v4500_v48 = vpop.f32.mrb[167].mxu1 }
 0x239   : > { %5028 = vst [vmem:[%s7316_s7 + $0x520] sm:$0xff] %v3474_v40  ;;  %5284 = vst [vmem:[%s7316_s7 + $0xd20] sm:$0xff] %v4498_v41  ;;  %v3477_v51 = vadd.f32 %v8072_v49, %v3476_v47  ;;  %v4501_v50 = vadd.f32 %v8072_v49, %v4500_v48 }
 0x23a   : > { %5031 = vst [vmem:[%s7316_s7 + $0x538] sm:$0xff] %v3485_v45  ;;  %5287 = vst [vmem:[%s7316_s7 + $0xd38] sm:$0xff] %v4509_v46 }
 0x23b   : > { %5029 = vst [vmem:[%s7316_s7 + $0x528] sm:$0xff] %v3477_v51  ;;  %5285 = vst [vmem:[%s7316_s7 + $0xd28] sm:$0xff] %v4501_v50 }
 0x23d   : > { %v6402_v52 = vpop.f32.mrb[168].mxu0  ;;  %v6658_v53 = vpop.f32.mrb[168].mxu1 }
 0x23e   : > { %v3498_v54 = vadd.f32 %v8072_v49, %v6402_v52  ;;  %v4522_v44 = vadd.f32 %v8072_v49, %v6658_v53  ;;  %v3489_v55 = vpop.f32.mrb[169].mxu0  ;;  %v4513_v56 = vpop.f32.mrb[169].mxu1 }
 0x23f   : > { %v3490_v57 = vadd.f32 %v8072_v49, %v3489_v55  ;;  %v4514_v58 = vadd.f32 %v8072_v49, %v4513_v56  ;;  %v6403_v59 = vpop.f32.mrb[170].mxu0  ;;  %v6659_v60 = vpop.f32.mrb[170].mxu1 }
 0x240   : > { %5034 = vst [vmem:[%s7316_s7 + $0x550] sm:$0xff] %v3498_v54  ;;  %5290 = vst [vmem:[%s7316_s7 + $0xd50] sm:$0xff] %v4522_v44  ;;  %v3501_v61 = vadd.f32 %v8072_v49, %v6403_v59  ;;  %v4525_v62 = vadd.f32 %v8072_v49, %v6659_v60  ;;  %v3492_v63 = vpop.f32.mrb[171].mxu0  ;;  %v4516_v0 = vpop.f32.mrb[171].mxu1 }
 0x241   : > { %5032 = vst [vmem:[%s7316_s7 + $0x540] sm:$0xff] %v3490_v57  ;;  %5288 = vst [vmem:[%s7316_s7 + $0xd40] sm:$0xff] %v4514_v58  ;;  %v3493_v1 = vadd.f32 %v8072_v49, %v3492_v63  ;;  %v4517_v2 = vadd.f32 %v8072_v49, %v4516_v0 }
 0x242   : > { %5035 = vst [vmem:[%s7316_s7 + $0x558] sm:$0xff] %v3501_v61  ;;  %5291 = vst [vmem:[%s7316_s7 + $0xd58] sm:$0xff] %v4525_v62 }
 0x243   : > { %5033 = vst [vmem:[%s7316_s7 + $0x548] sm:$0xff] %v3493_v1  ;;  %5289 = vst [vmem:[%s7316_s7 + $0xd48] sm:$0xff] %v4517_v2 }
 0x245   : > { %v6406_v3 = vpop.f32.mrb[172].mxu0  ;;  %v6662_v4 = vpop.f32.mrb[172].mxu1 }
 0x246   : > { %v3514_v5 = vadd.f32 %v8072_v49, %v6406_v3  ;;  %v4538_v6 = vadd.f32 %v8072_v49, %v6662_v4  ;;  %v3505_v7 = vpop.f32.mrb[173].mxu0  ;;  %v4529_v8 = vpop.f32.mrb[173].mxu1 }
 0x247   : > { %v3506_v9 = vadd.f32 %v8072_v49, %v3505_v7  ;;  %v4530_v10 = vadd.f32 %v8072_v49, %v4529_v8  ;;  %v6407_v11 = vpop.f32.mrb[174].mxu0  ;;  %v6663_v12 = vpop.f32.mrb[174].mxu1 }
 0x248   : > { %5038 = vst [vmem:[%s7316_s7 + $0x570] sm:$0xff] %v3514_v5  ;;  %5294 = vst [vmem:[%s7316_s7 + $0xd70] sm:$0xff] %v4538_v6  ;;  %v3517_v13 = vadd.f32 %v8072_v49, %v6407_v11  ;;  %v4541_v14 = vadd.f32 %v8072_v49, %v6663_v12  ;;  %v3508_v15 = vpop.f32.mrb[175].mxu0  ;;  %v4532_v16 = vpop.f32.mrb[175].mxu1 }
 0x249   : > { %5036 = vst [vmem:[%s7316_s7 + $0x560] sm:$0xff] %v3506_v9  ;;  %5292 = vst [vmem:[%s7316_s7 + $0xd60] sm:$0xff] %v4530_v10  ;;  %v3509_v17 = vadd.f32 %v8072_v49, %v3508_v15  ;;  %v4533_v18 = vadd.f32 %v8072_v49, %v4532_v16 }
 0x24a   : > { %5039 = vst [vmem:[%s7316_s7 + $0x578] sm:$0xff] %v3517_v13  ;;  %5295 = vst [vmem:[%s7316_s7 + $0xd78] sm:$0xff] %v4541_v14 }
 0x24b   : > { %5037 = vst [vmem:[%s7316_s7 + $0x568] sm:$0xff] %v3509_v17  ;;  %5293 = vst [vmem:[%s7316_s7 + $0xd68] sm:$0xff] %v4533_v18 }
 0x24d   : > { %v6410_v19 = vpop.f32.mrb[176].mxu0  ;;  %v6666_v20 = vpop.f32.mrb[176].mxu1 }
 0x24e   : > { %v3530_v21 = vadd.f32 %v8072_v49, %v6410_v19  ;;  %v4554_v22 = vadd.f32 %v8072_v49, %v6666_v20  ;;  %v3521_v23 = vpop.f32.mrb[177].mxu0  ;;  %v4545_v24 = vpop.f32.mrb[177].mxu1 }
 0x24f   : > { %v3522_v25 = vadd.f32 %v8072_v49, %v3521_v23  ;;  %v4546_v26 = vadd.f32 %v8072_v49, %v4545_v24  ;;  %v6411_v27 = vpop.f32.mrb[178].mxu0  ;;  %v6667_v28 = vpop.f32.mrb[178].mxu1 }
 0x250   : > { %5042 = vst [vmem:[%s7316_s7 + $0x590] sm:$0xff] %v3530_v21  ;;  %5298 = vst [vmem:[%s7316_s7 + $0xd90] sm:$0xff] %v4554_v22  ;;  %v3533_v29 = vadd.f32 %v8072_v49, %v6411_v27  ;;  %v4557_v30 = vadd.f32 %v8072_v49, %v6667_v28  ;;  %v3524_v31 = vpop.f32.mrb[179].mxu0  ;;  %v4548_v32 = vpop.f32.mrb[179].mxu1 }
 0x251   : > { %5040 = vst [vmem:[%s7316_s7 + $0x580] sm:$0xff] %v3522_v25  ;;  %5296 = vst [vmem:[%s7316_s7 + $0xd80] sm:$0xff] %v4546_v26  ;;  %v3525_v33 = vadd.f32 %v8072_v49, %v3524_v31  ;;  %v4549_v34 = vadd.f32 %v8072_v49, %v4548_v32 }
 0x252   : > { %5043 = vst [vmem:[%s7316_s7 + $0x598] sm:$0xff] %v3533_v29  ;;  %5299 = vst [vmem:[%s7316_s7 + $0xd98] sm:$0xff] %v4557_v30 }
 0x253   : > { %5041 = vst [vmem:[%s7316_s7 + $0x588] sm:$0xff] %v3525_v33  ;;  %5297 = vst [vmem:[%s7316_s7 + $0xd88] sm:$0xff] %v4549_v34 }
 0x255   : > { %v6414_v35 = vpop.f32.mrb[180].mxu0  ;;  %v6670_v36 = vpop.f32.mrb[180].mxu1 }
 0x256   : > { %v3546_v37 = vadd.f32 %v8072_v49, %v6414_v35  ;;  %v4570_v38 = vadd.f32 %v8072_v49, %v6670_v36  ;;  %v3537_v39 = vpop.f32.mrb[181].mxu0  ;;  %v4561_v40 = vpop.f32.mrb[181].mxu1 }
 0x257   : > { %v3538_v41 = vadd.f32 %v8072_v49, %v3537_v39  ;;  %v4562_v42 = vadd.f32 %v8072_v49, %v4561_v40  ;;  %v6415_v43 = vpop.f32.mrb[182].mxu0  ;;  %v6671_v45 = vpop.f32.mrb[182].mxu1 }
 0x258   : > { %5046 = vst [vmem:[%s7316_s7 + $0x5b0] sm:$0xff] %v3546_v37  ;;  %5302 = vst [vmem:[%s7316_s7 + $0xdb0] sm:$0xff] %v4570_v38  ;;  %v3549_v46 = vadd.f32 %v8072_v49, %v6415_v43  ;;  %v4573_v47 = vadd.f32 %v8072_v49, %v6671_v45  ;;  %v3540_v48 = vpop.f32.mrb[183].mxu0  ;;  %v4564_v51 = vpop.f32.mrb[183].mxu1 }
 0x259   : > { %5044 = vst [vmem:[%s7316_s7 + $0x5a0] sm:$0xff] %v3538_v41  ;;  %5300 = vst [vmem:[%s7316_s7 + $0xda0] sm:$0xff] %v4562_v42  ;;  %v3541_v50 = vadd.f32 %v8072_v49, %v3540_v48  ;;  %v4565_v52 = vadd.f32 %v8072_v49, %v4564_v51 }
 0x25a   : > { %5047 = vst [vmem:[%s7316_s7 + $0x5b8] sm:$0xff] %v3549_v46  ;;  %5303 = vst [vmem:[%s7316_s7 + $0xdb8] sm:$0xff] %v4573_v47 }
 0x25b   : > { %5045 = vst [vmem:[%s7316_s7 + $0x5a8] sm:$0xff] %v3541_v50  ;;  %5301 = vst [vmem:[%s7316_s7 + $0xda8] sm:$0xff] %v4565_v52 }
 0x25d   : > { %v6418_v53 = vpop.f32.mrb[184].mxu0  ;;  %v6674_v54 = vpop.f32.mrb[184].mxu1 }
 0x25e   : > { %v3562_v44 = vadd.f32 %v8072_v49, %v6418_v53  ;;  %v4586_v55 = vadd.f32 %v8072_v49, %v6674_v54  ;;  %v3553_v56 = vpop.f32.mrb[185].mxu0  ;;  %v4577_v57 = vpop.f32.mrb[185].mxu1 }
 0x25f   : > { %v3554_v58 = vadd.f32 %v8072_v49, %v3553_v56  ;;  %v4578_v59 = vadd.f32 %v8072_v49, %v4577_v57  ;;  %v6419_v60 = vpop.f32.mrb[186].mxu0  ;;  %v6675_v61 = vpop.f32.mrb[186].mxu1 }
 0x260   : > { %5050 = vst [vmem:[%s7316_s7 + $0x5d0] sm:$0xff] %v3562_v44  ;;  %5306 = vst [vmem:[%s7316_s7 + $0xdd0] sm:$0xff] %v4586_v55  ;;  %v3565_v62 = vadd.f32 %v8072_v49, %v6419_v60  ;;  %v4589_v63 = vadd.f32 %v8072_v49, %v6675_v61  ;;  %v3556_v0 = vpop.f32.mrb[187].mxu0  ;;  %v4580_v1 = vpop.f32.mrb[187].mxu1 }
 0x261   : > { %5048 = vst [vmem:[%s7316_s7 + $0x5c0] sm:$0xff] %v3554_v58  ;;  %5304 = vst [vmem:[%s7316_s7 + $0xdc0] sm:$0xff] %v4578_v59  ;;  %v3557_v2 = vadd.f32 %v8072_v49, %v3556_v0  ;;  %v4581_v3 = vadd.f32 %v8072_v49, %v4580_v1 }
 0x262   : > { %5051 = vst [vmem:[%s7316_s7 + $0x5d8] sm:$0xff] %v3565_v62  ;;  %5307 = vst [vmem:[%s7316_s7 + $0xdd8] sm:$0xff] %v4589_v63 }
 0x263   : > { %5049 = vst [vmem:[%s7316_s7 + $0x5c8] sm:$0xff] %v3557_v2  ;;  %5305 = vst [vmem:[%s7316_s7 + $0xdc8] sm:$0xff] %v4581_v3 }
 0x265   : > { %v6422_v4 = vpop.f32.mrb[188].mxu0  ;;  %v6678_v5 = vpop.f32.mrb[188].mxu1 }
 0x266   : > { %v3578_v6 = vadd.f32 %v8072_v49, %v6422_v4  ;;  %v4602_v7 = vadd.f32 %v8072_v49, %v6678_v5  ;;  %v3569_v8 = vpop.f32.mrb[189].mxu0  ;;  %v4593_v9 = vpop.f32.mrb[189].mxu1 }
 0x267   : > { %v3570_v10 = vadd.f32 %v8072_v49, %v3569_v8  ;;  %v4594_v11 = vadd.f32 %v8072_v49, %v4593_v9  ;;  %v6423_v12 = vpop.f32.mrb[190].mxu0  ;;  %v6679_v13 = vpop.f32.mrb[190].mxu1 }
 0x268   : > { %5054 = vst [vmem:[%s7316_s7 + $0x5f0] sm:$0xff] %v3578_v6  ;;  %5310 = vst [vmem:[%s7316_s7 + $0xdf0] sm:$0xff] %v4602_v7  ;;  %v3581_v14 = vadd.f32 %v8072_v49, %v6423_v12  ;;  %v4605_v15 = vadd.f32 %v8072_v49, %v6679_v13  ;;  %v3572_v16 = vpop.f32.mrb[191].mxu0  ;;  %v4596_v17 = vpop.f32.mrb[191].mxu1  ;;  %v8437_v7 = vld [vmem:[%s8652_s2] ss:$0 sm:$0xff] }
 0x269   : > { %5052 = vst [vmem:[%s7316_s7 + $0x5e0] sm:$0xff] %v3570_v10  ;;  %5308 = vst [vmem:[%s7316_s7 + $0xde0] sm:$0xff] %v4594_v11  ;;  %v3573_v18 = vadd.f32 %v8072_v49, %v3572_v16  ;;  %v4597_v19 = vadd.f32 %v8072_v49, %v4596_v17 }
 0x26a   : > { %5055 = vst [vmem:[%s7316_s7 + $0x5f8] sm:$0xff] %v3581_v14  ;;  %5311 = vst [vmem:[%s7316_s7 + $0xdf8] sm:$0xff] %v4605_v15 }
 0x26b   : > { %5053 = vst [vmem:[%s7316_s7 + $0x5e8] sm:$0xff] %v3573_v18  ;;  %5309 = vst [vmem:[%s7316_s7 + $0xde8] sm:$0xff] %v4597_v19 }
 0x26d   : > { %v6426_v20 = vpop.f32.mrb[192].mxu0  ;;  %v6682_v21 = vpop.f32.mrb[192].mxu1 }
 0x26e   : > { %v3594_v22 = vadd.f32 %v8072_v49, %v6426_v20  ;;  %v4618_v23 = vadd.f32 %v8072_v49, %v6682_v21  ;;  %v3585_v24 = vpop.f32.mrb[193].mxu0  ;;  %v4609_v25 = vpop.f32.mrb[193].mxu1 }
 0x26f   : > { %v3586_v26 = vadd.f32 %v8072_v49, %v3585_v24  ;;  %v4610_v27 = vadd.f32 %v8072_v49, %v4609_v25  ;;  %v6427_v28 = vpop.f32.mrb[194].mxu0  ;;  %v6683_v29 = vpop.f32.mrb[194].mxu1 }
 0x270   : > { %5058 = vst [vmem:[%s7316_s7 + $0x610] sm:$0xff] %v3594_v22  ;;  %5314 = vst [vmem:[%s7316_s7 + $0xe10] sm:$0xff] %v4618_v23  ;;  %v3597_v30 = vadd.f32 %v8072_v49, %v6427_v28  ;;  %v4621_v31 = vadd.f32 %v8072_v49, %v6683_v29  ;;  %v3588_v32 = vpop.f32.mrb[195].mxu0  ;;  %v4612_v33 = vpop.f32.mrb[195].mxu1 }
 0x271   : > { %5056 = vst [vmem:[%s7316_s7 + $0x600] sm:$0xff] %v3586_v26  ;;  %5312 = vst [vmem:[%s7316_s7 + $0xe00] sm:$0xff] %v4610_v27  ;;  %v3589_v34 = vadd.f32 %v8072_v49, %v3588_v32  ;;  %v4613_v35 = vadd.f32 %v8072_v49, %v4612_v33 }
 0x272   : > { %5059 = vst [vmem:[%s7316_s7 + $0x618] sm:$0xff] %v3597_v30  ;;  %5315 = vst [vmem:[%s7316_s7 + $0xe18] sm:$0xff] %v4621_v31 }
 0x273   : > { %5057 = vst [vmem:[%s7316_s7 + $0x608] sm:$0xff] %v3589_v34  ;;  %5313 = vst [vmem:[%s7316_s7 + $0xe08] sm:$0xff] %v4613_v35 }
 0x275   : > { %v6430_v36 = vpop.f32.mrb[196].mxu0  ;;  %v6686_v37 = vpop.f32.mrb[196].mxu1 }
 0x276   : > { %v3610_v38 = vadd.f32 %v8072_v49, %v6430_v36  ;;  %v4634_v39 = vadd.f32 %v8072_v49, %v6686_v37  ;;  %v3601_v40 = vpop.f32.mrb[197].mxu0  ;;  %v4625_v41 = vpop.f32.mrb[197].mxu1 }
 0x277   : > { %v3602_v42 = vadd.f32 %v8072_v49, %v3601_v40  ;;  %v4626_v43 = vadd.f32 %v8072_v49, %v4625_v41  ;;  %v6431_v45 = vpop.f32.mrb[198].mxu0  ;;  %v6687_v46 = vpop.f32.mrb[198].mxu1 }
 0x278   : > { %5062 = vst [vmem:[%s7316_s7 + $0x630] sm:$0xff] %v3610_v38  ;;  %5318 = vst [vmem:[%s7316_s7 + $0xe30] sm:$0xff] %v4634_v39  ;;  %v3613_v47 = vadd.f32 %v8072_v49, %v6431_v45  ;;  %v4637_v48 = vadd.f32 %v8072_v49, %v6687_v46  ;;  %v3604_v51 = vpop.f32.mrb[199].mxu0  ;;  %v4628_v50 = vpop.f32.mrb[199].mxu1 }
 0x279   : > { %5060 = vst [vmem:[%s7316_s7 + $0x620] sm:$0xff] %v3602_v42  ;;  %5316 = vst [vmem:[%s7316_s7 + $0xe20] sm:$0xff] %v4626_v43  ;;  %v3605_v52 = vadd.f32 %v8072_v49, %v3604_v51  ;;  %v4629_v53 = vadd.f32 %v8072_v49, %v4628_v50 }
 0x27a   : > { %5063 = vst [vmem:[%s7316_s7 + $0x638] sm:$0xff] %v3613_v47  ;;  %5319 = vst [vmem:[%s7316_s7 + $0xe38] sm:$0xff] %v4637_v48 }
 0x27b   : > { %5061 = vst [vmem:[%s7316_s7 + $0x628] sm:$0xff] %v3605_v52  ;;  %5317 = vst [vmem:[%s7316_s7 + $0xe28] sm:$0xff] %v4629_v53 }
 0x27d   : > { %v6434_v54 = vpop.f32.mrb[200].mxu0  ;;  %v6690_v44 = vpop.f32.mrb[200].mxu1 }
 0x27e   : > { %v3626_v55 = vadd.f32 %v8072_v49, %v6434_v54  ;;  %v4650_v56 = vadd.f32 %v8072_v49, %v6690_v44  ;;  %v3617_v57 = vpop.f32.mrb[201].mxu0  ;;  %v4641_v58 = vpop.f32.mrb[201].mxu1 }
 0x27f   : > { %v3618_v59 = vadd.f32 %v8072_v49, %v3617_v57  ;;  %v4642_v60 = vadd.f32 %v8072_v49, %v4641_v58  ;;  %v6435_v61 = vpop.f32.mrb[202].mxu0  ;;  %v6691_v62 = vpop.f32.mrb[202].mxu1 }
 0x280   : > { %5066 = vst [vmem:[%s7316_s7 + $0x650] sm:$0xff] %v3626_v55  ;;  %5322 = vst [vmem:[%s7316_s7 + $0xe50] sm:$0xff] %v4650_v56  ;;  %v3629_v63 = vadd.f32 %v8072_v49, %v6435_v61  ;;  %v4653_v0 = vadd.f32 %v8072_v49, %v6691_v62  ;;  %v3620_v1 = vpop.f32.mrb[203].mxu0  ;;  %v4644_v2 = vpop.f32.mrb[203].mxu1 }
 0x281   : > { %5064 = vst [vmem:[%s7316_s7 + $0x640] sm:$0xff] %v3618_v59  ;;  %5320 = vst [vmem:[%s7316_s7 + $0xe40] sm:$0xff] %v4642_v60  ;;  %v3621_v3 = vadd.f32 %v8072_v49, %v3620_v1  ;;  %v4645_v4 = vadd.f32 %v8072_v49, %v4644_v2 }
 0x282   : > { %5067 = vst [vmem:[%s7316_s7 + $0x658] sm:$0xff] %v3629_v63  ;;  %5323 = vst [vmem:[%s7316_s7 + $0xe58] sm:$0xff] %v4653_v0 }
 0x283   : > { %5065 = vst [vmem:[%s7316_s7 + $0x648] sm:$0xff] %v3621_v3  ;;  %5321 = vst [vmem:[%s7316_s7 + $0xe48] sm:$0xff] %v4645_v4 }
 0x285   : > { %v6438_v5 = vpop.f32.mrb[204].mxu0  ;;  %v6694_v6 = vpop.f32.mrb[204].mxu1 }
 0x286   : > { %v3642_v8 = vadd.f32 %v8437_v7, %v6438_v5  ;;  %v4666_v9 = vadd.f32 %v8437_v7, %v6694_v6  ;;  %v3633_v49 = vpop.f32.mrb[205].mxu0  ;;  %v4657_v10 = vpop.f32.mrb[205].mxu1 }
 0x287   : > { %v3634_v11 = vadd.f32 %v8437_v7, %v3633_v49  ;;  %v4658_v12 = vadd.f32 %v8437_v7, %v4657_v10  ;;  %v6439_v13 = vpop.f32.mrb[206].mxu0  ;;  %v6695_v14 = vpop.f32.mrb[206].mxu1 }
 0x288   : > { %5070 = vst [vmem:[%s7316_s7 + $0x670] sm:$0xff] %v3642_v8  ;;  %5326 = vst [vmem:[%s7316_s7 + $0xe70] sm:$0xff] %v4666_v9  ;;  %v3645_v15 = vadd.f32 %v8437_v7, %v6439_v13  ;;  %v4669_v16 = vadd.f32 %v8437_v7, %v6695_v14  ;;  %v3636_v17 = vpop.f32.mrb[207].mxu0  ;;  %v4660_v18 = vpop.f32.mrb[207].mxu1 }
 0x289   : > { %5068 = vst [vmem:[%s7316_s7 + $0x660] sm:$0xff] %v3634_v11  ;;  %5324 = vst [vmem:[%s7316_s7 + $0xe60] sm:$0xff] %v4658_v12  ;;  %v3637_v19 = vadd.f32 %v8437_v7, %v3636_v17  ;;  %v4661_v20 = vadd.f32 %v8437_v7, %v4660_v18 }
 0x28a   : > { %5071 = vst [vmem:[%s7316_s7 + $0x678] sm:$0xff] %v3645_v15  ;;  %5327 = vst [vmem:[%s7316_s7 + $0xe78] sm:$0xff] %v4669_v16 }
 0x28b   : > { %5069 = vst [vmem:[%s7316_s7 + $0x668] sm:$0xff] %v3637_v19  ;;  %5325 = vst [vmem:[%s7316_s7 + $0xe68] sm:$0xff] %v4661_v20 }
 0x28d   : > { %v6442_v21 = vpop.f32.mrb[208].mxu0  ;;  %v6698_v22 = vpop.f32.mrb[208].mxu1 }
 0x28e   : > { %v3658_v23 = vadd.f32 %v8437_v7, %v6442_v21  ;;  %v4682_v24 = vadd.f32 %v8437_v7, %v6698_v22  ;;  %v3649_v25 = vpop.f32.mrb[209].mxu0  ;;  %v4673_v26 = vpop.f32.mrb[209].mxu1 }
 0x28f   : > { %v3650_v27 = vadd.f32 %v8437_v7, %v3649_v25  ;;  %v4674_v28 = vadd.f32 %v8437_v7, %v4673_v26  ;;  %v6443_v29 = vpop.f32.mrb[210].mxu0  ;;  %v6699_v30 = vpop.f32.mrb[210].mxu1 }
 0x290   : > { %5074 = vst [vmem:[%s7316_s7 + $0x690] sm:$0xff] %v3658_v23  ;;  %5330 = vst [vmem:[%s7316_s7 + $0xe90] sm:$0xff] %v4682_v24  ;;  %v3661_v31 = vadd.f32 %v8437_v7, %v6443_v29  ;;  %v4685_v32 = vadd.f32 %v8437_v7, %v6699_v30  ;;  %v3652_v33 = vpop.f32.mrb[211].mxu0  ;;  %v4676_v34 = vpop.f32.mrb[211].mxu1 }
 0x291   : > { %5072 = vst [vmem:[%s7316_s7 + $0x680] sm:$0xff] %v3650_v27  ;;  %5328 = vst [vmem:[%s7316_s7 + $0xe80] sm:$0xff] %v4674_v28  ;;  %v3653_v35 = vadd.f32 %v8437_v7, %v3652_v33  ;;  %v4677_v36 = vadd.f32 %v8437_v7, %v4676_v34 }
 0x292   : > { %5075 = vst [vmem:[%s7316_s7 + $0x698] sm:$0xff] %v3661_v31  ;;  %5331 = vst [vmem:[%s7316_s7 + $0xe98] sm:$0xff] %v4685_v32 }
 0x293   : > { %5073 = vst [vmem:[%s7316_s7 + $0x688] sm:$0xff] %v3653_v35  ;;  %5329 = vst [vmem:[%s7316_s7 + $0xe88] sm:$0xff] %v4677_v36 }
 0x295   : > { %v6446_v37 = vpop.f32.mrb[212].mxu0  ;;  %v6702_v38 = vpop.f32.mrb[212].mxu1 }
 0x296   : > { %v3674_v39 = vadd.f32 %v8437_v7, %v6446_v37  ;;  %v4698_v40 = vadd.f32 %v8437_v7, %v6702_v38  ;;  %v3665_v41 = vpop.f32.mrb[213].mxu0  ;;  %v4689_v42 = vpop.f32.mrb[213].mxu1 }
 0x297   : > { %v3666_v43 = vadd.f32 %v8437_v7, %v3665_v41  ;;  %v4690_v45 = vadd.f32 %v8437_v7, %v4689_v42  ;;  %v6447_v46 = vpop.f32.mrb[214].mxu0  ;;  %v6703_v47 = vpop.f32.mrb[214].mxu1 }
 0x298   : > { %5078 = vst [vmem:[%s7316_s7 + $0x6b0] sm:$0xff] %v3674_v39  ;;  %5334 = vst [vmem:[%s7316_s7 + $0xeb0] sm:$0xff] %v4698_v40  ;;  %v3677_v48 = vadd.f32 %v8437_v7, %v6447_v46  ;;  %v4701_v51 = vadd.f32 %v8437_v7, %v6703_v47  ;;  %v3668_v50 = vpop.f32.mrb[215].mxu0  ;;  %v4692_v52 = vpop.f32.mrb[215].mxu1 }
 0x299   : > { %5076 = vst [vmem:[%s7316_s7 + $0x6a0] sm:$0xff] %v3666_v43  ;;  %5332 = vst [vmem:[%s7316_s7 + $0xea0] sm:$0xff] %v4690_v45  ;;  %v3669_v53 = vadd.f32 %v8437_v7, %v3668_v50  ;;  %v4693_v54 = vadd.f32 %v8437_v7, %v4692_v52 }
 0x29a   : > { %5079 = vst [vmem:[%s7316_s7 + $0x6b8] sm:$0xff] %v3677_v48  ;;  %5335 = vst [vmem:[%s7316_s7 + $0xeb8] sm:$0xff] %v4701_v51 }
 0x29b   : > { %5077 = vst [vmem:[%s7316_s7 + $0x6a8] sm:$0xff] %v3669_v53  ;;  %5333 = vst [vmem:[%s7316_s7 + $0xea8] sm:$0xff] %v4693_v54 }
 0x29d   : > { %v6450_v44 = vpop.f32.mrb[216].mxu0  ;;  %v6706_v55 = vpop.f32.mrb[216].mxu1 }
 0x29e   : > { %v3690_v56 = vadd.f32 %v8437_v7, %v6450_v44  ;;  %v4714_v57 = vadd.f32 %v8437_v7, %v6706_v55  ;;  %v3681_v58 = vpop.f32.mrb[217].mxu0  ;;  %v4705_v59 = vpop.f32.mrb[217].mxu1 }
 0x29f   : > { %v3682_v60 = vadd.f32 %v8437_v7, %v3681_v58  ;;  %v4706_v61 = vadd.f32 %v8437_v7, %v4705_v59  ;;  %v6451_v62 = vpop.f32.mrb[218].mxu0  ;;  %v6707_v63 = vpop.f32.mrb[218].mxu1 }
 0x2a0   : > { %5082 = vst [vmem:[%s7316_s7 + $0x6d0] sm:$0xff] %v3690_v56  ;;  %5338 = vst [vmem:[%s7316_s7 + $0xed0] sm:$0xff] %v4714_v57  ;;  %v3693_v0 = vadd.f32 %v8437_v7, %v6451_v62  ;;  %v4717_v1 = vadd.f32 %v8437_v7, %v6707_v63  ;;  %v3684_v2 = vpop.f32.mrb[219].mxu0  ;;  %v4708_v3 = vpop.f32.mrb[219].mxu1 }
 0x2a1   : > { %5080 = vst [vmem:[%s7316_s7 + $0x6c0] sm:$0xff] %v3682_v60  ;;  %5336 = vst [vmem:[%s7316_s7 + $0xec0] sm:$0xff] %v4706_v61  ;;  %v3685_v4 = vadd.f32 %v8437_v7, %v3684_v2  ;;  %v4709_v5 = vadd.f32 %v8437_v7, %v4708_v3 }
 0x2a2   : > { %5083 = vst [vmem:[%s7316_s7 + $0x6d8] sm:$0xff] %v3693_v0  ;;  %5339 = vst [vmem:[%s7316_s7 + $0xed8] sm:$0xff] %v4717_v1 }
 0x2a3   : > { %5081 = vst [vmem:[%s7316_s7 + $0x6c8] sm:$0xff] %v3685_v4  ;;  %5337 = vst [vmem:[%s7316_s7 + $0xec8] sm:$0xff] %v4709_v5 }
 0x2a5   : > { %v6454_v6 = vpop.f32.mrb[220].mxu0  ;;  %v6710_v8 = vpop.f32.mrb[220].mxu1 }
 0x2a6   : > { %v3706_v9 = vadd.f32 %v8437_v7, %v6454_v6  ;;  %v4730_v49 = vadd.f32 %v8437_v7, %v6710_v8  ;;  %v3697_v10 = vpop.f32.mrb[221].mxu0  ;;  %v4721_v11 = vpop.f32.mrb[221].mxu1 }
 0x2a7   : > { %v3698_v12 = vadd.f32 %v8437_v7, %v3697_v10  ;;  %v4722_v13 = vadd.f32 %v8437_v7, %v4721_v11  ;;  %v6455_v14 = vpop.f32.mrb[222].mxu0  ;;  %v6711_v15 = vpop.f32.mrb[222].mxu1 }
 0x2a8   : > { %5086 = vst [vmem:[%s7316_s7 + $0x6f0] sm:$0xff] %v3706_v9  ;;  %5342 = vst [vmem:[%s7316_s7 + $0xef0] sm:$0xff] %v4730_v49  ;;  %v3709_v16 = vadd.f32 %v8437_v7, %v6455_v14  ;;  %v4733_v17 = vadd.f32 %v8437_v7, %v6711_v15  ;;  %v3700_v18 = vpop.f32.mrb[223].mxu0  ;;  %v4724_v19 = vpop.f32.mrb[223].mxu1 }
 0x2a9   : > { %5084 = vst [vmem:[%s7316_s7 + $0x6e0] sm:$0xff] %v3698_v12  ;;  %5340 = vst [vmem:[%s7316_s7 + $0xee0] sm:$0xff] %v4722_v13  ;;  %v3701_v20 = vadd.f32 %v8437_v7, %v3700_v18  ;;  %v4725_v21 = vadd.f32 %v8437_v7, %v4724_v19 }
 0x2aa   : > { %5087 = vst [vmem:[%s7316_s7 + $0x6f8] sm:$0xff] %v3709_v16  ;;  %5343 = vst [vmem:[%s7316_s7 + $0xef8] sm:$0xff] %v4733_v17 }
 0x2ab   : > { %5085 = vst [vmem:[%s7316_s7 + $0x6e8] sm:$0xff] %v3701_v20  ;;  %5341 = vst [vmem:[%s7316_s7 + $0xee8] sm:$0xff] %v4725_v21 }
 0x2ad   : > { %v6458_v22 = vpop.f32.mrb[224].mxu0  ;;  %v6714_v23 = vpop.f32.mrb[224].mxu1 }
 0x2ae   : > { %v3722_v24 = vadd.f32 %v8437_v7, %v6458_v22  ;;  %v4746_v25 = vadd.f32 %v8437_v7, %v6714_v23  ;;  %v3713_v26 = vpop.f32.mrb[225].mxu0  ;;  %v4737_v27 = vpop.f32.mrb[225].mxu1 }
 0x2af   : > { %v3714_v28 = vadd.f32 %v8437_v7, %v3713_v26  ;;  %v4738_v29 = vadd.f32 %v8437_v7, %v4737_v27  ;;  %v6459_v30 = vpop.f32.mrb[226].mxu0  ;;  %v6715_v31 = vpop.f32.mrb[226].mxu1 }
 0x2b0   : > { %5090 = vst [vmem:[%s7316_s7 + $0x710] sm:$0xff] %v3722_v24  ;;  %5346 = vst [vmem:[%s7316_s7 + $0xf10] sm:$0xff] %v4746_v25  ;;  %v3725_v32 = vadd.f32 %v8437_v7, %v6459_v30  ;;  %v4749_v33 = vadd.f32 %v8437_v7, %v6715_v31  ;;  %v3716_v34 = vpop.f32.mrb[227].mxu0  ;;  %v4740_v35 = vpop.f32.mrb[227].mxu1 }
 0x2b1   : > { %5088 = vst [vmem:[%s7316_s7 + $0x700] sm:$0xff] %v3714_v28  ;;  %5344 = vst [vmem:[%s7316_s7 + $0xf00] sm:$0xff] %v4738_v29  ;;  %v3717_v36 = vadd.f32 %v8437_v7, %v3716_v34  ;;  %v4741_v37 = vadd.f32 %v8437_v7, %v4740_v35 }
 0x2b2   : > { %5091 = vst [vmem:[%s7316_s7 + $0x718] sm:$0xff] %v3725_v32  ;;  %5347 = vst [vmem:[%s7316_s7 + $0xf18] sm:$0xff] %v4749_v33 }
 0x2b3   : > { %5089 = vst [vmem:[%s7316_s7 + $0x708] sm:$0xff] %v3717_v36  ;;  %5345 = vst [vmem:[%s7316_s7 + $0xf08] sm:$0xff] %v4741_v37 }
 0x2b5   : > { %v6462_v38 = vpop.f32.mrb[228].mxu0  ;;  %v6718_v39 = vpop.f32.mrb[228].mxu1 }
 0x2b6   : > { %v3738_v40 = vadd.f32 %v8437_v7, %v6462_v38  ;;  %v4762_v41 = vadd.f32 %v8437_v7, %v6718_v39  ;;  %v3729_v42 = vpop.f32.mrb[229].mxu0  ;;  %v4753_v43 = vpop.f32.mrb[229].mxu1 }
 0x2b7   : > { %v3730_v45 = vadd.f32 %v8437_v7, %v3729_v42  ;;  %v4754_v46 = vadd.f32 %v8437_v7, %v4753_v43  ;;  %v6463_v47 = vpop.f32.mrb[230].mxu0  ;;  %v6719_v48 = vpop.f32.mrb[230].mxu1 }
 0x2b8   : > { %5094 = vst [vmem:[%s7316_s7 + $0x730] sm:$0xff] %v3738_v40  ;;  %5350 = vst [vmem:[%s7316_s7 + $0xf30] sm:$0xff] %v4762_v41  ;;  %v3741_v51 = vadd.f32 %v8437_v7, %v6463_v47  ;;  %v4765_v50 = vadd.f32 %v8437_v7, %v6719_v48  ;;  %v3732_v52 = vpop.f32.mrb[231].mxu0  ;;  %v4756_v53 = vpop.f32.mrb[231].mxu1 }
 0x2b9   : > { %5092 = vst [vmem:[%s7316_s7 + $0x720] sm:$0xff] %v3730_v45  ;;  %5348 = vst [vmem:[%s7316_s7 + $0xf20] sm:$0xff] %v4754_v46  ;;  %v3733_v54 = vadd.f32 %v8437_v7, %v3732_v52  ;;  %v4757_v44 = vadd.f32 %v8437_v7, %v4756_v53 }
 0x2ba   : > { %5095 = vst [vmem:[%s7316_s7 + $0x738] sm:$0xff] %v3741_v51  ;;  %5351 = vst [vmem:[%s7316_s7 + $0xf38] sm:$0xff] %v4765_v50 }
 0x2bb   : > { %5093 = vst [vmem:[%s7316_s7 + $0x728] sm:$0xff] %v3733_v54  ;;  %5349 = vst [vmem:[%s7316_s7 + $0xf28] sm:$0xff] %v4757_v44 }
 0x2bd   : > { %v6466_v55 = vpop.f32.mrb[232].mxu0  ;;  %v6722_v56 = vpop.f32.mrb[232].mxu1 }
 0x2be   : > { %v3754_v57 = vadd.f32 %v8437_v7, %v6466_v55  ;;  %v4778_v58 = vadd.f32 %v8437_v7, %v6722_v56  ;;  %v3745_v59 = vpop.f32.mrb[233].mxu0  ;;  %v4769_v60 = vpop.f32.mrb[233].mxu1 }
 0x2bf   : > { %v3746_v61 = vadd.f32 %v8437_v7, %v3745_v59  ;;  %v4770_v62 = vadd.f32 %v8437_v7, %v4769_v60  ;;  %v6467_v63 = vpop.f32.mrb[234].mxu0  ;;  %v6723_v0 = vpop.f32.mrb[234].mxu1 }
 0x2c0   : > { %5098 = vst [vmem:[%s7316_s7 + $0x750] sm:$0xff] %v3754_v57  ;;  %5354 = vst [vmem:[%s7316_s7 + $0xf50] sm:$0xff] %v4778_v58  ;;  %v3757_v1 = vadd.f32 %v8437_v7, %v6467_v63  ;;  %v4781_v2 = vadd.f32 %v8437_v7, %v6723_v0  ;;  %v3748_v3 = vpop.f32.mrb[235].mxu0  ;;  %v4772_v4 = vpop.f32.mrb[235].mxu1 }
 0x2c1   : > { %5096 = vst [vmem:[%s7316_s7 + $0x740] sm:$0xff] %v3746_v61  ;;  %5352 = vst [vmem:[%s7316_s7 + $0xf40] sm:$0xff] %v4770_v62  ;;  %v3749_v5 = vadd.f32 %v8437_v7, %v3748_v3  ;;  %v4773_v6 = vadd.f32 %v8437_v7, %v4772_v4 }
 0x2c2   : > { %5099 = vst [vmem:[%s7316_s7 + $0x758] sm:$0xff] %v3757_v1  ;;  %5355 = vst [vmem:[%s7316_s7 + $0xf58] sm:$0xff] %v4781_v2 }
 0x2c3   : > { %5097 = vst [vmem:[%s7316_s7 + $0x748] sm:$0xff] %v3749_v5  ;;  %5353 = vst [vmem:[%s7316_s7 + $0xf48] sm:$0xff] %v4773_v6 }
 0x2c5   : > { %v6470_v8 = vpop.f32.mrb[236].mxu0  ;;  %v6726_v9 = vpop.f32.mrb[236].mxu1 }
 0x2c6   : > { %v3770_v49 = vadd.f32 %v8437_v7, %v6470_v8  ;;  %v4794_v10 = vadd.f32 %v8437_v7, %v6726_v9  ;;  %v3761_v11 = vpop.f32.mrb[237].mxu0  ;;  %v4785_v12 = vpop.f32.mrb[237].mxu1 }
 0x2c7   : > { %v3762_v13 = vadd.f32 %v8437_v7, %v3761_v11  ;;  %v4786_v14 = vadd.f32 %v8437_v7, %v4785_v12  ;;  %v6471_v15 = vpop.f32.mrb[238].mxu0  ;;  %v6727_v16 = vpop.f32.mrb[238].mxu1 }
 0x2c8   : > { %5102 = vst [vmem:[%s7316_s7 + $0x770] sm:$0xff] %v3770_v49  ;;  %5358 = vst [vmem:[%s7316_s7 + $0xf70] sm:$0xff] %v4794_v10  ;;  %v3773_v17 = vadd.f32 %v8437_v7, %v6471_v15  ;;  %v4797_v18 = vadd.f32 %v8437_v7, %v6727_v16  ;;  %v3764_v19 = vpop.f32.mrb[239].mxu0  ;;  %v4788_v20 = vpop.f32.mrb[239].mxu1 }
 0x2c9   : > { %5100 = vst [vmem:[%s7316_s7 + $0x760] sm:$0xff] %v3762_v13  ;;  %5356 = vst [vmem:[%s7316_s7 + $0xf60] sm:$0xff] %v4786_v14  ;;  %v3765_v21 = vadd.f32 %v8437_v7, %v3764_v19  ;;  %v4789_v22 = vadd.f32 %v8437_v7, %v4788_v20 }
 0x2ca   : > { %5103 = vst [vmem:[%s7316_s7 + $0x778] sm:$0xff] %v3773_v17  ;;  %5359 = vst [vmem:[%s7316_s7 + $0xf78] sm:$0xff] %v4797_v18 }
 0x2cb   : > { %5101 = vst [vmem:[%s7316_s7 + $0x768] sm:$0xff] %v3765_v21  ;;  %5357 = vst [vmem:[%s7316_s7 + $0xf68] sm:$0xff] %v4789_v22 }
 0x2cd   : > { %v6474_v23 = vpop.f32.mrb[240].mxu0  ;;  %v6730_v24 = vpop.f32.mrb[240].mxu1 }
 0x2ce   : > { %v3786_v25 = vadd.f32 %v8437_v7, %v6474_v23  ;;  %v4810_v26 = vadd.f32 %v8437_v7, %v6730_v24  ;;  %v3777_v27 = vpop.f32.mrb[241].mxu0  ;;  %v4801_v28 = vpop.f32.mrb[241].mxu1 }
 0x2cf   : > { %v3778_v29 = vadd.f32 %v8437_v7, %v3777_v27  ;;  %v4802_v30 = vadd.f32 %v8437_v7, %v4801_v28  ;;  %v6475_v31 = vpop.f32.mrb[242].mxu0  ;;  %v6731_v32 = vpop.f32.mrb[242].mxu1 }
 0x2d0   : > { %5106 = vst [vmem:[%s7316_s7 + $0x790] sm:$0xff] %v3786_v25  ;;  %5362 = vst [vmem:[%s7316_s7 + $0xf90] sm:$0xff] %v4810_v26  ;;  %v3789_v33 = vadd.f32 %v8437_v7, %v6475_v31  ;;  %v4813_v34 = vadd.f32 %v8437_v7, %v6731_v32  ;;  %v3780_v35 = vpop.f32.mrb[243].mxu0  ;;  %v4804_v36 = vpop.f32.mrb[243].mxu1 }
 0x2d1   : > { %5104 = vst [vmem:[%s7316_s7 + $0x780] sm:$0xff] %v3778_v29  ;;  %5360 = vst [vmem:[%s7316_s7 + $0xf80] sm:$0xff] %v4802_v30  ;;  %v3781_v37 = vadd.f32 %v8437_v7, %v3780_v35  ;;  %v4805_v38 = vadd.f32 %v8437_v7, %v4804_v36 }
 0x2d2   : > { %5107 = vst [vmem:[%s7316_s7 + $0x798] sm:$0xff] %v3789_v33  ;;  %5363 = vst [vmem:[%s7316_s7 + $0xf98] sm:$0xff] %v4813_v34 }
 0x2d3   : > { %5105 = vst [vmem:[%s7316_s7 + $0x788] sm:$0xff] %v3781_v37  ;;  %5361 = vst [vmem:[%s7316_s7 + $0xf88] sm:$0xff] %v4805_v38 }
 0x2d5   : > { %v6478_v39 = vpop.f32.mrb[244].mxu0  ;;  %v6734_v40 = vpop.f32.mrb[244].mxu1 }
 0x2d6   : > { %v3802_v41 = vadd.f32 %v8437_v7, %v6478_v39  ;;  %v4826_v42 = vadd.f32 %v8437_v7, %v6734_v40  ;;  %v3793_v43 = vpop.f32.mrb[245].mxu0  ;;  %v4817_v45 = vpop.f32.mrb[245].mxu1 }
 0x2d7   : > { %v3794_v46 = vadd.f32 %v8437_v7, %v3793_v43  ;;  %v4818_v47 = vadd.f32 %v8437_v7, %v4817_v45  ;;  %v6479_v48 = vpop.f32.mrb[246].mxu0  ;;  %v6735_v51 = vpop.f32.mrb[246].mxu1 }
 0x2d8   : > { %5110 = vst [vmem:[%s7316_s7 + $0x7b0] sm:$0xff] %v3802_v41  ;;  %5366 = vst [vmem:[%s7316_s7 + $0xfb0] sm:$0xff] %v4826_v42  ;;  %v3805_v50 = vadd.f32 %v8437_v7, %v6479_v48  ;;  %v4829_v52 = vadd.f32 %v8437_v7, %v6735_v51  ;;  %v3796_v53 = vpop.f32.mrb[247].mxu0  ;;  %v4820_v54 = vpop.f32.mrb[247].mxu1 }
 0x2d9   : > { %5108 = vst [vmem:[%s7316_s7 + $0x7a0] sm:$0xff] %v3794_v46  ;;  %5364 = vst [vmem:[%s7316_s7 + $0xfa0] sm:$0xff] %v4818_v47  ;;  %v3797_v44 = vadd.f32 %v8437_v7, %v3796_v53  ;;  %v4821_v55 = vadd.f32 %v8437_v7, %v4820_v54 }
 0x2da   : > { %5111 = vst [vmem:[%s7316_s7 + $0x7b8] sm:$0xff] %v3805_v50  ;;  %5367 = vst [vmem:[%s7316_s7 + $0xfb8] sm:$0xff] %v4829_v52 }
 0x2db   : > { %5109 = vst [vmem:[%s7316_s7 + $0x7a8] sm:$0xff] %v3797_v44  ;;  %5365 = vst [vmem:[%s7316_s7 + $0xfa8] sm:$0xff] %v4821_v55 }
 0x2dd   : > { %v6482_v56 = vpop.f32.mrb[248].mxu0  ;;  %v6738_v57 = vpop.f32.mrb[248].mxu1 }
 0x2de   : > { %v3818_v58 = vadd.f32 %v8437_v7, %v6482_v56  ;;  %v4842_v59 = vadd.f32 %v8437_v7, %v6738_v57  ;;  %v3809_v60 = vpop.f32.mrb[249].mxu0  ;;  %v4833_v61 = vpop.f32.mrb[249].mxu1 }
 0x2df   : > { %v3810_v62 = vadd.f32 %v8437_v7, %v3809_v60  ;;  %v4834_v63 = vadd.f32 %v8437_v7, %v4833_v61  ;;  %v6483_v0 = vpop.f32.mrb[250].mxu0  ;;  %v6739_v1 = vpop.f32.mrb[250].mxu1 }
 0x2e0   : > { %5114 = vst [vmem:[%s7316_s7 + $0x7d0] sm:$0xff] %v3818_v58  ;;  %5370 = vst [vmem:[%s7316_s7 + $0xfd0] sm:$0xff] %v4842_v59  ;;  %v3821_v2 = vadd.f32 %v8437_v7, %v6483_v0  ;;  %v4845_v3 = vadd.f32 %v8437_v7, %v6739_v1  ;;  %v3812_v4 = vpop.f32.mrb[251].mxu0  ;;  %v4836_v5 = vpop.f32.mrb[251].mxu1 }
 0x2e1   : > { %5112 = vst [vmem:[%s7316_s7 + $0x7c0] sm:$0xff] %v3810_v62  ;;  %5368 = vst [vmem:[%s7316_s7 + $0xfc0] sm:$0xff] %v4834_v63  ;;  %v3813_v6 = vadd.f32 %v8437_v7, %v3812_v4  ;;  %v4837_v8 = vadd.f32 %v8437_v7, %v4836_v5 }
 0x2e2   : > { %5115 = vst [vmem:[%s7316_s7 + $0x7d8] sm:$0xff] %v3821_v2  ;;  %5371 = vst [vmem:[%s7316_s7 + $0xfd8] sm:$0xff] %v4845_v3 }
 0x2e3   : > { %5113 = vst [vmem:[%s7316_s7 + $0x7c8] sm:$0xff] %v3813_v6  ;;  %5369 = vst [vmem:[%s7316_s7 + $0xfc8] sm:$0xff] %v4837_v8 }
 0x2e5   : > { %v6486_v9 = vpop.f32.mrb[252].mxu0  ;;  %v6742_v49 = vpop.f32.mrb[252].mxu1 }
 0x2e6   : > { %v3834_v10 = vadd.f32 %v8437_v7, %v6486_v9  ;;  %v4858_v11 = vadd.f32 %v8437_v7, %v6742_v49  ;;  %v3825_v12 = vpop.f32.mrb[253].mxu0  ;;  %v4849_v13 = vpop.f32.mrb[253].mxu1 }
 0x2e7   : > { %v3826_v14 = vadd.f32 %v8437_v7, %v3825_v12  ;;  %v4850_v15 = vadd.f32 %v8437_v7, %v4849_v13  ;;  %v6487_v16 = vpop.f32.mrb[254].mxu0  ;;  %v6743_v17 = vpop.f32.mrb[254].mxu1 }
 0x2e8   : > { %5118 = vst [vmem:[%s7316_s7 + $0x7f0] sm:$0xff] %v3834_v10  ;;  %5374 = vst [vmem:[%s7316_s7 + $0xff0] sm:$0xff] %v4858_v11  ;;  %v3837_v18 = vadd.f32 %v8437_v7, %v6487_v16  ;;  %v4861_v19 = vadd.f32 %v8437_v7, %v6743_v17  ;;  %v3828_v20 = vpop.f32.mrb[255].mxu0  ;;  %v4852_v21 = vpop.f32.mrb[255].mxu1 }
 0x2e9   : > { %5116 = vst [vmem:[%s7316_s7 + $0x7e0] sm:$0xff] %v3826_v14  ;;  %5372 = vst [vmem:[%s7316_s7 + $0xfe0] sm:$0xff] %v4850_v15  ;;  %v3829_v22 = vadd.f32 %v8437_v7, %v3828_v20  ;;  %v4853_v23 = vadd.f32 %v8437_v7, %v4852_v21 }
 0x2ea   : > { %5119 = vst [vmem:[%s7316_s7 + $0x7f8] sm:$0xff] %v3837_v18  ;;  %5375 = vst [vmem:[%s7316_s7 + $0xff8] sm:$0xff] %v4861_v19 }
 0x2eb   : > { %5117 = vst [vmem:[%s7316_s7 + $0x7e8] sm:$0xff] %v3829_v22  ;;  %5373 = vst [vmem:[%s7316_s7 + $0xfe8] sm:$0xff] %v4853_v23 }
 0x2ec PF: > { %s13_s12 = sadd.s32 1, %s7032_s12  }
 0x2ed   : > { %p10_p4 = scmp.ge.s32.totalorder %s13_s12, 4  }
 0x2ef   :  { %12 = sbr.rel (!%p10_p4) target bundleno = 1 (0x1), region = 62 }

</bundles_post_ra>
